<compile_context>
chip_gen: v5e
topology: v5e:2x2
jax: 0.10.0
libtpu: 0.0.40
codegen_flags: <defaults>
</compile_context>

<pallas_src>
import functools
import jax
import jax.numpy as jnp
from jax.experimental import pallas as pl
from jax.experimental.pallas import tpu as pltpu

EPS = 1e-5  # nn.BatchNorm2d default


def _round_up(x, m):
    return (x + m - 1) // m * m


# ---------------------------------------------------------------------------
# Pallas kernels
# ---------------------------------------------------------------------------
def _conv_bn_kernel(*refs, relu, add_residual, inv_m):
    """Fused (im2col-matmul) conv + train-mode BatchNorm + (residual) + ReLU.

    Grid = (Cout_tiles,) only: K is a single full resident block, M (rows =
    N*H*W) is a single full block so per-channel batch statistics over N,H,W
    reproduce PyTorch BatchNorm2d training-mode forward semantics.
    """
    # TODO(synk): two-pass BN (sum/sumsq reduced across M tiles) so the M axis
    # can also be tiled/parallelised for ImageNet-scale inputs on v7x; at the
    # shapes used here whole-M residency fits VMEM easily.
    if add_residual:
        a_ref, w_ref, g_ref, b_ref, res_ref, o_ref = refs
    else:
        a_ref, w_ref, g_ref, b_ref, o_ref = refs
        res_ref = None

    acc = jnp.dot(a_ref[...], w_ref[...], preferred_element_type=jnp.float32)

    # single-pass batch statistics over rows (N*H*W): E[x^2] - mean^2
    s = jnp.sum(acc, axis=0, keepdims=True)
    ss = jnp.sum(acc * acc, axis=0, keepdims=True)
    mean = s * inv_m
    var = jnp.maximum(ss * inv_m - mean * mean, 0.0)   # biased batch var
    y = (acc - mean) * (g_ref[...] * jax.lax.rsqrt(var + EPS)) + b_ref[...]
    if add_residual:
        y = y + res_ref[...]
    if relu:
        y = jnp.maximum(y, 0.0)
    o_ref[...] = y


def _maxpool_kernel(x_ref, o_ref):
    # x_ref: [9, tr, 128] (the 9 shifted 3x3 windows, lane-dense rows).
    out = x_ref[0]
    for i in range(1, 9):
        out = jnp.maximum(out, x_ref[i])
    o_ref[...] = out


def _linear_kernel(a_ref, w_ref, b_ref, o_ref):
    o_ref[...] = (jnp.dot(a_ref[...], w_ref[...],
                          preferred_element_type=jnp.float32) + b_ref[...])


# ---------------------------------------------------------------------------
# Wrappers (JAX glue: im2col / padding / reshapes)
# ---------------------------------------------------------------------------
def _im2col(x, kh, kw, stride, pad):
    """x: [B, H, W, C] -> ([B*Ho*Wo, kh*kw*C], (B, Ho, Wo))."""
    # TODO(synk): fuse 3x3 patch extraction into the kernel (shifted
    # index_maps over the NHWC input) to avoid the kh*kw HBM duplication at
    # large inputs; at these shapes the duplicated tensor is < 1 MiB in bf16.
    B, H, W, C = x.shape
    Ho = (H + 2 * pad - kh) // stride + 1
    Wo = (W + 2 * pad - kw) // stride + 1
    xp = jnp.pad(x, ((0, 0), (pad, pad), (pad, pad), (0, 0)))
    cols = []
    for ky in range(kh):
        for kx in range(kw):
            cols.append(xp[:, ky:ky + stride * (Ho - 1) + 1:stride,
                           kx:kx + stride * (Wo - 1) + 1:stride, :])
    patches = jnp.concatenate(cols, axis=-1)          # [B, Ho, Wo, kh*kw*C]
    return patches.reshape(B * Ho * Wo, kh * kw * C), (B, Ho, Wo)


def _pick_tn(cout):
    if cout >= 1024:
        return 512
    if cout >= 256:
        return 256
    return 128


def conv_bn(x, w, gamma, beta, *, stride=1, pad=0, relu=True, residual=None):
    """x: [B,H,W,Cin] NHWC; w: PyTorch layout [Cout, Cin, kh, kw]."""
    cout, cin, kh, kw = w.shape
    # bf16 matmul operands: halves HBM traffic, doubles MXU throughput.
    a, (B, Ho, Wo) = _im2col(x.astype(jnp.bfloat16), kh, kw, stride, pad)
    M, K = a.shape
    # weight rows ordered (ky, kx, cin) to match im2col patch order
    wm = jnp.transpose(w, (2, 3, 1, 0)).reshape(K, cout).astype(jnp.bfloat16)

    # sublane-align K (only the 7x7 stem conv has K % 8 != 0: K = 147)
    Kp = _round_up(K, 8)
    if Kp != K:
        a = jnp.pad(a, ((0, 0), (0, Kp - K)))
        wm = jnp.pad(wm, ((0, Kp - K), (0, 0)))

    tn = _pick_tn(cout)
    Np = _round_up(cout, tn)
    w_p = jnp.pad(wm, ((0, 0), (0, Np - cout)))
    g_p = jnp.pad(gamma, (0, Np - cout)).reshape(1, Np)
    b_p = jnp.pad(beta, (0, Np - cout)).reshape(1, Np)

    in_specs = [
        pl.BlockSpec((M, Kp), lambda j: (0, 0)),      # full A, resident
        pl.BlockSpec((Kp, tn), lambda j: (0, j)),     # full-K weight strip
        pl.BlockSpec((1, tn), lambda j: (0, j)),
        pl.BlockSpec((1, tn), lambda j: (0, j)),
    ]
    args = [a, w_p, g_p, b_p]
    add_residual = residual is not None
    if add_residual:
        r = residual.reshape(M, cout)
        r_p = jnp.pad(r, ((0, 0), (0, Np - cout)))
        in_specs.append(pl.BlockSpec((M, tn), lambda j: (0, j)))
        args.append(r_p)

    kernel = functools.partial(_conv_bn_kernel, relu=relu,
                               add_residual=add_residual, inv_m=1.0 / M)
    out = pl.pallas_call(
        kernel,
        out_shape=jax.ShapeDtypeStruct((M, Np), jnp.float32),
        grid_spec=pltpu.PrefetchScalarGridSpec(
            num_scalar_prefetch=0,
            grid=(Np // tn,),
            in_specs=in_specs,
            out_specs=pl.BlockSpec((M, tn), lambda j: (0, j)),
        ),
        compiler_params=pltpu.CompilerParams(
            dimension_semantics=("parallel",),
            vmem_limit_bytes=32 * 1024 * 1024),
    )(*args)
    return out[:, :cout].reshape(B, Ho, Wo, cout)


def maxpool_3x3_s2_p1(x):
    B, H, W, C = x.shape
    Ho = (H + 2 - 3) // 2 + 1
    Wo = (W + 2 - 3) // 2 + 1
    xp = jnp.pad(x, ((0, 0), (1, 1), (1, 1), (0, 0)),
                 constant_values=-jnp.inf)
    wins = []
    for dy in range(3):
        for dx in range(3):
            wins.append(xp[:, dy:dy + 2 * (Ho - 1) + 1:2,
                           dx:dx + 2 * (Wo - 1) + 1:2, :])
    # lane-dense layout: fold (M, 64) -> (R, 128) so stores are unmasked.
    flat = B * Ho * Wo * C
    assert flat % 128 == 0
    R = flat // 128
    stacked = jnp.stack(wins, axis=0).reshape(9, R, 128)
    tr = min(1024, _round_up(R, 8))
    Rp = _round_up(R, tr)
    if Rp != R:
        stacked = jnp.pad(stacked, ((0, 0), (0, Rp - R), (0, 0)))
    out = pl.pallas_call(
        _maxpool_kernel,
        out_shape=jax.ShapeDtypeStruct((Rp, 128), x.dtype),
        grid_spec=pltpu.PrefetchScalarGridSpec(
            num_scalar_prefetch=0,
            grid=(Rp // tr,),
            in_specs=[pl.BlockSpec((9, tr, 128), lambda i: (0, i, 0))],
            out_specs=pl.BlockSpec((tr, 128), lambda i: (i, 0)),
        ),
        compiler_params=pltpu.CompilerParams(
            dimension_semantics=("parallel",)),
    )(stacked)
    return out[:R].reshape(B, Ho, Wo, C)


def linear(x, w, b):
    """x: [B, K]; w: [K, N] (already transposed from PyTorch [N, K]); b: [N]."""
    B, K = x.shape
    N = w.shape[1]
    Mp, Np = _round_up(B, 8), _round_up(N, 128)
    xp = jnp.pad(x, ((0, Mp - B), (0, 0)))
    wp = jnp.pad(w, ((0, 0), (0, Np - N)))
    bp = jnp.pad(b, (0, Np - N)).reshape(1, Np)
    # tiny problem: single full-block kernel, no grid, no scratch
    out = pl.pallas_call(
        _linear_kernel,
        out_shape=jax.ShapeDtypeStruct((Mp, Np), jnp.float32),
    )(xp, wp, bp)
    return out[:B, :N]


# ---------------------------------------------------------------------------
# Deterministic parameter construction (synthetic weights)
# ---------------------------------------------------------------------------
class ParamGen:
    def __init__(self, key):
        self.key = key
        self.i = 0

    def _next(self):
        self.i += 1
        return jax.random.fold_in(self.key, self.i)

    def conv(self, cout, cin, kh, kw):
        fan_in = cin * kh * kw
        return (jax.random.normal(self._next(), (cout, cin, kh, kw),
                                  jnp.float32) * (2.0 / fan_in) ** 0.5)

    def bn(self, c):
        g = 1.0 + 0.1 * jax.random.normal(self._next(), (c,), jnp.float32)
        b = 0.1 * jax.random.normal(self._next(), (c,), jnp.float32)
        return g, b


def make_bottleneck_params(pg, in_ch, mid_ch, out_ch, ds_stride):
    p = {"w1": pg.conv(mid_ch, in_ch, 1, 1)}
    p["g1"], p["b1"] = pg.bn(mid_ch)
    p["w2"] = pg.conv(mid_ch, mid_ch, 3, 3)
    p["g2"], p["b2"] = pg.bn(mid_ch)
    p["w3"] = pg.conv(out_ch, mid_ch, 1, 1)
    p["g3"], p["b3"] = pg.bn(out_ch)
    p["stride2"] = 1 if ds_stride is None else ds_stride
    if ds_stride is not None:
        p["wd"] = pg.conv(out_ch, in_ch, 1, 1)
        p["gd"], p["bd"] = pg.bn(out_ch)
        p["stride_d"] = ds_stride
    return p


def make_resnet50_params(key):
    pg = ParamGen(key)
    params = {"conv1": pg.conv(64, 3, 7, 7)}
    params["g1"], params["b1"] = pg.bn(64)

    cfgs = {
        "layer1": [(64, 64, 256, 1)] + [(256, 64, 256, None)] * 2,
        "layer2": [(256, 128, 512, 2)] + [(512, 128, 512, None)] * 3,
        "layer3": [(512, 256, 1024, 2)] + [(1024, 256, 1024, None)] * 5,
        "layer4": [(1024, 512, 2048, 2)] + [(2048, 512, 2048, None)] * 2,
    }
    for name, cfg in cfgs.items():
        params[name] = [make_bottleneck_params(pg, *c) for c in cfg]

    params["fc_w"] = (jax.random.normal(pg._next(), (5, 2048), jnp.float32)
                      * (1.0 / 2048.0) ** 0.5)
    params["fc_b"] = 0.01 * jax.random.normal(pg._next(), (5,), jnp.float32)
    return params


# ---------------------------------------------------------------------------
# Forward pass
# ---------------------------------------------------------------------------
def bottleneck_forward(x, p):
    ori = x
    out = conv_bn(x, p["w1"], p["g1"], p["b1"], stride=1, pad=0, relu=True)
    out = conv_bn(out, p["w2"], p["g2"], p["b2"], stride=p["stride2"], pad=1,
                  relu=True)
    if "wd" in p:
        ori = conv_bn(x, p["wd"], p["gd"], p["bd"], stride=p["stride_d"],
                      pad=0, relu=False)
    # conv3 + bn3 + residual add + relu, all fused in one Pallas kernel
    out = conv_bn(out, p["w3"], p["g3"], p["b3"], stride=1, pad=0, relu=True,
                  residual=ori)
    return out


def resnet50_forward(x_nchw, params):
    x = jnp.transpose(x_nchw, (0, 2, 3, 1)).astype(jnp.float32)  # NCHW -> NHWC
    out = conv_bn(x, params["conv1"], params["g1"], params["b1"],
                  stride=2, pad=3, relu=True)
    out = maxpool_3x3_s2_p1(out)
    for name in ("layer1", "layer2", "layer3", "layer4"):
        for p in params[name]:
            out = bottleneck_forward(out, p)
    # global adaptive avg-pool to (1,1): tiny spatial mean, done in JAX glue
    pooled = jnp.mean(out, axis=(1, 2))               # [B, 2048]
    logits = linear(pooled, params["fc_w"].T, params["fc_b"])  # [B, 5]
    return logits


if __name__ == "__main__":
    key = jax.random.PRNGKey(0)
    params = make_resnet50_params(key)
    # small deterministic input (ResNet50 channel widths are fixed by the arch)
    x = jax.random.normal(jax.random.fold_in(key, 12345),
                          (2, 3, 64, 64), jnp.float32)
    logits = resnet50_forward(x, params)
    logits = jax.block_until_ready(logits)
    assert logits.shape == (2, 5)
    assert bool(jnp.all(jnp.isfinite(logits)))
    print("KERNEL_OK")
</pallas_src>

<mosaic_0001>
module attributes {stable_mosaic.version = 11 : i64} {
  func.func @_conv_bn_kernel(%arg0: i32, %arg1: memref<2048x152xbf16, #tpu.memory_space<vmem>>, %arg2: memref<152x128xbf16, #tpu.memory_space<vmem>>, %arg3: memref<1x128xf32, #tpu.memory_space<vmem>>, %arg4: memref<1x128xf32, #tpu.memory_space<vmem>>, %arg5: memref<2048x128xf32, #tpu.memory_space<vmem>>) attributes {dimension_semantics = [#tpu.dimension_semantics<parallel>], iteration_bounds = array<i64: 1>, scalar_prefetch = 0 : i64, scratch_operands = 0 : i64, tpu.core_type = #tpu.core_type<tc>, window_params = [{pipeline_mode = #tpu.pipeline_mode<synchronous>, transform_indices = @transform_0, window_bounds = array<i64: 2048, 152>}, {transform_indices = @transform_1, window_bounds = array<i64: 152, 128>}, {transform_indices = @transform_2, window_bounds = array<i64: 1, 128>}, {transform_indices = @transform_3, window_bounds = array<i64: 1, 128>}, {transform_indices = @transform_4, window_bounds = array<i64: 2048, 128>}]} {
    %c0 = arith.constant 0 : index
    %c0_0 = arith.constant 0 : index
    %0 = vector.load %arg1[%c0, %c0_0] : memref<2048x152xbf16, #tpu.memory_space<vmem>>, vector<2048x152xbf16>
    %c0_1 = arith.constant 0 : index
    %c0_2 = arith.constant 0 : index
    %1 = vector.load %arg2[%c0_1, %c0_2] : memref<152x128xbf16, #tpu.memory_space<vmem>>, vector<152x128xbf16>
    %cst = arith.constant dense<0.000000e+00> : vector<2048x128xf32>
    %2 = tpu.matmul %0, %1, %cst {dimension_numbers = #tpu.dot_dimension_numbers<[1], [0], [0], [1], [0, 0, 1, 1], [], []>} : vector<2048x152xbf16>, vector<152x128xbf16>, vector<2048x128xf32> -> vector<2048x128xf32>
    %cst_3 = arith.constant dense<0.000000e+00> : vector<128xf32>
    %3 = vector.multi_reduction <add>, %2, %cst_3 [0] : vector<2048x128xf32> to vector<128xf32>
    %4 = vector.shape_cast %3 : vector<128xf32> to vector<1x128xf32>
    %5 = arith.mulf %2, %2 : vector<2048x128xf32>
    %cst_4 = arith.constant dense<0.000000e+00> : vector<128xf32>
    %6 = vector.multi_reduction <add>, %5, %cst_4 [0] : vector<2048x128xf32> to vector<128xf32>
    %7 = vector.shape_cast %6 : vector<128xf32> to vector<1x128xf32>
    %cst_5 = arith.constant 4.8828125E-4 : f32
    %8 = vector.broadcast %cst_5 : f32 to vector<1x128xf32>
    %9 = arith.mulf %4, %8 : vector<1x128xf32>
    %cst_6 = arith.constant 4.8828125E-4 : f32
    %10 = vector.broadcast %cst_6 : f32 to vector<1x128xf32>
    %11 = arith.mulf %7, %10 : vector<1x128xf32>
    %12 = arith.mulf %9, %9 : vector<1x128xf32>
    %13 = arith.subf %11, %12 : vector<1x128xf32>
    %cst_7 = arith.constant 0.000000e+00 : f32
    %14 = vector.broadcast %cst_7 : f32 to vector<1x128xf32>
    %15 = arith.maximumf %13, %14 : vector<1x128xf32>
    %16 = vector.broadcast %9 : vector<1x128xf32> to vector<2048x128xf32>
    %17 = arith.subf %2, %16 : vector<2048x128xf32>
    %c0_8 = arith.constant 0 : index
    %c0_9 = arith.constant 0 : index
    %18 = vector.load %arg3[%c0_8, %c0_9] : memref<1x128xf32, #tpu.memory_space<vmem>>, vector<1x128xf32>
    %cst_10 = arith.constant 9.99999974E-6 : f32
    %19 = vector.broadcast %cst_10 : f32 to vector<1x128xf32>
    %20 = arith.addf %15, %19 : vector<1x128xf32>
    %21 = math.rsqrt %20 : vector<1x128xf32>
    %22 = arith.mulf %18, %21 : vector<1x128xf32>
    %23 = vector.broadcast %22 : vector<1x128xf32> to vector<2048x128xf32>
    %24 = arith.mulf %17, %23 : vector<2048x128xf32>
    %c0_11 = arith.constant 0 : index
    %c0_12 = arith.constant 0 : index
    %25 = vector.load %arg4[%c0_11, %c0_12] : memref<1x128xf32, #tpu.memory_space<vmem>>, vector<1x128xf32>
    %26 = vector.broadcast %25 : vector<1x128xf32> to vector<2048x128xf32>
    %27 = arith.addf %24, %26 : vector<2048x128xf32>
    %cst_13 = arith.constant 0.000000e+00 : f32
    %28 = vector.broadcast %cst_13 : f32 to vector<2048x128xf32>
    %29 = arith.maximumf %27, %28 : vector<2048x128xf32>
    %c0_14 = arith.constant 0 : index
    %c0_15 = arith.constant 0 : index
    %30 = vector.load %arg5[%c0_14, %c0_15] : memref<2048x128xf32, #tpu.memory_space<vmem>>, vector<2048x128xf32>
    tpu.vector_store %arg5[%c0_14, %c0_15], %29 {strides = array<i32>} : memref<2048x128xf32, #tpu.memory_space<vmem>>, vector<2048x128xf32>,
    return
  }
  func.func @transform_0(%arg0: i32) -> (i32, i32) {
    %c0_i32 = arith.constant 0 : i32
    %c0_i32_0 = arith.constant 0 : i32
    %c0_i32_1 = arith.constant 0 : i32
    return %c0_i32, %c0_i32_0 : i32, i32
  }
  func.func @transform_1(%arg0: i32) -> (i32, i32) {
    %c0_i32 = arith.constant 0 : i32
    %c0_i32_0 = arith.constant 0 : i32
    return %c0_i32, %arg0 : i32, i32
  }
  func.func @transform_2(%arg0: i32) -> (i32, i32) {
    %c0_i32 = arith.constant 0 : i32
    %c0_i32_0 = arith.constant 0 : i32
    return %c0_i32, %arg0 : i32, i32
  }
  func.func @transform_3(%arg0: i32) -> (i32, i32) {
    %c0_i32 = arith.constant 0 : i32
    %c0_i32_0 = arith.constant 0 : i32
    return %c0_i32, %arg0 : i32, i32
  }
  func.func @transform_4(%arg0: i32) -> (i32, i32) {
    %c0_i32 = arith.constant 0 : i32
    %c0_i32_0 = arith.constant 0 : i32
    return %c0_i32, %arg0 : i32, i32
  }
}

</mosaic_0001>

<bundles_post_ra>
// kernel: tpu_custom_call.1
= control target key start
LH: loop header
LB: loop body
LE: loop exit
PB: predicated region body
PF: predicated region fallthrough
CT: control target
= control target key end

     0   :  { %vm1888_vm0 = vcmask 1043456   ;;  %s10973_s0 = inlined_call_operand.vmem [shape: bf16[2048,152], index: 0, kind: input, shape index: {}]   ;;  %s10974_s1 = inlined_call_operand.vmem [shape: bf16[152,128], index: 1, kind: input, shape index: {}]   ;;  %s10975_s2 = inlined_call_operand.vmem [shape: f32[1,128], index: 2, kind: input, shape index: {}]   ;;  %s10976_s3 = inlined_call_operand.vmem [shape: f32[1,128], index: 3, kind: input, shape index: {}]   ;;  %s10977_s4 = inlined_call_operand.hbm [shape: f32[2048,128], index: 4, kind: output, shape index: {}]  }
   0x1   :  { %v6742_v0 = vld [vmem:[%s10974_s1 + $0x38] sm:$0xff]  ;;  %v293_v1 = vld [vmem:[%s10974_s1 + $0x48] sm:$0xf]  ;;  %v6741_v3 = vld [vmem:[%s10974_s1 + $0x30] sm:$0xff] }
   0x2   :  { %v1483_v2 = vunpack.c.l.b16 %v293_v1  ;;  %1892 = vmatpush.bf16.msra.mxu0 %v6742_v0  ;;  %6744 = vmatpush.bf16.msra.mxu2 %v6742_v0  ;;  %v6743_v6 = vld [vmem:[%s10974_s1 + $0x40] sm:$0xff]  ;;  %v6740_v7 = vld [vmem:[%s10974_s1 + $0x28] sm:$0xff] }
   0x3   :  { %v6479_v8 = vld [vmem:[%s10973_s0 + $0x4] sm:$0xf]  ;;  %v5295_v9 = vld [vmem:[%s10973_s0 + $0x8] sm:$0xf0] }
   0x4   :  { %v1493_v4 = vpack.c.b16 %v1483_v2, %v1483_v2 }
   0x6   :  { %v1890_v5 = vsel %vm1888_vm0, %v1493_v4, 0  ;;  %1893 = vmatpush.bf16.msra.mxu0 %v6741_v3 }
   0x7   :  { %2547 = vmatpush.bf16.msra.mxu1 %v1890_v5 }
   0x8   :  { %9 = vsyncpa [#allocation3], 0  ;;  %6745 = vmatpush.bf16.msra.mxu2 %v6741_v3  ;;  %6752 = vmatpush.bf16.msra.mxu3 %v1890_v5  ;;  %v5298_v10 = vor.u32 %v6479_v8, %v5295_v9  ;;  %vm1503_vm1 = vcmask 195584   ;;  %v6739_v11 = vld [vmem:[%s10974_s1 + $0x20] sm:$0xff]  ;;  %v6738_v12 = vld [vmem:[%s10974_s1 + $0x18] sm:$0xff]  ;;  %s5279_s16 = sshll.u32 %s10977_s4, 4  ;;  %s5280_s16 = int_to_ptr.hbm [resolvable:$true] %s5279_s16 }
   0x9   :  { %v6737_v13 = vld [vmem:[%s10974_s1 + $0x10] sm:$0xff]  ;;  %v6736_v14 = vld [vmem:[%s10974_s1 + $0x8] sm:$0xff]  ;;  %v5303_v16 = vld [vmem:[%s10973_s0 + $0x18] sm:$0xf0]  ;;  %s6789_s17 = smov 128   ;;  %s6790_s18 = smov 8  }
   0xa   :  { %1894 = vmatpush.bf16.msra.mxu0 %v6740_v7  ;;  %v6481_v15 = vld [vmem:[%s10973_s0 + $0x14] sm:$0xf]  ;;  %v6735_v18 = vld [vmem:[%s10974_s1] sm:$0xff]  ;;  %v6480_v20 = vld [vmem:[%s10973_s0 + $0x4] sm:$0xf0] }
   0xb   :  { %2548 = vmatpush.bf16.msra.mxu1 %v6743_v6  ;;  %v5306_v17 = vor.u32 %v6481_v15, %v5303_v16  ;;  %v5293_v19 = vld [vmem:[%s10973_s0] sm:$0xf]  ;;  %v6483_v22 = vld [vmem:[%s10973_s0 + $0x24] sm:$0xf]  ;;  %v5311_v23 = vld [vmem:[%s10973_s0 + $0x28] sm:$0xf0] }
   0xc   :  { %6746 = vmatpush.bf16.msra.mxu2 %v6740_v7  ;;  %6753 = vmatpush.bf16.msra.mxu3 %v6743_v6  ;;  %v5294_v21 = vor.u32 %v6480_v20, %v5293_v19  ;;  %v5314_v24 = vor.u32 %v6483_v22, %v5311_v23  ;;  %v5301_v25 = vld [vmem:[%s10973_s0 + $0x10] sm:$0xf]  ;;  %v6482_v26 = vld [vmem:[%s10973_s0 + $0x14] sm:$0xf0]  ;;  %v6485_v28 = vld [vmem:[%s10973_s0 + $0x34] sm:$0xf] }
   0xd   :  { %v5302_v27 = vor.u32 %v6482_v26, %v5301_v25  ;;  %v5319_v29 = vld [vmem:[%s10973_s0 + $0x38] sm:$0xf0]  ;;  %v5309_v31 = vld [vmem:[%s10973_s0 + $0x20] sm:$0xf]  ;;  %v6484_v32 = vld [vmem:[%s10973_s0 + $0x24] sm:$0xf0] }
   0xe   :  { %6351 = vmatmul.msk.bf16.vlgmr.msra.gmra.mxu1 %vm1503_vm1, %v5298_v10  ;;  %1895 = vmatpush.bf16.msra.mxu0 %v6739_v11  ;;  %v5322_v30 = vor.u32 %v6485_v28, %v5319_v29  ;;  %v5310_v33 = vor.u32 %v6484_v32, %v5309_v31  ;;  %v6487_v34 = vld [vmem:[%s10973_s0 + $0x44] sm:$0xf]  ;;  %v5327_v35 = vld [vmem:[%s10973_s0 + $0x48] sm:$0xf0]  ;;  %v5317_v37 = vld [vmem:[%s10973_s0 + $0x30] sm:$0xf] }
   0xf   :  { %v5330_v36 = vor.u32 %v6487_v34, %v5327_v35  ;;  %v6486_v38 = vld [vmem:[%s10973_s0 + $0x34] sm:$0xf0]  ;;  %v6489_v40 = vld [vmem:[%s10973_s0 + $0x54] sm:$0xf]  ;;  %v5335_v41 = vld [vmem:[%s10973_s0 + $0x58] sm:$0xf0] }
  0x10   :  { %6747 = vmatpush.bf16.msra.mxu2 %v6739_v11  ;;  %v5318_v39 = vor.u32 %v6486_v38, %v5317_v37  ;;  %v5338_v42 = vor.u32 %v6489_v40, %v5335_v41  ;;  %v5325_v43 = vld [vmem:[%s10973_s0 + $0x40] sm:$0xf]  ;;  %v6488_v44 = vld [vmem:[%s10973_s0 + $0x44] sm:$0xf0]  ;;  %v6491_v46 = vld [vmem:[%s10973_s0 + $0x64] sm:$0xf] }
  0x11   :  { %v5326_v45 = vor.u32 %v6488_v44, %v5325_v43  ;;  %v5343_v47 = vld [vmem:[%s10973_s0 + $0x68] sm:$0xf0]  ;;  %v5333_v49 = vld [vmem:[%s10973_s0 + $0x50] sm:$0xf]  ;;  %v6490_v50 = vld [vmem:[%s10973_s0 + $0x54] sm:$0xf0] }
  0x12   :  { %1896 = vmatpush.bf16.msra.mxu0 %v6738_v12  ;;  %v5346_v48 = vor.u32 %v6491_v46, %v5343_v47  ;;  %v5334_v51 = vor.u32 %v6490_v50, %v5333_v49  ;;  %v6493_v52 = vld [vmem:[%s10973_s0 + $0x74] sm:$0xf]  ;;  %v5351_v53 = vld [vmem:[%s10973_s0 + $0x78] sm:$0xf0]  ;;  %v5341_v55 = vld [vmem:[%s10973_s0 + $0x60] sm:$0xf] }
  0x13   :  { %v5354_v54 = vor.u32 %v6493_v52, %v5351_v53  ;;  %v6492_v56 = vld [vmem:[%s10973_s0 + $0x64] sm:$0xf0]  ;;  %v6495_v58 = vld [vmem:[%s10973_s0 + $0x84] sm:$0xf]  ;;  %v5359_v59 = vld [vmem:[%s10973_s0 + $0x88] sm:$0xf0] }
  0x14   :  { %6748 = vmatpush.bf16.msra.mxu2 %v6738_v12  ;;  %v5342_v57 = vor.u32 %v6492_v56, %v5341_v55  ;;  %v5362_v60 = vor.u32 %v6495_v58, %v5359_v59  ;;  %v5349_v62 = vld [vmem:[%s10973_s0 + $0x70] sm:$0xf]  ;;  %v6494_v63 = vld [vmem:[%s10973_s0 + $0x74] sm:$0xf0]  ;;  %v6497_v2 = vld [vmem:[%s10973_s0 + $0x94] sm:$0xf] }
  0x15   :  { %v5350_v0 = vor.u32 %v6494_v63, %v5349_v62  ;;  %v5367_v3 = vld [vmem:[%s10973_s0 + $0x98] sm:$0xf0]  ;;  %v5357_v6 = vld [vmem:[%s10973_s0 + $0x80] sm:$0xf]  ;;  %v6496_v7 = vld [vmem:[%s10973_s0 + $0x84] sm:$0xf0] }
  0x16   :  { %1897 = vmatpush.bf16.msra.mxu0 %v6737_v13  ;;  %v5370_v4 = vor.u32 %v6497_v2, %v5367_v3  ;;  %v5358_v8 = vor.u32 %v6496_v7, %v5357_v6  ;;  %v6498_v19 = vld [vmem:[%s10973_s0 + $0x94] sm:$0xf0]  ;;  %v6501_v25 = vld [vmem:[%s10973_s0 + $0xb4] sm:$0xf]  ;;  %v5383_v26 = vld [vmem:[%s10973_s0 + $0xb8] sm:$0xf0] }
  0x17   :  { %v5386_v28 = vor.u32 %v6501_v25, %v5383_v26  ;;  %v6500_v31 = vld [vmem:[%s10973_s0 + $0xa4] sm:$0xf0]  ;;  %v6503_v37 = vld [vmem:[%s10973_s0 + $0xc4] sm:$0xf]  ;;  %v5391_v38 = vld [vmem:[%s10973_s0 + $0xc8] sm:$0xf0] }
  0x18   :  { %6749 = vmatpush.bf16.msra.mxu2 %v6737_v13  ;;  %v6499_v13 = vld [vmem:[%s10973_s0 + $0xa4] sm:$0xf]  ;;  %v5394_v40 = vor.u32 %v6503_v37, %v5391_v38  ;;  %v6502_v43 = vld [vmem:[%s10973_s0 + $0xb4] sm:$0xf0]  ;;  %v6505_v49 = vld [vmem:[%s10973_s0 + $0xd4] sm:$0xf] }
  0x19   :  { %v5399_v50 = vld [vmem:[%s10973_s0 + $0xd8] sm:$0xf0]  ;;  %v6504_v55 = vld [vmem:[%s10973_s0 + $0xc4] sm:$0xf0]  ;;  %v5407_v62 = vld [vmem:[%s10973_s0 + $0xe8] sm:$0xf0] }
  0x1a   :  { %1898 = vmatpush.bf16.msra.mxu0 %v6736_v14  ;;  %v5402_v52 = vor.u32 %v6505_v49, %v5399_v50  ;;  %v5397_v2 = vld [vmem:[%s10973_s0 + $0xd0] sm:$0xf]  ;;  %v6506_v3 = vld [vmem:[%s10973_s0 + $0xd4] sm:$0xf0]  ;;  %v5805_v7 = vld [vmem:[%s10973_s0 + $0x400] sm:$0xf] }
  0x1b   :  { %v5813_v25 = vld [vmem:[%s10973_s0 + $0x410] sm:$0xf]  ;;  %v6610_v26 = vld [vmem:[%s10973_s0 + $0x414] sm:$0xf0]  ;;  %v6611_v49 = vld [vmem:[%s10973_s0 + $0x424] sm:$0xf] }
  0x1c   :  { %6750 = vmatpush.bf16.msra.mxu2 %v6736_v14  ;;  %v5375_v14 = vld [vmem:[%s10973_s0 + $0xa8] sm:$0xf0] }
  0x1d   :  { %v5378_v16 = vor.u32 %v6499_v13, %v5375_v14  ;;  %v6509_v13 = vld [vmem:[%s10973_s0 + $0xf4] sm:$0xf]  ;;  %v5415_v14 = vld [vmem:[%s10973_s0 + $0xf8] sm:$0xf0] }
  0x1e   :  { %6352 = vmatmul.msk.bf16.gmra.mxu1 %vm1503_vm1, %v5306_v17  ;;  %1899 = vmatpush.bf16.msra.mxu0 %v6735_v18 }
  0x20   :  { %6751 = vmatpush.bf16.msra.mxu2 %v6735_v18  ;;  %v5365_v18 = vld [vmem:[%s10973_s0 + $0x90] sm:$0xf] }
  0x21   :  { %1900 = vmatmul.bf16.vlgmr.msra.gmra.mxu0 %v5294_v21  ;;  %v5366_v20 = vor.u32 %v6498_v19, %v5365_v18  ;;  %v5405_v19 = vld [vmem:[%s10973_s0 + $0xe0] sm:$0xf] }
  0x2e   :  { %6353 = vmatmul.msk.bf16.gmra.mxu1 %vm1503_vm1, %v5314_v24 }
  0x31   :  { %1905 = vmatmul.bf16.gmra.mxu0 %v5302_v27 }
  0x3e   :  { %6354 = vmatmul.msk.bf16.gmra.mxu1 %vm1503_vm1, %v5322_v30  ;;  %v5373_v30 = vld [vmem:[%s10973_s0 + $0xa0] sm:$0xf] }
  0x3f   :  { %v5374_v32 = vor.u32 %v6500_v31, %v5373_v30  ;;  %v5815_v30 = vld [vmem:[%s10973_s0 + $0x418] sm:$0xf0] }
  0x41   :  { %1910 = vmatmul.bf16.gmra.mxu0 %v5310_v33 }
  0x4e   :  { %6355 = vmatmul.msk.bf16.gmra.mxu1 %vm1503_vm1, %v5330_v36 }
  0x51   :  { %1915 = vmatmul.bf16.gmra.mxu0 %v5318_v39 }
  0x5e   :  { %6356 = vmatmul.msk.bf16.gmra.mxu1 %vm1503_vm1, %v5338_v42  ;;  %v5381_v42 = vld [vmem:[%s10973_s0 + $0xb0] sm:$0xf] }
  0x5f   :  { %v5382_v44 = vor.u32 %v6502_v43, %v5381_v42  ;;  %v6510_v42 = vld [vmem:[%s10973_s0 + $0xf4] sm:$0xf0] }
  0x61   :  { %1920 = vmatmul.bf16.gmra.mxu0 %v5326_v45 }
  0x6e   :  { %6357 = vmatmul.msk.bf16.gmra.mxu1 %vm1503_vm1, %v5346_v48 }
  0x71   :  { %1925 = vmatmul.bf16.gmra.mxu0 %v5334_v51 }
  0x7e   :  { %6358 = vmatmul.msk.bf16.gmra.mxu1 %vm1503_vm1, %v5354_v54  ;;  %v5389_v54 = vld [vmem:[%s10973_s0 + $0xc0] sm:$0xf] }
  0x7f   :  { %v5390_v56 = vor.u32 %v6504_v55, %v5389_v54 }
  0x81   :  { %1930 = vmatmul.bf16.gmra.mxu0 %v5342_v57 }
  0x8b   :  { %v2550_v61 = vpop.f32.mrf.mxu1 }
  0x8e   :  { %6359 = vmatmul.msk.bf16.gmra.mxu1 %vm1503_vm1, %v5362_v60 }
  0x91   :  { %1935 = vmatmul.bf16.gmra.mxu0 %v5350_v0 }
  0x93   :  { %v2552_v1 = vpop.f32.mrf.mxu1 }
  0x9b   :  { %v2555_v5 = vpop.f32.mrf.mxu1 }
  0x9e   :  { %6360 = vmatmul.msk.bf16.gmra.mxu1 %vm1503_vm1, %v5370_v4  ;;  %v1901_v9 = vpop.f32.mrf.mxu0  ;;  %v5398_v4 = vor.u32 %v6506_v3, %v5397_v2 }
  0x9f   :  { %v6970_v10 = vadd.f32 %v2550_v61, %v1901_v9  ;;  %v6507_v61 = vld [vmem:[%s10973_s0 + $0xe4] sm:$0xf] }
  0xa0   :  { %v5410_v0 = vor.u32 %v6507_v61, %v5407_v62  ;;  %v5421_v62 = vld [vmem:[%s10973_s0 + $0x100] sm:$0xf] }
  0xa1   :  { %11326 = vst [vmem:[#allocation5_spill] sm:$0xff] %v6970_v10  ;;  %1940 = vmatmul.bf16.gmra.mxu0 %v5358_v8  ;;  %v6608_v8 = vld [vmem:[%s10973_s0 + $0x404] sm:$0xf0] }
  0xa2   :  { %v5806_v9 = vor.u32 %v6608_v8, %v5805_v7  ;;  %v6613_v7 = vld [vmem:[%s10973_s0 + $0x434] sm:$0xf] }
  0xa3   :  { %v2557_v11 = vpop.f32.mrf.mxu1 }
  0xa4   :  { %2220 = vmatmul.bf16.vlgmr.msra.gmra.mxu2 %v5806_v9  ;;  %v5831_v9 = vld [vmem:[%s10973_s0 + $0x438] sm:$0xf0] }
  0xa6   :  { %v1903_v12 = vpop.f32.mrf.mxu0 }
  0xa7   :  { %v6978_v15 = vadd.f32 %v2552_v1, %v1903_v12 }
  0xa9   :  { %11327 = vst [vmem:[#allocation6_spill] sm:$0xff] %v6978_v15 }
  0xab   :  { %v2560_v17 = vpop.f32.mrf.mxu1 }
  0xae   :  { %6361 = vmatmul.msk.bf16.gmra.mxu1 %vm1503_vm1, %v5378_v16  ;;  %v1906_v21 = vpop.f32.mrf.mxu0 }
  0xaf   :  { %v6987_v22 = vadd.f32 %v2555_v5, %v1906_v21 }
  0xb1   :  { %11328 = vst [vmem:[#allocation7_spill] sm:$0xff] %v6987_v22  ;;  %1945 = vmatmul.bf16.gmra.mxu0 %v5366_v20  ;;  %v6508_v20 = vld [vmem:[%s10973_s0 + $0xe4] sm:$0xf0] }
  0xb2   :  { %v5406_v21 = vor.u32 %v6508_v20, %v5405_v19 }
  0xb3   :  { %v2562_v23 = vpop.f32.mrf.mxu1 }
  0xb6   :  { %v1908_v24 = vpop.f32.mrf.mxu0 }
  0xb7   :  { %v6995_v27 = vadd.f32 %v2557_v11, %v1908_v24 }
  0xb9   :  { %11329 = vst [vmem:[#allocation8_spill] sm:$0xff] %v6995_v27 }
  0xbb   :  { %v2565_v29 = vpop.f32.mrf.mxu1 }
  0xbe   :  { %6362 = vmatmul.msk.bf16.gmra.mxu1 %vm1503_vm1, %v5386_v28  ;;  %v1911_v33 = vpop.f32.mrf.mxu0  ;;  %v6609_v28 = vld [vmem:[%s10973_s0 + $0x414] sm:$0xf] }
  0xbf   :  { %v7004_v34 = vadd.f32 %v2560_v17, %v1911_v33  ;;  %v5418_v17 = vor.u32 %v6509_v13, %v5415_v14  ;;  %v6515_v14 = vld [vmem:[%s10973_s0 + $0x124] sm:$0xf] }
  0xc1   :  { %11330 = vst [vmem:[#allocation9_spill] sm:$0xff] %v7004_v34  ;;  %1950 = vmatmul.bf16.gmra.mxu0 %v5374_v32  ;;  %v5818_v32 = vor.u32 %v6609_v28, %v5815_v30  ;;  %v6616_v30 = vld [vmem:[%s10973_s0 + $0x444] sm:$0xf0] }
  0xc3   :  { %v2567_v35 = vpop.f32.mrf.mxu1  ;;  %6416 = vmatmul.msk.bf16.vlgmr.msra.gmra.mxu3 %vm1503_vm1, %v5818_v32 }
  0xc6   :  { %v1913_v36 = vpop.f32.mrf.mxu0 }
  0xc7   :  { %v7012_v39 = vadd.f32 %v2562_v23, %v1913_v36  ;;  %v5423_v36 = vld [vmem:[%s10973_s0 + $0x108] sm:$0xf0] }
  0xc9   :  { %11331 = vst [vmem:[#allocation10_spill] sm:$0xff] %v7012_v39 }
  0xcb   :  { %v2570_v41 = vpop.f32.mrf.mxu1 }
  0xce   :  { %6363 = vmatmul.msk.bf16.gmra.mxu1 %vm1503_vm1, %v5394_v40  ;;  %v1916_v45 = vpop.f32.mrf.mxu0 }
  0xcf   :  { %v7021_v46 = vadd.f32 %v2565_v29, %v1916_v45  ;;  %v5814_v29 = vor.u32 %v6610_v26, %v5813_v25 }
  0xd1   :  { %11332 = vst [vmem:[#allocation11_spill] sm:$0xff] %v7021_v46  ;;  %1955 = vmatmul.bf16.gmra.mxu0 %v5382_v44  ;;  %2225 = vmatmul.bf16.gmra.mxu2 %v5814_v29  ;;  %v5837_v29 = vld [vmem:[%s10973_s0 + $0x440] sm:$0xf] }
  0xd2   :  { %v5838_v32 = vor.u32 %v6616_v30, %v5837_v29  ;;  %v5463_v29 = vld [vmem:[%s10973_s0 + $0x158] sm:$0xf0] }
  0xd3   :  { %v2572_v47 = vpop.f32.mrf.mxu1 }
  0xd6   :  { %v1918_v48 = vpop.f32.mrf.mxu0 }
  0xd7   :  { %v7029_v51 = vadd.f32 %v2567_v35, %v1918_v48  ;;  %v6511_v35 = vld [vmem:[%s10973_s0 + $0x104] sm:$0xf]  ;;  %v6612_v48 = vld [vmem:[%s10973_s0 + $0x424] sm:$0xf0] }
  0xd8   :  { %v5426_v38 = vor.u32 %v6511_v35, %v5423_v36 }
  0xd9   :  { %11333 = vst [vmem:[#allocation12_spill] sm:$0xff] %v7029_v51 }
  0xdb   :  { %v2575_v53 = vpop.f32.mrf.mxu1 }
  0xde   :  { %6364 = vmatmul.msk.bf16.gmra.mxu1 %vm1503_vm1, %v5402_v52  ;;  %v1921_v57 = vpop.f32.mrf.mxu0  ;;  %v5823_v52 = vld [vmem:[%s10973_s0 + $0x428] sm:$0xf0] }
  0xdf   :  { %v7038_v58 = vadd.f32 %v2570_v41, %v1921_v57  ;;  %v5413_v41 = vld [vmem:[%s10973_s0 + $0xf0] sm:$0xf]  ;;  %v5826_v54 = vor.u32 %v6611_v49, %v5823_v52  ;;  %v5431_v57 = vld [vmem:[%s10973_s0 + $0x118] sm:$0xf0] }
  0xe0   :  { %v5414_v43 = vor.u32 %v6510_v42, %v5413_v41  ;;  %v5447_v41 = vld [vmem:[%s10973_s0 + $0x138] sm:$0xf0] }
  0xe1   :  { %11334 = vst [vmem:[#allocation13_spill] sm:$0xff] %v7038_v58  ;;  %1960 = vmatmul.bf16.gmra.mxu0 %v5390_v56  ;;  %6417 = vmatmul.msk.bf16.gmra.mxu3 %vm1503_vm1, %v5826_v54  ;;  %v6513_v56 = vld [vmem:[%s10973_s0 + $0x114] sm:$0xf]  ;;  %v6618_v54 = vld [vmem:[%s10973_s0 + $0x454] sm:$0xf0] }
  0xe3   :  { %v2577_v59 = vpop.f32.mrf.mxu1 }
  0xe6   :  { %v1923_v60 = vpop.f32.mrf.mxu0 }
  0xe7   :  { %v7046_v63 = vadd.f32 %v2572_v47, %v1923_v60  ;;  %v5821_v47 = vld [vmem:[%s10973_s0 + $0x420] sm:$0xf]  ;;  %v5434_v60 = vor.u32 %v6513_v56, %v5431_v57  ;;  %v5847_v57 = vld [vmem:[%s10973_s0 + $0x458] sm:$0xf0] }
  0xe8   :  { %v5822_v50 = vor.u32 %v6612_v48, %v5821_v47  ;;  %v5437_v47 = vld [vmem:[%s10973_s0 + $0x120] sm:$0xf]  ;;  %v6516_v48 = vld [vmem:[%s10973_s0 + $0x124] sm:$0xf0] }
  0xe9   :  { %11335 = vst [vmem:[#allocation14_spill] sm:$0xff] %v7046_v63  ;;  %v5438_v49 = vor.u32 %v6516_v48, %v5437_v47  ;;  %v5863_v48 = vld [vmem:[%s10973_s0 + $0x478] sm:$0xf0] }
  0xea   :  { %2230 = vmatmul.bf16.gmra.mxu2 %v5822_v50 }
  0xeb   :  { %v2580_v1 = vpop.f32.mrf.mxu1 }
  0xee   :  { %6365 = vmatmul.msk.bf16.gmra.mxu1 %vm1503_vm1, %v5410_v0  ;;  %v1926_v5 = vpop.f32.mrf.mxu0  ;;  %v6512_v0 = vld [vmem:[%s10973_s0 + $0x104] sm:$0xf0] }
  0xef   :  { %v7055_v6 = vadd.f32 %v2575_v53, %v1926_v5  ;;  %v6614_v5 = vld [vmem:[%s10973_s0 + $0x434] sm:$0xf0] }
  0xf1   :  { %11336 = vst [vmem:[#allocation15_spill] sm:$0xff] %v7055_v6  ;;  %1965 = vmatmul.bf16.gmra.mxu0 %v5398_v4  ;;  %v5829_v4 = vld [vmem:[%s10973_s0 + $0x430] sm:$0xf] }
  0xf2   :  { %v5830_v8 = vor.u32 %v6614_v5, %v5829_v4 }
  0xf3   :  { %v2582_v11 = vpop.f32.mrf.mxu1 }
  0xf6   :  { %v1928_v12 = vpop.f32.mrf.mxu0 }
  0xf7   :  { %v7069_v16 = vadd.f32 %v2577_v59, %v1928_v12  ;;  %v5834_v12 = vor.u32 %v6613_v7, %v5831_v9  ;;  %v5445_v7 = vld [vmem:[%s10973_s0 + $0x130] sm:$0xf] }
  0xf9   :  { %11337 = vst [vmem:[#allocation16_spill] sm:$0xff] %v7069_v16  ;;  %6418 = vmatmul.msk.bf16.gmra.mxu3 %vm1503_vm1, %v5834_v12 }
  0xfa   :  { %2235 = vmatmul.bf16.gmra.mxu2 %v5830_v8  ;;  %v6518_v8 = vld [vmem:[%s10973_s0 + $0x134] sm:$0xf0] }
  0xfb   :  { %v2585_v18 = vpop.f32.mrf.mxu1  ;;  %v5446_v9 = vor.u32 %v6518_v8, %v5445_v7  ;;  %v6624_v7 = vld [vmem:[%s10973_s0 + $0x484] sm:$0xf0]  ;;  %v6623_v8 = vld [vmem:[%s10973_s0 + $0x484] sm:$0xf] }
  0xfe   :  { %6366 = vmatmul.msk.bf16.gmra.mxu1 %vm1503_vm1, %v5418_v17  ;;  %v1931_v23 = vpop.f32.mrf.mxu0  ;;  %v5439_v17 = vld [vmem:[%s10973_s0 + $0x128] sm:$0xf0] }
  0xff   :  { %v7078_v24 = vadd.f32 %v2580_v1, %v1931_v23  ;;  %v5422_v1 = vor.u32 %v6512_v0, %v5421_v62  ;;  %v5442_v19 = vor.u32 %v6515_v14, %v5439_v17  ;;  %v6514_v23 = vld [vmem:[%s10973_s0 + $0x114] sm:$0xf0]  ;;  %v6519_v0 = vld [vmem:[%s10973_s0 + $0x144] sm:$0xf]  ;;  %v6620_v14 = vld [vmem:[%s10973_s0 + $0x464] sm:$0xf0] }
 0x100   :  { %v6619_v17 = vld [vmem:[%s10973_s0 + $0x464] sm:$0xf] }
 0x101   :  { %11338 = vst [vmem:[#allocation17_spill] sm:$0xff] %v7078_v24  ;;  %1970 = vmatmul.bf16.gmra.mxu0 %v5406_v21  ;;  %v5429_v21 = vld [vmem:[%s10973_s0 + $0x110] sm:$0xf] }
 0x102   :  { %v5430_v25 = vor.u32 %v6514_v23, %v5429_v21 }
 0x103   :  { %v2587_v31 = vpop.f32.mrf.mxu1 }
 0x106   :  { %v1933_v33 = vpop.f32.mrf.mxu0 }
 0x107   :  { %v7099_v37 = vadd.f32 %v2582_v11, %v1933_v33  ;;  %v5839_v33 = vld [vmem:[%s10973_s0 + $0x448] sm:$0xf0] }
 0x109   :  { %11339 = vst [vmem:[#allocation18_spill] sm:$0xff] %v7099_v37 }
 0x10a   :  { %2240 = vmatmul.bf16.gmra.mxu2 %v5838_v32 }
 0x10b   :  { %v2590_v40 = vpop.f32.mrf.mxu1 }
 0x10e   :  { %6367 = vmatmul.msk.bf16.gmra.mxu1 %vm1503_vm1, %v5426_v38  ;;  %v1936_v44 = vpop.f32.mrf.mxu0 }
 0x10f   :  { %v7108_v45 = vadd.f32 %v2585_v18, %v1936_v44 }
 0x111   :  { %11340 = vst [vmem:[#allocation19_spill] sm:$0xff] %v7108_v45  ;;  %1975 = vmatmul.bf16.gmra.mxu0 %v5414_v43 }
 0x113   :  { %v2592_v53 = vpop.f32.mrf.mxu1 }
 0x116   :  { %v1938_v55 = vpop.f32.mrf.mxu0 }
 0x117   :  { %v7129_v59 = vadd.f32 %v2587_v31, %v1938_v55  ;;  %v6615_v31 = vld [vmem:[%s10973_s0 + $0x444] sm:$0xf]  ;;  %v6617_v55 = vld [vmem:[%s10973_s0 + $0x454] sm:$0xf] }
 0x118   :  { %v5842_v36 = vor.u32 %v6615_v31, %v5839_v33  ;;  %v5453_v33 = vld [vmem:[%s10973_s0 + $0x140] sm:$0xf] }
 0x119   :  { %11341 = vst [vmem:[#allocation20_spill] sm:$0xff] %v7129_v59 }
 0x11a   :  { %6419 = vmatmul.msk.bf16.gmra.mxu3 %vm1503_vm1, %v5842_v36 }
 0x11b   :  { %v2595_v61 = vpop.f32.mrf.mxu1 }
 0x11e   :  { %6368 = vmatmul.msk.bf16.gmra.mxu1 %vm1503_vm1, %v5434_v60  ;;  %v1941_v2 = vpop.f32.mrf.mxu0 }
 0x11f   :  { %v7138_v3 = vadd.f32 %v2590_v40, %v1941_v2  ;;  %v6517_v40 = vld [vmem:[%s10973_s0 + $0x134] sm:$0xf] }
 0x120   :  { %v5450_v43 = vor.u32 %v6517_v40, %v5447_v41  ;;  %v5861_v41 = vld [vmem:[%s10973_s0 + $0x470] sm:$0xf] }
 0x121   :  { %11342 = vst [vmem:[#allocation21_spill] sm:$0xff] %v7138_v3  ;;  %1980 = vmatmul.bf16.gmra.mxu0 %v5422_v1  ;;  %v5455_v1 = vld [vmem:[%s10973_s0 + $0x148] sm:$0xf0] }
 0x122   :  { %v5458_v4 = vor.u32 %v6519_v0, %v5455_v1 }
 0x123   :  { %v2597_v11 = vpop.f32.mrf.mxu1 }
 0x126   :  { %v1943_v13 = vpop.f32.mrf.mxu0 }
 0x127   :  { %v7159_v18 = vadd.f32 %v2592_v53, %v1943_v13  ;;  %v5845_v53 = vld [vmem:[%s10973_s0 + $0x450] sm:$0xf]  ;;  %v5853_v13 = vld [vmem:[%s10973_s0 + $0x460] sm:$0xf] }
 0x128   :  { %v5846_v56 = vor.u32 %v6618_v54, %v5845_v53  ;;  %v6523_v54 = vld [vmem:[%s10973_s0 + $0x164] sm:$0xf] }
 0x129   :  { %11343 = vst [vmem:[#allocation22_spill] sm:$0xff] %v7159_v18 }
 0x12a   :  { %2245 = vmatmul.bf16.gmra.mxu2 %v5846_v56 }
 0x12b   :  { %v2600_v20 = vpop.f32.mrf.mxu1 }
 0x12e   :  { %6369 = vmatmul.msk.bf16.gmra.mxu1 %vm1503_vm1, %v5442_v19  ;;  %v1946_v26 = vpop.f32.mrf.mxu0  ;;  %v5854_v19 = vor.u32 %v6620_v14, %v5853_v13 }
 0x12f   :  { %v7168_v28 = vadd.f32 %v2595_v61, %v1946_v26  ;;  %v5850_v61 = vor.u32 %v6617_v55, %v5847_v57  ;;  %v6521_v26 = vld [vmem:[%s10973_s0 + $0x154] sm:$0xf]  ;;  %v5471_v55 = vld [vmem:[%s10973_s0 + $0x168] sm:$0xf0] }
 0x130   :  { %v5466_v31 = vor.u32 %v6521_v26, %v5463_v29  ;;  %v5474_v57 = vor.u32 %v6523_v54, %v5471_v55  ;;  %v5469_v29 = vld [vmem:[%s10973_s0 + $0x160] sm:$0xf]  ;;  %v5487_v54 = vld [vmem:[%s10973_s0 + $0x188] sm:$0xf0] }
 0x131   :  { %11344 = vst [vmem:[#allocation23_spill] sm:$0xff] %v7168_v28  ;;  %1985 = vmatmul.bf16.gmra.mxu0 %v5430_v25  ;;  %6420 = vmatmul.msk.bf16.gmra.mxu3 %vm1503_vm1, %v5850_v61  ;;  %v5461_v61 = vld [vmem:[%s10973_s0 + $0x150] sm:$0xf] }
 0x133   :  { %v2602_v35 = vpop.f32.mrf.mxu1 }
 0x136   :  { %v1948_v38 = vpop.f32.mrf.mxu0 }
 0x137   :  { %v7189_v42 = vadd.f32 %v2597_v11, %v1948_v38 }
 0x139   :  { %11345 = vst [vmem:[#allocation24_spill] sm:$0xff] %v7189_v42 }
 0x13a   :  { %2250 = vmatmul.bf16.gmra.mxu2 %v5854_v19  ;;  %v6525_v19 = vld [vmem:[%s10973_s0 + $0x174] sm:$0xf] }
 0x13b   :  { %v2605_v44 = vpop.f32.mrf.mxu1 }
 0x13e   :  { %6370 = vmatmul.msk.bf16.gmra.mxu1 %vm1503_vm1, %v5450_v43  ;;  %v1951_v50 = vpop.f32.mrf.mxu0  ;;  %v6622_v43 = vld [vmem:[%s10973_s0 + $0x474] sm:$0xf0] }
 0x13f   :  { %v7198_v52 = vadd.f32 %v2600_v20, %v1951_v50  ;;  %v5855_v20 = vld [vmem:[%s10973_s0 + $0x468] sm:$0xf0]  ;;  %v5862_v47 = vor.u32 %v6622_v43, %v5861_v41  ;;  %v6626_v41 = vld [vmem:[%s10973_s0 + $0x494] sm:$0xf0]  ;;  %v6625_v43 = vld [vmem:[%s10973_s0 + $0x494] sm:$0xf] }
 0x140   :  { %v5858_v23 = vor.u32 %v6619_v17, %v5855_v20  ;;  %v5479_v20 = vld [vmem:[%s10973_s0 + $0x178] sm:$0xf0] }
 0x141   :  { %11346 = vst [vmem:[#allocation25_spill] sm:$0xff] %v7198_v52  ;;  %1990 = vmatmul.bf16.gmra.mxu0 %v5438_v49 }
 0x142   :  { %6421 = vmatmul.msk.bf16.gmra.mxu3 %vm1503_vm1, %v5858_v23 }
 0x143   :  { %v2607_v60 = vpop.f32.mrf.mxu1 }
 0x146   :  { %v1953_v62 = vpop.f32.mrf.mxu0 }
 0x147   :  { %v7219_v2 = vadd.f32 %v2602_v35, %v1953_v62  ;;  %v6520_v35 = vld [vmem:[%s10973_s0 + $0x144] sm:$0xf0]  ;;  %v6522_v62 = vld [vmem:[%s10973_s0 + $0x154] sm:$0xf0] }
 0x148   :  { %v5454_v36 = vor.u32 %v6520_v35, %v5453_v33  ;;  %v5462_v0 = vor.u32 %v6522_v62, %v5461_v61 }
 0x149   :  { %11347 = vst [vmem:[#allocation26_spill] sm:$0xff] %v7219_v2 }
 0x14a   :  { %2255 = vmatmul.bf16.gmra.mxu2 %v5862_v47  ;;  %v5879_v47 = vld [vmem:[%s10973_s0 + $0x498] sm:$0xf0] }
 0x14b   :  { %v2610_v5 = vpop.f32.mrf.mxu1 }
 0x14e   :  { %6371 = vmatmul.msk.bf16.gmra.mxu1 %vm1503_vm1, %v5458_v4  ;;  %v1956_v11 = vpop.f32.mrf.mxu0 }
 0x14f   :  { %v7228_v12 = vadd.f32 %v2605_v44, %v1956_v11  ;;  %v6621_v44 = vld [vmem:[%s10973_s0 + $0x474] sm:$0xf]  ;;  %v5871_v11 = vld [vmem:[%s10973_s0 + $0x488] sm:$0xf0] }
 0x150   :  { %v5866_v50 = vor.u32 %v6621_v44, %v5863_v48  ;;  %v5874_v14 = vor.u32 %v6623_v8, %v5871_v11 }
 0x151   :  { %11348 = vst [vmem:[#allocation27_spill] sm:$0xff] %v7228_v12  ;;  %1995 = vmatmul.bf16.gmra.mxu0 %v5446_v9 }
 0x152   :  { %6422 = vmatmul.msk.bf16.gmra.mxu3 %vm1503_vm1, %v5866_v50 }
 0x153   :  { %v2612_v21 = vpop.f32.mrf.mxu1 }
 0x156   :  { %v1958_v25 = vpop.f32.mrf.mxu0 }
 0x157   :  { %v7249_v30 = vadd.f32 %v2607_v60, %v1958_v25  ;;  %v5482_v25 = vor.u32 %v6525_v19, %v5479_v20  ;;  %v6628_v19 = vld [vmem:[%s10973_s0 + $0x4a4] sm:$0xf0]  ;;  %v6627_v20 = vld [vmem:[%s10973_s0 + $0x4a4] sm:$0xf] }
 0x159   :  { %11349 = vst [vmem:[#allocation28_spill] sm:$0xff] %v7249_v30 }
 0x15b   :  { %v2615_v32 = vpop.f32.mrf.mxu1 }
 0x15e   :  { %6372 = vmatmul.msk.bf16.gmra.mxu1 %vm1503_vm1, %v5466_v31  ;;  %v1961_v38 = vpop.f32.mrf.mxu0  ;;  %v6524_v31 = vld [vmem:[%s10973_s0 + $0x164] sm:$0xf0] }
 0x15f   :  { %v7258_v40 = vadd.f32 %v2610_v5, %v1961_v38  ;;  %v5869_v5 = vld [vmem:[%s10973_s0 + $0x480] sm:$0xf]  ;;  %v5877_v38 = vld [vmem:[%s10973_s0 + $0x490] sm:$0xf] }
 0x160   :  { %v5870_v9 = vor.u32 %v6624_v7, %v5869_v5  ;;  %v5878_v44 = vor.u32 %v6626_v41, %v5877_v38  ;;  %v5495_v38 = vld [vmem:[%s10973_s0 + $0x198] sm:$0xf0] }
 0x161   :  { %11350 = vst [vmem:[#allocation29_spill] sm:$0xff] %v7258_v40  ;;  %2000 = vmatmul.bf16.gmra.mxu0 %v5454_v36 }
 0x162   :  { %2260 = vmatmul.bf16.gmra.mxu2 %v5870_v9  ;;  %6423 = vmatmul.msk.bf16.gmra.mxu3 %vm1503_vm1, %v5874_v14 }
 0x163   :  { %v2617_v49 = vpop.f32.mrf.mxu1 }
 0x166   :  { %v1963_v53 = vpop.f32.mrf.mxu0 }
 0x167   :  { %v7279_v56 = vadd.f32 %v2612_v21, %v1963_v53  ;;  %v7309_v21 = vpop.f32.mrf.mxu2  ;;  %v6527_v53 = vld [vmem:[%s10973_s0 + $0x184] sm:$0xf] }
 0x168   :  { %11353 = vst [vmem:[#allocation32_spill] sm:$0xff] %v7309_v21  ;;  %v5490_v61 = vor.u32 %v6527_v53, %v5487_v54  ;;  %v6528_v53 = vld [vmem:[%s10973_s0 + $0x184] sm:$0xf0] }
 0x169   :  { %11351 = vst [vmem:[#allocation30_spill] sm:$0xff] %v7279_v56 }
 0x16b   :  { %v2620_v60 = vpop.f32.mrf.mxu1 }
 0x16e   :  { %6373 = vmatmul.msk.bf16.gmra.mxu1 %vm1503_vm1, %v5474_v57  ;;  %v1966_v1 = vpop.f32.mrf.mxu0 }
 0x16f   :  { %v7288_v4 = vadd.f32 %v2615_v32, %v1966_v1  ;;  %v5470_v32 = vor.u32 %v6524_v31, %v5469_v29  ;;  %v7320_v35 = vpop.f32.mrf.mxu2  ;;  %v6526_v1 = vld [vmem:[%s10973_s0 + $0x174] sm:$0xf0] }
 0x170   :  { %11355 = vst [vmem:[#allocation34_spill] sm:$0xff] %v7320_v35  ;;  %v6644_v35 = vld [vmem:[%s10973_s0 + $0x524] sm:$0xf0] }
 0x171   :  { %11352 = vst [vmem:[#allocation31_spill] sm:$0xff] %v7288_v4  ;;  %2005 = vmatmul.bf16.gmra.mxu0 %v5462_v0  ;;  %v5477_v0 = vld [vmem:[%s10973_s0 + $0x170] sm:$0xf] }
 0x172   :  { %2265 = vmatmul.bf16.gmra.mxu2 %v5878_v44  ;;  %v5478_v7 = vor.u32 %v6526_v1, %v5477_v0 }
 0x173   :  { %v2622_v13 = vpop.f32.mrf.mxu1 }
 0x176   :  { %v1968_v17 = vpop.f32.mrf.mxu0 }
 0x177   :  { %v7311_v23 = vadd.f32 %v2617_v49, %v1968_v17  ;;  %v5882_v49 = vor.u32 %v6625_v43, %v5879_v47  ;;  %v2226_v55 = vpop.f32.mrf.mxu2  ;;  %v5885_v17 = vld [vmem:[%s10973_s0 + $0x4a0] sm:$0xf] }
 0x179   :  { %11354 = vst [vmem:[#allocation33_spill] sm:$0xff] %v7311_v23  ;;  %6424 = vmatmul.msk.bf16.gmra.mxu3 %vm1503_vm1, %v5882_v49 }
 0x17b   :  { %v2625_v26 = vpop.f32.mrf.mxu1 }
 0x17e   :  { %6374 = vmatmul.msk.bf16.gmra.mxu1 %vm1503_vm1, %v5482_v25  ;;  %v1971_v33 = vpop.f32.mrf.mxu0  ;;  %v5886_v25 = vor.u32 %v6628_v19, %v5885_v17 }
 0x17f   :  { %v7322_v36 = vadd.f32 %v2620_v60, %v1971_v33  ;;  %v2875_v60 = vpop.f32.mrf.mxu3  ;;  %v2228_v9 = vpop.f32.mrf.mxu2  ;;  %v6529_v33 = vld [vmem:[%s10973_s0 + $0x194] sm:$0xf] }
 0x180   :  { %v7351_v5 = vadd.f32 %v2875_v60, %v2226_v55  ;;  %v5498_v47 = vor.u32 %v6529_v33, %v5495_v38 }
 0x181   :  { %11356 = vst [vmem:[#allocation35_spill] sm:$0xff] %v7322_v36  ;;  %2010 = vmatmul.bf16.gmra.mxu0 %v5470_v32 }
 0x182   :  { %11358 = vst [vmem:[#allocation37_spill] sm:$0xff] %v7351_v5  ;;  %2270 = vmatmul.bf16.gmra.mxu2 %v5886_v25  ;;  %v6531_v25 = vld [vmem:[%s10973_s0 + $0x1a4] sm:$0xf] }
 0x183   :  { %v2627_v48 = vpop.f32.mrf.mxu1 }
 0x186   :  { %v1973_v50 = vpop.f32.mrf.mxu0 }
 0x187   :  { %v7343_v57 = vadd.f32 %v2622_v13, %v1973_v50  ;;  %v2877_v13 = vpop.f32.mrf.mxu3  ;;  %v2231_v41 = vpop.f32.mrf.mxu2  ;;  %v5485_v50 = vld [vmem:[%s10973_s0 + $0x180] sm:$0xf] }
 0x188   :  { %v7356_v14 = vadd.f32 %v2877_v13, %v2228_v9  ;;  %v5486_v55 = vor.u32 %v6528_v53, %v5485_v50  ;;  %v6629_v9 = vld [vmem:[%s10973_s0 + $0x4b4] sm:$0xf] }
 0x189   :  { %11357 = vst [vmem:[#allocation36_spill] sm:$0xff] %v7343_v57 }
 0x18a   :  { %11360 = vst [vmem:[#allocation39_spill] sm:$0xff] %v7356_v14  ;;  %v6642_v14 = vld [vmem:[%s10973_s0 + $0x514] sm:$0xf0] }
 0x18b   :  { %v2630_v62 = vpop.f32.mrf.mxu1 }
 0x18e   :  { %6375 = vmatmul.msk.bf16.gmra.mxu1 %vm1503_vm1, %v5490_v61  ;;  %v1976_v8 = vpop.f32.mrf.mxu0 }
 0x18f   :  { %v7354_v11 = vadd.f32 %v2625_v26, %v1976_v8  ;;  %v5887_v26 = vld [vmem:[%s10973_s0 + $0x4a8] sm:$0xf0]  ;;  %v2880_v44 = vpop.f32.mrf.mxu3  ;;  %v2233_v61 = vpop.f32.mrf.mxu2  ;;  %v6630_v8 = vld [vmem:[%s10973_s0 + $0x4b4] sm:$0xf0] }
 0x190   :  { %v5890_v31 = vor.u32 %v6627_v20, %v5887_v26  ;;  %v7385_v54 = vadd.f32 %v2880_v44, %v2231_v41  ;;  %v5503_v26 = vld [vmem:[%s10973_s0 + $0x1a8] sm:$0xf0]  ;;  %v5493_v44 = vld [vmem:[%s10973_s0 + $0x190] sm:$0xf] }
 0x191   :  { %11359 = vst [vmem:[#allocation38_spill] sm:$0xff] %v7354_v11  ;;  %2015 = vmatmul.bf16.gmra.mxu0 %v5478_v7  ;;  %v5893_v7 = vld [vmem:[%s10973_s0 + $0x4b0] sm:$0xf]  ;;  %v5506_v38 = vor.u32 %v6531_v25, %v5503_v26  ;;  %v6533_v25 = vld [vmem:[%s10973_s0 + $0x1b4] sm:$0xf] }
 0x192   :  { %6425 = vmatmul.msk.bf16.gmra.mxu3 %vm1503_vm1, %v5890_v31  ;;  %11362 = vst [vmem:[#allocation41_spill] sm:$0xff] %v7385_v54  ;;  %v5894_v13 = vor.u32 %v6630_v8, %v5893_v7  ;;  %v5901_v7 = vld [vmem:[%s10973_s0 + $0x4c0] sm:$0xf]  ;;  %v6632_v8 = vld [vmem:[%s10973_s0 + $0x4c4] sm:$0xf0] }
 0x193   :  { %v2632_v29 = vpop.f32.mrf.mxu1  ;;  %v5511_v26 = vld [vmem:[%s10973_s0 + $0x1b8] sm:$0xf0] }
 0x194   :  { %2275 = vmatmul.bf16.gmra.mxu2 %v5894_v13  ;;  %v5902_v13 = vor.u32 %v6632_v8, %v5901_v7 }
 0x196   :  { %v1978_v32 = vpop.f32.mrf.mxu0 }
 0x197   :  { %v7377_v43 = vadd.f32 %v2627_v48, %v1978_v32  ;;  %v2882_v0 = vpop.f32.mrf.mxu3  ;;  %v2236_v31 = vpop.f32.mrf.mxu2 }
 0x198   :  { %v7390_v1 = vadd.f32 %v2882_v0, %v2233_v61 }
 0x199   :  { %11361 = vst [vmem:[#allocation40_spill] sm:$0xff] %v7377_v43 }
 0x19a   :  { %11364 = vst [vmem:[#allocation43_spill] sm:$0xff] %v7390_v1  ;;  %v6640_v1 = vld [vmem:[%s10973_s0 + $0x504] sm:$0xf0] }
 0x19b   :  { %v2635_v49 = vpop.f32.mrf.mxu1 }
 0x19e   :  { %6376 = vmatmul.msk.bf16.gmra.mxu1 %vm1503_vm1, %v5498_v47  ;;  %v1981_v60 = vpop.f32.mrf.mxu0  ;;  %v6530_v47 = vld [vmem:[%s10973_s0 + $0x194] sm:$0xf0] }
 0x19f   :  { %v7388_v48 = vadd.f32 %v2630_v62, %v1981_v60  ;;  %v5895_v62 = vld [vmem:[%s10973_s0 + $0x4b8] sm:$0xf0]  ;;  %v2885_v33 = vpop.f32.mrf.mxu3  ;;  %v5494_v53 = vor.u32 %v6530_v47, %v5493_v44  ;;  %v2238_v60 = vpop.f32.mrf.mxu2  ;;  %v5514_v44 = vor.u32 %v6533_v25, %v5511_v26 }
 0x1a0   :  { %v5898_v19 = vor.u32 %v6629_v9, %v5895_v62  ;;  %v7419_v50 = vadd.f32 %v2885_v33, %v2236_v31  ;;  %v6631_v9 = vld [vmem:[%s10973_s0 + $0x4c4] sm:$0xf] }
 0x1a1   :  { %11363 = vst [vmem:[#allocation42_spill] sm:$0xff] %v7388_v48  ;;  %2020 = vmatmul.bf16.gmra.mxu0 %v5486_v55 }
 0x1a2   :  { %6426 = vmatmul.msk.bf16.gmra.mxu3 %vm1503_vm1, %v5898_v19  ;;  %11366 = vst [vmem:[#allocation45_spill] sm:$0xff] %v7419_v50 }
 0x1a3   :  { %v2637_v17 = vpop.f32.mrf.mxu1 }
 0x1a4   :  { %2280 = vmatmul.bf16.gmra.mxu2 %v5902_v13 }
 0x1a6   :  { %v1983_v20 = vpop.f32.mrf.mxu0 }
 0x1a7   :  { %v7411_v32 = vadd.f32 %v2632_v29, %v1983_v20  ;;  %v2887_v61 = vpop.f32.mrf.mxu3  ;;  %v2241_v31 = vpop.f32.mrf.mxu2 }
 0x1a8   :  { %v7424_v0 = vadd.f32 %v2887_v61, %v2238_v60 }
 0x1a9   :  { %11365 = vst [vmem:[#allocation44_spill] sm:$0xff] %v7411_v32 }
 0x1aa   :  { %11368 = vst [vmem:[#allocation47_spill] sm:$0xff] %v7424_v0  ;;  %v6638_v0 = vld [vmem:[%s10973_s0 + $0x4f4] sm:$0xf0] }
 0x1ab   :  { %v2640_v41 = vpop.f32.mrf.mxu1 }
 0x1ae   :  { %6377 = vmatmul.msk.bf16.gmra.mxu1 %vm1503_vm1, %v5506_v38  ;;  %v1986_v55 = vpop.f32.mrf.mxu0 }
 0x1af   :  { %v7422_v29 = vadd.f32 %v2635_v49, %v1986_v55  ;;  %v5903_v49 = vld [vmem:[%s10973_s0 + $0x4c8] sm:$0xf0]  ;;  %v2890_v38 = vpop.f32.mrf.mxu3  ;;  %v6532_v55 = vld [vmem:[%s10973_s0 + $0x1a4] sm:$0xf0]  ;;  %v2243_v8 = vpop.f32.mrf.mxu2 }
 0x1b0   :  { %v5906_v19 = vor.u32 %v6631_v9, %v5903_v49  ;;  %v7453_v60 = vadd.f32 %v2890_v38, %v2241_v31  ;;  %v5909_v49 = vld [vmem:[%s10973_s0 + $0x4d0] sm:$0xf] }
 0x1b1   :  { %11367 = vst [vmem:[#allocation46_spill] sm:$0xff] %v7422_v29  ;;  %2025 = vmatmul.bf16.gmra.mxu0 %v5494_v53  ;;  %v5501_v53 = vld [vmem:[%s10973_s0 + $0x1a0] sm:$0xf] }
 0x1b2   :  { %6427 = vmatmul.msk.bf16.gmra.mxu3 %vm1503_vm1, %v5906_v19  ;;  %11370 = vst [vmem:[#allocation49_spill] sm:$0xff] %v7453_v60  ;;  %v5502_v61 = vor.u32 %v6532_v55, %v5501_v53  ;;  %v6634_v19 = vld [vmem:[%s10973_s0 + $0x4d4] sm:$0xf0]  ;;  %v5519_v53 = vld [vmem:[%s10973_s0 + $0x1c8] sm:$0xf0] }
 0x1b3   :  { %v2642_v62 = vpop.f32.mrf.mxu1  ;;  %v5910_v25 = vor.u32 %v6634_v19, %v5909_v49  ;;  %v5509_v49 = vld [vmem:[%s10973_s0 + $0x1b0] sm:$0xf]  ;;  %v6534_v19 = vld [vmem:[%s10973_s0 + $0x1b4] sm:$0xf0] }
 0x1b5   :  { %2285 = vmatmul.bf16.gmra.mxu2 %v5910_v25  ;;  %v5510_v25 = vor.u32 %v6534_v19, %v5509_v49 }
 0x1b6   :  { %v1988_v20 = vpop.f32.mrf.mxu0 }
 0x1b7   :  { %v7445_v33 = vadd.f32 %v2637_v17, %v1988_v20  ;;  %v2892_v9 = vpop.f32.mrf.mxu3  ;;  %v6633_v20 = vld [vmem:[%s10973_s0 + $0x4d4] sm:$0xf]  ;;  %v2246_v55 = vpop.f32.mrf.mxu2 }
 0x1b8   :  { %v7458_v13 = vadd.f32 %v2892_v9, %v2243_v8 }
 0x1b9   :  { %11369 = vst [vmem:[#allocation48_spill] sm:$0xff] %v7445_v33 }
 0x1ba   :  { %11372 = vst [vmem:[#allocation51_spill] sm:$0xff] %v7458_v13  ;;  %v6636_v13 = vld [vmem:[%s10973_s0 + $0x4e4] sm:$0xf0] }
 0x1bb   :  { %v2645_v47 = vpop.f32.mrf.mxu1 }
 0x1be   :  { %6378 = vmatmul.msk.bf16.gmra.mxu1 %vm1503_vm1, %v5514_v44  ;;  %v1991_v7 = vpop.f32.mrf.mxu0  ;;  %v6535_v44 = vld [vmem:[%s10973_s0 + $0x1c4] sm:$0xf] }
 0x1bf   :  { %v7456_v17 = vadd.f32 %v2640_v41, %v1991_v7  ;;  %v5911_v41 = vld [vmem:[%s10973_s0 + $0x4d8] sm:$0xf0]  ;;  %v2895_v7 = vpop.f32.mrf.mxu3  ;;  %v5522_v8 = vor.u32 %v6535_v44, %v5519_v53  ;;  %v5917_v53 = vld [vmem:[%s10973_s0 + $0x4e0] sm:$0xf] }
 0x1c0   :  { %v5914_v31 = vor.u32 %v6633_v20, %v5911_v41  ;;  %v7487_v20 = vadd.f32 %v2895_v7, %v2246_v55  ;;  %v6635_v55 = vld [vmem:[%s10973_s0 + $0x4e4] sm:$0xf]  ;;  %v5918_v7 = vor.u32 %v6636_v13, %v5917_v53 }
 0x1c1   :  { %11371 = vst [vmem:[#allocation50_spill] sm:$0xff] %v7456_v17  ;;  %2030 = vmatmul.bf16.gmra.mxu0 %v5502_v61 }
 0x1c2   :  { %6428 = vmatmul.msk.bf16.gmra.mxu3 %vm1503_vm1, %v5914_v31  ;;  %11374 = vst [vmem:[#allocation53_spill] sm:$0xff] %v7487_v20  ;;  %v2248_v31 = vpop.f32.mrf.mxu2 }
 0x1c3   :  { %v2647_v26 = vpop.f32.mrf.mxu1 }
 0x1c5   :  { %2290 = vmatmul.bf16.gmra.mxu2 %v5918_v7  ;;  %v6536_v7 = vld [vmem:[%s10973_s0 + $0x1c4] sm:$0xf0] }
 0x1c6   :  { %v1993_v38 = vpop.f32.mrf.mxu0 }
 0x1c7   :  { %v7479_v61 = vadd.f32 %v2642_v62, %v1993_v38  ;;  %v2897_v38 = vpop.f32.mrf.mxu3 }
 0x1c8   :  { %v7492_v44 = vadd.f32 %v2897_v38, %v2248_v31  ;;  %v5527_v31 = vld [vmem:[%s10973_s0 + $0x1d8] sm:$0xf0] }
 0x1c9   :  { %11373 = vst [vmem:[#allocation52_spill] sm:$0xff] %v7479_v61 }
 0x1ca   :  { %11376 = vst [vmem:[#allocation55_spill] sm:$0xff] %v7492_v44 }
 0x1cb   :  { %v2650_v9 = vpop.f32.mrf.mxu1 }
 0x1ce   :  { %6379 = vmatmul.msk.bf16.gmra.mxu1 %vm1503_vm1, %v5522_v8  ;;  %v1996_v41 = vpop.f32.mrf.mxu0 }
 0x1cf   :  { %v7490_v62 = vadd.f32 %v2645_v47, %v1996_v41  ;;  %v5919_v47 = vld [vmem:[%s10973_s0 + $0x4e8] sm:$0xf0]  ;;  %v6537_v41 = vld [vmem:[%s10973_s0 + $0x1d4] sm:$0xf]  ;;  %v2900_v38 = vpop.f32.mrf.mxu3 }
 0x1d0   :  { %v5922_v49 = vor.u32 %v6635_v55, %v5919_v47  ;;  %v5530_v53 = vor.u32 %v6537_v41, %v5527_v31  ;;  %v5517_v55 = vld [vmem:[%s10973_s0 + $0x1c0] sm:$0xf]  ;;  %v5925_v31 = vld [vmem:[%s10973_s0 + $0x4f0] sm:$0xf] }
 0x1d1   :  { %11375 = vst [vmem:[#allocation54_spill] sm:$0xff] %v7490_v62  ;;  %2035 = vmatmul.bf16.gmra.mxu0 %v5510_v25  ;;  %v2251_v25 = vpop.f32.mrf.mxu2 }
 0x1d2   :  { %6429 = vmatmul.msk.bf16.gmra.mxu3 %vm1503_vm1, %v5922_v49  ;;  %v7521_v47 = vadd.f32 %v2900_v38, %v2251_v25  ;;  %v5518_v49 = vor.u32 %v6536_v7, %v5517_v55  ;;  %v6637_v25 = vld [vmem:[%s10973_s0 + $0x4f4] sm:$0xf]  ;;  %v5926_v38 = vor.u32 %v6638_v0, %v5925_v31  ;;  %v6539_v55 = vld [vmem:[%s10973_s0 + $0x1e4] sm:$0xf]  ;;  %v5535_v7 = vld [vmem:[%s10973_s0 + $0x1e8] sm:$0xf0] }
 0x1d3   :  { %v2652_v8 = vpop.f32.mrf.mxu1  ;;  %v5538_v31 = vor.u32 %v6539_v55, %v5535_v7  ;;  %v5933_v7 = vld [vmem:[%s10973_s0 + $0x500] sm:$0xf] }
 0x1d4   :  { %11378 = vst [vmem:[#allocation57_spill] sm:$0xff] %v7521_v47 }
 0x1d5   :  { %2295 = vmatmul.bf16.gmra.mxu2 %v5926_v38  ;;  %v6538_v38 = vld [vmem:[%s10973_s0 + $0x1d4] sm:$0xf0] }
 0x1d6   :  { %v1998_v19 = vpop.f32.mrf.mxu0 }
 0x1d7   :  { %v7513_v13 = vadd.f32 %v2647_v26, %v1998_v19  ;;  %v2902_v19 = vpop.f32.mrf.mxu3 }
 0x1d9   :  { %11377 = vst [vmem:[#allocation56_spill] sm:$0xff] %v7513_v13  ;;  %v2253_v60 = vpop.f32.mrf.mxu2 }
 0x1da   :  { %v7526_v41 = vadd.f32 %v2902_v19, %v2253_v60 }
 0x1db   :  { %v2655_v44 = vpop.f32.mrf.mxu1 }
 0x1dc   :  { %11380 = vst [vmem:[#allocation59_spill] sm:$0xff] %v7526_v41 }
 0x1de   :  { %6380 = vmatmul.msk.bf16.gmra.mxu1 %vm1503_vm1, %v5530_v53  ;;  %v2001_v20 = vpop.f32.mrf.mxu0 }
 0x1df   :  { %v7524_v26 = vadd.f32 %v2650_v9, %v2001_v20  ;;  %v5927_v9 = vld [vmem:[%s10973_s0 + $0x4f8] sm:$0xf0]  ;;  %v2905_v19 = vpop.f32.mrf.mxu3 }
 0x1e0   :  { %v5930_v20 = vor.u32 %v6637_v25, %v5927_v9  ;;  %v5525_v25 = vld [vmem:[%s10973_s0 + $0x1d0] sm:$0xf] }
 0x1e1   :  { %11379 = vst [vmem:[#allocation58_spill] sm:$0xff] %v7524_v26  ;;  %2040 = vmatmul.bf16.gmra.mxu0 %v5518_v49  ;;  %v2256_v49 = vpop.f32.mrf.mxu2 }
 0x1e2   :  { %6430 = vmatmul.msk.bf16.gmra.mxu3 %vm1503_vm1, %v5930_v20  ;;  %v7555_v9 = vadd.f32 %v2905_v19, %v2256_v49  ;;  %v5526_v20 = vor.u32 %v6538_v38, %v5525_v25  ;;  %v6639_v49 = vld [vmem:[%s10973_s0 + $0x504] sm:$0xf]  ;;  %v5934_v19 = vor.u32 %v6640_v1, %v5933_v7  ;;  %v6541_v25 = vld [vmem:[%s10973_s0 + $0x1f4] sm:$0xf]  ;;  %v5543_v38 = vld [vmem:[%s10973_s0 + $0x1f8] sm:$0xf0] }
 0x1e3   :  { %v2657_v60 = vpop.f32.mrf.mxu1  ;;  %v5546_v7 = vor.u32 %v6541_v25, %v5543_v38  ;;  %v5941_v38 = vld [vmem:[%s10973_s0 + $0x510] sm:$0xf] }
 0x1e4   :  { %11382 = vst [vmem:[#allocation61_spill] sm:$0xff] %v7555_v9 }
 0x1e5   :  { %2300 = vmatmul.bf16.gmra.mxu2 %v5934_v19  ;;  %v6540_v19 = vld [vmem:[%s10973_s0 + $0x1e4] sm:$0xf0] }
 0x1e6   :  { %v2003_v53 = vpop.f32.mrf.mxu0 }
 0x1e7   :  { %v7547_v0 = vadd.f32 %v2652_v8, %v2003_v53  ;;  %v2907_v53 = vpop.f32.mrf.mxu3 }
 0x1e9   :  { %11381 = vst [vmem:[#allocation60_spill] sm:$0xff] %v7547_v0  ;;  %v2258_v50 = vpop.f32.mrf.mxu2 }
 0x1ea   :  { %v7560_v55 = vadd.f32 %v2907_v53, %v2258_v50 }
 0x1eb   :  { %v2660_v41 = vpop.f32.mrf.mxu1 }
 0x1ec   :  { %11384 = vst [vmem:[#allocation63_spill] sm:$0xff] %v7560_v55 }
 0x1ee   :  { %6381 = vmatmul.msk.bf16.gmra.mxu1 %vm1503_vm1, %v5538_v31  ;;  %v2006_v47 = vpop.f32.mrf.mxu0 }
 0x1ef   :  { %v7558_v8 = vadd.f32 %v2655_v44, %v2006_v47  ;;  %v5935_v44 = vld [vmem:[%s10973_s0 + $0x508] sm:$0xf0]  ;;  %v2910_v53 = vpop.f32.mrf.mxu3 }
 0x1f0   :  { %v5938_v47 = vor.u32 %v6639_v49, %v5935_v44  ;;  %v5533_v49 = vld [vmem:[%s10973_s0 + $0x1e0] sm:$0xf] }
 0x1f1   :  { %11383 = vst [vmem:[#allocation62_spill] sm:$0xff] %v7558_v8  ;;  %2045 = vmatmul.bf16.gmra.mxu0 %v5526_v20  ;;  %v2261_v20 = vpop.f32.mrf.mxu2 }
 0x1f2   :  { %6431 = vmatmul.msk.bf16.gmra.mxu3 %vm1503_vm1, %v5938_v47  ;;  %v7589_v44 = vadd.f32 %v2910_v53, %v2261_v20  ;;  %v5534_v47 = vor.u32 %v6540_v19, %v5533_v49  ;;  %v6641_v20 = vld [vmem:[%s10973_s0 + $0x514] sm:$0xf]  ;;  %v5942_v53 = vor.u32 %v6642_v14, %v5941_v38  ;;  %v6543_v49 = vld [vmem:[%s10973_s0 + $0x204] sm:$0xf]  ;;  %v5551_v19 = vld [vmem:[%s10973_s0 + $0x208] sm:$0xf0] }
 0x1f3   :  { %v2662_v50 = vpop.f32.mrf.mxu1  ;;  %v5554_v38 = vor.u32 %v6543_v49, %v5551_v19  ;;  %v5949_v19 = vld [vmem:[%s10973_s0 + $0x520] sm:$0xf] }
 0x1f4   :  { %11386 = vst [vmem:[#allocation65_spill] sm:$0xff] %v7589_v44 }
 0x1f5   :  { %2305 = vmatmul.bf16.gmra.mxu2 %v5942_v53  ;;  %v6542_v53 = vld [vmem:[%s10973_s0 + $0x1f4] sm:$0xf0] }
 0x1f6   :  { %v2008_v31 = vpop.f32.mrf.mxu0 }
 0x1f7   :  { %v7581_v1 = vadd.f32 %v2657_v60, %v2008_v31  ;;  %v2912_v31 = vpop.f32.mrf.mxu3 }
 0x1f9   :  { %11385 = vst [vmem:[#allocation64_spill] sm:$0xff] %v7581_v1  ;;  %v2263_v54 = vpop.f32.mrf.mxu2 }
 0x1fa   :  { %v7594_v25 = vadd.f32 %v2912_v31, %v2263_v54 }
 0x1fb   :  { %v2665_v55 = vpop.f32.mrf.mxu1 }
 0x1fc   :  { %11388 = vst [vmem:[#allocation67_spill] sm:$0xff] %v7594_v25 }
 0x1fe   :  { %6382 = vmatmul.msk.bf16.gmra.mxu1 %vm1503_vm1, %v5546_v7  ;;  %v2011_v9 = vpop.f32.mrf.mxu0 }
 0x1ff   :  { %v7592_v60 = vadd.f32 %v2660_v41, %v2011_v9  ;;  %v5943_v41 = vld [vmem:[%s10973_s0 + $0x518] sm:$0xf0]  ;;  %v2915_v31 = vpop.f32.mrf.mxu3 }
 0x200   :  { %v5946_v9 = vor.u32 %v6641_v20, %v5943_v41  ;;  %v5541_v20 = vld [vmem:[%s10973_s0 + $0x1f0] sm:$0xf] }
 0x201   :  { %11387 = vst [vmem:[#allocation66_spill] sm:$0xff] %v7592_v60  ;;  %2050 = vmatmul.bf16.gmra.mxu0 %v5534_v47  ;;  %v2266_v47 = vpop.f32.mrf.mxu2  ;;  %v3455_v60 = vmul.f32 %v7004_v34, %v7004_v34 }
 0x202   :  { %6432 = vmatmul.msk.bf16.gmra.mxu3 %vm1503_vm1, %v5946_v9  ;;  %v7623_v41 = vadd.f32 %v2915_v31, %v2266_v47  ;;  %v5542_v9 = vor.u32 %v6542_v53, %v5541_v20  ;;  %v6643_v47 = vld [vmem:[%s10973_s0 + $0x524] sm:$0xf]  ;;  %v5950_v31 = vor.u32 %v6644_v35, %v5949_v19  ;;  %v6545_v20 = vld [vmem:[%s10973_s0 + $0x214] sm:$0xf]  ;;  %v5559_v53 = vld [vmem:[%s10973_s0 + $0x218] sm:$0xf0] }
 0x203   :  { %v2667_v54 = vpop.f32.mrf.mxu1  ;;  %v5562_v19 = vor.u32 %v6545_v20, %v5559_v53  ;;  %v5957_v53 = vld [vmem:[%s10973_s0 + $0x530] sm:$0xf] }
 0x204   :  { %11390 = vst [vmem:[#allocation69_spill] sm:$0xff] %v7623_v41 }
 0x205   :  { %2310 = vmatmul.bf16.gmra.mxu2 %v5950_v31  ;;  %v6544_v31 = vld [vmem:[%s10973_s0 + $0x204] sm:$0xf0] }
 0x206   :  { %v2013_v7 = vpop.f32.mrf.mxu0 }
 0x207   :  { %v7615_v14 = vadd.f32 %v2662_v50, %v2013_v7  ;;  %v2917_v7 = vpop.f32.mrf.mxu3 }
 0x209   :  { %11389 = vst [vmem:[#allocation68_spill] sm:$0xff] %v7615_v14  ;;  %v2268_v5 = vpop.f32.mrf.mxu2 }
 0x20a   :  { %v7628_v49 = vadd.f32 %v2917_v7, %v2268_v5 }
 0x20b   :  { %v2670_v25 = vpop.f32.mrf.mxu1 }
 0x20c   :  { %11392 = vst [vmem:[#allocation71_spill] sm:$0xff] %v7628_v49 }
 0x20e   :  { %6383 = vmatmul.msk.bf16.gmra.mxu1 %vm1503_vm1, %v5554_v38  ;;  %v2016_v44 = vpop.f32.mrf.mxu0 }
 0x20f   :  { %v7626_v50 = vadd.f32 %v2665_v55, %v2016_v44  ;;  %v5951_v55 = vld [vmem:[%s10973_s0 + $0x528] sm:$0xf0] }
 0x210   :  { %v5954_v44 = vor.u32 %v6643_v47, %v5951_v55  ;;  %v5549_v47 = vld [vmem:[%s10973_s0 + $0x200] sm:$0xf] }
 0x211   :  { %11391 = vst [vmem:[#allocation70_spill] sm:$0xff] %v7626_v50  ;;  %2055 = vmatmul.bf16.gmra.mxu0 %v5542_v9  ;;  %v2271_v9 = vpop.f32.mrf.mxu2 }
 0x212   :  { %6433 = vmatmul.msk.bf16.gmra.mxu3 %vm1503_vm1, %v5954_v44  ;;  %v5550_v44 = vor.u32 %v6544_v31, %v5549_v47  ;;  %v6547_v47 = vld [vmem:[%s10973_s0 + $0x224] sm:$0xf]  ;;  %v5567_v31 = vld [vmem:[%s10973_s0 + $0x228] sm:$0xf0] }
 0x213   :  { %v2672_v5 = vpop.f32.mrf.mxu1 }
 0x215   :  { %v2920_v7 = vpop.f32.mrf.mxu3 }
 0x216   :  { %v2018_v38 = vpop.f32.mrf.mxu0  ;;  %v7657_v55 = vadd.f32 %v2920_v7, %v2271_v9  ;;  %v6645_v9 = vld [vmem:[%s10973_s0 + $0x534] sm:$0xf] }
 0x217   :  { %v7649_v35 = vadd.f32 %v2667_v54, %v2018_v38 }
 0x218   :  { %11394 = vst [vmem:[#allocation73_spill] sm:$0xff] %v7657_v55 }
 0x219   :  { %11393 = vst [vmem:[#allocation72_spill] sm:$0xff] %v7649_v35  ;;  %v2273_v21 = vpop.f32.mrf.mxu2  ;;  %v6646_v35 = vld [vmem:[%s10973_s0 + $0x534] sm:$0xf0] }
 0x21a   :  { %v5958_v7 = vor.u32 %v6646_v35, %v5957_v53  ;;  %v5570_v53 = vor.u32 %v6547_v47, %v5567_v31  ;;  %v5965_v31 = vld [vmem:[%s10973_s0 + $0x540] sm:$0xf] }
 0x21b   :  { %v2675_v49 = vpop.f32.mrf.mxu1 }
 0x21c   :  { %2315 = vmatmul.bf16.gmra.mxu2 %v5958_v7  ;;  %v6546_v7 = vld [vmem:[%s10973_s0 + $0x214] sm:$0xf0] }
 0x21d   :  { %v2922_v38 = vpop.f32.mrf.mxu3 }
 0x21e   :  { %6384 = vmatmul.msk.bf16.gmra.mxu1 %vm1503_vm1, %v5562_v19  ;;  %v2021_v41 = vpop.f32.mrf.mxu0  ;;  %v7662_v20 = vadd.f32 %v2922_v38, %v2273_v21 }
 0x21f   :  { %v7660_v54 = vadd.f32 %v2670_v25, %v2021_v41  ;;  %v5959_v25 = vld [vmem:[%s10973_s0 + $0x538] sm:$0xf0] }
 0x220   :  { %11396 = vst [vmem:[#allocation75_spill] sm:$0xff] %v7662_v20  ;;  %v5962_v41 = vor.u32 %v6645_v9, %v5959_v25  ;;  %v5557_v9 = vld [vmem:[%s10973_s0 + $0x210] sm:$0xf] }
 0x221   :  { %11395 = vst [vmem:[#allocation74_spill] sm:$0xff] %v7660_v54  ;;  %2060 = vmatmul.bf16.gmra.mxu0 %v5550_v44  ;;  %v2276_v44 = vpop.f32.mrf.mxu2 }
 0x222   :  { %6434 = vmatmul.msk.bf16.gmra.mxu3 %vm1503_vm1, %v5962_v41  ;;  %v5558_v41 = vor.u32 %v6546_v7, %v5557_v9  ;;  %v6549_v9 = vld [vmem:[%s10973_s0 + $0x234] sm:$0xf]  ;;  %v5575_v7 = vld [vmem:[%s10973_s0 + $0x238] sm:$0xf0] }
 0x223   :  { %v2677_v21 = vpop.f32.mrf.mxu1 }
 0x225   :  { %v2925_v38 = vpop.f32.mrf.mxu3 }
 0x226   :  { %v2023_v19 = vpop.f32.mrf.mxu0  ;;  %v7691_v25 = vadd.f32 %v2925_v38, %v2276_v44  ;;  %v6647_v44 = vld [vmem:[%s10973_s0 + $0x544] sm:$0xf] }
 0x227   :  { %v7683_v35 = vadd.f32 %v2672_v5, %v2023_v19 }
 0x228   :  { %11398 = vst [vmem:[#allocation77_spill] sm:$0xff] %v7691_v25 }
 0x229   :  { %11397 = vst [vmem:[#allocation76_spill] sm:$0xff] %v7683_v35  ;;  %v2278_v54 = vpop.f32.mrf.mxu2  ;;  %v6648_v35 = vld [vmem:[%s10973_s0 + $0x544] sm:$0xf0] }
 0x22a   :  { %v5966_v38 = vor.u32 %v6648_v35, %v5965_v31  ;;  %v5578_v31 = vor.u32 %v6549_v9, %v5575_v7  ;;  %v5973_v7 = vld [vmem:[%s10973_s0 + $0x550] sm:$0xf] }
 0x22b   :  { %v2680_v20 = vpop.f32.mrf.mxu1 }
 0x22c   :  { %2320 = vmatmul.bf16.gmra.mxu2 %v5966_v38  ;;  %v6548_v38 = vld [vmem:[%s10973_s0 + $0x224] sm:$0xf0] }
 0x22d   :  { %v2927_v19 = vpop.f32.mrf.mxu3 }
 0x22e   :  { %6385 = vmatmul.msk.bf16.gmra.mxu1 %vm1503_vm1, %v5570_v53  ;;  %v2026_v55 = vpop.f32.mrf.mxu0  ;;  %v7696_v47 = vadd.f32 %v2927_v19, %v2278_v54 }
 0x22f   :  { %v7694_v5 = vadd.f32 %v2675_v49, %v2026_v55  ;;  %v5967_v49 = vld [vmem:[%s10973_s0 + $0x548] sm:$0xf0] }
 0x230   :  { %11400 = vst [vmem:[#allocation79_spill] sm:$0xff] %v7696_v47  ;;  %v5970_v54 = vor.u32 %v6647_v44, %v5967_v49  ;;  %v5565_v44 = vld [vmem:[%s10973_s0 + $0x220] sm:$0xf] }
 0x231   :  { %11399 = vst [vmem:[#allocation78_spill] sm:$0xff] %v7694_v5  ;;  %2065 = vmatmul.bf16.gmra.mxu0 %v5558_v41  ;;  %v2281_v41 = vpop.f32.mrf.mxu2 }
 0x232   :  { %6435 = vmatmul.msk.bf16.gmra.mxu3 %vm1503_vm1, %v5970_v54  ;;  %v5566_v54 = vor.u32 %v6548_v38, %v5565_v44  ;;  %v6551_v44 = vld [vmem:[%s10973_s0 + $0x244] sm:$0xf]  ;;  %v5583_v38 = vld [vmem:[%s10973_s0 + $0x248] sm:$0xf0] }
 0x233   :  { %v2682_v55 = vpop.f32.mrf.mxu1 }
 0x235   :  { %v2930_v19 = vpop.f32.mrf.mxu3 }
 0x236   :  { %v2028_v53 = vpop.f32.mrf.mxu0  ;;  %v7725_v49 = vadd.f32 %v2930_v19, %v2281_v41  ;;  %v6649_v41 = vld [vmem:[%s10973_s0 + $0x554] sm:$0xf] }
 0x237   :  { %v7717_v35 = vadd.f32 %v2677_v21, %v2028_v53 }
 0x238   :  { %11402 = vst [vmem:[#allocation81_spill] sm:$0xff] %v7725_v49 }
 0x239   :  { %11401 = vst [vmem:[#allocation80_spill] sm:$0xff] %v7717_v35  ;;  %v2283_v5 = vpop.f32.mrf.mxu2  ;;  %v6650_v35 = vld [vmem:[%s10973_s0 + $0x554] sm:$0xf0] }
 0x23a   :  { %v5974_v19 = vor.u32 %v6650_v35, %v5973_v7  ;;  %v5586_v7 = vor.u32 %v6551_v44, %v5583_v38  ;;  %v5981_v38 = vld [vmem:[%s10973_s0 + $0x560] sm:$0xf] }
 0x23b   :  { %v2685_v47 = vpop.f32.mrf.mxu1 }
 0x23c   :  { %2325 = vmatmul.bf16.gmra.mxu2 %v5974_v19  ;;  %v6550_v19 = vld [vmem:[%s10973_s0 + $0x234] sm:$0xf0] }
 0x23d   :  { %v2932_v53 = vpop.f32.mrf.mxu3 }
 0x23e   :  { %6386 = vmatmul.msk.bf16.gmra.mxu1 %vm1503_vm1, %v5578_v31  ;;  %v2031_v25 = vpop.f32.mrf.mxu0  ;;  %v7730_v9 = vadd.f32 %v2932_v53, %v2283_v5 }
 0x23f   :  { %v7728_v21 = vadd.f32 %v2680_v20, %v2031_v25  ;;  %v5975_v20 = vld [vmem:[%s10973_s0 + $0x558] sm:$0xf0] }
 0x240   :  { %11404 = vst [vmem:[#allocation83_spill] sm:$0xff] %v7730_v9  ;;  %v5978_v5 = vor.u32 %v6649_v41, %v5975_v20  ;;  %v5573_v41 = vld [vmem:[%s10973_s0 + $0x230] sm:$0xf] }
 0x241   :  { %11403 = vst [vmem:[#allocation82_spill] sm:$0xff] %v7728_v21  ;;  %2070 = vmatmul.bf16.gmra.mxu0 %v5566_v54  ;;  %v2286_v54 = vpop.f32.mrf.mxu2 }
 0x242   :  { %6436 = vmatmul.msk.bf16.gmra.mxu3 %vm1503_vm1, %v5978_v5  ;;  %v5574_v5 = vor.u32 %v6550_v19, %v5573_v41  ;;  %v6553_v41 = vld [vmem:[%s10973_s0 + $0x254] sm:$0xf]  ;;  %v5591_v19 = vld [vmem:[%s10973_s0 + $0x258] sm:$0xf0] }
 0x243   :  { %v2687_v25 = vpop.f32.mrf.mxu1 }
 0x245   :  { %v2935_v53 = vpop.f32.mrf.mxu3 }
 0x246   :  { %v2033_v31 = vpop.f32.mrf.mxu0  ;;  %v7759_v20 = vadd.f32 %v2935_v53, %v2286_v54  ;;  %v6651_v54 = vld [vmem:[%s10973_s0 + $0x564] sm:$0xf] }
 0x247   :  { %v7751_v35 = vadd.f32 %v2682_v55, %v2033_v31 }
 0x248   :  { %11406 = vst [vmem:[#allocation85_spill] sm:$0xff] %v7759_v20 }
 0x249   :  { %11405 = vst [vmem:[#allocation84_spill] sm:$0xff] %v7751_v35  ;;  %v2288_v21 = vpop.f32.mrf.mxu2  ;;  %v6652_v35 = vld [vmem:[%s10973_s0 + $0x564] sm:$0xf0] }
 0x24a   :  { %v5982_v53 = vor.u32 %v6652_v35, %v5981_v38  ;;  %v5594_v38 = vor.u32 %v6553_v41, %v5591_v19  ;;  %v5989_v19 = vld [vmem:[%s10973_s0 + $0x570] sm:$0xf] }
 0x24b   :  { %v2690_v9 = vpop.f32.mrf.mxu1 }
 0x24c   :  { %2330 = vmatmul.bf16.gmra.mxu2 %v5982_v53  ;;  %v6552_v53 = vld [vmem:[%s10973_s0 + $0x244] sm:$0xf0] }
 0x24d   :  { %v2937_v31 = vpop.f32.mrf.mxu3 }
 0x24e   :  { %6387 = vmatmul.msk.bf16.gmra.mxu1 %vm1503_vm1, %v5586_v7  ;;  %v2036_v49 = vpop.f32.mrf.mxu0  ;;  %v7764_v44 = vadd.f32 %v2937_v31, %v2288_v21 }
 0x24f   :  { %v7762_v55 = vadd.f32 %v2685_v47, %v2036_v49  ;;  %v5983_v47 = vld [vmem:[%s10973_s0 + $0x568] sm:$0xf0] }
 0x250   :  { %11408 = vst [vmem:[#allocation87_spill] sm:$0xff] %v7764_v44  ;;  %v5986_v21 = vor.u32 %v6651_v54, %v5983_v47  ;;  %v5581_v54 = vld [vmem:[%s10973_s0 + $0x240] sm:$0xf] }
 0x251   :  { %11407 = vst [vmem:[#allocation86_spill] sm:$0xff] %v7762_v55  ;;  %2075 = vmatmul.bf16.gmra.mxu0 %v5574_v5  ;;  %v2291_v5 = vpop.f32.mrf.mxu2 }
 0x252   :  { %6437 = vmatmul.msk.bf16.gmra.mxu3 %vm1503_vm1, %v5986_v21  ;;  %v5582_v21 = vor.u32 %v6552_v53, %v5581_v54  ;;  %v6555_v54 = vld [vmem:[%s10973_s0 + $0x264] sm:$0xf]  ;;  %v5599_v53 = vld [vmem:[%s10973_s0 + $0x268] sm:$0xf0] }
 0x253   :  { %v2692_v49 = vpop.f32.mrf.mxu1 }
 0x255   :  { %v2940_v31 = vpop.f32.mrf.mxu3 }
 0x256   :  { %v2038_v7 = vpop.f32.mrf.mxu0  ;;  %v7793_v47 = vadd.f32 %v2940_v31, %v2291_v5  ;;  %v6653_v5 = vld [vmem:[%s10973_s0 + $0x574] sm:$0xf] }
 0x257   :  { %v7785_v35 = vadd.f32 %v2687_v25, %v2038_v7 }
 0x258   :  { %11410 = vst [vmem:[#allocation89_spill] sm:$0xff] %v7793_v47 }
 0x259   :  { %11409 = vst [vmem:[#allocation88_spill] sm:$0xff] %v7785_v35  ;;  %v2293_v55 = vpop.f32.mrf.mxu2  ;;  %v6654_v35 = vld [vmem:[%s10973_s0 + $0x574] sm:$0xf0] }
 0x25a   :  { %v5990_v31 = vor.u32 %v6654_v35, %v5989_v19  ;;  %v5602_v19 = vor.u32 %v6555_v54, %v5599_v53  ;;  %v5997_v53 = vld [vmem:[%s10973_s0 + $0x580] sm:$0xf] }
 0x25b   :  { %v2695_v44 = vpop.f32.mrf.mxu1 }
 0x25c   :  { %2335 = vmatmul.bf16.gmra.mxu2 %v5990_v31  ;;  %v6554_v31 = vld [vmem:[%s10973_s0 + $0x254] sm:$0xf0] }
 0x25d   :  { %v2942_v7 = vpop.f32.mrf.mxu3 }
 0x25e   :  { %6388 = vmatmul.msk.bf16.gmra.mxu1 %vm1503_vm1, %v5594_v38  ;;  %v2041_v20 = vpop.f32.mrf.mxu0  ;;  %v7798_v41 = vadd.f32 %v2942_v7, %v2293_v55 }
 0x25f   :  { %v7796_v25 = vadd.f32 %v2690_v9, %v2041_v20  ;;  %v5991_v9 = vld [vmem:[%s10973_s0 + $0x578] sm:$0xf0] }
 0x260   :  { %11412 = vst [vmem:[#allocation91_spill] sm:$0xff] %v7798_v41  ;;  %v5994_v55 = vor.u32 %v6653_v5, %v5991_v9  ;;  %v5589_v5 = vld [vmem:[%s10973_s0 + $0x250] sm:$0xf] }
 0x261   :  { %11411 = vst [vmem:[#allocation90_spill] sm:$0xff] %v7796_v25  ;;  %2080 = vmatmul.bf16.gmra.mxu0 %v5582_v21  ;;  %v2296_v21 = vpop.f32.mrf.mxu2 }
 0x262   :  { %6438 = vmatmul.msk.bf16.gmra.mxu3 %vm1503_vm1, %v5994_v55  ;;  %v5590_v55 = vor.u32 %v6554_v31, %v5589_v5  ;;  %v6557_v5 = vld [vmem:[%s10973_s0 + $0x274] sm:$0xf]  ;;  %v5607_v31 = vld [vmem:[%s10973_s0 + $0x278] sm:$0xf0] }
 0x263   :  { %v2697_v20 = vpop.f32.mrf.mxu1 }
 0x265   :  { %v2945_v7 = vpop.f32.mrf.mxu3 }
 0x266   :  { %v2043_v38 = vpop.f32.mrf.mxu0  ;;  %v7827_v9 = vadd.f32 %v2945_v7, %v2296_v21  ;;  %v6655_v21 = vld [vmem:[%s10973_s0 + $0x584] sm:$0xf] }
 0x267   :  { %v7819_v35 = vadd.f32 %v2692_v49, %v2043_v38 }
 0x268   :  { %11414 = vst [vmem:[#allocation93_spill] sm:$0xff] %v7827_v9 }
 0x269   :  { %11413 = vst [vmem:[#allocation92_spill] sm:$0xff] %v7819_v35  ;;  %v2298_v25 = vpop.f32.mrf.mxu2  ;;  %v6656_v35 = vld [vmem:[%s10973_s0 + $0x584] sm:$0xf0] }
 0x26a   :  { %v5998_v7 = vor.u32 %v6656_v35, %v5997_v53  ;;  %v5610_v53 = vor.u32 %v6557_v5, %v5607_v31  ;;  %v6005_v31 = vld [vmem:[%s10973_s0 + $0x590] sm:$0xf] }
 0x26b   :  { %v2700_v41 = vpop.f32.mrf.mxu1 }
 0x26c   :  { %2340 = vmatmul.bf16.gmra.mxu2 %v5998_v7  ;;  %v6556_v7 = vld [vmem:[%s10973_s0 + $0x264] sm:$0xf0] }
 0x26d   :  { %v2947_v38 = vpop.f32.mrf.mxu3 }
 0x26e   :  { %6389 = vmatmul.msk.bf16.gmra.mxu1 %vm1503_vm1, %v5602_v19  ;;  %v2046_v47 = vpop.f32.mrf.mxu0  ;;  %v7832_v54 = vadd.f32 %v2947_v38, %v2298_v25 }
 0x26f   :  { %v7830_v49 = vadd.f32 %v2695_v44, %v2046_v47  ;;  %v5999_v44 = vld [vmem:[%s10973_s0 + $0x588] sm:$0xf0] }
 0x270   :  { %11416 = vst [vmem:[#allocation95_spill] sm:$0xff] %v7832_v54  ;;  %v6002_v25 = vor.u32 %v6655_v21, %v5999_v44  ;;  %v5597_v21 = vld [vmem:[%s10973_s0 + $0x260] sm:$0xf] }
 0x271   :  { %11415 = vst [vmem:[#allocation94_spill] sm:$0xff] %v7830_v49  ;;  %2085 = vmatmul.bf16.gmra.mxu0 %v5590_v55  ;;  %v2301_v55 = vpop.f32.mrf.mxu2 }
 0x272   :  { %6439 = vmatmul.msk.bf16.gmra.mxu3 %vm1503_vm1, %v6002_v25  ;;  %v5598_v25 = vor.u32 %v6556_v7, %v5597_v21  ;;  %v6559_v21 = vld [vmem:[%s10973_s0 + $0x284] sm:$0xf]  ;;  %v5615_v7 = vld [vmem:[%s10973_s0 + $0x288] sm:$0xf0] }
 0x273   :  { %v2702_v47 = vpop.f32.mrf.mxu1 }
 0x275   :  { %v2950_v38 = vpop.f32.mrf.mxu3 }
 0x276   :  { %v2048_v19 = vpop.f32.mrf.mxu0  ;;  %v7861_v44 = vadd.f32 %v2950_v38, %v2301_v55  ;;  %v6657_v55 = vld [vmem:[%s10973_s0 + $0x594] sm:$0xf] }
 0x277   :  { %v7853_v35 = vadd.f32 %v2697_v20, %v2048_v19 }
 0x278   :  { %11418 = vst [vmem:[#allocation97_spill] sm:$0xff] %v7861_v44 }
 0x279   :  { %11417 = vst [vmem:[#allocation96_spill] sm:$0xff] %v7853_v35  ;;  %v2303_v49 = vpop.f32.mrf.mxu2  ;;  %v6658_v35 = vld [vmem:[%s10973_s0 + $0x594] sm:$0xf0] }
 0x27a   :  { %v6006_v38 = vor.u32 %v6658_v35, %v6005_v31  ;;  %v5618_v31 = vor.u32 %v6559_v21, %v5615_v7  ;;  %v6013_v7 = vld [vmem:[%s10973_s0 + $0x5a0] sm:$0xf] }
 0x27b   :  { %v2705_v54 = vpop.f32.mrf.mxu1 }
 0x27c   :  { %2345 = vmatmul.bf16.gmra.mxu2 %v6006_v38  ;;  %v6558_v38 = vld [vmem:[%s10973_s0 + $0x274] sm:$0xf0] }
 0x27d   :  { %v2952_v19 = vpop.f32.mrf.mxu3 }
 0x27e   :  { %6390 = vmatmul.msk.bf16.gmra.mxu1 %vm1503_vm1, %v5610_v53  ;;  %v2051_v9 = vpop.f32.mrf.mxu0  ;;  %v7866_v5 = vadd.f32 %v2952_v19, %v2303_v49 }
 0x27f   :  { %v7864_v20 = vadd.f32 %v2700_v41, %v2051_v9  ;;  %v6007_v41 = vld [vmem:[%s10973_s0 + $0x598] sm:$0xf0] }
 0x280   :  { %11420 = vst [vmem:[#allocation99_spill] sm:$0xff] %v7866_v5  ;;  %v6010_v49 = vor.u32 %v6657_v55, %v6007_v41  ;;  %v5605_v55 = vld [vmem:[%s10973_s0 + $0x270] sm:$0xf] }
 0x281   :  { %11419 = vst [vmem:[#allocation98_spill] sm:$0xff] %v7864_v20  ;;  %2090 = vmatmul.bf16.gmra.mxu0 %v5598_v25  ;;  %v2306_v25 = vpop.f32.mrf.mxu2 }
 0x282   :  { %6440 = vmatmul.msk.bf16.gmra.mxu3 %vm1503_vm1, %v6010_v49  ;;  %v5606_v49 = vor.u32 %v6558_v38, %v5605_v55  ;;  %v6561_v55 = vld [vmem:[%s10973_s0 + $0x294] sm:$0xf]  ;;  %v5623_v38 = vld [vmem:[%s10973_s0 + $0x298] sm:$0xf0] }
 0x283   :  { %v2707_v9 = vpop.f32.mrf.mxu1 }
 0x285   :  { %v2955_v19 = vpop.f32.mrf.mxu3 }
 0x286   :  { %v2053_v53 = vpop.f32.mrf.mxu0  ;;  %v7895_v41 = vadd.f32 %v2955_v19, %v2306_v25  ;;  %v6659_v25 = vld [vmem:[%s10973_s0 + $0x5a4] sm:$0xf] }
 0x287   :  { %v7887_v35 = vadd.f32 %v2702_v47, %v2053_v53 }
 0x288   :  { %11422 = vst [vmem:[#allocation101_spill] sm:$0xff] %v7895_v41 }
 0x289   :  { %11421 = vst [vmem:[#allocation100_spill] sm:$0xff] %v7887_v35  ;;  %v2308_v20 = vpop.f32.mrf.mxu2  ;;  %v6660_v35 = vld [vmem:[%s10973_s0 + $0x5a4] sm:$0xf0] }
 0x28a   :  { %v6014_v19 = vor.u32 %v6660_v35, %v6013_v7  ;;  %v5626_v7 = vor.u32 %v6561_v55, %v5623_v38  ;;  %v6021_v38 = vld [vmem:[%s10973_s0 + $0x5b0] sm:$0xf] }
 0x28b   :  { %v2710_v5 = vpop.f32.mrf.mxu1 }
 0x28c   :  { %2350 = vmatmul.bf16.gmra.mxu2 %v6014_v19  ;;  %v6560_v19 = vld [vmem:[%s10973_s0 + $0x284] sm:$0xf0] }
 0x28d   :  { %v2957_v53 = vpop.f32.mrf.mxu3 }
 0x28e   :  { %6391 = vmatmul.msk.bf16.gmra.mxu1 %vm1503_vm1, %v5618_v31  ;;  %v2056_v44 = vpop.f32.mrf.mxu0  ;;  %v7900_v21 = vadd.f32 %v2957_v53, %v2308_v20 }
 0x28f   :  { %v7898_v47 = vadd.f32 %v2705_v54, %v2056_v44  ;;  %v6015_v54 = vld [vmem:[%s10973_s0 + $0x5a8] sm:$0xf0] }
 0x290   :  { %11424 = vst [vmem:[#allocation103_spill] sm:$0xff] %v7900_v21  ;;  %v6018_v20 = vor.u32 %v6659_v25, %v6015_v54  ;;  %v5613_v25 = vld [vmem:[%s10973_s0 + $0x280] sm:$0xf] }
 0x291   :  { %11423 = vst [vmem:[#allocation102_spill] sm:$0xff] %v7898_v47  ;;  %2095 = vmatmul.bf16.gmra.mxu0 %v5606_v49  ;;  %v2311_v49 = vpop.f32.mrf.mxu2 }
 0x292   :  { %6441 = vmatmul.msk.bf16.gmra.mxu3 %vm1503_vm1, %v6018_v20  ;;  %v5614_v20 = vor.u32 %v6560_v19, %v5613_v25  ;;  %v6563_v25 = vld [vmem:[%s10973_s0 + $0x2a4] sm:$0xf]  ;;  %v5631_v19 = vld [vmem:[%s10973_s0 + $0x2a8] sm:$0xf0] }
 0x293   :  { %v2712_v44 = vpop.f32.mrf.mxu1 }
 0x295   :  { %v2960_v53 = vpop.f32.mrf.mxu3 }
 0x296   :  { %v2058_v31 = vpop.f32.mrf.mxu0  ;;  %v7929_v54 = vadd.f32 %v2960_v53, %v2311_v49  ;;  %v6661_v49 = vld [vmem:[%s10973_s0 + $0x5b4] sm:$0xf] }
 0x297   :  { %v7921_v35 = vadd.f32 %v2707_v9, %v2058_v31 }
 0x298   :  { %11426 = vst [vmem:[#allocation105_spill] sm:$0xff] %v7929_v54 }
 0x299   :  { %11425 = vst [vmem:[#allocation104_spill] sm:$0xff] %v7921_v35  ;;  %v2313_v47 = vpop.f32.mrf.mxu2  ;;  %v6662_v35 = vld [vmem:[%s10973_s0 + $0x5b4] sm:$0xf0] }
 0x29a   :  { %v6022_v53 = vor.u32 %v6662_v35, %v6021_v38  ;;  %v5634_v38 = vor.u32 %v6563_v25, %v5631_v19  ;;  %v6029_v19 = vld [vmem:[%s10973_s0 + $0x5c0] sm:$0xf] }
 0x29b   :  { %v2715_v21 = vpop.f32.mrf.mxu1 }
 0x29c   :  { %2355 = vmatmul.bf16.gmra.mxu2 %v6022_v53  ;;  %v6562_v53 = vld [vmem:[%s10973_s0 + $0x294] sm:$0xf0] }
 0x29d   :  { %v2962_v31 = vpop.f32.mrf.mxu3 }
 0x29e   :  { %6392 = vmatmul.msk.bf16.gmra.mxu1 %vm1503_vm1, %v5626_v7  ;;  %v2061_v41 = vpop.f32.mrf.mxu0  ;;  %v7934_v55 = vadd.f32 %v2962_v31, %v2313_v47 }
 0x29f   :  { %v7932_v9 = vadd.f32 %v2710_v5, %v2061_v41  ;;  %v6023_v5 = vld [vmem:[%s10973_s0 + $0x5b8] sm:$0xf0] }
 0x2a0   :  { %11428 = vst [vmem:[#allocation107_spill] sm:$0xff] %v7934_v55  ;;  %v6026_v47 = vor.u32 %v6661_v49, %v6023_v5  ;;  %v5621_v49 = vld [vmem:[%s10973_s0 + $0x290] sm:$0xf] }
 0x2a1   :  { %11427 = vst [vmem:[#allocation106_spill] sm:$0xff] %v7932_v9  ;;  %2100 = vmatmul.bf16.gmra.mxu0 %v5614_v20  ;;  %v2316_v20 = vpop.f32.mrf.mxu2 }
 0x2a2   :  { %6442 = vmatmul.msk.bf16.gmra.mxu3 %vm1503_vm1, %v6026_v47  ;;  %v5622_v47 = vor.u32 %v6562_v53, %v5621_v49  ;;  %v6565_v49 = vld [vmem:[%s10973_s0 + $0x2b4] sm:$0xf]  ;;  %v5639_v53 = vld [vmem:[%s10973_s0 + $0x2b8] sm:$0xf0] }
 0x2a3   :  { %v2717_v41 = vpop.f32.mrf.mxu1 }
 0x2a5   :  { %v2965_v31 = vpop.f32.mrf.mxu3 }
 0x2a6   :  { %v2063_v7 = vpop.f32.mrf.mxu0  ;;  %v7963_v5 = vadd.f32 %v2965_v31, %v2316_v20  ;;  %v6663_v20 = vld [vmem:[%s10973_s0 + $0x5c4] sm:$0xf] }
 0x2a7   :  { %v7955_v35 = vadd.f32 %v2712_v44, %v2063_v7 }
 0x2a8   :  { %11430 = vst [vmem:[#allocation109_spill] sm:$0xff] %v7963_v5 }
 0x2a9   :  { %11429 = vst [vmem:[#allocation108_spill] sm:$0xff] %v7955_v35  ;;  %v2318_v9 = vpop.f32.mrf.mxu2  ;;  %v6664_v35 = vld [vmem:[%s10973_s0 + $0x5c4] sm:$0xf0] }
 0x2aa   :  { %v6030_v31 = vor.u32 %v6664_v35, %v6029_v19  ;;  %v5642_v19 = vor.u32 %v6565_v49, %v5639_v53  ;;  %v6037_v53 = vld [vmem:[%s10973_s0 + $0x5d0] sm:$0xf] }
 0x2ab   :  { %v2720_v55 = vpop.f32.mrf.mxu1 }
 0x2ac   :  { %2360 = vmatmul.bf16.gmra.mxu2 %v6030_v31  ;;  %v6564_v31 = vld [vmem:[%s10973_s0 + $0x2a4] sm:$0xf0] }
 0x2ad   :  { %v2967_v7 = vpop.f32.mrf.mxu3 }
 0x2ae   :  { %6393 = vmatmul.msk.bf16.gmra.mxu1 %vm1503_vm1, %v5634_v38  ;;  %v2066_v54 = vpop.f32.mrf.mxu0  ;;  %v7968_v25 = vadd.f32 %v2967_v7, %v2318_v9 }
 0x2af   :  { %v7966_v44 = vadd.f32 %v2715_v21, %v2066_v54  ;;  %v6031_v21 = vld [vmem:[%s10973_s0 + $0x5c8] sm:$0xf0] }
 0x2b0   :  { %11432 = vst [vmem:[#allocation111_spill] sm:$0xff] %v7968_v25  ;;  %v6034_v9 = vor.u32 %v6663_v20, %v6031_v21  ;;  %v5629_v20 = vld [vmem:[%s10973_s0 + $0x2a0] sm:$0xf] }
 0x2b1   :  { %11431 = vst [vmem:[#allocation110_spill] sm:$0xff] %v7966_v44  ;;  %2105 = vmatmul.bf16.gmra.mxu0 %v5622_v47  ;;  %v2321_v47 = vpop.f32.mrf.mxu2 }
 0x2b2   :  { %6443 = vmatmul.msk.bf16.gmra.mxu3 %vm1503_vm1, %v6034_v9  ;;  %v5630_v9 = vor.u32 %v6564_v31, %v5629_v20  ;;  %v6567_v20 = vld [vmem:[%s10973_s0 + $0x2c4] sm:$0xf]  ;;  %v5647_v31 = vld [vmem:[%s10973_s0 + $0x2c8] sm:$0xf0] }
 0x2b3   :  { %v2722_v54 = vpop.f32.mrf.mxu1 }
 0x2b5   :  { %v2970_v7 = vpop.f32.mrf.mxu3 }
 0x2b6   :  { %v2068_v38 = vpop.f32.mrf.mxu0  ;;  %v7997_v21 = vadd.f32 %v2970_v7, %v2321_v47  ;;  %v6665_v47 = vld [vmem:[%s10973_s0 + $0x5d4] sm:$0xf] }
 0x2b7   :  { %v7989_v35 = vadd.f32 %v2717_v41, %v2068_v38 }
 0x2b8   :  { %11434 = vst [vmem:[#allocation113_spill] sm:$0xff] %v7997_v21 }
 0x2b9   :  { %11433 = vst [vmem:[#allocation112_spill] sm:$0xff] %v7989_v35  ;;  %v2323_v44 = vpop.f32.mrf.mxu2  ;;  %v6666_v35 = vld [vmem:[%s10973_s0 + $0x5d4] sm:$0xf0] }
 0x2ba   :  { %v6038_v7 = vor.u32 %v6666_v35, %v6037_v53  ;;  %v5650_v53 = vor.u32 %v6567_v20, %v5647_v31  ;;  %v6045_v31 = vld [vmem:[%s10973_s0 + $0x5e0] sm:$0xf] }
 0x2bb   :  { %v2725_v25 = vpop.f32.mrf.mxu1 }
 0x2bc   :  { %2365 = vmatmul.bf16.gmra.mxu2 %v6038_v7  ;;  %v6566_v7 = vld [vmem:[%s10973_s0 + $0x2b4] sm:$0xf0] }
 0x2bd   :  { %v2972_v38 = vpop.f32.mrf.mxu3 }
 0x2be   :  { %6394 = vmatmul.msk.bf16.gmra.mxu1 %vm1503_vm1, %v5642_v19  ;;  %v2071_v5 = vpop.f32.mrf.mxu0  ;;  %v8002_v49 = vadd.f32 %v2972_v38, %v2323_v44 }
 0x2bf   :  { %v8000_v41 = vadd.f32 %v2720_v55, %v2071_v5  ;;  %v6039_v55 = vld [vmem:[%s10973_s0 + $0x5d8] sm:$0xf0] }
 0x2c0   :  { %11436 = vst [vmem:[#allocation115_spill] sm:$0xff] %v8002_v49  ;;  %v6042_v44 = vor.u32 %v6665_v47, %v6039_v55  ;;  %v5637_v47 = vld [vmem:[%s10973_s0 + $0x2b0] sm:$0xf] }
 0x2c1   :  { %11435 = vst [vmem:[#allocation114_spill] sm:$0xff] %v8000_v41  ;;  %2110 = vmatmul.bf16.gmra.mxu0 %v5630_v9  ;;  %v2326_v9 = vpop.f32.mrf.mxu2 }
 0x2c2   :  { %6444 = vmatmul.msk.bf16.gmra.mxu3 %vm1503_vm1, %v6042_v44  ;;  %v5638_v44 = vor.u32 %v6566_v7, %v5637_v47  ;;  %v6569_v47 = vld [vmem:[%s10973_s0 + $0x2d4] sm:$0xf]  ;;  %v5655_v7 = vld [vmem:[%s10973_s0 + $0x2d8] sm:$0xf0] }
 0x2c3   :  { %v2727_v5 = vpop.f32.mrf.mxu1 }
 0x2c5   :  { %v2975_v38 = vpop.f32.mrf.mxu3 }
 0x2c6   :  { %v2073_v19 = vpop.f32.mrf.mxu0  ;;  %v8031_v55 = vadd.f32 %v2975_v38, %v2326_v9  ;;  %v6667_v9 = vld [vmem:[%s10973_s0 + $0x5e4] sm:$0xf] }
 0x2c7   :  { %v8023_v35 = vadd.f32 %v2722_v54, %v2073_v19 }
 0x2c8   :  { %11438 = vst [vmem:[#allocation117_spill] sm:$0xff] %v8031_v55 }
 0x2c9   :  { %11437 = vst [vmem:[#allocation116_spill] sm:$0xff] %v8023_v35  ;;  %v2328_v41 = vpop.f32.mrf.mxu2  ;;  %v6668_v35 = vld [vmem:[%s10973_s0 + $0x5e4] sm:$0xf0] }
 0x2ca   :  { %v6046_v38 = vor.u32 %v6668_v35, %v6045_v31  ;;  %v5658_v31 = vor.u32 %v6569_v47, %v5655_v7  ;;  %v6053_v7 = vld [vmem:[%s10973_s0 + $0x5f0] sm:$0xf] }
 0x2cb   :  { %v2730_v49 = vpop.f32.mrf.mxu1 }
 0x2cc   :  { %2370 = vmatmul.bf16.gmra.mxu2 %v6046_v38  ;;  %v6568_v38 = vld [vmem:[%s10973_s0 + $0x2c4] sm:$0xf0] }
 0x2cd   :  { %v2977_v19 = vpop.f32.mrf.mxu3 }
 0x2ce   :  { %6395 = vmatmul.msk.bf16.gmra.mxu1 %vm1503_vm1, %v5650_v53  ;;  %v2076_v21 = vpop.f32.mrf.mxu0  ;;  %v8036_v20 = vadd.f32 %v2977_v19, %v2328_v41 }
 0x2cf   :  { %v8034_v54 = vadd.f32 %v2725_v25, %v2076_v21  ;;  %v6047_v25 = vld [vmem:[%s10973_s0 + $0x5e8] sm:$0xf0] }
 0x2d0   :  { %11440 = vst [vmem:[#allocation119_spill] sm:$0xff] %v8036_v20  ;;  %v6050_v41 = vor.u32 %v6667_v9, %v6047_v25  ;;  %v5645_v9 = vld [vmem:[%s10973_s0 + $0x2c0] sm:$0xf] }
 0x2d1   :  { %11439 = vst [vmem:[#allocation118_spill] sm:$0xff] %v8034_v54  ;;  %2115 = vmatmul.bf16.gmra.mxu0 %v5638_v44  ;;  %v2331_v44 = vpop.f32.mrf.mxu2 }
 0x2d2   :  { %6445 = vmatmul.msk.bf16.gmra.mxu3 %vm1503_vm1, %v6050_v41  ;;  %v5646_v41 = vor.u32 %v6568_v38, %v5645_v9  ;;  %v6571_v9 = vld [vmem:[%s10973_s0 + $0x2e4] sm:$0xf]  ;;  %v5663_v38 = vld [vmem:[%s10973_s0 + $0x2e8] sm:$0xf0] }
 0x2d3   :  { %v2732_v21 = vpop.f32.mrf.mxu1 }
 0x2d5   :  { %v2980_v19 = vpop.f32.mrf.mxu3 }
 0x2d6   :  { %v2078_v53 = vpop.f32.mrf.mxu0  ;;  %v8065_v25 = vadd.f32 %v2980_v19, %v2331_v44  ;;  %v6669_v44 = vld [vmem:[%s10973_s0 + $0x5f4] sm:$0xf] }
 0x2d7   :  { %v8057_v35 = vadd.f32 %v2727_v5, %v2078_v53 }
 0x2d8   :  { %11442 = vst [vmem:[#allocation121_spill] sm:$0xff] %v8065_v25 }
 0x2d9   :  { %11441 = vst [vmem:[#allocation120_spill] sm:$0xff] %v8057_v35  ;;  %v2333_v54 = vpop.f32.mrf.mxu2  ;;  %v6670_v35 = vld [vmem:[%s10973_s0 + $0x5f4] sm:$0xf0] }
 0x2da   :  { %v6054_v19 = vor.u32 %v6670_v35, %v6053_v7  ;;  %v5666_v7 = vor.u32 %v6571_v9, %v5663_v38  ;;  %v6061_v38 = vld [vmem:[%s10973_s0 + $0x600] sm:$0xf] }
 0x2db   :  { %v2735_v20 = vpop.f32.mrf.mxu1 }
 0x2dc   :  { %2375 = vmatmul.bf16.gmra.mxu2 %v6054_v19  ;;  %v6570_v19 = vld [vmem:[%s10973_s0 + $0x2d4] sm:$0xf0] }
 0x2dd   :  { %v2982_v53 = vpop.f32.mrf.mxu3 }
 0x2de   :  { %6396 = vmatmul.msk.bf16.gmra.mxu1 %vm1503_vm1, %v5658_v31  ;;  %v2081_v55 = vpop.f32.mrf.mxu0  ;;  %v8070_v47 = vadd.f32 %v2982_v53, %v2333_v54 }
 0x2df   :  { %v8068_v5 = vadd.f32 %v2730_v49, %v2081_v55  ;;  %v6055_v49 = vld [vmem:[%s10973_s0 + $0x5f8] sm:$0xf0] }
 0x2e0   :  { %11444 = vst [vmem:[#allocation123_spill] sm:$0xff] %v8070_v47  ;;  %v6058_v54 = vor.u32 %v6669_v44, %v6055_v49  ;;  %v5653_v44 = vld [vmem:[%s10973_s0 + $0x2d0] sm:$0xf] }
 0x2e1   :  { %11443 = vst [vmem:[#allocation122_spill] sm:$0xff] %v8068_v5  ;;  %2120 = vmatmul.bf16.gmra.mxu0 %v5646_v41  ;;  %v2336_v41 = vpop.f32.mrf.mxu2 }
 0x2e2   :  { %6446 = vmatmul.msk.bf16.gmra.mxu3 %vm1503_vm1, %v6058_v54  ;;  %v5654_v54 = vor.u32 %v6570_v19, %v5653_v44  ;;  %v6573_v44 = vld [vmem:[%s10973_s0 + $0x2f4] sm:$0xf]  ;;  %v5671_v19 = vld [vmem:[%s10973_s0 + $0x2f8] sm:$0xf0] }
 0x2e3   :  { %v2737_v55 = vpop.f32.mrf.mxu1 }
 0x2e5   :  { %v2985_v53 = vpop.f32.mrf.mxu3 }
 0x2e6   :  { %v2083_v31 = vpop.f32.mrf.mxu0  ;;  %v8099_v49 = vadd.f32 %v2985_v53, %v2336_v41  ;;  %v6671_v41 = vld [vmem:[%s10973_s0 + $0x604] sm:$0xf] }
 0x2e7   :  { %v8091_v35 = vadd.f32 %v2732_v21, %v2083_v31 }
 0x2e8   :  { %11446 = vst [vmem:[#allocation125_spill] sm:$0xff] %v8099_v49 }
 0x2e9   :  { %11445 = vst [vmem:[#allocation124_spill] sm:$0xff] %v8091_v35  ;;  %v2338_v5 = vpop.f32.mrf.mxu2  ;;  %v6672_v35 = vld [vmem:[%s10973_s0 + $0x604] sm:$0xf0] }
 0x2ea   :  { %v6062_v53 = vor.u32 %v6672_v35, %v6061_v38  ;;  %v5674_v38 = vor.u32 %v6573_v44, %v5671_v19  ;;  %v6069_v19 = vld [vmem:[%s10973_s0 + $0x610] sm:$0xf] }
 0x2eb   :  { %v2740_v47 = vpop.f32.mrf.mxu1 }
 0x2ec   :  { %2380 = vmatmul.bf16.gmra.mxu2 %v6062_v53  ;;  %v6572_v53 = vld [vmem:[%s10973_s0 + $0x2e4] sm:$0xf0] }
 0x2ed   :  { %v2987_v31 = vpop.f32.mrf.mxu3 }
 0x2ee   :  { %6397 = vmatmul.msk.bf16.gmra.mxu1 %vm1503_vm1, %v5666_v7  ;;  %v2086_v25 = vpop.f32.mrf.mxu0  ;;  %v8104_v9 = vadd.f32 %v2987_v31, %v2338_v5 }
 0x2ef   :  { %v8102_v21 = vadd.f32 %v2735_v20, %v2086_v25  ;;  %v6063_v20 = vld [vmem:[%s10973_s0 + $0x608] sm:$0xf0] }
 0x2f0   :  { %11448 = vst [vmem:[#allocation127_spill] sm:$0xff] %v8104_v9  ;;  %v6066_v5 = vor.u32 %v6671_v41, %v6063_v20  ;;  %v5661_v41 = vld [vmem:[%s10973_s0 + $0x2e0] sm:$0xf] }
 0x2f1   :  { %11447 = vst [vmem:[#allocation126_spill] sm:$0xff] %v8102_v21  ;;  %2125 = vmatmul.bf16.gmra.mxu0 %v5654_v54  ;;  %v2341_v54 = vpop.f32.mrf.mxu2 }
 0x2f2   :  { %6447 = vmatmul.msk.bf16.gmra.mxu3 %vm1503_vm1, %v6066_v5  ;;  %v5662_v5 = vor.u32 %v6572_v53, %v5661_v41  ;;  %v6575_v41 = vld [vmem:[%s10973_s0 + $0x304] sm:$0xf]  ;;  %v5679_v53 = vld [vmem:[%s10973_s0 + $0x308] sm:$0xf0] }
 0x2f3   :  { %v2742_v25 = vpop.f32.mrf.mxu1 }
 0x2f5   :  { %v2990_v31 = vpop.f32.mrf.mxu3 }
 0x2f6   :  { %v2088_v7 = vpop.f32.mrf.mxu0  ;;  %v8133_v20 = vadd.f32 %v2990_v31, %v2341_v54  ;;  %v6673_v54 = vld [vmem:[%s10973_s0 + $0x614] sm:$0xf] }
 0x2f7   :  { %v8125_v35 = vadd.f32 %v2737_v55, %v2088_v7 }
 0x2f8   :  { %11450 = vst [vmem:[#allocation129_spill] sm:$0xff] %v8133_v20 }
 0x2f9   :  { %11449 = vst [vmem:[#allocation128_spill] sm:$0xff] %v8125_v35  ;;  %v2343_v21 = vpop.f32.mrf.mxu2  ;;  %v6674_v35 = vld [vmem:[%s10973_s0 + $0x614] sm:$0xf0] }
 0x2fa   :  { %v6070_v31 = vor.u32 %v6674_v35, %v6069_v19  ;;  %v5682_v19 = vor.u32 %v6575_v41, %v5679_v53  ;;  %v6077_v53 = vld [vmem:[%s10973_s0 + $0x620] sm:$0xf] }
 0x2fb   :  { %v2745_v9 = vpop.f32.mrf.mxu1 }
 0x2fc   :  { %2385 = vmatmul.bf16.gmra.mxu2 %v6070_v31  ;;  %v6574_v31 = vld [vmem:[%s10973_s0 + $0x2f4] sm:$0xf0] }
 0x2fd   :  { %v2992_v7 = vpop.f32.mrf.mxu3 }
 0x2fe   :  { %6398 = vmatmul.msk.bf16.gmra.mxu1 %vm1503_vm1, %v5674_v38  ;;  %v2091_v49 = vpop.f32.mrf.mxu0  ;;  %v8138_v44 = vadd.f32 %v2992_v7, %v2343_v21 }
 0x2ff   :  { %v8136_v55 = vadd.f32 %v2740_v47, %v2091_v49  ;;  %v6071_v47 = vld [vmem:[%s10973_s0 + $0x618] sm:$0xf0] }
 0x300   :  { %11452 = vst [vmem:[#allocation131_spill] sm:$0xff] %v8138_v44  ;;  %v6074_v21 = vor.u32 %v6673_v54, %v6071_v47  ;;  %v5669_v54 = vld [vmem:[%s10973_s0 + $0x2f0] sm:$0xf] }
 0x301   :  { %11451 = vst [vmem:[#allocation130_spill] sm:$0xff] %v8136_v55  ;;  %2130 = vmatmul.bf16.gmra.mxu0 %v5662_v5  ;;  %v2346_v5 = vpop.f32.mrf.mxu2 }
 0x302   :  { %6448 = vmatmul.msk.bf16.gmra.mxu3 %vm1503_vm1, %v6074_v21  ;;  %v5670_v21 = vor.u32 %v6574_v31, %v5669_v54  ;;  %v6577_v54 = vld [vmem:[%s10973_s0 + $0x314] sm:$0xf]  ;;  %v5687_v31 = vld [vmem:[%s10973_s0 + $0x318] sm:$0xf0] }
 0x303   :  { %v2747_v49 = vpop.f32.mrf.mxu1 }
 0x305   :  { %v2995_v7 = vpop.f32.mrf.mxu3 }
 0x306   :  { %v2093_v38 = vpop.f32.mrf.mxu0  ;;  %v8167_v47 = vadd.f32 %v2995_v7, %v2346_v5  ;;  %v6675_v5 = vld [vmem:[%s10973_s0 + $0x624] sm:$0xf] }
 0x307   :  { %v8159_v35 = vadd.f32 %v2742_v25, %v2093_v38 }
 0x308   :  { %11454 = vst [vmem:[#allocation133_spill] sm:$0xff] %v8167_v47 }
 0x309   :  { %11453 = vst [vmem:[#allocation132_spill] sm:$0xff] %v8159_v35  ;;  %v2348_v55 = vpop.f32.mrf.mxu2  ;;  %v6676_v35 = vld [vmem:[%s10973_s0 + $0x624] sm:$0xf0] }
 0x30a   :  { %v6078_v7 = vor.u32 %v6676_v35, %v6077_v53  ;;  %v5690_v53 = vor.u32 %v6577_v54, %v5687_v31  ;;  %v6085_v31 = vld [vmem:[%s10973_s0 + $0x630] sm:$0xf] }
 0x30b   :  { %v2750_v44 = vpop.f32.mrf.mxu1 }
 0x30c   :  { %2390 = vmatmul.bf16.gmra.mxu2 %v6078_v7  ;;  %v6576_v7 = vld [vmem:[%s10973_s0 + $0x304] sm:$0xf0] }
 0x30d   :  { %v2997_v38 = vpop.f32.mrf.mxu3 }
 0x30e   :  { %6399 = vmatmul.msk.bf16.gmra.mxu1 %vm1503_vm1, %v5682_v19  ;;  %v2096_v20 = vpop.f32.mrf.mxu0  ;;  %v8172_v41 = vadd.f32 %v2997_v38, %v2348_v55 }
 0x30f   :  { %v8170_v25 = vadd.f32 %v2745_v9, %v2096_v20  ;;  %v6079_v9 = vld [vmem:[%s10973_s0 + $0x628] sm:$0xf0] }
 0x310   :  { %11456 = vst [vmem:[#allocation135_spill] sm:$0xff] %v8172_v41  ;;  %v6082_v55 = vor.u32 %v6675_v5, %v6079_v9  ;;  %v5677_v5 = vld [vmem:[%s10973_s0 + $0x300] sm:$0xf] }
 0x311   :  { %11455 = vst [vmem:[#allocation134_spill] sm:$0xff] %v8170_v25  ;;  %2135 = vmatmul.bf16.gmra.mxu0 %v5670_v21  ;;  %v2351_v21 = vpop.f32.mrf.mxu2 }
 0x312   :  { %6449 = vmatmul.msk.bf16.gmra.mxu3 %vm1503_vm1, %v6082_v55  ;;  %v5678_v55 = vor.u32 %v6576_v7, %v5677_v5  ;;  %v6579_v5 = vld [vmem:[%s10973_s0 + $0x324] sm:$0xf]  ;;  %v5695_v7 = vld [vmem:[%s10973_s0 + $0x328] sm:$0xf0] }
 0x313   :  { %v2752_v20 = vpop.f32.mrf.mxu1 }
 0x315   :  { %v3000_v38 = vpop.f32.mrf.mxu3 }
 0x316   :  { %v2098_v19 = vpop.f32.mrf.mxu0  ;;  %v8201_v9 = vadd.f32 %v3000_v38, %v2351_v21  ;;  %v6677_v21 = vld [vmem:[%s10973_s0 + $0x634] sm:$0xf] }
 0x317   :  { %v8193_v35 = vadd.f32 %v2747_v49, %v2098_v19 }
 0x318   :  { %11458 = vst [vmem:[#allocation137_spill] sm:$0xff] %v8201_v9 }
 0x319   :  { %11457 = vst [vmem:[#allocation136_spill] sm:$0xff] %v8193_v35  ;;  %v2353_v25 = vpop.f32.mrf.mxu2  ;;  %v6678_v35 = vld [vmem:[%s10973_s0 + $0x634] sm:$0xf0] }
 0x31a   :  { %v6086_v38 = vor.u32 %v6678_v35, %v6085_v31  ;;  %v5698_v31 = vor.u32 %v6579_v5, %v5695_v7  ;;  %v6093_v7 = vld [vmem:[%s10973_s0 + $0x640] sm:$0xf] }
 0x31b   :  { %v2755_v41 = vpop.f32.mrf.mxu1 }
 0x31c   :  { %2395 = vmatmul.bf16.gmra.mxu2 %v6086_v38  ;;  %v6578_v38 = vld [vmem:[%s10973_s0 + $0x314] sm:$0xf0] }
 0x31d   :  { %v3002_v19 = vpop.f32.mrf.mxu3 }
 0x31e   :  { %6400 = vmatmul.msk.bf16.gmra.mxu1 %vm1503_vm1, %v5690_v53  ;;  %v2101_v47 = vpop.f32.mrf.mxu0  ;;  %v8206_v54 = vadd.f32 %v3002_v19, %v2353_v25 }
 0x31f   :  { %v8204_v49 = vadd.f32 %v2750_v44, %v2101_v47  ;;  %v6087_v44 = vld [vmem:[%s10973_s0 + $0x638] sm:$0xf0] }
 0x320   :  { %11460 = vst [vmem:[#allocation139_spill] sm:$0xff] %v8206_v54  ;;  %v6090_v25 = vor.u32 %v6677_v21, %v6087_v44  ;;  %v5685_v21 = vld [vmem:[%s10973_s0 + $0x310] sm:$0xf] }
 0x321   :  { %11459 = vst [vmem:[#allocation138_spill] sm:$0xff] %v8204_v49  ;;  %2140 = vmatmul.bf16.gmra.mxu0 %v5678_v55  ;;  %v2356_v55 = vpop.f32.mrf.mxu2 }
 0x322   :  { %6450 = vmatmul.msk.bf16.gmra.mxu3 %vm1503_vm1, %v6090_v25  ;;  %v5686_v25 = vor.u32 %v6578_v38, %v5685_v21  ;;  %v6581_v21 = vld [vmem:[%s10973_s0 + $0x334] sm:$0xf]  ;;  %v5703_v38 = vld [vmem:[%s10973_s0 + $0x338] sm:$0xf0] }
 0x323   :  { %v2757_v47 = vpop.f32.mrf.mxu1 }
 0x325   :  { %v3005_v19 = vpop.f32.mrf.mxu3 }
 0x326   :  { %v2103_v53 = vpop.f32.mrf.mxu0  ;;  %v8235_v44 = vadd.f32 %v3005_v19, %v2356_v55  ;;  %v6679_v55 = vld [vmem:[%s10973_s0 + $0x644] sm:$0xf] }
 0x327   :  { %v8227_v35 = vadd.f32 %v2752_v20, %v2103_v53 }
 0x328   :  { %11462 = vst [vmem:[#allocation141_spill] sm:$0xff] %v8235_v44 }
 0x329   :  { %11461 = vst [vmem:[#allocation140_spill] sm:$0xff] %v8227_v35  ;;  %v2358_v49 = vpop.f32.mrf.mxu2  ;;  %v6680_v35 = vld [vmem:[%s10973_s0 + $0x644] sm:$0xf0] }
 0x32a   :  { %v6094_v19 = vor.u32 %v6680_v35, %v6093_v7  ;;  %v5706_v7 = vor.u32 %v6581_v21, %v5703_v38  ;;  %v6101_v38 = vld [vmem:[%s10973_s0 + $0x650] sm:$0xf] }
 0x32b   :  { %v2760_v54 = vpop.f32.mrf.mxu1 }
 0x32c   :  { %2400 = vmatmul.bf16.gmra.mxu2 %v6094_v19  ;;  %v6580_v19 = vld [vmem:[%s10973_s0 + $0x324] sm:$0xf0] }
 0x32d   :  { %v3007_v53 = vpop.f32.mrf.mxu3 }
 0x32e   :  { %6401 = vmatmul.msk.bf16.gmra.mxu1 %vm1503_vm1, %v5698_v31  ;;  %v2106_v9 = vpop.f32.mrf.mxu0  ;;  %v8240_v5 = vadd.f32 %v3007_v53, %v2358_v49 }
 0x32f   :  { %v8238_v20 = vadd.f32 %v2755_v41, %v2106_v9  ;;  %v6095_v41 = vld [vmem:[%s10973_s0 + $0x648] sm:$0xf0] }
 0x330   :  { %11464 = vst [vmem:[#allocation143_spill] sm:$0xff] %v8240_v5  ;;  %v6098_v49 = vor.u32 %v6679_v55, %v6095_v41  ;;  %v5693_v55 = vld [vmem:[%s10973_s0 + $0x320] sm:$0xf] }
 0x331   :  { %11463 = vst [vmem:[#allocation142_spill] sm:$0xff] %v8238_v20  ;;  %2145 = vmatmul.bf16.gmra.mxu0 %v5686_v25  ;;  %v2361_v25 = vpop.f32.mrf.mxu2 }
 0x332   :  { %6451 = vmatmul.msk.bf16.gmra.mxu3 %vm1503_vm1, %v6098_v49  ;;  %v5694_v49 = vor.u32 %v6580_v19, %v5693_v55  ;;  %v6583_v55 = vld [vmem:[%s10973_s0 + $0x344] sm:$0xf]  ;;  %v5711_v19 = vld [vmem:[%s10973_s0 + $0x348] sm:$0xf0] }
 0x333   :  { %v2762_v9 = vpop.f32.mrf.mxu1 }
 0x335   :  { %v3010_v53 = vpop.f32.mrf.mxu3 }
 0x336   :  { %v2108_v31 = vpop.f32.mrf.mxu0  ;;  %v8269_v41 = vadd.f32 %v3010_v53, %v2361_v25  ;;  %v6681_v25 = vld [vmem:[%s10973_s0 + $0x654] sm:$0xf] }
 0x337   :  { %v8261_v35 = vadd.f32 %v2757_v47, %v2108_v31 }
 0x338   :  { %11466 = vst [vmem:[#allocation145_spill] sm:$0xff] %v8269_v41 }
 0x339   :  { %11465 = vst [vmem:[#allocation144_spill] sm:$0xff] %v8261_v35  ;;  %v2363_v20 = vpop.f32.mrf.mxu2  ;;  %v6682_v35 = vld [vmem:[%s10973_s0 + $0x654] sm:$0xf0] }
 0x33a   :  { %v6102_v53 = vor.u32 %v6682_v35, %v6101_v38  ;;  %v5714_v38 = vor.u32 %v6583_v55, %v5711_v19  ;;  %v6109_v19 = vld [vmem:[%s10973_s0 + $0x660] sm:$0xf] }
 0x33b   :  { %v2765_v5 = vpop.f32.mrf.mxu1 }
 0x33c   :  { %2405 = vmatmul.bf16.gmra.mxu2 %v6102_v53  ;;  %v6582_v53 = vld [vmem:[%s10973_s0 + $0x334] sm:$0xf0] }
 0x33d   :  { %v3012_v31 = vpop.f32.mrf.mxu3 }
 0x33e   :  { %6402 = vmatmul.msk.bf16.gmra.mxu1 %vm1503_vm1, %v5706_v7  ;;  %v2111_v44 = vpop.f32.mrf.mxu0  ;;  %v8274_v21 = vadd.f32 %v3012_v31, %v2363_v20 }
 0x33f   :  { %v8272_v47 = vadd.f32 %v2760_v54, %v2111_v44  ;;  %v6103_v54 = vld [vmem:[%s10973_s0 + $0x658] sm:$0xf0] }
 0x340   :  { %11468 = vst [vmem:[#allocation147_spill] sm:$0xff] %v8274_v21  ;;  %v6106_v20 = vor.u32 %v6681_v25, %v6103_v54  ;;  %v5701_v25 = vld [vmem:[%s10973_s0 + $0x330] sm:$0xf] }
 0x341   :  { %11467 = vst [vmem:[#allocation146_spill] sm:$0xff] %v8272_v47  ;;  %2150 = vmatmul.bf16.gmra.mxu0 %v5694_v49  ;;  %v2366_v49 = vpop.f32.mrf.mxu2 }
 0x342   :  { %6452 = vmatmul.msk.bf16.gmra.mxu3 %vm1503_vm1, %v6106_v20  ;;  %v5702_v20 = vor.u32 %v6582_v53, %v5701_v25  ;;  %v6585_v25 = vld [vmem:[%s10973_s0 + $0x354] sm:$0xf]  ;;  %v5719_v53 = vld [vmem:[%s10973_s0 + $0x358] sm:$0xf0] }
 0x343   :  { %v2767_v44 = vpop.f32.mrf.mxu1 }
 0x345   :  { %v3015_v31 = vpop.f32.mrf.mxu3 }
 0x346   :  { %v2113_v7 = vpop.f32.mrf.mxu0  ;;  %v8303_v54 = vadd.f32 %v3015_v31, %v2366_v49  ;;  %v6683_v49 = vld [vmem:[%s10973_s0 + $0x664] sm:$0xf] }
 0x347   :  { %v8295_v35 = vadd.f32 %v2762_v9, %v2113_v7 }
 0x348   :  { %11470 = vst [vmem:[#allocation149_spill] sm:$0xff] %v8303_v54 }
 0x349   :  { %11469 = vst [vmem:[#allocation148_spill] sm:$0xff] %v8295_v35  ;;  %v2368_v47 = vpop.f32.mrf.mxu2  ;;  %v6684_v35 = vld [vmem:[%s10973_s0 + $0x664] sm:$0xf0] }
 0x34a   :  { %v6110_v31 = vor.u32 %v6684_v35, %v6109_v19  ;;  %v5722_v19 = vor.u32 %v6585_v25, %v5719_v53  ;;  %v6117_v53 = vld [vmem:[%s10973_s0 + $0x670] sm:$0xf] }
 0x34b   :  { %v2770_v21 = vpop.f32.mrf.mxu1 }
 0x34c   :  { %2410 = vmatmul.bf16.gmra.mxu2 %v6110_v31  ;;  %v6584_v31 = vld [vmem:[%s10973_s0 + $0x344] sm:$0xf0] }
 0x34d   :  { %v3017_v7 = vpop.f32.mrf.mxu3 }
 0x34e   :  { %6403 = vmatmul.msk.bf16.gmra.mxu1 %vm1503_vm1, %v5714_v38  ;;  %v2116_v41 = vpop.f32.mrf.mxu0  ;;  %v8308_v55 = vadd.f32 %v3017_v7, %v2368_v47 }
 0x34f   :  { %v8306_v9 = vadd.f32 %v2765_v5, %v2116_v41  ;;  %v6111_v5 = vld [vmem:[%s10973_s0 + $0x668] sm:$0xf0] }
 0x350   :  { %11472 = vst [vmem:[#allocation151_spill] sm:$0xff] %v8308_v55  ;;  %v6114_v47 = vor.u32 %v6683_v49, %v6111_v5  ;;  %v5709_v49 = vld [vmem:[%s10973_s0 + $0x340] sm:$0xf] }
 0x351   :  { %11471 = vst [vmem:[#allocation150_spill] sm:$0xff] %v8306_v9  ;;  %2155 = vmatmul.bf16.gmra.mxu0 %v5702_v20  ;;  %v2371_v20 = vpop.f32.mrf.mxu2 }
 0x352   :  { %6453 = vmatmul.msk.bf16.gmra.mxu3 %vm1503_vm1, %v6114_v47  ;;  %v5710_v47 = vor.u32 %v6584_v31, %v5709_v49  ;;  %v6587_v49 = vld [vmem:[%s10973_s0 + $0x364] sm:$0xf]  ;;  %v5727_v31 = vld [vmem:[%s10973_s0 + $0x368] sm:$0xf0] }
 0x353   :  { %v2772_v41 = vpop.f32.mrf.mxu1 }
 0x355   :  { %v3020_v7 = vpop.f32.mrf.mxu3 }
 0x356   :  { %v2118_v38 = vpop.f32.mrf.mxu0  ;;  %v8337_v5 = vadd.f32 %v3020_v7, %v2371_v20  ;;  %v6685_v20 = vld [vmem:[%s10973_s0 + $0x674] sm:$0xf] }
 0x357   :  { %v8329_v35 = vadd.f32 %v2767_v44, %v2118_v38 }
 0x358   :  { %11474 = vst [vmem:[#allocation153_spill] sm:$0xff] %v8337_v5 }
 0x359   :  { %11473 = vst [vmem:[#allocation152_spill] sm:$0xff] %v8329_v35  ;;  %v2373_v9 = vpop.f32.mrf.mxu2  ;;  %v6686_v35 = vld [vmem:[%s10973_s0 + $0x674] sm:$0xf0] }
 0x35a   :  { %v6118_v7 = vor.u32 %v6686_v35, %v6117_v53  ;;  %v5730_v53 = vor.u32 %v6587_v49, %v5727_v31  ;;  %v6125_v31 = vld [vmem:[%s10973_s0 + $0x680] sm:$0xf] }
 0x35b   :  { %v2775_v55 = vpop.f32.mrf.mxu1 }
 0x35c   :  { %2415 = vmatmul.bf16.gmra.mxu2 %v6118_v7  ;;  %v6586_v7 = vld [vmem:[%s10973_s0 + $0x354] sm:$0xf0] }
 0x35d   :  { %v3022_v38 = vpop.f32.mrf.mxu3 }
 0x35e   :  { %6404 = vmatmul.msk.bf16.gmra.mxu1 %vm1503_vm1, %v5722_v19  ;;  %v2121_v54 = vpop.f32.mrf.mxu0  ;;  %v8342_v25 = vadd.f32 %v3022_v38, %v2373_v9 }
 0x35f   :  { %v8340_v44 = vadd.f32 %v2770_v21, %v2121_v54  ;;  %v6119_v21 = vld [vmem:[%s10973_s0 + $0x678] sm:$0xf0] }
 0x360   :  { %11476 = vst [vmem:[#allocation155_spill] sm:$0xff] %v8342_v25  ;;  %v6122_v9 = vor.u32 %v6685_v20, %v6119_v21  ;;  %v5717_v20 = vld [vmem:[%s10973_s0 + $0x350] sm:$0xf] }
 0x361   :  { %11475 = vst [vmem:[#allocation154_spill] sm:$0xff] %v8340_v44  ;;  %2160 = vmatmul.bf16.gmra.mxu0 %v5710_v47  ;;  %v2376_v47 = vpop.f32.mrf.mxu2 }
 0x362   :  { %6454 = vmatmul.msk.bf16.gmra.mxu3 %vm1503_vm1, %v6122_v9  ;;  %v5718_v9 = vor.u32 %v6586_v7, %v5717_v20  ;;  %v6589_v20 = vld [vmem:[%s10973_s0 + $0x374] sm:$0xf]  ;;  %v5735_v7 = vld [vmem:[%s10973_s0 + $0x378] sm:$0xf0] }
 0x363   :  { %v2777_v54 = vpop.f32.mrf.mxu1 }
 0x365   :  { %v3025_v38 = vpop.f32.mrf.mxu3 }
 0x366   :  { %v2123_v19 = vpop.f32.mrf.mxu0  ;;  %v8371_v21 = vadd.f32 %v3025_v38, %v2376_v47  ;;  %v6687_v47 = vld [vmem:[%s10973_s0 + $0x684] sm:$0xf] }
 0x367   :  { %v8363_v35 = vadd.f32 %v2772_v41, %v2123_v19 }
 0x368   :  { %11478 = vst [vmem:[#allocation157_spill] sm:$0xff] %v8371_v21 }
 0x369   :  { %11477 = vst [vmem:[#allocation156_spill] sm:$0xff] %v8363_v35  ;;  %v2378_v44 = vpop.f32.mrf.mxu2  ;;  %v6688_v35 = vld [vmem:[%s10973_s0 + $0x684] sm:$0xf0] }
 0x36a   :  { %v6126_v38 = vor.u32 %v6688_v35, %v6125_v31  ;;  %v5738_v31 = vor.u32 %v6589_v20, %v5735_v7  ;;  %v6133_v7 = vld [vmem:[%s10973_s0 + $0x690] sm:$0xf] }
 0x36b   :  { %v2780_v25 = vpop.f32.mrf.mxu1 }
 0x36c   :  { %2420 = vmatmul.bf16.gmra.mxu2 %v6126_v38  ;;  %v6588_v38 = vld [vmem:[%s10973_s0 + $0x364] sm:$0xf0] }
 0x36d   :  { %v3027_v19 = vpop.f32.mrf.mxu3 }
 0x36e   :  { %6405 = vmatmul.msk.bf16.gmra.mxu1 %vm1503_vm1, %v5730_v53  ;;  %v2126_v5 = vpop.f32.mrf.mxu0  ;;  %v8376_v49 = vadd.f32 %v3027_v19, %v2378_v44 }
 0x36f   :  { %v8374_v41 = vadd.f32 %v2775_v55, %v2126_v5  ;;  %v6127_v55 = vld [vmem:[%s10973_s0 + $0x688] sm:$0xf0] }
 0x370   :  { %11480 = vst [vmem:[#allocation159_spill] sm:$0xff] %v8376_v49  ;;  %v6130_v44 = vor.u32 %v6687_v47, %v6127_v55  ;;  %v5725_v47 = vld [vmem:[%s10973_s0 + $0x360] sm:$0xf] }
 0x371   :  { %11479 = vst [vmem:[#allocation158_spill] sm:$0xff] %v8374_v41  ;;  %2165 = vmatmul.bf16.gmra.mxu0 %v5718_v9  ;;  %v2381_v9 = vpop.f32.mrf.mxu2 }
 0x372   :  { %6455 = vmatmul.msk.bf16.gmra.mxu3 %vm1503_vm1, %v6130_v44  ;;  %v5726_v44 = vor.u32 %v6588_v38, %v5725_v47  ;;  %v6591_v47 = vld [vmem:[%s10973_s0 + $0x384] sm:$0xf]  ;;  %v5743_v38 = vld [vmem:[%s10973_s0 + $0x388] sm:$0xf0] }
 0x373   :  { %v2782_v5 = vpop.f32.mrf.mxu1 }
 0x375   :  { %v3030_v19 = vpop.f32.mrf.mxu3 }
 0x376   :  { %v2128_v53 = vpop.f32.mrf.mxu0  ;;  %v8405_v55 = vadd.f32 %v3030_v19, %v2381_v9  ;;  %v6689_v9 = vld [vmem:[%s10973_s0 + $0x694] sm:$0xf] }
 0x377   :  { %v8397_v35 = vadd.f32 %v2777_v54, %v2128_v53 }
 0x378   :  { %11482 = vst [vmem:[#allocation161_spill] sm:$0xff] %v8405_v55 }
 0x379   :  { %11481 = vst [vmem:[#allocation160_spill] sm:$0xff] %v8397_v35  ;;  %v2383_v41 = vpop.f32.mrf.mxu2  ;;  %v6690_v35 = vld [vmem:[%s10973_s0 + $0x694] sm:$0xf0] }
 0x37a   :  { %v6134_v19 = vor.u32 %v6690_v35, %v6133_v7  ;;  %v5746_v7 = vor.u32 %v6591_v47, %v5743_v38  ;;  %v6141_v38 = vld [vmem:[%s10973_s0 + $0x6a0] sm:$0xf] }
 0x37b   :  { %v2785_v49 = vpop.f32.mrf.mxu1 }
 0x37c   :  { %2425 = vmatmul.bf16.gmra.mxu2 %v6134_v19  ;;  %v6590_v19 = vld [vmem:[%s10973_s0 + $0x374] sm:$0xf0] }
 0x37d   :  { %v3032_v53 = vpop.f32.mrf.mxu3 }
 0x37e   :  { %6406 = vmatmul.msk.bf16.gmra.mxu1 %vm1503_vm1, %v5738_v31  ;;  %v2131_v21 = vpop.f32.mrf.mxu0  ;;  %v8410_v20 = vadd.f32 %v3032_v53, %v2383_v41 }
 0x37f   :  { %v8408_v54 = vadd.f32 %v2780_v25, %v2131_v21  ;;  %v6135_v25 = vld [vmem:[%s10973_s0 + $0x698] sm:$0xf0] }
 0x380   :  { %11484 = vst [vmem:[#allocation163_spill] sm:$0xff] %v8410_v20  ;;  %v6138_v41 = vor.u32 %v6689_v9, %v6135_v25  ;;  %v5733_v9 = vld [vmem:[%s10973_s0 + $0x370] sm:$0xf] }
 0x381   :  { %11483 = vst [vmem:[#allocation162_spill] sm:$0xff] %v8408_v54  ;;  %2170 = vmatmul.bf16.gmra.mxu0 %v5726_v44  ;;  %v2386_v44 = vpop.f32.mrf.mxu2 }
 0x382   :  { %6456 = vmatmul.msk.bf16.gmra.mxu3 %vm1503_vm1, %v6138_v41  ;;  %v5734_v41 = vor.u32 %v6590_v19, %v5733_v9  ;;  %v6593_v9 = vld [vmem:[%s10973_s0 + $0x394] sm:$0xf]  ;;  %v5751_v19 = vld [vmem:[%s10973_s0 + $0x398] sm:$0xf0] }
 0x383   :  { %v2787_v21 = vpop.f32.mrf.mxu1 }
 0x385   :  { %v3035_v53 = vpop.f32.mrf.mxu3 }
 0x386   :  { %v2133_v31 = vpop.f32.mrf.mxu0  ;;  %v8439_v25 = vadd.f32 %v3035_v53, %v2386_v44  ;;  %v6691_v44 = vld [vmem:[%s10973_s0 + $0x6a4] sm:$0xf] }
 0x387   :  { %v8431_v35 = vadd.f32 %v2782_v5, %v2133_v31 }
 0x388   :  { %11486 = vst [vmem:[#allocation165_spill] sm:$0xff] %v8439_v25 }
 0x389   :  { %11485 = vst [vmem:[#allocation164_spill] sm:$0xff] %v8431_v35  ;;  %v2388_v54 = vpop.f32.mrf.mxu2  ;;  %v6692_v35 = vld [vmem:[%s10973_s0 + $0x6a4] sm:$0xf0] }
 0x38a   :  { %v6142_v53 = vor.u32 %v6692_v35, %v6141_v38  ;;  %v5754_v38 = vor.u32 %v6593_v9, %v5751_v19  ;;  %v3190_v9 = vadd.f32 %v6978_v15, %v6970_v10 }
 0x38b   :  { %v2790_v20 = vpop.f32.mrf.mxu1 }
 0x38c   :  { %2430 = vmatmul.bf16.gmra.mxu2 %v6142_v53 }
 0x38d   :  { %v3037_v31 = vpop.f32.mrf.mxu3 }
 0x38e   :  { %6407 = vmatmul.msk.bf16.gmra.mxu1 %vm1503_vm1, %v5746_v7  ;;  %v2136_v55 = vpop.f32.mrf.mxu0  ;;  %v8444_v47 = vadd.f32 %v3037_v31, %v2388_v54 }
 0x38f   :  { %v8442_v5 = vadd.f32 %v2785_v49, %v2136_v55  ;;  %v6143_v49 = vld [vmem:[%s10973_s0 + $0x6a8] sm:$0xf0] }
 0x390   :  { %11488 = vst [vmem:[#allocation167_spill] sm:$0xff] %v8444_v47  ;;  %v6146_v54 = vor.u32 %v6691_v44, %v6143_v49  ;;  %v3452_v44 = vmul.f32 %v6978_v15, %v6978_v15  ;;  %v5741_v49 = vld [vmem:[%s10973_s0 + $0x380] sm:$0xf] }
 0x391   :  { %11487 = vst [vmem:[#allocation166_spill] sm:$0xff] %v8442_v5  ;;  %2175 = vmatmul.bf16.gmra.mxu0 %v5734_v41  ;;  %v2391_v41 = vpop.f32.mrf.mxu2 }
 0x392   :  { %6457 = vmatmul.msk.bf16.gmra.mxu3 %vm1503_vm1, %v6146_v54  ;;  %v6592_v54 = vld [vmem:[%s10973_s0 + $0x384] sm:$0xf0] }
 0x393   :  { %v2792_v55 = vpop.f32.mrf.mxu1  ;;  %v5742_v19 = vor.u32 %v6592_v54, %v5741_v49  ;;  %v3456_v49 = vmul.f32 %v7012_v39, %v7012_v39 }
 0x395   :  { %v3040_v31 = vpop.f32.mrf.mxu3 }
 0x396   :  { %v2138_v7 = vpop.f32.mrf.mxu0  ;;  %v8477_v47 = vadd.f32 %v3040_v31, %v2391_v41  ;;  %v3191_v41 = vadd.f32 %v3190_v9, %v6987_v22 }
 0x397   :  { %v8465_v35 = vadd.f32 %v2787_v21, %v2138_v7  ;;  %v3451_v21 = vmul.f32 %v6970_v10, %v6970_v10  ;;  %v3453_v7 = vmul.f32 %v6987_v22, %v6987_v22 }
 0x398   :  { %11490 = vst [vmem:[#allocation169_spill] sm:$0xff] %v8477_v47 }
 0x399   :  { %11489 = vst [vmem:[#allocation168_spill] sm:$0xff] %v8465_v35  ;;  %v3707_v25 = vadd.f32 %v3452_v44, %v3451_v21  ;;  %v3454_v35 = vmul.f32 %v6995_v27, %v6995_v27  ;;  %v2393_v50 = vpop.f32.mrf.mxu2  ;;  %v6694_v44 = vld [vmem:[%s10973_s0 + $0x6b4] sm:$0xf0] }
 0x39b   :  { %v8469_v53 = vpop.f32.mrf.mxu1  ;;  %v3708_v14 = vadd.f32 %v3707_v25, %v3453_v7 }
 0x39d   :  { %v3042_v47 = vpop.f32.mrf.mxu3 }
 0x39e   :  { %6408 = vmatmul.msk.bf16.gmra.mxu1 %vm1503_vm1, %v5754_v38  ;;  %v2141_v5 = vpop.f32.mrf.mxu0  ;;  %v8493_v1 = vadd.f32 %v3042_v47, %v2393_v50  ;;  %v6149_v38 = vld [vmem:[%s10973_s0 + $0x6b0] sm:$0xf]  ;;  %v6151_v50 = vld [vmem:[%s10973_s0 + $0x6b8] sm:$0xf0]  ;;  %v3709_v47 = vadd.f32 %v3708_v14, %v3454_v35  ;;  %v3458_v14 = vmul.f32 %v7029_v51, %v7029_v51 }
 0x39f   :  { %v8489_v31 = vadd.f32 %v2790_v20, %v2141_v5  ;;  %v6693_v20 = vld [vmem:[%s10973_s0 + $0x6b4] sm:$0xf]  ;;  %v3192_v5 = vadd.f32 %v3191_v41, %v6995_v27  ;;  %v6150_v25 = vor.u32 %v6694_v44, %v6149_v38  ;;  %v3457_v41 = vmul.f32 %v7021_v46, %v7021_v46  ;;  %v6595_v44 = vld [vmem:[%s10973_s0 + $0x3a4] sm:$0xf] }
 0x3a0   :  { %v6154_v21 = vor.u32 %v6693_v20, %v6151_v50  ;;  %v3710_v9 = vadd.f32 %v3709_v47, %v3455_v60  ;;  %v5759_v60 = vld [vmem:[%s10973_s0 + $0x3a8] sm:$0xf0] }
 0x3a1   :  { %2180 = vmatmul.bf16.gmra.mxu0 %v5742_v19  ;;  %v3193_v7 = vadd.f32 %v3192_v5, %v7004_v34  ;;  %2435 = vmatmul.bf16.gmra.mxu2 %v6150_v25  ;;  %v2396_v20 = vpop.f32.mrf.mxu2 }
 0x3a2   :  { %6458 = vmatmul.msk.bf16.gmra.mxu3 %vm1503_vm1, %v6154_v21  ;;  %v3711_v38 = vadd.f32 %v3710_v9, %v3456_v49  ;;  %v3459_v49 = vmul.f32 %v7038_v58, %v7038_v58 }
 0x3a3   :  { %v8510_v54 = vpop.f32.mrf.mxu1  ;;  %v3194_v19 = vadd.f32 %v3193_v7, %v7012_v39  ;;  %v5762_v7 = vor.u32 %v6595_v44, %v5759_v60  ;;  %v3460_v39 = vmul.f32 %v7046_v63, %v7046_v63 }
 0x3a4   :  { %v3712_v47 = vadd.f32 %v3711_v38, %v3457_v41 }
 0x3a5   :  { %v3195_v5 = vadd.f32 %v3194_v19, %v7021_v46  ;;  %v3045_v50 = vpop.f32.mrf.mxu3  ;;  %v5749_v19 = vld [vmem:[%s10973_s0 + $0x390] sm:$0xf] }
 0x3a6   :  { %v2143_v35 = vpop.f32.mrf.mxu0  ;;  %v3713_v9 = vadd.f32 %v3712_v47, %v3458_v14  ;;  %v8542_v38 = vadd.f32 %v3045_v50, %v2396_v20  ;;  %v3461_v14 = vmul.f32 %v7055_v6, %v7055_v6  ;;  %v3462_v47 = vmul.f32 %v7069_v16, %v7069_v16 }
 0x3a7   :  { %v8526_v25 = vadd.f32 %v2792_v55, %v2143_v35  ;;  %v3196_v21 = vadd.f32 %v3195_v5, %v7029_v51  ;;  %v6594_v55 = vld [vmem:[%s10973_s0 + $0x394] sm:$0xf0] }
 0x3a8   :  { %v3714_v35 = vadd.f32 %v3713_v9, %v3459_v49  ;;  %v5750_v60 = vor.u32 %v6594_v55, %v5749_v19 }
 0x3a9   :  { %11491 = vst [vmem:[#allocation170_spill] sm:$0xff] %v8526_v25  ;;  %v3197_v41 = vadd.f32 %v3196_v21, %v7038_v58  ;;  %v2398_v46 = vpop.f32.mrf.mxu2  ;;  %v3463_v21 = vmul.f32 %v7078_v24, %v7078_v24 }
 0x3aa   :  { %v3715_v5 = vadd.f32 %v3714_v35, %v3460_v39  ;;  %v6157_v39 = vld [vmem:[%s10973_s0 + $0x6c0] sm:$0xf] }
 0x3ab   :  { %v8533_v34 = vpop.f32.mrf.mxu1  ;;  %v3198_v44 = vadd.f32 %v3197_v41, %v7046_v63  ;;  %v3464_v41 = vmul.f32 %v7099_v37, %v7099_v37 }
 0x3ac   :  { %v3716_v49 = vadd.f32 %v3715_v5, %v3461_v14 }
 0x3ad   :  { %v3199_v27 = vadd.f32 %v3198_v44, %v7055_v6  ;;  %v3047_v50 = vpop.f32.mrf.mxu3 }
 0x3ae   :  { %6409 = vmatmul.msk.bf16.gmra.mxu1 %vm1503_vm1, %v5762_v7  ;;  %v2146_v51 = vpop.f32.mrf.mxu0  ;;  %v8556_v9 = vadd.f32 %v3047_v50, %v2398_v46  ;;  %v6696_v7 = vld [vmem:[%s10973_s0 + $0x6c4] sm:$0xf0]  ;;  %v6159_v46 = vld [vmem:[%s10973_s0 + $0x6c8] sm:$0xf0]  ;;  %v3717_v55 = vadd.f32 %v3716_v49, %v3462_v47  ;;  %v3466_v47 = vmul.f32 %v7129_v59, %v7129_v59 }
 0x3af   :  { %v8552_v20 = vadd.f32 %v8469_v53, %v2146_v51  ;;  %v6695_v51 = vld [vmem:[%s10973_s0 + $0x6c4] sm:$0xf]  ;;  %v3200_v53 = vadd.f32 %v3199_v27, %v7069_v16  ;;  %v6158_v19 = vor.u32 %v6696_v7, %v6157_v39  ;;  %v3465_v27 = vmul.f32 %v7108_v45, %v7108_v45  ;;  %v6597_v39 = vld [vmem:[%s10973_s0 + $0x3b4] sm:$0xf] }
 0x3b0   :  { %v6162_v14 = vor.u32 %v6695_v51, %v6159_v46  ;;  %v3718_v5 = vadd.f32 %v3717_v55, %v3463_v21  ;;  %v5767_v21 = vld [vmem:[%s10973_s0 + $0x3b8] sm:$0xf0]  ;;  %v3467_v55 = vmul.f32 %v7138_v3, %v7138_v3 }
 0x3b1   :  { %11492 = vst [vmem:[#allocation171_spill] sm:$0xff] %v8552_v20  ;;  %2185 = vmatmul.bf16.gmra.mxu0 %v5750_v60  ;;  %v3201_v44 = vadd.f32 %v3200_v53, %v7078_v24  ;;  %2440 = vmatmul.bf16.gmra.mxu2 %v6158_v19  ;;  %v2401_v7 = vpop.f32.mrf.mxu2 }
 0x3b2   :  { %6459 = vmatmul.msk.bf16.gmra.mxu3 %vm1503_vm1, %v6162_v14  ;;  %v3719_v50 = vadd.f32 %v3718_v5, %v3464_v41  ;;  %v5770_v14 = vor.u32 %v6597_v39, %v5767_v21  ;;  %v3468_v5 = vmul.f32 %v7159_v18, %v7159_v18 }
 0x3b3   :  { %v8573_v35 = vpop.f32.mrf.mxu1  ;;  %v3202_v60 = vadd.f32 %v3201_v44, %v7099_v37 }
 0x3b4   :  { %v3720_v46 = vadd.f32 %v3719_v50, %v3465_v27 }
 0x3b5   :  { %v3203_v51 = vadd.f32 %v3202_v60, %v7108_v45  ;;  %v3050_v19 = vpop.f32.mrf.mxu3  ;;  %v5757_v60 = vld [vmem:[%s10973_s0 + $0x3a0] sm:$0xf] }
 0x3b6   :  { %v2148_v49 = vpop.f32.mrf.mxu0  ;;  %v3721_v44 = vadd.f32 %v3720_v46, %v3466_v47  ;;  %v8606_v50 = vadd.f32 %v3050_v19, %v2401_v7  ;;  %v3469_v47 = vmul.f32 %v7168_v28, %v7168_v28  ;;  %v3470_v46 = vmul.f32 %v7189_v42, %v7189_v42 }
 0x3b7   :  { %v8590_v53 = vadd.f32 %v8510_v54, %v2148_v49  ;;  %v3204_v41 = vadd.f32 %v3203_v51, %v7129_v59  ;;  %v6596_v54 = vld [vmem:[%s10973_s0 + $0x3a4] sm:$0xf0] }
 0x3b8   :  { %11493 = vst [vmem:[#allocation172_spill] sm:$0xff] %v8606_v50  ;;  %v3722_v49 = vadd.f32 %v3721_v44, %v3467_v55  ;;  %v5758_v21 = vor.u32 %v6596_v54, %v5757_v60 }
 0x3b9   :  { %v3205_v27 = vadd.f32 %v3204_v41, %v7138_v3  ;;  %v2403_v45 = vpop.f32.mrf.mxu2  ;;  %v3471_v41 = vmul.f32 %v7198_v52, %v7198_v52 }
 0x3ba   :  { %v3723_v51 = vadd.f32 %v3722_v49, %v3468_v5  ;;  %v6698_v5 = vld [vmem:[%s10973_s0 + $0x6d4] sm:$0xf0] }
 0x3bb   :  { %v8597_v37 = vpop.f32.mrf.mxu1  ;;  %v3206_v39 = vadd.f32 %v3205_v27, %v7159_v18  ;;  %v3472_v27 = vmul.f32 %v7219_v2, %v7219_v2 }
 0x3bc   :  { %v3724_v55 = vadd.f32 %v3723_v51, %v3469_v47 }
 0x3bd   :  { %v3207_v24 = vadd.f32 %v3206_v39, %v7168_v28  ;;  %v3052_v19 = vpop.f32.mrf.mxu3 }
 0x3be   :  { %6410 = vmatmul.msk.bf16.gmra.mxu1 %vm1503_vm1, %v5770_v14  ;;  %v2151_v59 = vpop.f32.mrf.mxu0  ;;  %v8620_v44 = vadd.f32 %v3052_v19, %v2403_v45  ;;  %v6165_v14 = vld [vmem:[%s10973_s0 + $0x6d0] sm:$0xf]  ;;  %v6167_v45 = vld [vmem:[%s10973_s0 + $0x6d8] sm:$0xf0]  ;;  %v3725_v54 = vadd.f32 %v3724_v55, %v3470_v46  ;;  %v3474_v46 = vmul.f32 %v7249_v30, %v7249_v30 }
 0x3bf   :  { %v8616_v7 = vadd.f32 %v8533_v34, %v2151_v59  ;;  %v6697_v34 = vld [vmem:[%s10973_s0 + $0x6d4] sm:$0xf]  ;;  %v3208_v59 = vadd.f32 %v3207_v24, %v7189_v42  ;;  %v6166_v60 = vor.u32 %v6698_v5, %v6165_v14  ;;  %v3473_v24 = vmul.f32 %v7228_v12, %v7228_v12  ;;  %v6599_v14 = vld [vmem:[%s10973_s0 + $0x3c4] sm:$0xf] }
 0x3c0   :  { %11495 = vst [vmem:[#allocation174_spill] sm:$0xff] %v8620_v44  ;;  %v6170_v47 = vor.u32 %v6697_v34, %v6167_v45  ;;  %v3726_v51 = vadd.f32 %v3725_v54, %v3471_v41  ;;  %v5775_v41 = vld [vmem:[%s10973_s0 + $0x3c8] sm:$0xf0]  ;;  %v3475_v54 = vmul.f32 %v7258_v40, %v7258_v40 }
 0x3c1   :  { %11494 = vst [vmem:[#allocation173_spill] sm:$0xff] %v8616_v7  ;;  %2190 = vmatmul.bf16.gmra.mxu0 %v5758_v21  ;;  %v3209_v39 = vadd.f32 %v3208_v59, %v7198_v52  ;;  %2445 = vmatmul.bf16.gmra.mxu2 %v6166_v60  ;;  %v2406_v5 = vpop.f32.mrf.mxu2 }
 0x3c2   :  { %6460 = vmatmul.msk.bf16.gmra.mxu3 %vm1503_vm1, %v6170_v47  ;;  %v3727_v19 = vadd.f32 %v3726_v51, %v3472_v27  ;;  %v5778_v47 = vor.u32 %v6599_v14, %v5775_v41  ;;  %v3476_v51 = vmul.f32 %v7279_v56, %v7279_v56 }
 0x3c3   :  { %v8637_v49 = vpop.f32.mrf.mxu1  ;;  %v3210_v21 = vadd.f32 %v3209_v39, %v7219_v2 }
 0x3c4   :  { %v3728_v45 = vadd.f32 %v3727_v19, %v3473_v24 }
 0x3c5   :  { %v3211_v34 = vadd.f32 %v3210_v21, %v7228_v12  ;;  %v3055_v60 = vpop.f32.mrf.mxu3  ;;  %v5765_v21 = vld [vmem:[%s10973_s0 + $0x3b0] sm:$0xf] }
 0x3c6   :  { %v2153_v55 = vpop.f32.mrf.mxu0  ;;  %v3729_v39 = vadd.f32 %v3728_v45, %v3474_v46  ;;  %v8670_v19 = vadd.f32 %v3055_v60, %v2406_v5  ;;  %v3477_v46 = vmul.f32 %v7288_v4, %v7288_v4  ;;  %v3478_v45 = vmul.f32 %v7311_v23, %v7311_v23 }
 0x3c7   :  { %v8654_v59 = vadd.f32 %v8573_v35, %v2153_v55  ;;  %v3212_v27 = vadd.f32 %v3211_v34, %v7249_v30  ;;  %v6598_v35 = vld [vmem:[%s10973_s0 + $0x3b4] sm:$0xf0] }
 0x3c8   :  { %v3730_v55 = vadd.f32 %v3729_v39, %v3475_v54  ;;  %v5766_v41 = vor.u32 %v6598_v35, %v5765_v21 }
 0x3c9   :  { %11496 = vst [vmem:[#allocation175_spill] sm:$0xff] %v8654_v59  ;;  %v3213_v24 = vadd.f32 %v3212_v27, %v7258_v40  ;;  %v2408_v12 = vpop.f32.mrf.mxu2  ;;  %v3479_v27 = vmul.f32 %v7322_v36, %v7322_v36 }
 0x3ca   :  { %v3731_v34 = vadd.f32 %v3730_v55, %v3476_v51  ;;  %v6700_v51 = vld [vmem:[%s10973_s0 + $0x6e4] sm:$0xf0] }
 0x3cb   :  { %v8661_v2 = vpop.f32.mrf.mxu1  ;;  %v3214_v14 = vadd.f32 %v3213_v24, %v7279_v56  ;;  %v3480_v24 = vmul.f32 %v7343_v57, %v7343_v57 }
 0x3cc   :  { %v3732_v54 = vadd.f32 %v3731_v34, %v3477_v46 }
 0x3cd   :  { %v3215_v52 = vadd.f32 %v3214_v14, %v7288_v4  ;;  %v3057_v60 = vpop.f32.mrf.mxu3 }
 0x3ce   :  { %6411 = vmatmul.msk.bf16.gmra.mxu1 %vm1503_vm1, %v5778_v47  ;;  %v2156_v30 = vpop.f32.mrf.mxu0  ;;  %v8684_v39 = vadd.f32 %v3057_v60, %v2408_v12  ;;  %v6173_v47 = vld [vmem:[%s10973_s0 + $0x6e0] sm:$0xf]  ;;  %v6175_v12 = vld [vmem:[%s10973_s0 + $0x6e8] sm:$0xf0]  ;;  %v3733_v35 = vadd.f32 %v3732_v54, %v3478_v45  ;;  %v3482_v45 = vmul.f32 %v7377_v43, %v7377_v43 }
 0x3cf   :  { %v8680_v5 = vadd.f32 %v8597_v37, %v2156_v30  ;;  %v6699_v37 = vld [vmem:[%s10973_s0 + $0x6e4] sm:$0xf]  ;;  %v3216_v30 = vadd.f32 %v3215_v52, %v7311_v23  ;;  %v6174_v21 = vor.u32 %v6700_v51, %v6173_v47  ;;  %v3481_v52 = vmul.f32 %v7354_v11, %v7354_v11  ;;  %v6601_v47 = vld [vmem:[%s10973_s0 + $0x3d4] sm:$0xf] }
 0x3d0   :  { %v6178_v46 = vor.u32 %v6699_v37, %v6175_v12  ;;  %v3734_v34 = vadd.f32 %v3733_v35, %v3479_v27  ;;  %v5783_v27 = vld [vmem:[%s10973_s0 + $0x3d8] sm:$0xf0]  ;;  %v3483_v35 = vmul.f32 %v7388_v48, %v7388_v48 }
 0x3d1   :  { %11497 = vst [vmem:[#allocation176_spill] sm:$0xff] %v8680_v5  ;;  %2195 = vmatmul.bf16.gmra.mxu0 %v5766_v41  ;;  %v3217_v14 = vadd.f32 %v3216_v30, %v7322_v36  ;;  %2450 = vmatmul.bf16.gmra.mxu2 %v6174_v21  ;;  %v2411_v51 = vpop.f32.mrf.mxu2 }
 0x3d2   :  { %6461 = vmatmul.msk.bf16.gmra.mxu3 %vm1503_vm1, %v6178_v46  ;;  %v3735_v60 = vadd.f32 %v3734_v34, %v3480_v24  ;;  %v5786_v46 = vor.u32 %v6601_v47, %v5783_v27  ;;  %v3484_v34 = vmul.f32 %v7411_v32, %v7411_v32 }
 0x3d3   :  { %v8701_v55 = vpop.f32.mrf.mxu1  ;;  %v3218_v41 = vadd.f32 %v3217_v14, %v7343_v57 }
 0x3d4   :  { %v3736_v12 = vadd.f32 %v3735_v60, %v3481_v52 }
 0x3d5   :  { %v3219_v37 = vadd.f32 %v3218_v41, %v7354_v11  ;;  %v3060_v21 = vpop.f32.mrf.mxu3  ;;  %v5773_v41 = vld [vmem:[%s10973_s0 + $0x3c0] sm:$0xf] }
 0x3d6   :  { %v2158_v54 = vpop.f32.mrf.mxu0  ;;  %v3737_v14 = vadd.f32 %v3736_v12, %v3482_v45  ;;  %v8734_v60 = vadd.f32 %v3060_v21, %v2411_v51  ;;  %v3485_v45 = vmul.f32 %v7422_v29, %v7422_v29  ;;  %v3486_v12 = vmul.f32 %v7445_v33, %v7445_v33 }
 0x3d7   :  { %v8718_v30 = vadd.f32 %v8637_v49, %v2158_v54  ;;  %v3220_v24 = vadd.f32 %v3219_v37, %v7377_v43  ;;  %v6600_v49 = vld [vmem:[%s10973_s0 + $0x3c4] sm:$0xf0] }
 0x3d8   :  { %11499 = vst [vmem:[#allocation178_spill] sm:$0xff] %v8734_v60  ;;  %v3738_v54 = vadd.f32 %v3737_v14, %v3483_v35  ;;  %v5774_v27 = vor.u32 %v6600_v49, %v5773_v41 }
 0x3d9   :  { %11498 = vst [vmem:[#allocation177_spill] sm:$0xff] %v8718_v30  ;;  %v3221_v52 = vadd.f32 %v3220_v24, %v7388_v48  ;;  %v2413_v11 = vpop.f32.mrf.mxu2  ;;  %v3487_v24 = vmul.f32 %v7456_v17, %v7456_v17 }
 0x3da   :  { %v3739_v37 = vadd.f32 %v3738_v54, %v3484_v34  ;;  %v6702_v34 = vld [vmem:[%s10973_s0 + $0x6f4] sm:$0xf0] }
 0x3db   :  { %v8725_v57 = vpop.f32.mrf.mxu1  ;;  %v3222_v47 = vadd.f32 %v3221_v52, %v7411_v32  ;;  %v3488_v52 = vmul.f32 %v7479_v61, %v7479_v61 }
 0x3dc   :  { %v3740_v35 = vadd.f32 %v3739_v37, %v3485_v45 }
 0x3dd   :  { %v3223_v36 = vadd.f32 %v3222_v47, %v7422_v29  ;;  %v3062_v21 = vpop.f32.mrf.mxu3 }
 0x3de   :  { %6412 = vmatmul.msk.bf16.gmra.mxu1 %vm1503_vm1, %v5786_v46  ;;  %v2161_v43 = vpop.f32.mrf.mxu0  ;;  %v8748_v14 = vadd.f32 %v3062_v21, %v2413_v11  ;;  %v6181_v46 = vld [vmem:[%s10973_s0 + $0x6f0] sm:$0xf]  ;;  %v6183_v11 = vld [vmem:[%s10973_s0 + $0x6f8] sm:$0xf0]  ;;  %v3741_v49 = vadd.f32 %v3740_v35, %v3486_v12  ;;  %v3490_v12 = vmul.f32 %v7513_v13, %v7513_v13 }
 0x3df   :  { %v8744_v51 = vadd.f32 %v8661_v2, %v2161_v43  ;;  %v6701_v2 = vld [vmem:[%s10973_s0 + $0x6f4] sm:$0xf]  ;;  %v3224_v43 = vadd.f32 %v3223_v36, %v7445_v33  ;;  %v6182_v41 = vor.u32 %v6702_v34, %v6181_v46  ;;  %v3489_v36 = vmul.f32 %v7490_v62, %v7490_v62  ;;  %v6603_v46 = vld [vmem:[%s10973_s0 + $0x3e4] sm:$0xf] }
 0x3e0   :  { %11500 = vst [vmem:[#allocation179_spill] sm:$0xff] %v8748_v14  ;;  %v6186_v45 = vor.u32 %v6701_v2, %v6183_v11  ;;  %v3742_v37 = vadd.f32 %v3741_v49, %v3487_v24  ;;  %v5791_v24 = vld [vmem:[%s10973_s0 + $0x3e8] sm:$0xf0]  ;;  %v3491_v49 = vmul.f32 %v7524_v26, %v7524_v26 }
 0x3e1   :  { %2200 = vmatmul.bf16.gmra.mxu0 %v5774_v27  ;;  %v3225_v47 = vadd.f32 %v3224_v43, %v7456_v17  ;;  %2455 = vmatmul.bf16.gmra.mxu2 %v6182_v41  ;;  %v2416_v34 = vpop.f32.mrf.mxu2 }
 0x3e2   :  { %6462 = vmatmul.msk.bf16.gmra.mxu3 %vm1503_vm1, %v6186_v45  ;;  %v3743_v21 = vadd.f32 %v3742_v37, %v3488_v52  ;;  %v5794_v45 = vor.u32 %v6603_v46, %v5791_v24  ;;  %v3492_v37 = vmul.f32 %v7547_v0, %v7547_v0 }
 0x3e3   :  { %v8765_v54 = vpop.f32.mrf.mxu1  ;;  %v3226_v27 = vadd.f32 %v3225_v47, %v7479_v61 }
 0x3e4   :  { %v3744_v11 = vadd.f32 %v3743_v21, %v3489_v36 }
 0x3e5   :  { %v3227_v2 = vadd.f32 %v3226_v27, %v7490_v62  ;;  %v3065_v41 = vpop.f32.mrf.mxu3  ;;  %v5781_v27 = vld [vmem:[%s10973_s0 + $0x3d0] sm:$0xf] }
 0x3e6   :  { %v2163_v35 = vpop.f32.mrf.mxu0  ;;  %v3745_v47 = vadd.f32 %v3744_v11, %v3490_v12  ;;  %v8798_v21 = vadd.f32 %v3065_v41, %v2416_v34  ;;  %v3493_v12 = vmul.f32 %v7558_v8, %v7558_v8  ;;  %v11503_v11 = vld [vmem:[#allocation64_spill] sm:$0xff] }
 0x3e7   :  { %v8782_v43 = vadd.f32 %v8701_v55, %v2163_v35  ;;  %v3228_v52 = vadd.f32 %v3227_v2, %v7513_v13  ;;  %v6602_v55 = vld [vmem:[%s10973_s0 + $0x3d4] sm:$0xf0]  ;;  %v3494_v13 = vmul.f32 %v11503_v11, %v11503_v11 }
 0x3e8   :  { %11502 = vst [vmem:[#allocation181_spill] sm:$0xff] %v8798_v21  ;;  %v3746_v35 = vadd.f32 %v3745_v47, %v3491_v49  ;;  %v5782_v24 = vor.u32 %v6602_v55, %v5781_v27 }
 0x3e9   :  { %11501 = vst [vmem:[#allocation180_spill] sm:$0xff] %v8782_v43  ;;  %v3229_v36 = vadd.f32 %v3228_v52, %v7524_v26  ;;  %v2418_v17 = vpop.f32.mrf.mxu2  ;;  %v11505_v52 = vld [vmem:[#allocation66_spill] sm:$0xff] }
 0x3ea   :  { %v3747_v2 = vadd.f32 %v3746_v35, %v3492_v37  ;;  %v3495_v47 = vmul.f32 %v11505_v52, %v11505_v52  ;;  %v6704_v37 = vld [vmem:[%s10973_s0 + $0x704] sm:$0xf0]  ;;  %v11507_v35 = vld [vmem:[#allocation68_spill] sm:$0xff] }
 0x3eb   :  { %v8789_v61 = vpop.f32.mrf.mxu1  ;;  %v3230_v46 = vadd.f32 %v3229_v36, %v7547_v0  ;;  %v11508_v0 = vld [vmem:[#allocation70_spill] sm:$0xff] }
 0x3ec   :  { %v3748_v49 = vadd.f32 %v3747_v2, %v3493_v12  ;;  %v3496_v12 = vmul.f32 %v11507_v35, %v11507_v35 }
 0x3ed   :  { %v3231_v33 = vadd.f32 %v3230_v46, %v7558_v8  ;;  %v3067_v41 = vpop.f32.mrf.mxu3 }
 0x3ee   :  { %6413 = vmatmul.msk.bf16.gmra.mxu1 %vm1503_vm1, %v5794_v45  ;;  %v2166_v62 = vpop.f32.mrf.mxu0  ;;  %v8812_v36 = vadd.f32 %v3067_v41, %v2418_v17  ;;  %v6189_v45 = vld [vmem:[%s10973_s0 + $0x700] sm:$0xf]  ;;  %v6191_v17 = vld [vmem:[%s10973_s0 + $0x708] sm:$0xf0]  ;;  %v3749_v55 = vadd.f32 %v3748_v49, %v3494_v13 }
 0x3ef   :  { %v8808_v34 = vadd.f32 %v8725_v57, %v2166_v62  ;;  %v6703_v57 = vld [vmem:[%s10973_s0 + $0x704] sm:$0xf]  ;;  %v3232_v62 = vadd.f32 %v3231_v33, %v11503_v11  ;;  %v6190_v27 = vor.u32 %v6704_v37, %v6189_v45  ;;  %v3497_v33 = vmul.f32 %v11508_v0, %v11508_v0  ;;  %v11509_v37 = vld [vmem:[#allocation72_spill] sm:$0xff] }
 0x3f0   :  { %11506 = vst [vmem:[#allocation183_spill] sm:$0xff] %v8812_v36  ;;  %v6194_v2 = vor.u32 %v6703_v57, %v6191_v17  ;;  %v3750_v8 = vadd.f32 %v3749_v55, %v3495_v47  ;;  %v3498_v13 = vmul.f32 %v11509_v37, %v11509_v37  ;;  %v6605_v57 = vld [vmem:[%s10973_s0 + $0x3f4] sm:$0xf]  ;;  %v5799_v47 = vld [vmem:[%s10973_s0 + $0x3f8] sm:$0xf0] }
 0x3f1   :  { %11504 = vst [vmem:[#allocation182_spill] sm:$0xff] %v8808_v34  ;;  %2205 = vmatmul.bf16.gmra.mxu0 %v5782_v24  ;;  %v3233_v41 = vadd.f32 %v3232_v62, %v11505_v52  ;;  %2460 = vmatmul.bf16.gmra.mxu2 %v6190_v27  ;;  %v2421_v62 = vpop.f32.mrf.mxu2  ;;  %v11512_v11 = vld [vmem:[#allocation76_spill] sm:$0xff] }
 0x3f2   :  { %6463 = vmatmul.msk.bf16.gmra.mxu3 %vm1503_vm1, %v6194_v2  ;;  %v3751_v45 = vadd.f32 %v3750_v8, %v3496_v12  ;;  %v11511_v12 = vld [vmem:[#allocation74_spill] sm:$0xff]  ;;  %v3500_v26 = vmul.f32 %v11512_v11, %v11512_v11 }
 0x3f3   :  { %v8829_v46 = vpop.f32.mrf.mxu1  ;;  %v3234_v24 = vadd.f32 %v3233_v41, %v11507_v35  ;;  %v3499_v2 = vmul.f32 %v11511_v12, %v11511_v12  ;;  %v5802_v35 = vor.u32 %v6605_v57, %v5799_v47  ;;  %v11514_v57 = vld [vmem:[#allocation78_spill] sm:$0xff] }
 0x3f4   :  { %v3752_v8 = vadd.f32 %v3751_v45, %v3497_v33 }
 0x3f5   :  { %v3235_v27 = vadd.f32 %v3234_v24, %v11508_v0  ;;  %v3070_v55 = vpop.f32.mrf.mxu3  ;;  %v5789_v24 = vld [vmem:[%s10973_s0 + $0x3e0] sm:$0xf] }
 0x3f6   :  { %v2168_v49 = vpop.f32.mrf.mxu0  ;;  %v3753_v52 = vadd.f32 %v3752_v8, %v3498_v13  ;;  %v8862_v45 = vadd.f32 %v3070_v55, %v2421_v62  ;;  %v3501_v13 = vmul.f32 %v11514_v57, %v11514_v57 }
 0x3f7   :  { %v8846_v17 = vadd.f32 %v8765_v54, %v2168_v49  ;;  %v3236_v41 = vadd.f32 %v3235_v27, %v11509_v37  ;;  %v6604_v54 = vld [vmem:[%s10973_s0 + $0x3e4] sm:$0xf0]  ;;  %v11515_v37 = vld [vmem:[#allocation80_spill] sm:$0xff] }
 0x3f8   :  { %11513 = vst [vmem:[#allocation185_spill] sm:$0xff] %v8862_v45  ;;  %v3754_v49 = vadd.f32 %v3753_v52, %v3499_v2  ;;  %v5790_v27 = vor.u32 %v6604_v54, %v5789_v24  ;;  %v3502_v0 = vmul.f32 %v11515_v37, %v11515_v37  ;;  %v11516_v2 = vld [vmem:[#allocation82_spill] sm:$0xff] }
 0x3f9   :  { %11510 = vst [vmem:[#allocation184_spill] sm:$0xff] %v8846_v17  ;;  %v3237_v33 = vadd.f32 %v3236_v41, %v11511_v12  ;;  %v2423_v48 = vpop.f32.mrf.mxu2  ;;  %v3503_v41 = vmul.f32 %v11516_v2, %v11516_v2 }
 0x3fa   :  { %v3755_v8 = vadd.f32 %v3754_v49, %v3500_v26  ;;  %v6197_v26 = vld [vmem:[%s10973_s0 + $0x710] sm:$0xf]  ;;  %v11518_v49 = vld [vmem:[#allocation84_spill] sm:$0xff] }
 0x3fb   :  { %v8853_v29 = vpop.f32.mrf.mxu1  ;;  %v3238_v47 = vadd.f32 %v3237_v33, %v11512_v11  ;;  %v11519_v11 = vld [vmem:[#allocation86_spill] sm:$0xff] }
 0x3fc   :  { %v3756_v55 = vadd.f32 %v3755_v8, %v3501_v13  ;;  %v3504_v13 = vmul.f32 %v11518_v49, %v11518_v49 }
 0x3fd   :  { %v3239_v23 = vadd.f32 %v3238_v47, %v11514_v57  ;;  %v3072_v52 = vpop.f32.mrf.mxu3 }
 0x3fe   :  { %6414 = vmatmul.msk.bf16.gmra.mxu1 %vm1503_vm1, %v5802_v35  ;;  %v2171_v32 = vpop.f32.mrf.mxu0  ;;  %v8876_v33 = vadd.f32 %v3072_v52, %v2423_v48  ;;  %v6706_v35 = vld [vmem:[%s10973_s0 + $0x714] sm:$0xf0]  ;;  %v6199_v48 = vld [vmem:[%s10973_s0 + $0x718] sm:$0xf0]  ;;  %v3757_v54 = vadd.f32 %v3756_v55, %v3502_v0 }
 0x3ff   :  { %v8872_v62 = vadd.f32 %v8789_v61, %v2171_v32  ;;  %v6705_v32 = vld [vmem:[%s10973_s0 + $0x714] sm:$0xf]  ;;  %v3240_v61 = vadd.f32 %v3239_v23, %v11515_v37  ;;  %v6198_v24 = vor.u32 %v6706_v35, %v6197_v26  ;;  %v3505_v23 = vmul.f32 %v11519_v11, %v11519_v11  ;;  %v11520_v35 = vld [vmem:[#allocation88_spill] sm:$0xff] }
 0x400   :  { %11517 = vst [vmem:[#allocation186_spill] sm:$0xff] %v8876_v33  ;;  %v6202_v8 = vor.u32 %v6705_v32, %v6199_v48  ;;  %v3758_v57 = vadd.f32 %v3757_v54, %v3503_v41  ;;  %v3506_v0 = vmul.f32 %v11520_v35, %v11520_v35  ;;  %v6607_v32 = vld [vmem:[%s10973_s0 + $0x404] sm:$0xf]  ;;  %v5807_v41 = vld [vmem:[%s10973_s0 + $0x408] sm:$0xf0]  ;;  %v11523_v37 = vld [vmem:[#allocation92_spill] sm:$0xff] }
 0x401   :  { %2210 = vmatmul.bf16.gmra.mxu0 %v5790_v27  ;;  %v3241_v52 = vadd.f32 %v3240_v61, %v11516_v2  ;;  %2465 = vmatmul.bf16.gmra.mxu2 %v6198_v24  ;;  %v2426_v61 = vpop.f32.mrf.mxu2  ;;  %v3508_v12 = vmul.f32 %v11523_v37, %v11523_v37 }
 0x402   :  { %6464 = vmatmul.msk.bf16.gmra.mxu3 %vm1503_vm1, %v6202_v8  ;;  %v3759_v26 = vadd.f32 %v3758_v57, %v3504_v13  ;;  %v11522_v13 = vld [vmem:[#allocation90_spill] sm:$0xff] }
 0x403   :  { %v8893_v47 = vpop.f32.mrf.mxu1  ;;  %v3242_v27 = vadd.f32 %v3241_v52, %v11518_v49  ;;  %v3507_v8 = vmul.f32 %v11522_v13, %v11522_v13  ;;  %v5810_v49 = vor.u32 %v6607_v32, %v5807_v41 }
 0x404   :  { %v3760_v57 = vadd.f32 %v3759_v26, %v3505_v23 }
 0x405   :  { %v3243_v24 = vadd.f32 %v3242_v27, %v11519_v11  ;;  %v3075_v54 = vpop.f32.mrf.mxu3  ;;  %v5797_v27 = vld [vmem:[%s10973_s0 + $0x3f0] sm:$0xf] }
 0x406   :  { %v2173_v55 = vpop.f32.mrf.mxu0  ;;  %v3761_v2 = vadd.f32 %v3760_v57, %v3506_v0  ;;  %v8924_v26 = vadd.f32 %v3075_v54, %v2426_v61 }
 0x407   :  { %v8910_v48 = vadd.f32 %v8829_v46, %v2173_v55  ;;  %v3244_v52 = vadd.f32 %v3243_v24, %v11520_v35  ;;  %v6606_v46 = vld [vmem:[%s10973_s0 + $0x3f4] sm:$0xf0]  ;;  %v11525_v24 = vld [vmem:[#allocation94_spill] sm:$0xff] }
 0x408   :  { %11524 = vst [vmem:[#allocation188_spill] sm:$0xff] %v8924_v26  ;;  %v3762_v55 = vadd.f32 %v3761_v2, %v3507_v8  ;;  %v3509_v0 = vmul.f32 %v11525_v24, %v11525_v24  ;;  %v5798_v41 = vor.u32 %v6606_v46, %v5797_v27  ;;  %v11526_v35 = vld [vmem:[#allocation96_spill] sm:$0xff]  ;;  %v11528_v8 = vld [vmem:[#allocation98_spill] sm:$0xff] }
 0x409   :  { %11521 = vst [vmem:[#allocation187_spill] sm:$0xff] %v8910_v48  ;;  %v3245_v23 = vadd.f32 %v3244_v52, %v11522_v13  ;;  %v3510_v11 = vmul.f32 %v11526_v35, %v11526_v35  ;;  %v2428_v40 = vpop.f32.mrf.mxu2  ;;  %v3511_v52 = vmul.f32 %v11528_v8, %v11528_v8 }
 0x40a   :  { %v3763_v57 = vadd.f32 %v3762_v55, %v3508_v12  ;;  %v6205_v12 = vld [vmem:[%s10973_s0 + $0x720] sm:$0xf]  ;;  %v11530_v55 = vld [vmem:[#allocation100_spill] sm:$0xff] }
 0x40b   :  { %v2830_v4 = vpop.f32.mrf.mxu1  ;;  %v3246_v32 = vadd.f32 %v3245_v23, %v11523_v37  ;;  %v11531_v37 = vld [vmem:[#allocation102_spill] sm:$0xff] }
 0x40c   :  { %v3764_v54 = vadd.f32 %v3763_v57, %v3509_v0  ;;  %v3512_v0 = vmul.f32 %v11530_v55, %v11530_v55  ;;  %v3513_v13 = vmul.f32 %v11531_v37, %v11531_v37 }
 0x40d   :  { %v3247_v42 = vadd.f32 %v3246_v32, %v11525_v24  ;;  %v3077_v2 = vpop.f32.mrf.mxu3 }
 0x40e   :  { %6415 = vmatmul.msk.bf16.gmra.mxu1 %vm1503_vm1, %v5810_v49  ;;  %v2176_v56 = vpop.f32.mrf.mxu0  ;;  %v8938_v23 = vadd.f32 %v3077_v2, %v2428_v40  ;;  %v6708_v49 = vld [vmem:[%s10973_s0 + $0x724] sm:$0xf0]  ;;  %v6207_v40 = vld [vmem:[%s10973_s0 + $0x728] sm:$0xf0]  ;;  %v3765_v46 = vadd.f32 %v3764_v54, %v3510_v11 }
 0x40f   :  { %v8934_v61 = vadd.f32 %v8853_v29, %v2176_v56  ;;  %v6707_v56 = vld [vmem:[%s10973_s0 + $0x724] sm:$0xf]  ;;  %v3248_v29 = vadd.f32 %v3247_v42, %v11526_v35  ;;  %v6206_v27 = vor.u32 %v6708_v49, %v6205_v12  ;;  %v11532_v12 = vld [vmem:[#allocation104_spill] sm:$0xff] }
 0x410   :  { %11529 = vst [vmem:[#allocation190_spill] sm:$0xff] %v8938_v23  ;;  %v6210_v57 = vor.u32 %v6707_v56, %v6207_v40  ;;  %v3766_v24 = vadd.f32 %v3765_v46, %v3511_v52  ;;  %v3514_v11 = vmul.f32 %v11532_v12, %v11532_v12 }
 0x411   :  { %11527 = vst [vmem:[#allocation189_spill] sm:$0xff] %v8934_v61  ;;  %2215 = vmatmul.bf16.gmra.mxu0 %v5798_v41  ;;  %v3249_v2 = vadd.f32 %v3248_v29, %v11528_v8  ;;  %2470 = vmatmul.bf16.gmra.mxu2 %v6206_v27  ;;  %v2431_v49 = vpop.f32.mrf.mxu2  ;;  %v11534_v27 = vld [vmem:[#allocation106_spill] sm:$0xff] }
 0x412   :  { %6465 = vmatmul.msk.bf16.gmra.mxu3 %vm1503_vm1, %v6210_v57  ;;  %v3767_v41 = vadd.f32 %v3766_v24, %v3512_v0  ;;  %v3515_v40 = vmul.f32 %v11534_v27, %v11534_v27 }
 0x413   :  { %v2832_v32 = vpop.f32.mrf.mxu1  ;;  %v3250_v42 = vadd.f32 %v3249_v2, %v11530_v55  ;;  %v11535_v2 = vld [vmem:[#allocation108_spill] sm:$0xff] }
 0x414   :  { %v3768_v52 = vadd.f32 %v3767_v41, %v3513_v13  ;;  %v3516_v24 = vmul.f32 %v11535_v2, %v11535_v2 }
 0x415   :  { %v3251_v35 = vadd.f32 %v3250_v42, %v11531_v37  ;;  %v3080_v29 = vpop.f32.mrf.mxu3  ;;  %v11537_v37 = vld [vmem:[#allocation110_spill] sm:$0xff] }
 0x416   :  { %v2178_v54 = vpop.f32.mrf.mxu0  ;;  %v3769_v57 = vadd.f32 %v3768_v52, %v3514_v11  ;;  %v8972_v8 = vadd.f32 %v3080_v29, %v2431_v49  ;;  %v11540_v49 = vld [vmem:[#allocation114_spill] sm:$0xff] }
 0x417   :  { %v8964_v56 = vadd.f32 %v8893_v47, %v2178_v54  ;;  %v3252_v46 = vadd.f32 %v3251_v35, %v11532_v12  ;;  %v3517_v47 = vmul.f32 %v11537_v37, %v11537_v37  ;;  %v11538_v54 = vld [vmem:[#allocation112_spill] sm:$0xff]  ;;  %v3519_v29 = vmul.f32 %v11540_v49, %v11540_v49 }
 0x418   :  { %11536 = vst [vmem:[#allocation192_spill] sm:$0xff] %v8972_v8  ;;  %v3770_v42 = vadd.f32 %v3769_v57, %v3515_v40  ;;  %v3518_v28 = vmul.f32 %v11538_v54, %v11538_v54  ;;  %v6710_v57 = vld [vmem:[%s10973_s0 + $0x734] sm:$0xf0] }
 0x419   :  { %11533 = vst [vmem:[#allocation191_spill] sm:$0xff] %v8964_v56  ;;  %v3253_v55 = vadd.f32 %v3252_v46, %v11534_v27  ;;  %v2433_v11 = vpop.f32.mrf.mxu2  ;;  %v11543_v27 = vld [vmem:[#allocation118_spill] sm:$0xff] }
 0x41a   :  { %v3771_v41 = vadd.f32 %v3770_v42, %v3516_v24  ;;  %v3521_v3 = vmul.f32 %v11543_v27, %v11543_v27 }
 0x41b   :  { %v2835_v0 = vpop.f32.mrf.mxu1  ;;  %v3254_v13 = vadd.f32 %v3253_v55, %v11535_v2  ;;  %v6213_v55 = vld [vmem:[%s10973_s0 + $0x730] sm:$0xf] }
 0x41c   :  { %v3772_v46 = vadd.f32 %v3771_v41, %v3517_v47  ;;  %v6214_v42 = vor.u32 %v6710_v57, %v6213_v55  ;;  %v11544_v57 = vld [vmem:[#allocation120_spill] sm:$0xff] }
 0x41d   :  { %v3255_v52 = vadd.f32 %v3254_v13, %v11537_v37  ;;  %v3082_v18 = vpop.f32.mrf.mxu3  ;;  %v11542_v13 = vld [vmem:[#allocation116_spill] sm:$0xff] }
 0x41e   :  { %v2181_v35 = vpop.f32.mrf.mxu0  ;;  %v8984_v40 = vadd.f32 %v3082_v18, %v2433_v11  ;;  %v6215_v18 = vld [vmem:[%s10973_s0 + $0x738] sm:$0xf0]  ;;  %v3773_v47 = vadd.f32 %v3772_v46, %v3518_v28  ;;  %v3520_v41 = vmul.f32 %v11542_v13, %v11542_v13  ;;  %v3522_v28 = vmul.f32 %v11544_v57, %v11544_v57 }
 0x41f   :  { %v8980_v12 = vadd.f32 %v2830_v4, %v2181_v35  ;;  %v6709_v4 = vld [vmem:[%s10973_s0 + $0x734] sm:$0xf]  ;;  %v3256_v24 = vadd.f32 %v3255_v52, %v11538_v54 }
 0x420   :  { %11541 = vst [vmem:[#allocation194_spill] sm:$0xff] %v8984_v40  ;;  %v6218_v11 = vor.u32 %v6709_v4, %v6215_v18  ;;  %v3774_v2 = vadd.f32 %v3773_v47, %v3519_v29  ;;  %v11546_v29 = vld [vmem:[#allocation122_spill] sm:$0xff] }
 0x421   :  { %11539 = vst [vmem:[#allocation193_spill] sm:$0xff] %v8980_v12  ;;  %v3257_v37 = vadd.f32 %v3256_v24, %v11540_v49  ;;  %2475 = vmatmul.bf16.gmra.mxu2 %v6214_v42  ;;  %v3523_v18 = vmul.f32 %v11546_v29, %v11546_v29  ;;  %v11547_v49 = vld [vmem:[#allocation124_spill] sm:$0xff] }
 0x422   :  { %6466 = vmatmul.msk.bf16.gmra.mxu3 %vm1503_vm1, %v6218_v11  ;;  %v3775_v55 = vadd.f32 %v3774_v2, %v3520_v41 }
 0x423   :  { %v2837_v35 = vpop.f32.mrf.mxu1  ;;  %v3258_v52 = vadd.f32 %v3257_v37, %v11542_v13  ;;  %v3524_v37 = vmul.f32 %v11547_v49, %v11547_v49 }
 0x424   :  { %v2436_v54 = vpop.f32.mrf.mxu2  ;;  %v3776_v42 = vadd.f32 %v3775_v55, %v3521_v3 }
 0x425   :  { %v3259_v16 = vadd.f32 %v3258_v52, %v11543_v27  ;;  %v3085_v24 = vpop.f32.mrf.mxu3  ;;  %v11549_v52 = vld [vmem:[#allocation126_spill] sm:$0xff] }
 0x426   :  { %v2183_v46 = vpop.f32.mrf.mxu0  ;;  %v3777_v11 = vadd.f32 %v3776_v42, %v3522_v28  ;;  %v9017_v13 = vadd.f32 %v3085_v24, %v2436_v54  ;;  %v11552_v54 = vld [vmem:[#allocation130_spill] sm:$0xff] }
 0x427   :  { %v9009_v4 = vadd.f32 %v2832_v32, %v2183_v46  ;;  %v3260_v47 = vadd.f32 %v3259_v16, %v11544_v57  ;;  %v3525_v32 = vmul.f32 %v11549_v52, %v11549_v52  ;;  %v11550_v46 = vld [vmem:[#allocation128_spill] sm:$0xff]  ;;  %v3527_v24 = vmul.f32 %v11552_v54, %v11552_v54 }
 0x428   :  { %11548 = vst [vmem:[#allocation196_spill] sm:$0xff] %v9017_v13  ;;  %v3778_v6 = vadd.f32 %v3777_v11, %v3523_v18  ;;  %v3526_v27 = vmul.f32 %v11550_v46, %v11550_v46  ;;  %v6712_v11 = vld [vmem:[%s10973_s0 + $0x744] sm:$0xf0] }
 0x429   :  { %11545 = vst [vmem:[#allocation195_spill] sm:$0xff] %v9009_v4  ;;  %v3261_v41 = vadd.f32 %v3260_v47, %v11546_v29  ;;  %v11555_v29 = vld [vmem:[#allocation134_spill] sm:$0xff] }
 0x42a   :  { %v3779_v55 = vadd.f32 %v3778_v6, %v3524_v37  ;;  %v6221_v6 = vld [vmem:[%s10973_s0 + $0x740] sm:$0xf]  ;;  %v3529_v58 = vmul.f32 %v11555_v29, %v11555_v29 }
 0x42b   :  { %v2840_v2 = vpop.f32.mrf.mxu1  ;;  %v3262_v3 = vadd.f32 %v3261_v41, %v11547_v49  ;;  %v6222_v41 = vor.u32 %v6712_v11, %v6221_v6  ;;  %v11556_v11 = vld [vmem:[#allocation136_spill] sm:$0xff] }
 0x42c   :  { %v2438_v28 = vpop.f32.mrf.mxu2  ;;  %v3780_v47 = vadd.f32 %v3779_v55, %v3525_v32 }
 0x42d   :  { %v3263_v42 = vadd.f32 %v3262_v3, %v11549_v52  ;;  %v3087_v63 = vpop.f32.mrf.mxu3  ;;  %v11554_v3 = vld [vmem:[#allocation132_spill] sm:$0xff] }
 0x42e   :  { %v2186_v16 = vpop.f32.mrf.mxu0  ;;  %v9029_v18 = vadd.f32 %v3087_v63, %v2438_v28  ;;  %v6223_v63 = vld [vmem:[%s10973_s0 + $0x748] sm:$0xf0]  ;;  %v3781_v32 = vadd.f32 %v3780_v47, %v3526_v27  ;;  %v3528_v55 = vmul.f32 %v11554_v3, %v11554_v3  ;;  %v3530_v27 = vmul.f32 %v11556_v11, %v11556_v11 }
 0x42f   :  { %v9025_v57 = vadd.f32 %v2835_v0, %v2186_v16  ;;  %v6711_v0 = vld [vmem:[%s10973_s0 + $0x744] sm:$0xf]  ;;  %v3264_v37 = vadd.f32 %v3263_v42, %v11550_v46 }
 0x430   :  { %11553 = vst [vmem:[#allocation198_spill] sm:$0xff] %v9029_v18  ;;  %v6226_v28 = vor.u32 %v6711_v0, %v6223_v63  ;;  %v3782_v49 = vadd.f32 %v3781_v32, %v3527_v24  ;;  %v11558_v24 = vld [vmem:[#allocation138_spill] sm:$0xff] }
 0x431   :  { %11551 = vst [vmem:[#allocation197_spill] sm:$0xff] %v9025_v57  ;;  %v3265_v52 = vadd.f32 %v3264_v37, %v11552_v54  ;;  %2480 = vmatmul.bf16.gmra.mxu2 %v6222_v41  ;;  %v3531_v63 = vmul.f32 %v11558_v24, %v11558_v24  ;;  %v11559_v54 = vld [vmem:[#allocation140_spill] sm:$0xff]  ;;  %v11572_v18 = vld [vmem:[#allocation158_spill] sm:$0xff] }
 0x432   :  { %6467 = vmatmul.msk.bf16.gmra.mxu3 %vm1503_vm1, %v6226_v28  ;;  %v3783_v6 = vadd.f32 %v3782_v49, %v3528_v55  ;;  %v3532_v49 = vmul.f32 %v11559_v54, %v11559_v54 }
 0x433   :  { %v9046_v16 = vpop.f32.mrf.mxu1  ;;  %v3266_v42 = vadd.f32 %v3265_v52, %v11554_v3 }
 0x434   :  { %v2441_v46 = vpop.f32.mrf.mxu2  ;;  %v3784_v41 = vadd.f32 %v3783_v6, %v3529_v58 }
 0x435   :  { %v3267_v22 = vadd.f32 %v3266_v42, %v11555_v29  ;;  %v3090_v37 = vpop.f32.mrf.mxu3  ;;  %v11562_v29 = vld [vmem:[#allocation144_spill] sm:$0xff] }
 0x436   :  { %v2188_v47 = vpop.f32.mrf.mxu0  ;;  %v3785_v28 = vadd.f32 %v3784_v41, %v3530_v27  ;;  %v9066_v3 = vadd.f32 %v3090_v37, %v2441_v46  ;;  %v11564_v46 = vld [vmem:[#allocation146_spill] sm:$0xff] }
 0x437   :  { %v9056_v0 = vadd.f32 %v2837_v35, %v2188_v47  ;;  %v3268_v32 = vadd.f32 %v3267_v22, %v11556_v11  ;;  %v11561_v35 = vld [vmem:[#allocation142_spill] sm:$0xff]  ;;  %v3534_v22 = vmul.f32 %v11562_v29, %v11562_v29  ;;  %v3535_v37 = vmul.f32 %v11564_v46, %v11564_v46 }
 0x438   :  { %11560 = vst [vmem:[#allocation200_spill] sm:$0xff] %v9066_v3  ;;  %v3786_v42 = vadd.f32 %v3785_v28, %v3531_v63  ;;  %v3533_v47 = vmul.f32 %v11561_v35, %v11561_v35  ;;  %v6229_v28 = vld [vmem:[%s10973_s0 + $0x750] sm:$0xf] }
 0x439   :  { %11557 = vst [vmem:[#allocation199_spill] sm:$0xff] %v9056_v0  ;;  %v3269_v55 = vadd.f32 %v3268_v32, %v11558_v24  ;;  %v11567_v24 = vld [vmem:[#allocation150_spill] sm:$0xff] }
 0x43a   :  { %v3787_v6 = vadd.f32 %v3786_v42, %v3532_v49  ;;  %v6714_v49 = vld [vmem:[%s10973_s0 + $0x754] sm:$0xf0] }
 0x43b   :  { %v9063_v52 = vpop.f32.mrf.mxu1  ;;  %v3270_v58 = vadd.f32 %v3269_v55, %v11559_v54  ;;  %v6230_v42 = vor.u32 %v6714_v49, %v6229_v28  ;;  %v11568_v49 = vld [vmem:[#allocation152_spill] sm:$0xff] }
 0x43c   :  { %v2443_v41 = vpop.f32.mrf.mxu2  ;;  %v3788_v32 = vadd.f32 %v3787_v6, %v3533_v47 }
 0x43d   :  { %v3271_v11 = vadd.f32 %v3270_v58, %v11561_v35  ;;  %v3092_v10 = vpop.f32.mrf.mxu3  ;;  %v11566_v58 = vld [vmem:[#allocation148_spill] sm:$0xff] }
 0x43e   :  { %v2191_v27 = vpop.f32.mrf.mxu0  ;;  %v9078_v63 = vadd.f32 %v3092_v10, %v2443_v41  ;;  %v6231_v10 = vld [vmem:[%s10973_s0 + $0x758] sm:$0xf0]  ;;  %v3789_v47 = vadd.f32 %v3788_v32, %v3534_v22  ;;  %v3536_v6 = vmul.f32 %v11566_v58, %v11566_v58  ;;  %v3538_v22 = vmul.f32 %v11568_v49, %v11568_v49 }
 0x43f   :  { %v9074_v15 = vadd.f32 %v2840_v2, %v2191_v27  ;;  %v6713_v2 = vld [vmem:[%s10973_s0 + $0x754] sm:$0xf]  ;;  %v3272_v55 = vadd.f32 %v3271_v11, %v11562_v29 }
 0x440   :  { %11565 = vst [vmem:[#allocation202_spill] sm:$0xff] %v9078_v63  ;;  %v6234_v41 = vor.u32 %v6713_v2, %v6231_v10  ;;  %v3790_v54 = vadd.f32 %v3789_v47, %v3535_v37  ;;  %v3537_v63 = vmul.f32 %v11567_v24, %v11567_v24 }
 0x441   :  { %11563 = vst [vmem:[#allocation201_spill] sm:$0xff] %v9074_v15  ;;  %v3273_v35 = vadd.f32 %v3272_v55, %v11564_v46  ;;  %2485 = vmatmul.bf16.gmra.mxu2 %v6230_v42  ;;  %v11569_v42 = vld [vmem:[#allocation154_spill] sm:$0xff] }
 0x442   :  { %6468 = vmatmul.msk.bf16.gmra.mxu3 %vm1503_vm1, %v6234_v41  ;;  %v3791_v28 = vadd.f32 %v3790_v54, %v3536_v6  ;;  %v3539_v37 = vmul.f32 %v11569_v42, %v11569_v42  ;;  %v11570_v41 = vld [vmem:[#allocation156_spill] sm:$0xff] }
 0x443   :  { %v9095_v27 = vpop.f32.mrf.mxu1  ;;  %v3274_v11 = vadd.f32 %v3273_v35, %v11566_v58  ;;  %v3540_v35 = vmul.f32 %v11570_v41, %v11570_v41 }
 0x444   :  { %v2446_v29 = vpop.f32.mrf.mxu2  ;;  %v3792_v55 = vadd.f32 %v3791_v28, %v3537_v63 }
 0x445   :  { %v3275_v2 = vadd.f32 %v3274_v11, %v11567_v24  ;;  %v3095_v10 = vpop.f32.mrf.mxu3  ;;  %v3541_v11 = vmul.f32 %v11572_v18, %v11572_v18  ;;  %v11573_v24 = vld [vmem:[#allocation160_spill] sm:$0xff] }
 0x446   :  { %v9104_v32 = vpop.f32.mrf.mxu0  ;;  %v3793_v46 = vadd.f32 %v3792_v55, %v3538_v22  ;;  %v9115_v58 = vadd.f32 %v3095_v10, %v2446_v29  ;;  %v6237_v10 = vld [vmem:[%s10973_s0 + $0x760] sm:$0xf] }
 0x447   :  { %v3276_v47 = vadd.f32 %v3275_v2, %v11568_v49  ;;  %v3542_v2 = vmul.f32 %v11573_v24, %v11573_v24 }
 0x448   :  { %11571 = vst [vmem:[#allocation203_spill] sm:$0xff] %v9115_v58  ;;  %v3794_v3 = vadd.f32 %v3793_v46, %v3539_v37  ;;  %v6715_v37 = vld [vmem:[%s10973_s0 + $0x764] sm:$0xf] }
 0x449   :  { %v3277_v6 = vadd.f32 %v3276_v47, %v11569_v42  ;;  %v11574_v47 = vld [vmem:[#allocation162_spill] sm:$0xff] }
 0x44a   :  { %v3795_v28 = vadd.f32 %v3794_v3, %v3540_v35  ;;  %v3543_v29 = vmul.f32 %v11574_v47, %v11574_v47  ;;  %v6716_v3 = vld [vmem:[%s10973_s0 + $0x764] sm:$0xf0] }
 0x44b   :  { %v9112_v54 = vpop.f32.mrf.mxu1  ;;  %v3278_v63 = vadd.f32 %v3277_v6, %v11570_v41  ;;  %v6238_v6 = vor.u32 %v6716_v3, %v6237_v10  ;;  %v11578_v3 = vld [vmem:[#allocation168_spill] sm:$0xff] }
 0x44c   :  { %v2448_v55 = vpop.f32.mrf.mxu2  ;;  %v3796_v40 = vadd.f32 %v3795_v28, %v3541_v11 }
 0x44d   :  { %v3279_v49 = vadd.f32 %v3278_v63, %v11572_v18  ;;  %v3097_v13 = vpop.f32.mrf.mxu3  ;;  %v11576_v63 = vld [vmem:[#allocation164_spill] sm:$0xff] }
 0x44e   :  { %v9122_v22 = vpop.f32.mrf.mxu0  ;;  %v9127_v46 = vadd.f32 %v3097_v13, %v2448_v55  ;;  %v6239_v13 = vld [vmem:[%s10973_s0 + $0x768] sm:$0xf0]  ;;  %v3797_v11 = vadd.f32 %v3796_v40, %v3542_v2  ;;  %v3544_v28 = vmul.f32 %v11576_v63, %v11576_v63  ;;  %v3546_v40 = vmul.f32 %v11578_v3, %v11578_v3 }
 0x44f   :  { %v3280_v35 = vadd.f32 %v3279_v49, %v11573_v24  ;;  %v6242_v18 = vor.u32 %v6715_v37, %v6239_v13 }
 0x450   :  { %11575 = vst [vmem:[#allocation204_spill] sm:$0xff] %v9127_v46  ;;  %v3798_v42 = vadd.f32 %v3797_v11, %v3543_v29  ;;  %v11577_v46 = vld [vmem:[#allocation166_spill] sm:$0xff]  ;;  %v3547_v29 = vmul.f32 %v8489_v31, %v8489_v31 }
 0x451   :  { %v3281_v41 = vadd.f32 %v3280_v35, %v11574_v47  ;;  %2490 = vmatmul.bf16.gmra.mxu2 %v6238_v6  ;;  %v3545_v58 = vmul.f32 %v11577_v46, %v11577_v46 }
 0x452   :  { %6469 = vmatmul.msk.bf16.gmra.mxu3 %vm1503_vm1, %v6242_v18  ;;  %v3799_v10 = vadd.f32 %v3798_v42, %v3544_v28  ;;  %v3548_v18 = vmul.f32 %v8526_v25, %v8526_v25 }
 0x453   :  { %v9144_v55 = vpop.f32.mrf.mxu1  ;;  %v3282_v49 = vadd.f32 %v3281_v41, %v11576_v63 }
 0x454   :  { %v2451_v24 = vpop.f32.mrf.mxu2  ;;  %v3800_v35 = vadd.f32 %v3799_v10, %v3545_v58 }
 0x455   :  { %v3283_v37 = vadd.f32 %v3282_v49, %v11577_v46  ;;  %v3100_v13 = vpop.f32.mrf.mxu3  ;;  %v3549_v49 = vmul.f32 %v8552_v20, %v8552_v20 }
 0x456   :  { %v9153_v2 = vpop.f32.mrf.mxu0  ;;  %v3801_v11 = vadd.f32 %v3800_v35, %v3546_v40  ;;  %v9164_v28 = vadd.f32 %v3100_v13, %v2451_v24  ;;  %v3551_v24 = vmul.f32 %v8616_v7, %v8616_v7 }
 0x457   :  { %v3284_v6 = vadd.f32 %v3283_v37, %v11578_v3  ;;  %v3550_v37 = vmul.f32 %v8590_v53, %v8590_v53 }
 0x458   :  { %11579 = vst [vmem:[#allocation205_spill] sm:$0xff] %v9164_v28  ;;  %v3802_v63 = vadd.f32 %v3801_v11, %v3547_v29  ;;  %v6245_v29 = vld [vmem:[%s10973_s0 + $0x770] sm:$0xf] }
 0x459   :  { %v3285_v41 = vadd.f32 %v3284_v6, %v8489_v31  ;;  %v6717_v6 = vld [vmem:[%s10973_s0 + $0x774] sm:$0xf] }
 0x45a   :  { %v3803_v10 = vadd.f32 %v3802_v63, %v3548_v18  ;;  %v6718_v63 = vld [vmem:[%s10973_s0 + $0x774] sm:$0xf0] }
 0x45b   :  { %v9161_v42 = vpop.f32.mrf.mxu1  ;;  %v3286_v58 = vadd.f32 %v3285_v41, %v8526_v25  ;;  %v6246_v18 = vor.u32 %v6718_v63, %v6245_v29  ;;  %v3553_v25 = vmul.f32 %v8680_v5, %v8680_v5 }
 0x45c   :  { %v2453_v35 = vpop.f32.mrf.mxu2  ;;  %v3804_v47 = vadd.f32 %v3803_v10, %v3549_v49  ;;  %v3552_v49 = vmul.f32 %v8654_v59, %v8654_v59 }
 0x45d   :  { %v3287_v3 = vadd.f32 %v3286_v58, %v8552_v20  ;;  %v3102_v46 = vpop.f32.mrf.mxu3 }
 0x45e   :  { %v9171_v40 = vpop.f32.mrf.mxu0  ;;  %v9176_v13 = vadd.f32 %v3102_v46, %v2453_v35  ;;  %v6247_v46 = vld [vmem:[%s10973_s0 + $0x778] sm:$0xf0]  ;;  %v3805_v41 = vadd.f32 %v3804_v47, %v3550_v37  ;;  %v3554_v47 = vmul.f32 %v8718_v30, %v8718_v30 }
 0x45f   :  { %v3288_v11 = vadd.f32 %v3287_v3, %v8590_v53  ;;  %v6250_v10 = vor.u32 %v6717_v6, %v6247_v46 }
 0x460   :  { %11580 = vst [vmem:[#allocation206_spill] sm:$0xff] %v9176_v13  ;;  %v3806_v20 = vadd.f32 %v3805_v41, %v3551_v24  ;;  %v3555_v24 = vmul.f32 %v8744_v51, %v8744_v51 }
 0x461   :  { %v3289_v35 = vadd.f32 %v3288_v11, %v8616_v7  ;;  %2495 = vmatmul.bf16.gmra.mxu2 %v6246_v18 }
 0x462   :  { %6470 = vmatmul.msk.bf16.gmra.mxu3 %vm1503_vm1, %v6250_v10  ;;  %v3807_v29 = vadd.f32 %v3806_v20, %v3552_v49  ;;  %v3556_v10 = vmul.f32 %v8782_v43, %v8782_v43 }
 0x463   :  { %v9193_v58 = vpop.f32.mrf.mxu1  ;;  %v3290_v3 = vadd.f32 %v3289_v35, %v8654_v59 }
 0x464   :  { %v2456_v63 = vpop.f32.mrf.mxu2  ;;  %v3808_v11 = vadd.f32 %v3807_v29, %v3553_v25 }
 0x465   :  { %v3291_v6 = vadd.f32 %v3290_v3, %v8680_v5  ;;  %v3105_v46 = vpop.f32.mrf.mxu3  ;;  %v3557_v3 = vmul.f32 %v8808_v34, %v8808_v34 }
 0x466   :  { %v9202_v37 = vpop.f32.mrf.mxu0  ;;  %v3809_v41 = vadd.f32 %v3808_v11, %v3554_v47  ;;  %v9213_v35 = vadd.f32 %v3105_v46, %v2456_v63  ;;  %v3559_v63 = vmul.f32 %v8872_v62, %v8872_v62 }
 0x467   :  { %v3292_v18 = vadd.f32 %v3291_v6, %v8718_v30  ;;  %v3558_v6 = vmul.f32 %v8846_v17, %v8846_v17 }
 0x468   :  { %v3810_v59 = vadd.f32 %v3809_v41, %v3555_v24  ;;  %v6253_v24 = vld [vmem:[%s10973_s0 + $0x780] sm:$0xf] }
 0x469   :  { %v3293_v49 = vadd.f32 %v3292_v18, %v8744_v51  ;;  %v6719_v18 = vld [vmem:[%s10973_s0 + $0x784] sm:$0xf] }
 0x46a   :  { %v3811_v29 = vadd.f32 %v3810_v59, %v3556_v10  ;;  %v6720_v59 = vld [vmem:[%s10973_s0 + $0x784] sm:$0xf0] }
 0x46b   :  { %v9210_v20 = vpop.f32.mrf.mxu1  ;;  %v3294_v25 = vadd.f32 %v3293_v49, %v8782_v43  ;;  %v6254_v10 = vor.u32 %v6720_v59, %v6253_v24  ;;  %v3561_v43 = vmul.f32 %v8934_v61, %v8934_v61 }
 0x46c   :  { %v2458_v11 = vpop.f32.mrf.mxu2  ;;  %v3812_v7 = vadd.f32 %v3811_v29, %v3557_v3  ;;  %v3560_v3 = vmul.f32 %v8910_v48, %v8910_v48 }
 0x46d   :  { %v3295_v30 = vadd.f32 %v3294_v25, %v8808_v34  ;;  %v3107_v5 = vpop.f32.mrf.mxu3 }
 0x46e   :  { %v9220_v47 = vpop.f32.mrf.mxu0  ;;  %v9225_v46 = vadd.f32 %v3107_v5, %v2458_v11  ;;  %v6255_v5 = vld [vmem:[%s10973_s0 + $0x788] sm:$0xf0]  ;;  %v3813_v49 = vadd.f32 %v3812_v7, %v3558_v6  ;;  %v3562_v7 = vmul.f32 %v8964_v56, %v8964_v56 }
 0x46f   :  { %v3296_v41 = vadd.f32 %v3295_v30, %v8846_v17  ;;  %v6258_v29 = vor.u32 %v6719_v18, %v6255_v5 }
 0x470   :  { %v3814_v34 = vadd.f32 %v3813_v49, %v3559_v63  ;;  %v3563_v63 = vmul.f32 %v8980_v12, %v8980_v12  ;;  %v3564_v49 = vmul.f32 %v9009_v4, %v9009_v4 }
 0x471   :  { %v3297_v11 = vadd.f32 %v3296_v41, %v8872_v62  ;;  %2500 = vmatmul.bf16.gmra.mxu2 %v6254_v10 }
 0x472   :  { %6471 = vmatmul.msk.bf16.gmra.mxu3 %vm1503_vm1, %v6258_v29  ;;  %v3815_v24 = vadd.f32 %v3814_v34, %v3560_v3 }
 0x473   :  { %v9242_v25 = vpop.f32.mrf.mxu1  ;;  %v3298_v30 = vadd.f32 %v3297_v11, %v8910_v48  ;;  %v3565_v11 = vmul.f32 %v9025_v57, %v9025_v57  ;;  %v11660_v48 = vld [vmem:[#allocation155_spill] sm:$0xff] }
 0x474   :  { %v2461_v59 = vpop.f32.mrf.mxu2  ;;  %v3816_v5 = vadd.f32 %v3815_v24, %v3561_v43  ;;  %v3566_v24 = vmul.f32 %v9056_v0, %v9056_v0 }
 0x475   :  { %v3299_v17 = vadd.f32 %v3298_v30, %v8934_v61  ;;  %v3110_v18 = vpop.f32.mrf.mxu3 }
 0x476   :  { %v2208_v6 = vpop.f32.mrf.mxu0  ;;  %v3817_v10 = vadd.f32 %v3816_v5, %v3562_v7  ;;  %v9270_v61 = vadd.f32 %v3110_v18, %v2461_v59  ;;  %v6721_v59 = vld [vmem:[%s10973_s0 + $0x794] sm:$0xf] }
 0x477   :  { %v3300_v41 = vadd.f32 %v3299_v17, %v8964_v56  ;;  %v9267_v17 = vadd.f32 %v9046_v16, %v9104_v32  ;;  %v6261_v16 = vld [vmem:[%s10973_s0 + $0x790] sm:$0xf]  ;;  %v6722_v32 = vld [vmem:[%s10973_s0 + $0x794] sm:$0xf0] }
 0x478   :  { %v3818_v3 = vadd.f32 %v3817_v10, %v3563_v63  ;;  %v3567_v10 = vmul.f32 %v9074_v15, %v9074_v15 }
 0x479   :  { %v3301_v34 = vadd.f32 %v3300_v41, %v8980_v12  ;;  %11581 = vst [vmem:[#allocation207_spill] sm:$0xff] %v9267_v17 }
 0x47a   :  { %v3819_v43 = vadd.f32 %v3818_v3, %v3564_v49  ;;  %v9276_v49 = vadd.f32 %v9063_v52, %v9122_v22  ;;  %v6262_v3 = vor.u32 %v6722_v32, %v6261_v16  ;;  %v6263_v52 = vld [vmem:[%s10973_s0 + $0x798] sm:$0xf0]  ;;  %v9304_v16 = vadd.f32 %v9112_v54, %v9171_v40 }
 0x47b   :  { %v9257_v29 = vpop.f32.mrf.mxu1  ;;  %v3302_v30 = vadd.f32 %v3301_v34, %v9009_v4  ;;  %v9319_v40 = vadd.f32 %v9161_v42, %v9220_v47  ;;  %v11652_v4 = vld [vmem:[#allocation139_spill] sm:$0xff] }
 0x47c   :  { %v2463_v5 = vpop.f32.mrf.mxu2  ;;  %v3820_v41 = vadd.f32 %v3819_v43, %v3565_v11  ;;  %11582 = vst [vmem:[#allocation208_spill] sm:$0xff] %v9276_v49  ;;  %v3568_v11 = vmul.f32 %v9267_v17, %v9267_v17  ;;  %v3571_v54 = vmul.f32 %v9304_v16, %v9304_v16 }
 0x47d   :  { %v3303_v56 = vadd.f32 %v3302_v30, %v9025_v57  ;;  %v3112_v63 = vpop.f32.mrf.mxu3  ;;  %v9297_v30 = vadd.f32 %v9095_v27, %v9153_v2  ;;  %11584 = vst [vmem:[#allocation210_spill] sm:$0xff] %v9304_v16  ;;  %v9312_v2 = vadd.f32 %v9144_v55, %v9202_v37 }
 0x47e   :  { %v2211_v7 = vpop.f32.mrf.mxu0  ;;  %v9278_v34 = vadd.f32 %v3112_v63, %v2463_v5  ;;  %v3821_v22 = vadd.f32 %v3820_v41, %v3566_v24  ;;  %v6266_v5 = vor.u32 %v6721_v59, %v6263_v52  ;;  %11586 = vst [vmem:[#allocation212_spill] sm:$0xff] %v9319_v40 }
 0x47f   :  { %v3304_v18 = vadd.f32 %v3303_v56, %v9056_v0  ;;  %11583 = vst [vmem:[#allocation209_spill] sm:$0xff] %v9297_v30  ;;  %v3569_v56 = vmul.f32 %v9276_v49, %v9276_v49  ;;  %v3570_v27 = vmul.f32 %v9297_v30, %v9297_v30  ;;  %v3572_v55 = vmul.f32 %v9312_v2, %v9312_v2 }
 0x480   :  { %v3822_v57 = vadd.f32 %v3821_v22, %v3567_v10  ;;  %11585 = vst [vmem:[#allocation211_spill] sm:$0xff] %v9312_v2  ;;  %v9326_v22 = vadd.f32 %v9193_v58, %v2208_v6  ;;  %v9332_v42 = vadd.f32 %v9210_v20, %v2211_v7  ;;  %v6269_v20 = vld [vmem:[%s10973_s0 + $0x7a0] sm:$0xf]  ;;  %v6724_v7 = vld [vmem:[%s10973_s0 + $0x7a4] sm:$0xf0] }
 0x481   :  { %v3305_v63 = vadd.f32 %v3304_v18, %v9074_v15  ;;  %2505 = vmatmul.bf16.gmra.mxu2 %v6262_v3  ;;  %v11644_v15 = vld [vmem:[#allocation123_spill] sm:$0xff] }
 0x482   :  { %6472 = vmatmul.msk.bf16.gmra.mxu3 %vm1503_vm1, %v6266_v5  ;;  %v3823_v41 = vadd.f32 %v3822_v57, %v3568_v11  ;;  %11587 = vst [vmem:[#allocation213_spill] sm:$0xff] %v9326_v22 }
 0x483   :  { %v2867_v43 = vpop.f32.mrf.mxu1  ;;  %v3306_v24 = vadd.f32 %v3305_v63, %v9267_v17  ;;  %v3573_v63 = vmul.f32 %v9319_v40, %v9319_v40  ;;  %11588 = vst [vmem:[#allocation214_spill] sm:$0xff] %v9332_v42 }
 0x484   :  { %v2466_v32 = vpop.f32.mrf.mxu2  ;;  %v3824_v3 = vadd.f32 %v3823_v41, %v3569_v56 }
 0x485   :  { %v3307_v59 = vadd.f32 %v3306_v24, %v9276_v49  ;;  %v3115_v18 = vpop.f32.mrf.mxu3  ;;  %v11637_v49 = vld [vmem:[#allocation111_spill] sm:$0xff] }
 0x486   :  { %v2213_v10 = vpop.f32.mrf.mxu0  ;;  %v3825_v52 = vadd.f32 %v3824_v3, %v3570_v27  ;;  %v9340_v6 = vadd.f32 %v3115_v18, %v2466_v32  ;;  %v6270_v18 = vor.u32 %v6724_v7, %v6269_v20  ;;  %v11591_v7 = vld [vmem:[#allocation32_spill] sm:$0xff] }
 0x487   :  { %v3308_v57 = vadd.f32 %v3307_v59, %v9297_v30  ;;  %v3574_v59 = vmul.f32 %v9326_v22, %v9326_v22  ;;  %v9338_v58 = vadd.f32 %v9242_v25, %v2213_v10  ;;  %v3575_v10 = vmul.f32 %v9332_v42, %v9332_v42 }
 0x488   :  { %v3826_v5 = vadd.f32 %v3825_v52, %v3571_v54  ;;  %v6723_v52 = vld [vmem:[%s10973_s0 + $0x7a4] sm:$0xf] }
 0x489   :  { %v3309_v37 = vadd.f32 %v3308_v57, %v9304_v16  ;;  %11589 = vst [vmem:[#allocation215_spill] sm:$0xff] %v9338_v58  ;;  %v11628_v16 = vld [vmem:[#allocation95_spill] sm:$0xff] }
 0x48a   :  { %v3827_v47 = vadd.f32 %v3826_v5, %v3572_v55  ;;  %v6271_v55 = vld [vmem:[%s10973_s0 + $0x7a8] sm:$0xf0] }
 0x48b   :  { %v2870_v11 = vpop.f32.mrf.mxu1  ;;  %v3310_v56 = vadd.f32 %v3309_v37, %v9312_v2  ;;  %v6274_v37 = vor.u32 %v6723_v52, %v6271_v55  ;;  %v11594_v55 = vld [vmem:[#allocation34_spill] sm:$0xff] }
 0x48c   :  { %v2468_v41 = vpop.f32.mrf.mxu2  ;;  %v3828_v54 = vadd.f32 %v3827_v47, %v3573_v63 }
 0x48d   :  { %v3311_v27 = vadd.f32 %v3310_v56, %v9319_v40  ;;  %v3117_v3 = vpop.f32.mrf.mxu3  ;;  %v3576_v56 = vmul.f32 %v9338_v58, %v9338_v58  ;;  %v11620_v40 = vld [vmem:[#allocation79_spill] sm:$0xff] }
 0x48e   :  { %v2216_v24 = vpop.f32.mrf.mxu0  ;;  %v9342_v57 = vadd.f32 %v3117_v3, %v2468_v41  ;;  %v3829_v5 = vadd.f32 %v3828_v54, %v3574_v59  ;;  %v9370_v59 = vadd.f32 %v2870_v11, %v11591_v7 }
 0x48f   :  { %v3312_v25 = vadd.f32 %v3311_v27, %v9326_v22  ;;  %v9357_v32 = vadd.f32 %v9257_v29, %v2216_v24 }
 0x490   :  { %v3830_v47 = vadd.f32 %v3829_v5, %v3575_v10  ;;  %11592 = vst [vmem:[#allocation32_spill] sm:$0xff] %v9370_v59 }
 0x491   :  { %11590 = vst [vmem:[#allocation216_spill] sm:$0xff] %v9357_v32  ;;  %v3313_v63 = vadd.f32 %v3312_v25, %v9332_v42  ;;  %2510 = vmatmul.bf16.gmra.mxu2 %v6270_v18  ;;  %v3577_v29 = vmul.f32 %v9357_v32, %v9357_v32  ;;  %v11611_v42 = vld [vmem:[#allocation63_spill] sm:$0xff] }
 0x492   :  { %6473 = vmatmul.msk.bf16.gmra.mxu3 %vm1503_vm1, %v6274_v37  ;;  %v3831_v20 = vadd.f32 %v3830_v47, %v3576_v56 }
 0x493   :  { %v3314_v41 = vadd.f32 %v3313_v63, %v9338_v58  ;;  %v2872_v24 = vpop.f32.mrf.mxu1  ;;  %v3579_v63 = vmul.f32 %v9370_v59, %v9370_v59 }
 0x494   :  { %v2471_v3 = vpop.f32.mrf.mxu2  ;;  %v3832_v18 = vadd.f32 %v3831_v20, %v3577_v29  ;;  %v9376_v10 = vadd.f32 %v2872_v24, %v11594_v55  ;;  %v11596_v24 = vld [vmem:[#allocation37_spill] sm:$0xff] }
 0x495   :  { %v3315_v54 = vadd.f32 %v3314_v41, %v9357_v32  ;;  %v3120_v25 = vpop.f32.mrf.mxu3  ;;  %v11601_v32 = vld [vmem:[#allocation47_spill] sm:$0xff] }
 0x496   :  { %v2218_v27 = vpop.f32.mrf.mxu0  ;;  %11595 = vst [vmem:[#allocation34_spill] sm:$0xff] %v9376_v10 }
 0x497   :  { %v9373_v52 = vadd.f32 %v2867_v43, %v2218_v27  ;;  %v3580_v43 = vmul.f32 %v9376_v10, %v9376_v10  ;;  %v3581_v27 = vmul.f32 %v11596_v24, %v11596_v24 }
 0x499   :  { %11593 = vst [vmem:[#allocation217_spill] sm:$0xff] %v9373_v52  ;;  %v3316_v37 = vadd.f32 %v3315_v54, %v9373_v52  ;;  %v3578_v5 = vmul.f32 %v9373_v52, %v9373_v52  ;;  %v9390_v54 = vadd.f32 %v3120_v25, %v2471_v3 }
 0x49b   :  { %v3317_v11 = vadd.f32 %v3316_v37, %v9370_v59  ;;  %v3833_v56 = vadd.f32 %v3832_v18, %v3578_v5  ;;  %v6277_v18 = vld [vmem:[%s10973_s0 + $0x7b0] sm:$0xf]  ;;  %v6726_v37 = vld [vmem:[%s10973_s0 + $0x7b4] sm:$0xf0]  ;;  %v6725_v5 = vld [vmem:[%s10973_s0 + $0x7b4] sm:$0xf] }
 0x49c   :  { %v2473_v29 = vpop.f32.mrf.mxu2 }
 0x49d   :  { %v3318_v47 = vadd.f32 %v3317_v11, %v9376_v10  ;;  %v3834_v41 = vadd.f32 %v3833_v56, %v3579_v63  ;;  %v3122_v55 = vpop.f32.mrf.mxu3  ;;  %v11597_v63 = vld [vmem:[#allocation39_spill] sm:$0xff]  ;;  %v6278_v56 = vor.u32 %v6726_v37, %v6277_v18  ;;  %v11600_v18 = vld [vmem:[#allocation45_spill] sm:$0xff] }
 0x49e   :  { %v9392_v52 = vadd.f32 %v3122_v55, %v2473_v29  ;;  %v3582_v11 = vmul.f32 %v11597_v63, %v11597_v63  ;;  %v11599_v10 = vld [vmem:[#allocation43_spill] sm:$0xff]  ;;  %v3585_v37 = vmul.f32 %v11600_v18, %v11600_v18 }
 0x49f   :  { %v3319_v20 = vadd.f32 %v3318_v47, %v11596_v24  ;;  %v3835_v7 = vadd.f32 %v3834_v41, %v3580_v43  ;;  %v6279_v43 = vld [vmem:[%s10973_s0 + $0x7b8] sm:$0xf0]  ;;  %v11598_v41 = vld [vmem:[#allocation41_spill] sm:$0xff]  ;;  %v3584_v59 = vmul.f32 %v11599_v10, %v11599_v10 }
 0x4a0   :  { %v6282_v47 = vor.u32 %v6725_v5, %v6279_v43  ;;  %v3583_v29 = vmul.f32 %v11598_v41, %v11598_v41 }
 0x4a1   :  { %v3320_v3 = vadd.f32 %v3319_v20, %v11597_v63  ;;  %v3836_v25 = vadd.f32 %v3835_v7, %v3581_v27  ;;  %2515 = vmatmul.bf16.gmra.mxu2 %v6278_v56  ;;  %v11602_v56 = vld [vmem:[#allocation49_spill] sm:$0xff] }
 0x4a2   :  { %6474 = vmatmul.msk.bf16.gmra.mxu3 %vm1503_vm1, %v6282_v47  ;;  %v3587_v47 = vmul.f32 %v11602_v56, %v11602_v56 }
 0x4a3   :  { %v3321_v55 = vadd.f32 %v3320_v3, %v11598_v41  ;;  %v3837_v24 = vadd.f32 %v3836_v25, %v3582_v11  ;;  %v3586_v11 = vmul.f32 %v11601_v32, %v11601_v32 }
 0x4a4   :  { %v2476_v7 = vpop.f32.mrf.mxu2 }
 0x4a5   :  { %v3322_v27 = vadd.f32 %v3321_v55, %v11599_v10  ;;  %v3838_v20 = vadd.f32 %v3837_v24, %v3583_v29  ;;  %v3125_v63 = vpop.f32.mrf.mxu3  ;;  %v11603_v29 = vld [vmem:[#allocation51_spill] sm:$0xff] }
 0x4a6   :  { %v3588_v10 = vmul.f32 %v11603_v29, %v11603_v29 }
 0x4a7   :  { %v3323_v5 = vadd.f32 %v3322_v27, %v11600_v18  ;;  %v3839_v43 = vadd.f32 %v3838_v20, %v3584_v59  ;;  %v11604_v20 = vld [vmem:[#allocation53_spill] sm:$0xff] }
 0x4a8   :  { %v3589_v18 = vmul.f32 %v11604_v20, %v11604_v20 }
 0x4a9   :  { %v3324_v3 = vadd.f32 %v3323_v5, %v11601_v32  ;;  %v3840_v25 = vadd.f32 %v3839_v43, %v3585_v37  ;;  %v9431_v37 = vadd.f32 %v3125_v63, %v2476_v7 }
 0x4ab   :  { %v3325_v55 = vadd.f32 %v3324_v3, %v11602_v56  ;;  %v3841_v24 = vadd.f32 %v3840_v25, %v3586_v11  ;;  %11605 = vst [vmem:[#allocation218_spill] sm:$0xff] %v9431_v37  ;;  %v6285_v11 = vld [vmem:[%s10973_s0 + $0x7c0] sm:$0xf]  ;;  %v6728_v3 = vld [vmem:[%s10973_s0 + $0x7c4] sm:$0xf0] }
 0x4ac   :  { %v2478_v59 = vpop.f32.mrf.mxu2  ;;  %v6727_v25 = vld [vmem:[%s10973_s0 + $0x7c4] sm:$0xf]  ;;  %v6286_v7 = vor.u32 %v6728_v3, %v6285_v11 }
 0x4ad   :  { %v3326_v41 = vadd.f32 %v3325_v55, %v11603_v29  ;;  %v3842_v27 = vadd.f32 %v3841_v24, %v3587_v47  ;;  %v3127_v43 = vpop.f32.mrf.mxu3  ;;  %v11607_v47 = vld [vmem:[#allocation55_spill] sm:$0xff]  ;;  %v6287_v55 = vld [vmem:[%s10973_s0 + $0x7c8] sm:$0xf0]  ;;  %v11610_v11 = vld [vmem:[#allocation61_spill] sm:$0xff] }
 0x4ae   :  { %v9433_v32 = vadd.f32 %v3127_v43, %v2478_v59  ;;  %v6290_v24 = vor.u32 %v6727_v25, %v6287_v55  ;;  %v11609_v29 = vld [vmem:[#allocation59_spill] sm:$0xff]  ;;  %v3593_v3 = vmul.f32 %v11610_v11, %v11610_v11 }
 0x4af   :  { %v3327_v58 = vadd.f32 %v3326_v41, %v11604_v20  ;;  %v3843_v5 = vadd.f32 %v3842_v27, %v3588_v10  ;;  %v3590_v10 = vmul.f32 %v11607_v47, %v11607_v47  ;;  %v11608_v27 = vld [vmem:[#allocation57_spill] sm:$0xff]  ;;  %v3592_v56 = vmul.f32 %v11609_v29, %v11609_v29 }
 0x4b0   :  { %11606 = vst [vmem:[#allocation219_spill] sm:$0xff] %v9433_v32  ;;  %v3591_v59 = vmul.f32 %v11608_v27, %v11608_v27 }
 0x4b1   :  { %v3328_v63 = vadd.f32 %v3327_v58, %v11607_v47  ;;  %v3844_v41 = vadd.f32 %v3843_v5, %v3589_v18  ;;  %2520 = vmatmul.bf16.gmra.mxu2 %v6286_v7  ;;  %v11612_v7 = vld [vmem:[#allocation65_spill] sm:$0xff] }
 0x4b2   :  { %6475 = vmatmul.msk.bf16.gmra.mxu3 %vm1503_vm1, %v6290_v24  ;;  %v3595_v24 = vmul.f32 %v11612_v7, %v11612_v7 }
 0x4b3   :  { %v3329_v43 = vadd.f32 %v3328_v63, %v11608_v27  ;;  %v3845_v20 = vadd.f32 %v3844_v41, %v3590_v10  ;;  %v3594_v10 = vmul.f32 %v11611_v42, %v11611_v42 }
 0x4b4   :  { %v2481_v5 = vpop.f32.mrf.mxu2 }
 0x4b5   :  { %v3330_v58 = vadd.f32 %v3329_v43, %v11609_v29  ;;  %v3846_v18 = vadd.f32 %v3845_v20, %v3591_v59  ;;  %v3130_v47 = vpop.f32.mrf.mxu3  ;;  %v11613_v59 = vld [vmem:[#allocation67_spill] sm:$0xff] }
 0x4b6   :  { %v3596_v29 = vmul.f32 %v11613_v59, %v11613_v59 }
 0x4b7   :  { %v3331_v25 = vadd.f32 %v3330_v58, %v11610_v11  ;;  %v3847_v55 = vadd.f32 %v3846_v18, %v3592_v56  ;;  %v11614_v18 = vld [vmem:[#allocation69_spill] sm:$0xff] }
 0x4b8   :  { %v3597_v11 = vmul.f32 %v11614_v18, %v11614_v18 }
 0x4b9   :  { %v3332_v63 = vadd.f32 %v3331_v25, %v11611_v42  ;;  %v3848_v41 = vadd.f32 %v3847_v55, %v3593_v3  ;;  %v9472_v3 = vadd.f32 %v3130_v47, %v2481_v5 }
 0x4bb   :  { %v3333_v43 = vadd.f32 %v3332_v63, %v11612_v7  ;;  %v3849_v20 = vadd.f32 %v3848_v41, %v3594_v10  ;;  %v6293_v10 = vld [vmem:[%s10973_s0 + $0x7d0] sm:$0xf]  ;;  %v6730_v63 = vld [vmem:[%s10973_s0 + $0x7d4] sm:$0xf0]  ;;  %v6729_v41 = vld [vmem:[%s10973_s0 + $0x7d4] sm:$0xf] }
 0x4bc   :  { %v2483_v56 = vpop.f32.mrf.mxu2  ;;  %v6294_v5 = vor.u32 %v6730_v63, %v6293_v10  ;;  %v11619_v10 = vld [vmem:[#allocation77_spill] sm:$0xff] }
 0x4bd   :  { %v3334_v27 = vadd.f32 %v3333_v43, %v11613_v59  ;;  %v3850_v58 = vadd.f32 %v3849_v20, %v3595_v24  ;;  %v3132_v55 = vpop.f32.mrf.mxu3  ;;  %v11616_v24 = vld [vmem:[#allocation71_spill] sm:$0xff]  ;;  %v6295_v43 = vld [vmem:[%s10973_s0 + $0x7d8] sm:$0xf0]  ;;  %v3601_v63 = vmul.f32 %v11619_v10, %v11619_v10 }
 0x4be   :  { %v9474_v42 = vadd.f32 %v3132_v55, %v2483_v56  ;;  %v6298_v20 = vor.u32 %v6729_v41, %v6295_v43  ;;  %v11618_v59 = vld [vmem:[#allocation75_spill] sm:$0xff] }
 0x4bf   :  { %v3335_v22 = vadd.f32 %v3334_v27, %v11614_v18  ;;  %v3851_v25 = vadd.f32 %v3850_v58, %v3596_v29  ;;  %v3598_v29 = vmul.f32 %v11616_v24, %v11616_v24  ;;  %v11617_v58 = vld [vmem:[#allocation73_spill] sm:$0xff]  ;;  %v3600_v7 = vmul.f32 %v11618_v59, %v11618_v59 }
 0x4c0   :  { %11615 = vst [vmem:[#allocation220_spill] sm:$0xff] %v9474_v42  ;;  %v3599_v56 = vmul.f32 %v11617_v58, %v11617_v58 }
 0x4c1   :  { %v3336_v47 = vadd.f32 %v3335_v22, %v11616_v24  ;;  %v3852_v27 = vadd.f32 %v3851_v25, %v3597_v11  ;;  %2525 = vmatmul.bf16.gmra.mxu2 %v6294_v5  ;;  %v11621_v5 = vld [vmem:[#allocation81_spill] sm:$0xff] }
 0x4c2   :  { %6476 = vmatmul.msk.bf16.gmra.mxu3 %vm1503_vm1, %v6298_v20  ;;  %v3603_v20 = vmul.f32 %v11621_v5, %v11621_v5 }
 0x4c3   :  { %v3337_v55 = vadd.f32 %v3336_v47, %v11617_v58  ;;  %v3853_v18 = vadd.f32 %v3852_v27, %v3598_v29  ;;  %v3602_v29 = vmul.f32 %v11620_v40, %v11620_v40 }
 0x4c4   :  { %v2486_v25 = vpop.f32.mrf.mxu2 }
 0x4c5   :  { %v3338_v22 = vadd.f32 %v3337_v55, %v11618_v59  ;;  %v3854_v11 = vadd.f32 %v3853_v18, %v3599_v56  ;;  %v3135_v24 = vpop.f32.mrf.mxu3  ;;  %v11622_v56 = vld [vmem:[#allocation83_spill] sm:$0xff] }
 0x4c6   :  { %v3604_v59 = vmul.f32 %v11622_v56, %v11622_v56 }
 0x4c7   :  { %v3339_v41 = vadd.f32 %v3338_v22, %v11619_v10  ;;  %v3855_v43 = vadd.f32 %v3854_v11, %v3600_v7  ;;  %v11623_v11 = vld [vmem:[#allocation85_spill] sm:$0xff] }
 0x4c8   :  { %v3605_v10 = vmul.f32 %v11623_v11, %v11623_v11 }
 0x4c9   :  { %v3340_v47 = vadd.f32 %v3339_v41, %v11620_v40  ;;  %v3856_v27 = vadd.f32 %v3855_v43, %v3601_v63  ;;  %v9513_v63 = vadd.f32 %v3135_v24, %v2486_v25 }
 0x4cb   :  { %v3341_v55 = vadd.f32 %v3340_v47, %v11621_v5  ;;  %v3857_v18 = vadd.f32 %v3856_v27, %v3602_v29  ;;  %v6301_v29 = vld [vmem:[%s10973_s0 + $0x7e0] sm:$0xf]  ;;  %v6732_v47 = vld [vmem:[%s10973_s0 + $0x7e4] sm:$0xf0]  ;;  %v6731_v27 = vld [vmem:[%s10973_s0 + $0x7e4] sm:$0xf] }
 0x4cc   :  { %v2488_v7 = vpop.f32.mrf.mxu2  ;;  %v6302_v25 = vor.u32 %v6732_v47, %v6301_v29  ;;  %v11627_v29 = vld [vmem:[#allocation93_spill] sm:$0xff] }
 0x4cd   :  { %v3342_v58 = vadd.f32 %v3341_v55, %v11622_v56  ;;  %v3858_v22 = vadd.f32 %v3857_v18, %v3603_v20  ;;  %v3137_v43 = vpop.f32.mrf.mxu3  ;;  %v11624_v20 = vld [vmem:[#allocation87_spill] sm:$0xff]  ;;  %v6303_v55 = vld [vmem:[%s10973_s0 + $0x7e8] sm:$0xf0]  ;;  %v3609_v47 = vmul.f32 %v11627_v29, %v11627_v29 }
 0x4ce   :  { %v9515_v40 = vadd.f32 %v3137_v43, %v2488_v7  ;;  %v6306_v18 = vor.u32 %v6731_v27, %v6303_v55  ;;  %v11626_v56 = vld [vmem:[#allocation91_spill] sm:$0xff] }
 0x4cf   :  { %v3343_v2 = vadd.f32 %v3342_v58, %v11623_v11  ;;  %v3859_v41 = vadd.f32 %v3858_v22, %v3604_v59  ;;  %v3606_v59 = vmul.f32 %v11624_v20, %v11624_v20  ;;  %v11625_v22 = vld [vmem:[#allocation89_spill] sm:$0xff]  ;;  %v3608_v5 = vmul.f32 %v11626_v56, %v11626_v56 }
 0x4d0   :  { %v3607_v7 = vmul.f32 %v11625_v22, %v11625_v22 }
 0x4d1   :  { %v3344_v24 = vadd.f32 %v3343_v2, %v11624_v20  ;;  %v3860_v58 = vadd.f32 %v3859_v41, %v3605_v10  ;;  %2530 = vmatmul.bf16.gmra.mxu2 %v6302_v25  ;;  %v11629_v25 = vld [vmem:[#allocation97_spill] sm:$0xff] }
 0x4d2   :  { %6477 = vmatmul.msk.bf16.gmra.mxu3 %vm1503_vm1, %v6306_v18  ;;  %v3611_v18 = vmul.f32 %v11629_v25, %v11629_v25 }
 0x4d3   :  { %v3345_v43 = vadd.f32 %v3344_v24, %v11625_v22  ;;  %v3861_v11 = vadd.f32 %v3860_v58, %v3606_v59  ;;  %v3610_v59 = vmul.f32 %v11628_v16, %v11628_v16 }
 0x4d4   :  { %v2491_v41 = vpop.f32.mrf.mxu2 }
 0x4d5   :  { %v3346_v2 = vadd.f32 %v3345_v43, %v11626_v56  ;;  %v3862_v10 = vadd.f32 %v3861_v11, %v3607_v7  ;;  %v3140_v20 = vpop.f32.mrf.mxu3  ;;  %v11630_v7 = vld [vmem:[#allocation99_spill] sm:$0xff] }
 0x4d6   :  { %v3612_v56 = vmul.f32 %v11630_v7, %v11630_v7 }
 0x4d7   :  { %v3347_v27 = vadd.f32 %v3346_v2, %v11627_v29  ;;  %v3863_v55 = vadd.f32 %v3862_v10, %v3608_v5  ;;  %v11631_v10 = vld [vmem:[#allocation101_spill] sm:$0xff] }
 0x4d8   :  { %v3613_v29 = vmul.f32 %v11631_v10, %v11631_v10 }
 0x4d9   :  { %v3348_v24 = vadd.f32 %v3347_v27, %v11628_v16  ;;  %v3864_v58 = vadd.f32 %v3863_v55, %v3609_v47  ;;  %v9554_v47 = vadd.f32 %v3140_v20, %v2491_v41 }
 0x4db   :  { %v3349_v43 = vadd.f32 %v3348_v24, %v11629_v25  ;;  %v3865_v11 = vadd.f32 %v3864_v58, %v3610_v59  ;;  %11632 = vst [vmem:[#allocation221_spill] sm:$0xff] %v9554_v47  ;;  %v6309_v59 = vld [vmem:[%s10973_s0 + $0x7f0] sm:$0xf]  ;;  %v6734_v24 = vld [vmem:[%s10973_s0 + $0x7f4] sm:$0xf0] }
 0x4dc   :  { %v2493_v5 = vpop.f32.mrf.mxu2  ;;  %v6733_v58 = vld [vmem:[%s10973_s0 + $0x7f4] sm:$0xf]  ;;  %v6310_v41 = vor.u32 %v6734_v24, %v6309_v59  ;;  %v11636_v59 = vld [vmem:[#allocation109_spill] sm:$0xff] }
 0x4dd   :  { %v3350_v22 = vadd.f32 %v3349_v43, %v11630_v7  ;;  %v3866_v2 = vadd.f32 %v3865_v11, %v3611_v18  ;;  %v3142_v55 = vpop.f32.mrf.mxu3  ;;  %v11633_v18 = vld [vmem:[#allocation103_spill] sm:$0xff]  ;;  %v6311_v43 = vld [vmem:[%s10973_s0 + $0x7f8] sm:$0xf0]  ;;  %v3617_v24 = vmul.f32 %v11636_v59, %v11636_v59 }
 0x4de   :  { %v9556_v16 = vadd.f32 %v3142_v55, %v2493_v5  ;;  %v6314_v11 = vor.u32 %v6733_v58, %v6311_v43  ;;  %v11635_v7 = vld [vmem:[#allocation107_spill] sm:$0xff] }
 0x4df   :  { %v3351_v30 = vadd.f32 %v3350_v22, %v11631_v10  ;;  %v3867_v27 = vadd.f32 %v3866_v2, %v3612_v56  ;;  %v3614_v56 = vmul.f32 %v11633_v18, %v11633_v18  ;;  %v11634_v2 = vld [vmem:[#allocation105_spill] sm:$0xff]  ;;  %v3616_v25 = vmul.f32 %v11635_v7, %v11635_v7 }
 0x4e0   :  { %v3615_v5 = vmul.f32 %v11634_v2, %v11634_v2 }
 0x4e1   :  { %v3352_v20 = vadd.f32 %v3351_v30, %v11633_v18  ;;  %v3868_v22 = vadd.f32 %v3867_v27, %v3613_v29  ;;  %2535 = vmatmul.bf16.gmra.mxu2 %v6310_v41  ;;  %v11638_v41 = vld [vmem:[#allocation113_spill] sm:$0xff] }
 0x4e2   :  { %6478 = vmatmul.msk.bf16.gmra.mxu3 %vm1503_vm1, %v6314_v11  ;;  %v3619_v11 = vmul.f32 %v11638_v41, %v11638_v41 }
 0x4e3   :  { %v3353_v55 = vadd.f32 %v3352_v20, %v11634_v2  ;;  %v3869_v10 = vadd.f32 %v3868_v22, %v3614_v56  ;;  %v3618_v56 = vmul.f32 %v11637_v49, %v11637_v49 }
 0x4e4   :  { %v2496_v27 = vpop.f32.mrf.mxu2 }
 0x4e5   :  { %v3354_v30 = vadd.f32 %v3353_v55, %v11635_v7  ;;  %v3870_v29 = vadd.f32 %v3869_v10, %v3615_v5  ;;  %v3145_v18 = vpop.f32.mrf.mxu3  ;;  %v11639_v5 = vld [vmem:[#allocation115_spill] sm:$0xff] }
 0x4e6   :  { %v3620_v7 = vmul.f32 %v11639_v5, %v11639_v5 }
 0x4e7   :  { %v3355_v58 = vadd.f32 %v3354_v30, %v11636_v59  ;;  %v3871_v43 = vadd.f32 %v3870_v29, %v3616_v25  ;;  %v11640_v29 = vld [vmem:[#allocation117_spill] sm:$0xff] }
 0x4e8   :  { %v3621_v59 = vmul.f32 %v11640_v29, %v11640_v29 }
 0x4e9   :  { %v3356_v20 = vadd.f32 %v3355_v58, %v11637_v49  ;;  %v3872_v22 = vadd.f32 %v3871_v43, %v3617_v24  ;;  %v9595_v24 = vadd.f32 %v3145_v18, %v2496_v27 }
 0x4eb   :  { %v3357_v55 = vadd.f32 %v3356_v20, %v11638_v41  ;;  %v3873_v10 = vadd.f32 %v3872_v22, %v3618_v56  ;;  %11641 = vst [vmem:[#allocation222_spill] sm:$0xff] %v9595_v24  ;;  %v11642_v20 = vld [vmem:[#allocation119_spill] sm:$0xff] }
 0x4ec   :  { %v2498_v25 = vpop.f32.mrf.mxu2  ;;  %v3622_v56 = vmul.f32 %v11642_v20, %v11642_v20 }
 0x4ed   :  { %v3358_v2 = vadd.f32 %v3357_v55, %v11639_v5  ;;  %v3874_v30 = vadd.f32 %v3873_v10, %v3619_v11  ;;  %v3147_v43 = vpop.f32.mrf.mxu3  ;;  %v11643_v55 = vld [vmem:[#allocation121_spill] sm:$0xff] }
 0x4ee   :  { %v9597_v49 = vadd.f32 %v3147_v43, %v2498_v25  ;;  %v3623_v11 = vmul.f32 %v11643_v55, %v11643_v55 }
 0x4ef   :  { %v3359_v17 = vadd.f32 %v3358_v2, %v11640_v29  ;;  %v3875_v58 = vadd.f32 %v3874_v30, %v3620_v7  ;;  %v3624_v7 = vmul.f32 %v11644_v15, %v11644_v15  ;;  %v11645_v30 = vld [vmem:[#allocation125_spill] sm:$0xff] }
 0x4f0   :  { %v3625_v25 = vmul.f32 %v11645_v30, %v11645_v30 }
 0x4f1   :  { %v3360_v22 = vadd.f32 %v3359_v17, %v11642_v20  ;;  %v3876_v41 = vadd.f32 %v3875_v58, %v3621_v59  ;;  %v11646_v58 = vld [vmem:[#allocation127_spill] sm:$0xff] }
 0x4f2   :  { %v3626_v20 = vmul.f32 %v11646_v58, %v11646_v58 }
 0x4f3   :  { %v3361_v10 = vadd.f32 %v3360_v22, %v11643_v55  ;;  %v3877_v5 = vadd.f32 %v3876_v41, %v3622_v56  ;;  %v11647_v56 = vld [vmem:[#allocation129_spill] sm:$0xff] }
 0x4f4   :  { %v2501_v27 = vpop.f32.mrf.mxu2  ;;  %v3627_v55 = vmul.f32 %v11647_v56, %v11647_v56 }
 0x4f5   :  { %v3362_v18 = vadd.f32 %v3361_v10, %v11644_v15  ;;  %v3878_v2 = vadd.f32 %v3877_v5, %v3623_v11  ;;  %v3150_v59 = vpop.f32.mrf.mxu3  ;;  %v11648_v11 = vld [vmem:[#allocation131_spill] sm:$0xff] }
 0x4f6   :  { %v3628_v10 = vmul.f32 %v11648_v11, %v11648_v11 }
 0x4f7   :  { %v3363_v43 = vadd.f32 %v3362_v18, %v11645_v30  ;;  %v3879_v17 = vadd.f32 %v3878_v2, %v3624_v7  ;;  %v11649_v2 = vld [vmem:[#allocation133_spill] sm:$0xff] }
 0x4f8   :  { %v3629_v30 = vmul.f32 %v11649_v2, %v11649_v2 }
 0x4f9   :  { %v3364_v22 = vadd.f32 %v3363_v43, %v11646_v58  ;;  %v3880_v41 = vadd.f32 %v3879_v17, %v3625_v25  ;;  %v9623_v25 = vadd.f32 %v3150_v59, %v2501_v27 }
 0x4fb   :  { %v3881_v29 = vadd.f32 %v3880_v41, %v3626_v20  ;;  %v3365_v5 = vadd.f32 %v3364_v22, %v11647_v56  ;;  %v11650_v20 = vld [vmem:[#allocation135_spill] sm:$0xff] }
 0x4fc   :  { %v2503_v7 = vpop.f32.mrf.mxu2  ;;  %v3630_v22 = vmul.f32 %v11650_v20, %v11650_v20 }
 0x4fd   :  { %v3366_v15 = vadd.f32 %v3365_v5, %v11648_v11  ;;  %v3882_v18 = vadd.f32 %v3881_v29, %v3627_v55  ;;  %v3152_v17 = vpop.f32.mrf.mxu3  ;;  %v11651_v5 = vld [vmem:[#allocation137_spill] sm:$0xff] }
 0x4fe   :  { %v9625_v58 = vadd.f32 %v3152_v17, %v2503_v7  ;;  %v3631_v29 = vmul.f32 %v11651_v5, %v11651_v5 }
 0x4ff   :  { %v3367_v0 = vadd.f32 %v3366_v15, %v11649_v2  ;;  %v3883_v43 = vadd.f32 %v3882_v18, %v3628_v10  ;;  %v3632_v15 = vmul.f32 %v11652_v4, %v11652_v4  ;;  %v11653_v18 = vld [vmem:[#allocation141_spill] sm:$0xff] }
 0x500   :  { %v3633_v7 = vmul.f32 %v11653_v18, %v11653_v18 }
 0x501   :  { %v3368_v41 = vadd.f32 %v3367_v0, %v11650_v20  ;;  %v3884_v56 = vadd.f32 %v3883_v43, %v3629_v30  ;;  %v11654_v43 = vld [vmem:[#allocation143_spill] sm:$0xff] }
 0x502   :  { %v3634_v20 = vmul.f32 %v11654_v43, %v11654_v43 }
 0x503   :  { %v3369_v55 = vadd.f32 %v3368_v41, %v11651_v5  ;;  %v3885_v11 = vadd.f32 %v3884_v56, %v3630_v22  ;;  %v11655_v22 = vld [vmem:[#allocation145_spill] sm:$0xff] }
 0x504   :  { %v2506_v10 = vpop.f32.mrf.mxu2  ;;  %v3635_v5 = vmul.f32 %v11655_v22, %v11655_v22 }
 0x505   :  { %v3370_v27 = vadd.f32 %v3369_v55, %v11652_v4  ;;  %v3886_v59 = vadd.f32 %v3885_v11, %v3631_v29  ;;  %v3155_v30 = vpop.f32.mrf.mxu3  ;;  %v11656_v29 = vld [vmem:[#allocation147_spill] sm:$0xff] }
 0x506   :  { %v3636_v4 = vmul.f32 %v11656_v29, %v11656_v29 }
 0x507   :  { %v3371_v17 = vadd.f32 %v3370_v27, %v11653_v18  ;;  %v3887_v0 = vadd.f32 %v3886_v59, %v3632_v15  ;;  %v11657_v59 = vld [vmem:[#allocation149_spill] sm:$0xff] }
 0x508   :  { %v3637_v18 = vmul.f32 %v11657_v59, %v11657_v59 }
 0x509   :  { %v3372_v41 = vadd.f32 %v3371_v17, %v11654_v43  ;;  %v3888_v56 = vadd.f32 %v3887_v0, %v3633_v7  ;;  %v9651_v7 = vadd.f32 %v3155_v30, %v2506_v10  ;;  %v11661_v30 = vld [vmem:[#allocation157_spill] sm:$0xff] }
 0x50b   :  { %v3373_v55 = vadd.f32 %v3372_v41, %v11655_v22  ;;  %v3889_v11 = vadd.f32 %v3888_v56, %v3634_v20  ;;  %v11658_v41 = vld [vmem:[#allocation151_spill] sm:$0xff] }
 0x50c   :  { %v2508_v15 = vpop.f32.mrf.mxu2  ;;  %v3638_v20 = vmul.f32 %v11658_v41, %v11658_v41 }
 0x50d   :  { %v3374_v2 = vadd.f32 %v3373_v55, %v11656_v29  ;;  %v3890_v27 = vadd.f32 %v3889_v11, %v3635_v5  ;;  %v3157_v0 = vpop.f32.mrf.mxu3  ;;  %v11659_v55 = vld [vmem:[#allocation153_spill] sm:$0xff] }
 0x50e   :  { %v9653_v43 = vadd.f32 %v3157_v0, %v2508_v15  ;;  %v3639_v5 = vmul.f32 %v11659_v55, %v11659_v55 }
 0x50f   :  { %v3375_v12 = vadd.f32 %v3374_v2, %v11657_v59  ;;  %v3891_v17 = vadd.f32 %v3890_v27, %v3636_v4  ;;  %v3640_v4 = vmul.f32 %v11660_v48, %v11660_v48  ;;  %v3641_v27 = vmul.f32 %v11661_v30, %v11661_v30 }
 0x511   :  { %v3376_v56 = vadd.f32 %v3375_v12, %v11658_v41  ;;  %v3892_v22 = vadd.f32 %v3891_v17, %v3637_v18  ;;  %v11662_v12 = vld [vmem:[#allocation159_spill] sm:$0xff] }
 0x512   :  { %v3642_v18 = vmul.f32 %v11662_v12, %v11662_v12 }
 0x513   :  { %v3377_v11 = vadd.f32 %v3376_v56, %v11659_v55  ;;  %v3893_v29 = vadd.f32 %v3892_v22, %v3638_v20  ;;  %v11663_v56 = vld [vmem:[#allocation161_spill] sm:$0xff] }
 0x514   :  { %v3643_v22 = vmul.f32 %v11663_v56, %v11663_v56 }
 0x515   :  { %v3378_v2 = vadd.f32 %v3377_v11, %v11660_v48  ;;  %v3894_v10 = vadd.f32 %v3893_v29, %v3639_v5  ;;  %v11664_v11 = vld [vmem:[#allocation163_spill] sm:$0xff] }
 0x516   :  { %v3644_v29 = vmul.f32 %v11664_v11, %v11664_v11 }
 0x517   :  { %v3379_v15 = vadd.f32 %v3378_v2, %v11661_v30  ;;  %v3895_v0 = vadd.f32 %v3894_v10, %v3640_v4  ;;  %v2511_v2 = vpop.f32.mrf.mxu2  ;;  %v3160_v4 = vpop.f32.mrf.mxu3  ;;  %v11665_v10 = vld [vmem:[#allocation165_spill] sm:$0xff] }
 0x518   :  { %v3645_v30 = vmul.f32 %v11665_v10, %v11665_v10 }
 0x519   :  { %v3380_v17 = vadd.f32 %v3379_v15, %v11662_v12  ;;  %v3896_v41 = vadd.f32 %v3895_v0, %v3641_v27  ;;  %v9679_v0 = vadd.f32 %v3160_v4, %v2511_v2  ;;  %v11666_v12 = vld [vmem:[#allocation167_spill] sm:$0xff] }
 0x51b   :  { %v3381_v20 = vadd.f32 %v3380_v17, %v11663_v56  ;;  %v3897_v55 = vadd.f32 %v3896_v41, %v3642_v18  ;;  %v3646_v17 = vmul.f32 %v11666_v12, %v11666_v12  ;;  %v11667_v56 = vld [vmem:[#allocation169_spill] sm:$0xff] }
 0x51d   :  { %v3382_v5 = vadd.f32 %v3381_v20, %v11664_v11  ;;  %v3898_v48 = vadd.f32 %v3897_v55, %v3643_v22  ;;  %v3647_v20 = vmul.f32 %v11667_v56, %v11667_v56  ;;  %v3648_v11 = vmul.f32 %v8493_v1, %v8493_v1 }
 0x51f   :  { %v3383_v15 = vadd.f32 %v3382_v5, %v11665_v10  ;;  %v3899_v27 = vadd.f32 %v3898_v48, %v3644_v29  ;;  %v3649_v29 = vmul.f32 %v8542_v38, %v8542_v38 }
 0x521   :  { %v3384_v41 = vadd.f32 %v3383_v15, %v11666_v12  ;;  %v3900_v18 = vadd.f32 %v3899_v27, %v3645_v30  ;;  %v3650_v30 = vmul.f32 %v8556_v9, %v8556_v9 }
 0x523   :  { %v3385_v55 = vadd.f32 %v3384_v41, %v11667_v56  ;;  %v3901_v22 = vadd.f32 %v3900_v18, %v3646_v17  ;;  %v3651_v17 = vmul.f32 %v8606_v50, %v8606_v50 }
 0x525   :  { %v3386_v5 = vadd.f32 %v3385_v55, %v8493_v1  ;;  %v3902_v48 = vadd.f32 %v3901_v22, %v3647_v20  ;;  %v3652_v20 = vmul.f32 %v8620_v44, %v8620_v44 }
 0x527   :  { %v3387_v2 = vadd.f32 %v3386_v5, %v8542_v38  ;;  %v3903_v4 = vadd.f32 %v3902_v48, %v3648_v11  ;;  %v9702_v5 = vpop.f32.mrf.mxu2  ;;  %v9704_v11 = vpop.f32.mrf.mxu3  ;;  %v3653_v48 = vmul.f32 %v8670_v19, %v8670_v19 }
 0x529   :  { %v3388_v15 = vadd.f32 %v3387_v2, %v8556_v9  ;;  %v3904_v27 = vadd.f32 %v3903_v4, %v3649_v29  ;;  %v3654_v4 = vmul.f32 %v8684_v39, %v8684_v39 }
 0x52b   :  { %v3389_v41 = vadd.f32 %v3388_v15, %v8606_v50  ;;  %v3905_v18 = vadd.f32 %v3904_v27, %v3650_v30  ;;  %v3655_v27 = vmul.f32 %v8734_v60, %v8734_v60 }
 0x52d   :  { %v3390_v55 = vadd.f32 %v3389_v41, %v8620_v44  ;;  %v3906_v22 = vadd.f32 %v3905_v18, %v3651_v17  ;;  %v3656_v18 = vmul.f32 %v8748_v14, %v8748_v14 }
 0x52f   :  { %v3391_v29 = vadd.f32 %v3390_v55, %v8670_v19  ;;  %v3907_v2 = vadd.f32 %v3906_v22, %v3652_v20  ;;  %v3657_v20 = vmul.f32 %v8798_v21, %v8798_v21 }
 0x531   :  { %v3392_v30 = vadd.f32 %v3391_v29, %v8684_v39  ;;  %v3908_v15 = vadd.f32 %v3907_v2, %v3653_v48  ;;  %v9721_v29 = vpop.f32.mrf.mxu2  ;;  %v9723_v48 = vpop.f32.mrf.mxu3  ;;  %v3658_v2 = vmul.f32 %v8812_v36, %v8812_v36 }
 0x533   :  { %v3393_v17 = vadd.f32 %v3392_v30, %v8734_v60  ;;  %v3909_v41 = vadd.f32 %v3908_v15, %v3654_v4  ;;  %v3659_v15 = vmul.f32 %v8862_v45, %v8862_v45 }
 0x535   :  { %v3394_v44 = vadd.f32 %v3393_v17, %v8748_v14  ;;  %v3910_v50 = vadd.f32 %v3909_v41, %v3655_v27 }
 0x537   :  { %v3395_v55 = vadd.f32 %v3394_v44, %v8798_v21  ;;  %v3911_v22 = vadd.f32 %v3910_v50, %v3656_v18  ;;  %v3660_v44 = vmul.f32 %v8876_v33, %v8876_v33  ;;  %v3661_v18 = vmul.f32 %v8924_v26, %v8924_v26 }
 0x539   :  { %v3396_v4 = vadd.f32 %v3395_v55, %v8812_v36  ;;  %v3912_v30 = vadd.f32 %v3911_v22, %v3657_v20  ;;  %v3662_v20 = vmul.f32 %v8938_v23, %v8938_v23 }
 0x53b   :  { %v3397_v27 = vadd.f32 %v3396_v4, %v8862_v45  ;;  %v3913_v17 = vadd.f32 %v3912_v30, %v3658_v2  ;;  %v9740_v4 = vpop.f32.mrf.mxu2  ;;  %v9742_v2 = vpop.f32.mrf.mxu3  ;;  %v3663_v30 = vmul.f32 %v8972_v8, %v8972_v8 }
 0x53d   :  { %v3398_v50 = vadd.f32 %v3397_v27, %v8876_v33  ;;  %v3914_v41 = vadd.f32 %v3913_v17, %v3659_v15  ;;  %v11668_v17 = vld [vmem:[#allocation194_spill] sm:$0xff] }
 0x53f   :  { %v3399_v21 = vadd.f32 %v3398_v50, %v8924_v26  ;;  %v3915_v14 = vadd.f32 %v3914_v41, %v3660_v44  ;;  %v3664_v50 = vmul.f32 %v11668_v17, %v11668_v17  ;;  %v11669_v26 = vld [vmem:[#allocation196_spill] sm:$0xff] }
 0x541   :  { %v3400_v55 = vadd.f32 %v3399_v21, %v8938_v23  ;;  %v3916_v22 = vadd.f32 %v3915_v14, %v3661_v18  ;;  %v3665_v21 = vmul.f32 %v11669_v26, %v11669_v26  ;;  %v11670_v23 = vld [vmem:[#allocation198_spill] sm:$0xff] }
 0x542   :  { %v3666_v33 = vmul.f32 %v11670_v23, %v11670_v23 }
 0x543   :  { %v3401_v15 = vadd.f32 %v3400_v55, %v8972_v8  ;;  %v3917_v27 = vadd.f32 %v3916_v22, %v3662_v20  ;;  %v11671_v55 = vld [vmem:[#allocation200_spill] sm:$0xff] }
 0x544   :  { %v3667_v20 = vmul.f32 %v11671_v55, %v11671_v55 }
 0x545   :  { %v3402_v44 = vadd.f32 %v3401_v15, %v11668_v17  ;;  %v3918_v41 = vadd.f32 %v3917_v27, %v3663_v30  ;;  %v9759_v15 = vpop.f32.mrf.mxu2  ;;  %v9761_v30 = vpop.f32.mrf.mxu3  ;;  %v11672_v27 = vld [vmem:[#allocation202_spill] sm:$0xff] }
 0x547   :  { %v3403_v14 = vadd.f32 %v3402_v44, %v11669_v26  ;;  %v3919_v18 = vadd.f32 %v3918_v41, %v3664_v50  ;;  %v3668_v44 = vmul.f32 %v11672_v27, %v11672_v27  ;;  %v11673_v26 = vld [vmem:[#allocation203_spill] sm:$0xff] }
 0x549   :  { %v3404_v45 = vadd.f32 %v3403_v14, %v11670_v23  ;;  %v3920_v36 = vadd.f32 %v3919_v18, %v3665_v21  ;;  %v3669_v14 = vmul.f32 %v11673_v26, %v11673_v26  ;;  %v11674_v23 = vld [vmem:[#allocation204_spill] sm:$0xff] }
 0x54b   :  { %v3405_v22 = vadd.f32 %v3404_v45, %v11671_v55  ;;  %v3921_v8 = vadd.f32 %v3920_v36, %v3666_v33  ;;  %v3670_v45 = vmul.f32 %v11674_v23, %v11674_v23  ;;  %v3671_v55 = vmul.f32 %v9164_v28, %v9164_v28 }
 0x54d   :  { %v3406_v50 = vadd.f32 %v3405_v22, %v11672_v27  ;;  %v3922_v41 = vadd.f32 %v3921_v8, %v3667_v20  ;;  %v3672_v8 = vmul.f32 %v9176_v13, %v9176_v13 }
 0x54f   :  { %v3407_v21 = vadd.f32 %v3406_v50, %v11673_v26  ;;  %v3923_v18 = vadd.f32 %v3922_v41, %v3668_v44  ;;  %v9778_v50 = vpop.f32.mrf.mxu2  ;;  %v9780_v44 = vpop.f32.mrf.mxu3  ;;  %v3673_v41 = vmul.f32 %v9213_v35, %v9213_v35 }
 0x551   :  { %v3408_v36 = vadd.f32 %v3407_v21, %v11674_v23  ;;  %v3924_v33 = vadd.f32 %v3923_v18, %v3669_v14  ;;  %v3674_v18 = vmul.f32 %v9225_v46, %v9225_v46 }
 0x553   :  { %v3409_v17 = vadd.f32 %v3408_v36, %v9164_v28  ;;  %v3925_v60 = vadd.f32 %v3924_v33, %v3670_v45  ;;  %v3676_v28 = vmul.f32 %v9278_v34, %v9278_v34 }
 0x555   :  { %v3410_v20 = vadd.f32 %v3409_v17, %v9176_v13  ;;  %v3926_v22 = vadd.f32 %v3925_v60, %v3671_v55  ;;  %v3675_v60 = vmul.f32 %v9270_v61, %v9270_v61 }
 0x557   :  { %v3411_v14 = vadd.f32 %v3410_v20, %v9213_v35  ;;  %v3927_v21 = vadd.f32 %v3926_v22, %v3672_v8  ;;  %v3677_v22 = vmul.f32 %v9340_v6, %v9340_v6 }
 0x559   :  { %v3412_v45 = vadd.f32 %v3411_v14, %v9225_v46  ;;  %v3928_v36 = vadd.f32 %v3927_v21, %v3673_v41  ;;  %v9797_v14 = vpop.f32.mrf.mxu2  ;;  %v9799_v41 = vpop.f32.mrf.mxu3 }
 0x55b   :  { %v3413_v33 = vadd.f32 %v3412_v45, %v9270_v61  ;;  %v3929_v17 = vadd.f32 %v3928_v36, %v3674_v18  ;;  %v3678_v18 = vmul.f32 %v9342_v57, %v9342_v57 }
 0x55d   :  { %v3930_v55 = vadd.f32 %v3929_v17, %v3675_v60  ;;  %v3414_v13 = vadd.f32 %v3413_v33, %v9278_v34  ;;  %v3680_v17 = vmul.f32 %v9392_v52, %v9392_v52 }
 0x55f   :  { %v3931_v20 = vadd.f32 %v3930_v55, %v3676_v28  ;;  %v3415_v8 = vadd.f32 %v3414_v13, %v9340_v6  ;;  %v3679_v28 = vmul.f32 %v9390_v54, %v9390_v54 }
 0x561   :  { %v3932_v21 = vadd.f32 %v3931_v20, %v3677_v22  ;;  %v3416_v45 = vadd.f32 %v3415_v8, %v9342_v57  ;;  %v3681_v8 = vmul.f32 %v9431_v37, %v9431_v37 }
 0x563   :  { %v3933_v36 = vadd.f32 %v3932_v21, %v3678_v18  ;;  %v3417_v33 = vadd.f32 %v3416_v45, %v9390_v54  ;;  %v3682_v45 = vmul.f32 %v9433_v32, %v9433_v32  ;;  %v9816_v18 = vpop.f32.mrf.mxu2 }
 0x565   :  { %v3934_v13 = vadd.f32 %v3933_v36, %v3679_v28  ;;  %v3418_v60 = vadd.f32 %v3417_v33, %v9392_v52  ;;  %v9818_v36 = vpop.f32.mrf.mxu3 }
 0x567   :  { %v3935_v55 = vadd.f32 %v3934_v13, %v3680_v17  ;;  %v3419_v20 = vadd.f32 %v3418_v60, %v9431_v37  ;;  %v3683_v13 = vmul.f32 %v9472_v3, %v9472_v3 }
 0x569   :  { %v3936_v22 = vadd.f32 %v3935_v55, %v3681_v8  ;;  %v3420_v21 = vadd.f32 %v3419_v20, %v9433_v32  ;;  %v3684_v55 = vmul.f32 %v9474_v42, %v9474_v42  ;;  %v3685_v32 = vmul.f32 %v9513_v63, %v9513_v63 }
 0x56b   :  { %v3937_v33 = vadd.f32 %v3936_v22, %v3682_v45  ;;  %v3421_v28 = vadd.f32 %v3420_v21, %v9472_v3  ;;  %v3686_v21 = vmul.f32 %v9515_v40, %v9515_v40 }
 0x56d   :  { %v3938_v60 = vadd.f32 %v3937_v33, %v3683_v13  ;;  %v3422_v17 = vadd.f32 %v3421_v28, %v9474_v42  ;;  %v3687_v28 = vmul.f32 %v9554_v47, %v9554_v47  ;;  %v2531_v13 = vpop.f32.mrf.mxu2  ;;  %v3180_v42 = vpop.f32.mrf.mxu3 }
 0x56f   :  { %v3939_v20 = vadd.f32 %v3938_v60, %v3684_v55  ;;  %v3423_v8 = vadd.f32 %v3422_v17, %v9513_v63  ;;  %v3688_v55 = vmul.f32 %v9556_v16, %v9556_v16 }
 0x571   :  { %v3940_v37 = vadd.f32 %v3939_v20, %v3685_v32  ;;  %v3424_v22 = vadd.f32 %v3423_v8, %v9515_v40  ;;  %v3689_v8 = vmul.f32 %v9595_v24, %v9595_v24 }
 0x573   :  { %v3941_v45 = vadd.f32 %v3940_v37, %v3686_v21  ;;  %v3425_v33 = vadd.f32 %v3424_v22, %v9554_v47  ;;  %v3690_v21 = vmul.f32 %v9597_v49, %v9597_v49 }
 0x575   :  { %v3942_v60 = vadd.f32 %v3941_v45, %v3687_v28  ;;  %v3426_v17 = vadd.f32 %v3425_v33, %v9556_v16  ;;  %v3691_v33 = vmul.f32 %v9623_v25, %v9623_v25 }
 0x577   :  { %v3943_v32 = vadd.f32 %v3942_v60, %v3688_v55  ;;  %v3427_v20 = vadd.f32 %v3426_v17, %v9595_v24  ;;  %v3692_v17 = vmul.f32 %v9625_v58, %v9625_v58  ;;  %v2533_v55 = vpop.f32.mrf.mxu2  ;;  %v3182_v24 = vpop.f32.mrf.mxu3 }
 0x579   :  { %v3944_v37 = vadd.f32 %v3943_v32, %v3689_v8  ;;  %v3428_v22 = vadd.f32 %v3427_v20, %v9597_v49  ;;  %v3693_v8 = vmul.f32 %v9651_v7, %v9651_v7 }
 0x57b   :  { %v3945_v47 = vadd.f32 %v3944_v37, %v3690_v21  ;;  %v3429_v45 = vadd.f32 %v3428_v22, %v9623_v25  ;;  %v3694_v21 = vmul.f32 %v9653_v43, %v9653_v43 }
 0x57d   :  { %v3946_v28 = vadd.f32 %v3945_v47, %v3691_v33  ;;  %v3430_v60 = vadd.f32 %v3429_v45, %v9625_v58  ;;  %v9858_v47 = vadd.f32 %v9704_v11, %v9702_v5  ;;  %v9872_v5 = vadd.f32 %v9742_v2, %v9740_v4 }
 0x57e   :  { %v9886_v4 = vadd.f32 %v9780_v44, %v9778_v50  ;;  %v9900_v50 = vadd.f32 %v9818_v36, %v9816_v18 }
 0x57f   :  { %v3947_v32 = vadd.f32 %v3946_v28, %v3692_v17  ;;  %v3431_v20 = vadd.f32 %v3430_v60, %v9651_v7  ;;  %11675 = vst [vmem:[#allocation149_spill] sm:$0xff] %v9858_v47  ;;  %v3695_v28 = vmul.f32 %v9679_v0, %v9679_v0  ;;  %v9865_v60 = vadd.f32 %v9723_v48, %v9721_v29  ;;  %v2536_v48 = vpop.f32.mrf.mxu2 }
 0x580   :  { %11677 = vst [vmem:[#allocation167_spill] sm:$0xff] %v9872_v5  ;;  %v9879_v29 = vadd.f32 %v9761_v30, %v9759_v15  ;;  %v9893_v15 = vadd.f32 %v9799_v41, %v9797_v14 }
 0x581   :  { %v3948_v37 = vadd.f32 %v3947_v32, %v3693_v8  ;;  %v3432_v22 = vadd.f32 %v3431_v20, %v9653_v43  ;;  %11676 = vst [vmem:[#allocation165_spill] sm:$0xff] %v9865_v60  ;;  %v3696_v20 = vmul.f32 %v9858_v47, %v9858_v47 }
 0x582   :  { %11678 = vst [vmem:[#allocation169_spill] sm:$0xff] %v9879_v29 }
 0x583   :  { %v3949_v45 = vadd.f32 %v3948_v37, %v3694_v21  ;;  %v3433_v33 = vadd.f32 %v3432_v22, %v9679_v0  ;;  %v3697_v37 = vmul.f32 %v9865_v60, %v9865_v60  ;;  %v3185_v22 = vpop.f32.mrf.mxu3  ;;  %11679 = vst [vmem:[#allocation202_spill] sm:$0xff] %v9886_v4 }
 0x584   :  { %11680 = vst [vmem:[#allocation203_spill] sm:$0xff] %v9893_v15 }
 0x585   :  { %v3950_v17 = vadd.f32 %v3949_v45, %v3695_v28  ;;  %v3434_v32 = vadd.f32 %v3433_v33, %v9858_v47  ;;  %v3698_v33 = vmul.f32 %v9872_v5, %v9872_v5  ;;  %11681 = vst [vmem:[#allocation204_spill] sm:$0xff] %v9900_v50 }
 0x587   :  { %v3951_v11 = vadd.f32 %v3950_v17, %v3696_v20  ;;  %v3435_v8 = vadd.f32 %v3434_v32, %v9865_v60  ;;  %v3699_v17 = vmul.f32 %v9879_v29, %v9879_v29  ;;  %v3700_v20 = vmul.f32 %v9886_v4, %v9886_v4 }
 0x589   :  { %v3952_v21 = vadd.f32 %v3951_v11, %v3697_v37  ;;  %v3436_v45 = vadd.f32 %v3435_v8, %v9872_v5  ;;  %v3701_v8 = vmul.f32 %v9893_v15, %v9893_v15  ;;  %v9905_v37 = vadd.f32 %v3180_v42, %v2531_v13 }
 0x58b   :  { %v3953_v2 = vadd.f32 %v3952_v21, %v3698_v33  ;;  %v3437_v28 = vadd.f32 %v3436_v45, %v9879_v29  ;;  %11682 = vst [vmem:[#allocation223_spill] sm:$0xff] %v9905_v37  ;;  %v3702_v21 = vmul.f32 %v9900_v50, %v9900_v50  ;;  %v9910_v45 = vadd.f32 %v3182_v24, %v2533_v55  ;;  %v2538_v33 = vpop.f32.mrf.mxu2 }
 0x58d   :  { %v3954_v30 = vadd.f32 %v3953_v2, %v3699_v17  ;;  %v3438_v32 = vadd.f32 %v3437_v28, %v9886_v4  ;;  %11683 = vst [vmem:[#allocation224_spill] sm:$0xff] %v9910_v45  ;;  %v3187_v2 = vpop.f32.mrf.mxu3  ;;  %v3703_v28 = vmul.f32 %v9905_v37, %v9905_v37  ;;  %v9915_v17 = vadd.f32 %v3185_v22, %v2536_v48 }
 0x58f   :  { %v3955_v44 = vadd.f32 %v3954_v30, %v3700_v20  ;;  %v3439_v11 = vadd.f32 %v3438_v32, %v9893_v15  ;;  %11684 = vst [vmem:[#allocation225_spill] sm:$0xff] %v9915_v17  ;;  %v3704_v30 = vmul.f32 %v9910_v45, %v9910_v45  ;;  %v3188_v32 = vadd.f32 %v3187_v2, %v2538_v33 }
 0x590   :  { %v3705_v55 = vmul.f32 %v9915_v17, %v9915_v17 }
 0x591   :  { %v3956_v14 = vadd.f32 %v3955_v44, %v3701_v8  ;;  %v3440_v41 = vadd.f32 %v3439_v11, %v9900_v50  ;;  %v3706_v8 = vmul.f32 %v3188_v32, %v3188_v32 }
 0x593   :  { %v3957_v18 = vadd.f32 %v3956_v14, %v3702_v21  ;;  %v3441_v36 = vadd.f32 %v3440_v41, %v9905_v37 }
 0x595   :  { %v3958_v42 = vadd.f32 %v3957_v18, %v3703_v28  ;;  %v3442_v13 = vadd.f32 %v3441_v36, %v9910_v45 }
 0x597   :  { %v3959_v20 = vadd.f32 %v3958_v42, %v3704_v30  ;;  %v3443_v24 = vadd.f32 %v3442_v13, %v9915_v17 }
 0x599   :  { %v3960_v44 = vadd.f32 %v3959_v20, %v3705_v55  ;;  %v3444_v11 = vadd.f32 %v3443_v24, %v3188_v32 }
 0x59b   :  { %v3445_v14 = vrot.slane %v3444_v11, 4  ;;  %v3961_v41 = vadd.f32 %v3960_v44, %v3706_v8 }
 0x59d   :  { %v3446_v48 = vadd.f32 %v3445_v14, %v3444_v11  ;;  %v3962_v22 = vrot.slane %v3961_v41, 4 }
 0x59f   :  { %v3447_v21 = vrot.slane %v3446_v48, 2  ;;  %v3963_v18 = vadd.f32 %v3962_v22, %v3961_v41 }
 0x5a1   :  { %v3448_v36 = vadd.f32 %v3447_v21, %v3446_v48  ;;  %v3964_v28 = vrot.slane %v3963_v18, 2 }
 0x5a3   :  { %v3449_v37 = vrot.slane %v3448_v36, 1  ;;  %v3965_v45 = vadd.f32 %v3964_v28, %v3963_v18  ;;  %v9933_v18 = vld [vmem:[%s10976_s3] ss:$0 sm:$0xff] }
 0x5a5   :  { %v3450_v33 = vadd.f32 %v3449_v37, %v3448_v36  ;;  %v3966_v2 = vrot.slane %v3965_v45, 1  ;;  %v4229_v37 = vld [vmem:[%s10975_s2] sm:$0x1] }
 0x5a7   :  { %v3967_v42 = vadd.f32 %v3966_v2, %v3965_v45  ;;  %v9923_v13 = vmul.f32 0.00048828125, %v3450_v33 }
 0x5a9   :  { %v3969_v30 = vmul.f32 0.00048828125, %v3967_v42  ;;  %v3970_v20 = vmul.f32 %v9923_v13, %v9923_v13  ;;  %v4228_v36 = vsub.f32 %v3188_v32, %v9923_v13 }
 0x5ab   :  { %v3971_v24 = vsub.f32 %v3969_v30, %v3970_v20  ;;  %v11685_v30 = vld [vmem:[#allocation5_spill] sm:$0xff] }
 0x5ac   :  { %v3973_v20 = vsub.f32 %v11685_v30, %v9923_v13  ;;  %v11692_v30 = vld [vmem:[#allocation12_spill] sm:$0xff] }
 0x5ad   :  { %v3972_v55 = vmax.f32 %v3971_v24, 0.0  ;;  %v11686_v24 = vld [vmem:[#allocation6_spill] sm:$0xff] }
 0x5af   :  { %v4230_v44 = vadd.f32 1e-05, %v3972_v55  ;;  %v3974_v55 = vsub.f32 %v11686_v24, %v9923_v13  ;;  %v3980_v24 = vsub.f32 %v11692_v30, %v9923_v13 }
 0x5b1   :  { %6758 = vrsqrt.f32 %v4230_v44  ;;  %vm4237_vm3 = vweird.f32 %v4230_v44 }
 0x5b7   :  { %v6759_v11 = vpop.eup %6758 }
 0x5b8   :  { %v4232_v8 = vmul.f32 %v6759_v11, %v4230_v44  ;;  %vm4238_vm2 = vweird.f32 %v6759_v11  ;;  %v11687_v44 = vld [vmem:[#allocation7_spill] sm:$0xff] }
 0x5b9   :  { %vm4239_vm4 = vmor %vm4237_vm3, %vm4238_vm2 }
 0x5ba   :  { %v4233_v14 = vmul.f32 %v6759_v11, %v4232_v8  ;;  %v11688_v8 = vld [vmem:[#allocation8_spill] sm:$0xff] }
 0x5bb   :  { %v3976_v32 = vsub.f32 %v11688_v8, %v9923_v13 }
 0x5bc   :  { %v4234_v41 = vmul.f32 0.5, %v4233_v14  ;;  %v11689_v14 = vld [vmem:[#allocation9_spill] sm:$0xff] }
 0x5be   :  { %v4235_v48 = vsub.f32 1.5, %v4234_v41  ;;  %v3977_v41 = vsub.f32 %v11689_v14, %v9923_v13 }
 0x5c0   :  { %v4236_v45 = vmul.f32 %v6759_v11, %v4235_v48 }
 0x5c2   :  { %v4240_v22 = vsel %vm4239_vm4, %v6759_v11, %v4236_v45  ;;  %v3975_v11 = vsub.f32 %v11687_v44, %v9923_v13  ;;  %v11693_v44 = vld [vmem:[#allocation13_spill] sm:$0xff] }
 0x5c3   :  { %v4241_v21 = vmul.f32 %v4240_v22, %v4229_v37  ;;  %v11690_v22 = vld [vmem:[#allocation10_spill] sm:$0xff] }
 0x5c5   :  { %v9936_v28 = vperm.slane %v4241_v21, 0  ;;  %v3978_v21 = vsub.f32 %v11690_v22, %v9923_v13  ;;  %v11694_v22 = vld [vmem:[#allocation14_spill] sm:$0xff] }
 0x5c7   :  { %v4500_v33 = vmul.f32 %v9936_v28, %v4228_v36  ;;  %v4245_v48 = vmul.f32 %v9936_v28, %v3973_v20  ;;  %v4246_v37 = vmul.f32 %v9936_v28, %v3974_v55  ;;  %v4247_v45 = vmul.f32 %v9936_v28, %v3975_v11 }
 0x5c8   :  { %v4248_v36 = vmul.f32 %v9936_v28, %v3976_v32  ;;  %v3981_v20 = vsub.f32 %v11693_v44, %v9923_v13  ;;  %v4250_v55 = vmul.f32 %v9936_v28, %v3978_v21  ;;  %v4252_v30 = vmul.f32 %v9936_v28, %v3980_v24  ;;  %v11696_v21 = vld [vmem:[#allocation16_spill] sm:$0xff] }
 0x5c9   :  { %v4760_v2 = vadd.f32 %v9933_v18, %v4500_v33  ;;  %v11691_v33 = vld [vmem:[#allocation11_spill] sm:$0xff]  ;;  %v4505_v8 = vadd.f32 %v9933_v18, %v4245_v48  ;;  %v4506_v14 = vadd.f32 %v9933_v18, %v4246_v37  ;;  %v4507_v32 = vadd.f32 %v9933_v18, %v4247_v45  ;;  %v11697_v37 = vld [vmem:[#allocation17_spill] sm:$0xff] }
 0x5ca   :  { %v4508_v44 = vadd.f32 %v9933_v18, %v4248_v36  ;;  %v3984_v50 = vsub.f32 %v11696_v21, %v9923_v13  ;;  %v3985_v45 = vsub.f32 %v11697_v37, %v9923_v13  ;;  %v11698_v21 = vld [vmem:[#allocation18_spill] sm:$0xff]  ;;  %v11699_v37 = vld [vmem:[#allocation19_spill] sm:$0xff] }
 0x5cb   :  { %v5016_v42 = vmax.f32 %v4760_v2, 0.0  ;;  %v3979_v2 = vsub.f32 %v11691_v33, %v9923_v13  ;;  %v3982_v33 = vsub.f32 %v11694_v22, %v9923_v13  ;;  %v4761_v4 = vmax.f32 %v4505_v8, 0.0 }
 0x5cc   :  { %v4762_v36 = vmax.f32 %v4506_v14, 0.0  ;;  %v4763_v29 = vmax.f32 %v4507_v32, 0.0  ;;  %v3986_v5 = vsub.f32 %v11698_v21, %v9923_v13  ;;  %v4764_v60 = vmax.f32 %v4508_v44, 0.0 }
 0x5cd   :  { %5272 = vst [vmem:[#allocation2 + $0x7f8] sm:$0xff] %v5016_v42  ;;  %v4249_v42 = vmul.f32 %v9936_v28, %v3977_v41  ;;  %v4251_v11 = vmul.f32 %v9936_v28, %v3979_v2  ;;  %v11695_v41 = vld [vmem:[#allocation15_spill] sm:$0xff]  ;;  %v4253_v2 = vmul.f32 %v9936_v28, %v3981_v20  ;;  %v4254_v15 = vmul.f32 %v9936_v28, %v3982_v33 }
 0x5ce   :  { %v3983_v17 = vsub.f32 %v11695_v41, %v9923_v13  ;;  %v4510_v41 = vadd.f32 %v9933_v18, %v4250_v55  ;;  %v4256_v20 = vmul.f32 %v9936_v28, %v3984_v50  ;;  %v3987_v33 = vsub.f32 %v11699_v37, %v9923_v13  ;;  %5017 = vst [vmem:[#allocation2] sm:$0xff] %v4761_v4  ;;  %v11702_v4 = vld [vmem:[#allocation22_spill] sm:$0xff] }
 0x5cf   :  { %v4509_v48 = vadd.f32 %v9933_v18, %v4249_v42  ;;  %v4511_v24 = vadd.f32 %v9933_v18, %v4251_v11  ;;  %v4512_v42 = vadd.f32 %v9933_v18, %v4252_v30  ;;  %v4513_v55 = vadd.f32 %v9933_v18, %v4253_v2  ;;  %v11700_v11 = vld [vmem:[#allocation20_spill] sm:$0xff]  ;;  %5018 = vst [vmem:[#allocation2 + $0x8] sm:$0xff] %v4762_v36  ;;  %v11701_v30 = vld [vmem:[#allocation21_spill] sm:$0xff] }
 0x5d0   :  { %v4255_v22 = vmul.f32 %v9936_v28, %v3983_v17  ;;  %v4257_v17 = vmul.f32 %v9936_v28, %v3985_v45  ;;  %v3988_v8 = vsub.f32 %v11700_v11, %v9923_v13  ;;  %v4258_v14 = vmul.f32 %v9936_v28, %v3986_v5  ;;  %5019 = vst [vmem:[#allocation2 + $0x10] sm:$0xff] %v4763_v29  ;;  %v11704_v29 = vld [vmem:[#allocation24_spill] sm:$0xff] }
 0x5d1   :  { %v4765_v47 = vmax.f32 %v4509_v48, 0.0  ;;  %v4514_v32 = vadd.f32 %v9933_v18, %v4254_v15  ;;  %v4766_v50 = vmax.f32 %v4510_v41, 0.0  ;;  %v3989_v44 = vsub.f32 %v11701_v30, %v9923_v13  ;;  %5020 = vst [vmem:[#allocation2 + $0x18] sm:$0xff] %v4764_v60  ;;  %v11703_v15 = vld [vmem:[#allocation23_spill] sm:$0xff]  ;;  %v11705_v60 = vld [vmem:[#allocation25_spill] sm:$0xff] }
 0x5d2   :  { %v4259_v21 = vmul.f32 %v9936_v28, %v3987_v33  ;;  %v4515_v45 = vadd.f32 %v9933_v18, %v4255_v22  ;;  %v4767_v37 = vmax.f32 %v4511_v24, 0.0  ;;  %v3990_v2 = vsub.f32 %v11702_v4, %v9923_v13 }
 0x5d3   :  { %v4260_v48 = vmul.f32 %v9936_v28, %v3988_v8  ;;  %v4516_v5 = vadd.f32 %v9933_v18, %v4256_v20  ;;  %v4768_v11 = vmax.f32 %v4512_v42, 0.0  ;;  %v3991_v41 = vsub.f32 %v11703_v15, %v9923_v13  ;;  %5021 = vst [vmem:[#allocation2 + $0x20] sm:$0xff] %v4765_v47  ;;  %v11706_v47 = vld [vmem:[#allocation26_spill] sm:$0xff] }
 0x5d4   :  { %v4261_v36 = vmul.f32 %v9936_v28, %v3989_v44  ;;  %v4517_v33 = vadd.f32 %v9933_v18, %v4257_v17  ;;  %v4769_v30 = vmax.f32 %v4513_v55, 0.0  ;;  %v3992_v22 = vsub.f32 %v11704_v29, %v9923_v13  ;;  %5022 = vst [vmem:[#allocation2 + $0x28] sm:$0xff] %v4766_v50 }
 0x5d5   :  { %v4262_v24 = vmul.f32 %v9936_v28, %v3990_v2  ;;  %v4518_v8 = vadd.f32 %v9933_v18, %v4258_v14  ;;  %v4770_v4 = vmax.f32 %v4514_v32, 0.0  ;;  %v3993_v20 = vsub.f32 %v11705_v60, %v9923_v13  ;;  %5023 = vst [vmem:[#allocation2 + $0x30] sm:$0xff] %v4767_v37  ;;  %v11707_v14 = vld [vmem:[#allocation27_spill] sm:$0xff] }
 0x5d6   :  { %v4263_v42 = vmul.f32 %v9936_v28, %v3991_v41  ;;  %v4519_v44 = vadd.f32 %v9933_v18, %v4259_v21  ;;  %v4771_v15 = vmax.f32 %v4515_v45, 0.0  ;;  %v3994_v17 = vsub.f32 %v11706_v47, %v9923_v13  ;;  %5024 = vst [vmem:[#allocation2 + $0x38] sm:$0xff] %v4768_v11  ;;  %v11708_v21 = vld [vmem:[#allocation28_spill] sm:$0xff] }
 0x5d7   :  { %v4264_v55 = vmul.f32 %v9936_v28, %v3992_v22  ;;  %v4520_v2 = vadd.f32 %v9933_v18, %v4260_v48  ;;  %v4772_v29 = vmax.f32 %v4516_v5, 0.0  ;;  %v3995_v32 = vsub.f32 %v11707_v14, %v9923_v13  ;;  %5025 = vst [vmem:[#allocation2 + $0x40] sm:$0xff] %v4769_v30  ;;  %v11709_v48 = vld [vmem:[#allocation29_spill] sm:$0xff] }
 0x5d8   :  { %v4265_v50 = vmul.f32 %v9936_v28, %v3993_v20  ;;  %v4521_v41 = vadd.f32 %v9933_v18, %v4261_v36  ;;  %v4773_v60 = vmax.f32 %v4517_v33, 0.0  ;;  %v3996_v45 = vsub.f32 %v11708_v21, %v9923_v13  ;;  %5026 = vst [vmem:[#allocation2 + $0x48] sm:$0xff] %v4770_v4  ;;  %v11710_v36 = vld [vmem:[#allocation30_spill] sm:$0xff] }
 0x5d9   :  { %v4266_v37 = vmul.f32 %v9936_v28, %v3994_v17  ;;  %v4522_v22 = vadd.f32 %v9933_v18, %v4262_v24  ;;  %v4774_v47 = vmax.f32 %v4518_v8, 0.0  ;;  %v3997_v5 = vsub.f32 %v11709_v48, %v9923_v13  ;;  %5027 = vst [vmem:[#allocation2 + $0x50] sm:$0xff] %v4771_v15  ;;  %v11711_v24 = vld [vmem:[#allocation31_spill] sm:$0xff] }
 0x5da   :  { %v4267_v11 = vmul.f32 %v9936_v28, %v3995_v32  ;;  %v4523_v20 = vadd.f32 %v9933_v18, %v4263_v42  ;;  %v4775_v14 = vmax.f32 %v4519_v44, 0.0  ;;  %v3998_v33 = vsub.f32 %v11710_v36, %v9923_v13  ;;  %5028 = vst [vmem:[#allocation2 + $0x58] sm:$0xff] %v4772_v29  ;;  %v11712_v42 = vld [vmem:[#allocation33_spill] sm:$0xff] }
 0x5db   :  { %v4268_v30 = vmul.f32 %v9936_v28, %v3996_v45  ;;  %v4524_v17 = vadd.f32 %v9933_v18, %v4264_v55  ;;  %v4776_v21 = vmax.f32 %v4520_v2, 0.0  ;;  %v3999_v8 = vsub.f32 %v11711_v24, %v9923_v13  ;;  %5029 = vst [vmem:[#allocation2 + $0x60] sm:$0xff] %v4773_v60  ;;  %v11713_v55 = vld [vmem:[#allocation35_spill] sm:$0xff] }
 0x5dc   :  { %v4269_v4 = vmul.f32 %v9936_v28, %v3997_v5  ;;  %v4525_v32 = vadd.f32 %v9933_v18, %v4265_v50  ;;  %v4777_v48 = vmax.f32 %v4521_v41, 0.0  ;;  %v4000_v44 = vsub.f32 %v11712_v42, %v9923_v13  ;;  %5030 = vst [vmem:[#allocation2 + $0x68] sm:$0xff] %v4774_v47  ;;  %v11714_v50 = vld [vmem:[#allocation36_spill] sm:$0xff] }
 0x5dd   :  { %v4270_v15 = vmul.f32 %v9936_v28, %v3998_v33  ;;  %v4526_v45 = vadd.f32 %v9933_v18, %v4266_v37  ;;  %v4778_v36 = vmax.f32 %v4522_v22, 0.0  ;;  %v4001_v2 = vsub.f32 %v11713_v55, %v9923_v13  ;;  %5031 = vst [vmem:[#allocation2 + $0x70] sm:$0xff] %v4775_v14  ;;  %v11715_v37 = vld [vmem:[#allocation38_spill] sm:$0xff] }
 0x5de   :  { %v4271_v29 = vmul.f32 %v9936_v28, %v3999_v8  ;;  %v4527_v5 = vadd.f32 %v9933_v18, %v4267_v11  ;;  %v4779_v24 = vmax.f32 %v4523_v20, 0.0  ;;  %v4002_v41 = vsub.f32 %v11714_v50, %v9923_v13  ;;  %5032 = vst [vmem:[#allocation2 + $0x78] sm:$0xff] %v4776_v21  ;;  %v11716_v11 = vld [vmem:[#allocation40_spill] sm:$0xff] }
 0x5df   :  { %v4272_v60 = vmul.f32 %v9936_v28, %v4000_v44  ;;  %v4528_v33 = vadd.f32 %v9933_v18, %v4268_v30  ;;  %v4780_v42 = vmax.f32 %v4524_v17, 0.0  ;;  %v4003_v22 = vsub.f32 %v11715_v37, %v9923_v13  ;;  %5033 = vst [vmem:[#allocation2 + $0x80] sm:$0xff] %v4777_v48  ;;  %v11717_v30 = vld [vmem:[#allocation42_spill] sm:$0xff] }
 0x5e0   :  { %v4273_v47 = vmul.f32 %v9936_v28, %v4001_v2  ;;  %v4529_v8 = vadd.f32 %v9933_v18, %v4269_v4  ;;  %v4781_v55 = vmax.f32 %v4525_v32, 0.0  ;;  %v4004_v20 = vsub.f32 %v11716_v11, %v9923_v13  ;;  %5034 = vst [vmem:[#allocation2 + $0x88] sm:$0xff] %v4778_v36  ;;  %v11718_v4 = vld [vmem:[#allocation44_spill] sm:$0xff] }
 0x5e1   :  { %v4274_v14 = vmul.f32 %v9936_v28, %v4002_v41  ;;  %v4530_v44 = vadd.f32 %v9933_v18, %v4270_v15  ;;  %v4782_v50 = vmax.f32 %v4526_v45, 0.0  ;;  %v4005_v17 = vsub.f32 %v11717_v30, %v9923_v13  ;;  %5035 = vst [vmem:[#allocation2 + $0x90] sm:$0xff] %v4779_v24  ;;  %v11719_v15 = vld [vmem:[#allocation46_spill] sm:$0xff] }
 0x5e2   :  { %v4275_v21 = vmul.f32 %v9936_v28, %v4003_v22  ;;  %v4531_v2 = vadd.f32 %v9933_v18, %v4271_v29  ;;  %v4783_v37 = vmax.f32 %v4527_v5, 0.0  ;;  %v4006_v32 = vsub.f32 %v11718_v4, %v9923_v13  ;;  %5036 = vst [vmem:[#allocation2 + $0x98] sm:$0xff] %v4780_v42  ;;  %v11720_v29 = vld [vmem:[#allocation48_spill] sm:$0xff] }
 0x5e3   :  { %v4276_v48 = vmul.f32 %v9936_v28, %v4004_v20  ;;  %v4532_v41 = vadd.f32 %v9933_v18, %v4272_v60  ;;  %v4784_v11 = vmax.f32 %v4528_v33, 0.0  ;;  %v4007_v45 = vsub.f32 %v11719_v15, %v9923_v13  ;;  %5037 = vst [vmem:[#allocation2 + $0xa0] sm:$0xff] %v4781_v55  ;;  %v11721_v60 = vld [vmem:[#allocation50_spill] sm:$0xff] }
 0x5e4   :  { %v4277_v36 = vmul.f32 %v9936_v28, %v4005_v17  ;;  %v4533_v22 = vadd.f32 %v9933_v18, %v4273_v47  ;;  %v4785_v30 = vmax.f32 %v4529_v8, 0.0  ;;  %v4008_v5 = vsub.f32 %v11720_v29, %v9923_v13  ;;  %5038 = vst [vmem:[#allocation2 + $0xa8] sm:$0xff] %v4782_v50  ;;  %v11722_v47 = vld [vmem:[#allocation52_spill] sm:$0xff] }
 0x5e5   :  { %v4278_v24 = vmul.f32 %v9936_v28, %v4006_v32  ;;  %v4534_v20 = vadd.f32 %v9933_v18, %v4274_v14  ;;  %v4786_v4 = vmax.f32 %v4530_v44, 0.0  ;;  %v4009_v33 = vsub.f32 %v11721_v60, %v9923_v13  ;;  %5039 = vst [vmem:[#allocation2 + $0xb0] sm:$0xff] %v4783_v37  ;;  %v11723_v14 = vld [vmem:[#allocation54_spill] sm:$0xff] }
 0x5e6   :  { %v4279_v42 = vmul.f32 %v9936_v28, %v4007_v45  ;;  %v4535_v17 = vadd.f32 %v9933_v18, %v4275_v21  ;;  %v4787_v15 = vmax.f32 %v4531_v2, 0.0  ;;  %v4010_v8 = vsub.f32 %v11722_v47, %v9923_v13  ;;  %5040 = vst [vmem:[#allocation2 + $0xb8] sm:$0xff] %v4784_v11  ;;  %v11724_v21 = vld [vmem:[#allocation56_spill] sm:$0xff] }
 0x5e7   :  { %v4280_v55 = vmul.f32 %v9936_v28, %v4008_v5  ;;  %v4536_v32 = vadd.f32 %v9933_v18, %v4276_v48  ;;  %v4788_v29 = vmax.f32 %v4532_v41, 0.0  ;;  %v4011_v44 = vsub.f32 %v11723_v14, %v9923_v13  ;;  %5041 = vst [vmem:[#allocation2 + $0xc0] sm:$0xff] %v4785_v30  ;;  %v11725_v48 = vld [vmem:[#allocation58_spill] sm:$0xff] }
 0x5e8   :  { %v4281_v50 = vmul.f32 %v9936_v28, %v4009_v33  ;;  %v4537_v45 = vadd.f32 %v9933_v18, %v4277_v36  ;;  %v4789_v60 = vmax.f32 %v4533_v22, 0.0  ;;  %v4012_v2 = vsub.f32 %v11724_v21, %v9923_v13  ;;  %5042 = vst [vmem:[#allocation2 + $0xc8] sm:$0xff] %v4786_v4  ;;  %v11726_v36 = vld [vmem:[#allocation60_spill] sm:$0xff] }
 0x5e9   :  { %v4282_v37 = vmul.f32 %v9936_v28, %v4010_v8  ;;  %v4538_v5 = vadd.f32 %v9933_v18, %v4278_v24  ;;  %v4790_v47 = vmax.f32 %v4534_v20, 0.0  ;;  %v4013_v41 = vsub.f32 %v11725_v48, %v9923_v13  ;;  %5043 = vst [vmem:[#allocation2 + $0xd0] sm:$0xff] %v4787_v15  ;;  %v11727_v24 = vld [vmem:[#allocation62_spill] sm:$0xff] }
 0x5ea   :  { %v4283_v11 = vmul.f32 %v9936_v28, %v4011_v44  ;;  %v4539_v33 = vadd.f32 %v9933_v18, %v4279_v42  ;;  %v4791_v14 = vmax.f32 %v4535_v17, 0.0  ;;  %v4014_v22 = vsub.f32 %v11726_v36, %v9923_v13  ;;  %5044 = vst [vmem:[#allocation2 + $0xd8] sm:$0xff] %v4788_v29  ;;  %v11728_v42 = vld [vmem:[#allocation64_spill] sm:$0xff] }
 0x5eb   :  { %v4284_v30 = vmul.f32 %v9936_v28, %v4012_v2  ;;  %v4540_v8 = vadd.f32 %v9933_v18, %v4280_v55  ;;  %v4792_v21 = vmax.f32 %v4536_v32, 0.0  ;;  %v4015_v20 = vsub.f32 %v11727_v24, %v9923_v13  ;;  %5045 = vst [vmem:[#allocation2 + $0xe0] sm:$0xff] %v4789_v60  ;;  %v11729_v55 = vld [vmem:[#allocation66_spill] sm:$0xff] }
 0x5ec   :  { %v4285_v4 = vmul.f32 %v9936_v28, %v4013_v41  ;;  %v4541_v44 = vadd.f32 %v9933_v18, %v4281_v50  ;;  %v4793_v48 = vmax.f32 %v4537_v45, 0.0  ;;  %v4016_v17 = vsub.f32 %v11728_v42, %v9923_v13  ;;  %5046 = vst [vmem:[#allocation2 + $0xe8] sm:$0xff] %v4790_v47  ;;  %v11730_v50 = vld [vmem:[#allocation68_spill] sm:$0xff] }
 0x5ed   :  { %v4286_v15 = vmul.f32 %v9936_v28, %v4014_v22  ;;  %v4542_v2 = vadd.f32 %v9933_v18, %v4282_v37  ;;  %v4794_v36 = vmax.f32 %v4538_v5, 0.0  ;;  %v4017_v32 = vsub.f32 %v11729_v55, %v9923_v13  ;;  %5047 = vst [vmem:[#allocation2 + $0xf0] sm:$0xff] %v4791_v14  ;;  %v11731_v37 = vld [vmem:[#allocation70_spill] sm:$0xff] }
 0x5ee   :  { %v4287_v29 = vmul.f32 %v9936_v28, %v4015_v20  ;;  %v4543_v41 = vadd.f32 %v9933_v18, %v4283_v11  ;;  %v4795_v24 = vmax.f32 %v4539_v33, 0.0  ;;  %v4018_v45 = vsub.f32 %v11730_v50, %v9923_v13  ;;  %5048 = vst [vmem:[#allocation2 + $0xf8] sm:$0xff] %v4792_v21  ;;  %v11732_v11 = vld [vmem:[#allocation72_spill] sm:$0xff] }
 0x5ef   :  { %v4288_v60 = vmul.f32 %v9936_v28, %v4016_v17  ;;  %v4544_v22 = vadd.f32 %v9933_v18, %v4284_v30  ;;  %v4796_v42 = vmax.f32 %v4540_v8, 0.0  ;;  %v4019_v5 = vsub.f32 %v11731_v37, %v9923_v13  ;;  %5049 = vst [vmem:[#allocation2 + $0x100] sm:$0xff] %v4793_v48  ;;  %v11733_v30 = vld [vmem:[#allocation74_spill] sm:$0xff] }
 0x5f0   :  { %v4289_v47 = vmul.f32 %v9936_v28, %v4017_v32  ;;  %v4545_v20 = vadd.f32 %v9933_v18, %v4285_v4  ;;  %v4797_v55 = vmax.f32 %v4541_v44, 0.0  ;;  %v4020_v33 = vsub.f32 %v11732_v11, %v9923_v13  ;;  %5050 = vst [vmem:[#allocation2 + $0x108] sm:$0xff] %v4794_v36  ;;  %v11734_v4 = vld [vmem:[#allocation76_spill] sm:$0xff] }
 0x5f1   :  { %v4290_v14 = vmul.f32 %v9936_v28, %v4018_v45  ;;  %v4546_v17 = vadd.f32 %v9933_v18, %v4286_v15  ;;  %v4798_v50 = vmax.f32 %v4542_v2, 0.0  ;;  %v4021_v8 = vsub.f32 %v11733_v30, %v9923_v13  ;;  %5051 = vst [vmem:[#allocation2 + $0x110] sm:$0xff] %v4795_v24  ;;  %v11735_v15 = vld [vmem:[#allocation78_spill] sm:$0xff] }
 0x5f2   :  { %v4291_v21 = vmul.f32 %v9936_v28, %v4019_v5  ;;  %v4547_v32 = vadd.f32 %v9933_v18, %v4287_v29  ;;  %v4799_v37 = vmax.f32 %v4543_v41, 0.0  ;;  %v4022_v44 = vsub.f32 %v11734_v4, %v9923_v13  ;;  %5052 = vst [vmem:[#allocation2 + $0x118] sm:$0xff] %v4796_v42  ;;  %v11736_v29 = vld [vmem:[#allocation80_spill] sm:$0xff] }
 0x5f3   :  { %v4292_v48 = vmul.f32 %v9936_v28, %v4020_v33  ;;  %v4548_v45 = vadd.f32 %v9933_v18, %v4288_v60  ;;  %v4800_v11 = vmax.f32 %v4544_v22, 0.0  ;;  %v4023_v2 = vsub.f32 %v11735_v15, %v9923_v13  ;;  %5053 = vst [vmem:[#allocation2 + $0x120] sm:$0xff] %v4797_v55  ;;  %v11737_v60 = vld [vmem:[#allocation82_spill] sm:$0xff] }
 0x5f4   :  { %v4293_v36 = vmul.f32 %v9936_v28, %v4021_v8  ;;  %v4549_v5 = vadd.f32 %v9933_v18, %v4289_v47  ;;  %v4801_v30 = vmax.f32 %v4545_v20, 0.0  ;;  %v4024_v41 = vsub.f32 %v11736_v29, %v9923_v13  ;;  %5054 = vst [vmem:[#allocation2 + $0x128] sm:$0xff] %v4798_v50  ;;  %v11738_v47 = vld [vmem:[#allocation84_spill] sm:$0xff] }
 0x5f5   :  { %v4294_v24 = vmul.f32 %v9936_v28, %v4022_v44  ;;  %v4550_v33 = vadd.f32 %v9933_v18, %v4290_v14  ;;  %v4802_v4 = vmax.f32 %v4546_v17, 0.0  ;;  %v4025_v22 = vsub.f32 %v11737_v60, %v9923_v13  ;;  %5055 = vst [vmem:[#allocation2 + $0x130] sm:$0xff] %v4799_v37  ;;  %v11739_v14 = vld [vmem:[#allocation86_spill] sm:$0xff] }
 0x5f6   :  { %v4295_v42 = vmul.f32 %v9936_v28, %v4023_v2  ;;  %v4551_v8 = vadd.f32 %v9933_v18, %v4291_v21  ;;  %v4803_v15 = vmax.f32 %v4547_v32, 0.0  ;;  %v4026_v20 = vsub.f32 %v11738_v47, %v9923_v13  ;;  %5056 = vst [vmem:[#allocation2 + $0x138] sm:$0xff] %v4800_v11  ;;  %v11740_v21 = vld [vmem:[#allocation88_spill] sm:$0xff] }
 0x5f7   :  { %v4296_v55 = vmul.f32 %v9936_v28, %v4024_v41  ;;  %v4552_v44 = vadd.f32 %v9933_v18, %v4292_v48  ;;  %v4804_v29 = vmax.f32 %v4548_v45, 0.0  ;;  %v4027_v17 = vsub.f32 %v11739_v14, %v9923_v13  ;;  %5057 = vst [vmem:[#allocation2 + $0x140] sm:$0xff] %v4801_v30  ;;  %v11741_v48 = vld [vmem:[#allocation90_spill] sm:$0xff] }
 0x5f8   :  { %v4297_v50 = vmul.f32 %v9936_v28, %v4025_v22  ;;  %v4553_v2 = vadd.f32 %v9933_v18, %v4293_v36  ;;  %v4805_v60 = vmax.f32 %v4549_v5, 0.0  ;;  %v4028_v32 = vsub.f32 %v11740_v21, %v9923_v13  ;;  %5058 = vst [vmem:[#allocation2 + $0x148] sm:$0xff] %v4802_v4  ;;  %v11742_v36 = vld [vmem:[#allocation92_spill] sm:$0xff] }
 0x5f9   :  { %v4298_v37 = vmul.f32 %v9936_v28, %v4026_v20  ;;  %v4554_v41 = vadd.f32 %v9933_v18, %v4294_v24  ;;  %v4806_v47 = vmax.f32 %v4550_v33, 0.0  ;;  %v4029_v45 = vsub.f32 %v11741_v48, %v9923_v13  ;;  %5059 = vst [vmem:[#allocation2 + $0x150] sm:$0xff] %v4803_v15  ;;  %v11743_v24 = vld [vmem:[#allocation94_spill] sm:$0xff] }
 0x5fa   :  { %v4299_v11 = vmul.f32 %v9936_v28, %v4027_v17  ;;  %v4555_v22 = vadd.f32 %v9933_v18, %v4295_v42  ;;  %v4807_v14 = vmax.f32 %v4551_v8, 0.0  ;;  %v4030_v5 = vsub.f32 %v11742_v36, %v9923_v13  ;;  %5060 = vst [vmem:[#allocation2 + $0x158] sm:$0xff] %v4804_v29  ;;  %v11744_v42 = vld [vmem:[#allocation96_spill] sm:$0xff] }
 0x5fb   :  { %v4300_v30 = vmul.f32 %v9936_v28, %v4028_v32  ;;  %v4556_v20 = vadd.f32 %v9933_v18, %v4296_v55  ;;  %v4808_v21 = vmax.f32 %v4552_v44, 0.0  ;;  %v4031_v33 = vsub.f32 %v11743_v24, %v9923_v13  ;;  %5061 = vst [vmem:[#allocation2 + $0x160] sm:$0xff] %v4805_v60  ;;  %v11745_v55 = vld [vmem:[#allocation98_spill] sm:$0xff] }
 0x5fc   :  { %v4301_v4 = vmul.f32 %v9936_v28, %v4029_v45  ;;  %v4557_v17 = vadd.f32 %v9933_v18, %v4297_v50  ;;  %v4809_v48 = vmax.f32 %v4553_v2, 0.0  ;;  %v4032_v8 = vsub.f32 %v11744_v42, %v9923_v13  ;;  %5062 = vst [vmem:[#allocation2 + $0x168] sm:$0xff] %v4806_v47  ;;  %v11746_v50 = vld [vmem:[#allocation100_spill] sm:$0xff] }
 0x5fd   :  { %v4302_v15 = vmul.f32 %v9936_v28, %v4030_v5  ;;  %v4558_v32 = vadd.f32 %v9933_v18, %v4298_v37  ;;  %v4810_v36 = vmax.f32 %v4554_v41, 0.0  ;;  %v4033_v44 = vsub.f32 %v11745_v55, %v9923_v13  ;;  %5063 = vst [vmem:[#allocation2 + $0x170] sm:$0xff] %v4807_v14  ;;  %v11747_v37 = vld [vmem:[#allocation102_spill] sm:$0xff] }
 0x5fe   :  { %v4303_v29 = vmul.f32 %v9936_v28, %v4031_v33  ;;  %v4559_v45 = vadd.f32 %v9933_v18, %v4299_v11  ;;  %v4811_v24 = vmax.f32 %v4555_v22, 0.0  ;;  %v4034_v2 = vsub.f32 %v11746_v50, %v9923_v13  ;;  %5064 = vst [vmem:[#allocation2 + $0x178] sm:$0xff] %v4808_v21  ;;  %v11748_v11 = vld [vmem:[#allocation104_spill] sm:$0xff] }
 0x5ff   :  { %v4304_v60 = vmul.f32 %v9936_v28, %v4032_v8  ;;  %v4560_v5 = vadd.f32 %v9933_v18, %v4300_v30  ;;  %v4812_v42 = vmax.f32 %v4556_v20, 0.0  ;;  %v4035_v41 = vsub.f32 %v11747_v37, %v9923_v13  ;;  %5065 = vst [vmem:[#allocation2 + $0x180] sm:$0xff] %v4809_v48  ;;  %v11749_v30 = vld [vmem:[#allocation106_spill] sm:$0xff] }
 0x600   :  { %v4305_v47 = vmul.f32 %v9936_v28, %v4033_v44  ;;  %v4561_v33 = vadd.f32 %v9933_v18, %v4301_v4  ;;  %v4813_v55 = vmax.f32 %v4557_v17, 0.0  ;;  %v4036_v22 = vsub.f32 %v11748_v11, %v9923_v13  ;;  %5066 = vst [vmem:[#allocation2 + $0x188] sm:$0xff] %v4810_v36  ;;  %v11750_v4 = vld [vmem:[#allocation108_spill] sm:$0xff] }
 0x601   :  { %v4306_v14 = vmul.f32 %v9936_v28, %v4034_v2  ;;  %v4562_v8 = vadd.f32 %v9933_v18, %v4302_v15  ;;  %v4814_v50 = vmax.f32 %v4558_v32, 0.0  ;;  %v4037_v20 = vsub.f32 %v11749_v30, %v9923_v13  ;;  %5067 = vst [vmem:[#allocation2 + $0x190] sm:$0xff] %v4811_v24  ;;  %v11751_v15 = vld [vmem:[#allocation110_spill] sm:$0xff] }
 0x602   :  { %v4307_v21 = vmul.f32 %v9936_v28, %v4035_v41  ;;  %v4563_v44 = vadd.f32 %v9933_v18, %v4303_v29  ;;  %v4815_v37 = vmax.f32 %v4559_v45, 0.0  ;;  %v4038_v17 = vsub.f32 %v11750_v4, %v9923_v13  ;;  %5068 = vst [vmem:[#allocation2 + $0x198] sm:$0xff] %v4812_v42  ;;  %v11752_v29 = vld [vmem:[#allocation112_spill] sm:$0xff] }
 0x603   :  { %v4308_v48 = vmul.f32 %v9936_v28, %v4036_v22  ;;  %v4564_v2 = vadd.f32 %v9933_v18, %v4304_v60  ;;  %v4816_v11 = vmax.f32 %v4560_v5, 0.0  ;;  %v4039_v32 = vsub.f32 %v11751_v15, %v9923_v13  ;;  %5069 = vst [vmem:[#allocation2 + $0x1a0] sm:$0xff] %v4813_v55  ;;  %v11753_v60 = vld [vmem:[#allocation114_spill] sm:$0xff] }
 0x604   :  { %v4309_v36 = vmul.f32 %v9936_v28, %v4037_v20  ;;  %v4565_v41 = vadd.f32 %v9933_v18, %v4305_v47  ;;  %v4817_v30 = vmax.f32 %v4561_v33, 0.0  ;;  %v4040_v45 = vsub.f32 %v11752_v29, %v9923_v13  ;;  %5070 = vst [vmem:[#allocation2 + $0x1a8] sm:$0xff] %v4814_v50  ;;  %v11754_v47 = vld [vmem:[#allocation116_spill] sm:$0xff] }
 0x605   :  { %v4310_v24 = vmul.f32 %v9936_v28, %v4038_v17  ;;  %v4566_v22 = vadd.f32 %v9933_v18, %v4306_v14  ;;  %v4818_v4 = vmax.f32 %v4562_v8, 0.0  ;;  %v4041_v5 = vsub.f32 %v11753_v60, %v9923_v13  ;;  %5071 = vst [vmem:[#allocation2 + $0x1b0] sm:$0xff] %v4815_v37  ;;  %v11755_v14 = vld [vmem:[#allocation118_spill] sm:$0xff] }
 0x606   :  { %v4311_v42 = vmul.f32 %v9936_v28, %v4039_v32  ;;  %v4567_v20 = vadd.f32 %v9933_v18, %v4307_v21  ;;  %v4819_v15 = vmax.f32 %v4563_v44, 0.0  ;;  %v4042_v33 = vsub.f32 %v11754_v47, %v9923_v13  ;;  %5072 = vst [vmem:[#allocation2 + $0x1b8] sm:$0xff] %v4816_v11  ;;  %v11756_v21 = vld [vmem:[#allocation120_spill] sm:$0xff] }
 0x607   :  { %v4312_v55 = vmul.f32 %v9936_v28, %v4040_v45  ;;  %v4568_v17 = vadd.f32 %v9933_v18, %v4308_v48  ;;  %v4820_v29 = vmax.f32 %v4564_v2, 0.0  ;;  %v4043_v8 = vsub.f32 %v11755_v14, %v9923_v13  ;;  %5073 = vst [vmem:[#allocation2 + $0x1c0] sm:$0xff] %v4817_v30  ;;  %v11757_v48 = vld [vmem:[#allocation122_spill] sm:$0xff] }
 0x608   :  { %v4313_v50 = vmul.f32 %v9936_v28, %v4041_v5  ;;  %v4569_v32 = vadd.f32 %v9933_v18, %v4309_v36  ;;  %v4821_v60 = vmax.f32 %v4565_v41, 0.0  ;;  %v4044_v44 = vsub.f32 %v11756_v21, %v9923_v13  ;;  %5074 = vst [vmem:[#allocation2 + $0x1c8] sm:$0xff] %v4818_v4  ;;  %v11758_v36 = vld [vmem:[#allocation124_spill] sm:$0xff] }
 0x609   :  { %v4314_v37 = vmul.f32 %v9936_v28, %v4042_v33  ;;  %v4570_v45 = vadd.f32 %v9933_v18, %v4310_v24  ;;  %v4822_v47 = vmax.f32 %v4566_v22, 0.0  ;;  %v4045_v2 = vsub.f32 %v11757_v48, %v9923_v13  ;;  %5075 = vst [vmem:[#allocation2 + $0x1d0] sm:$0xff] %v4819_v15  ;;  %v11759_v24 = vld [vmem:[#allocation126_spill] sm:$0xff] }
 0x60a   :  { %v4315_v11 = vmul.f32 %v9936_v28, %v4043_v8  ;;  %v4571_v5 = vadd.f32 %v9933_v18, %v4311_v42  ;;  %v4823_v14 = vmax.f32 %v4567_v20, 0.0  ;;  %v4046_v41 = vsub.f32 %v11758_v36, %v9923_v13  ;;  %5076 = vst [vmem:[#allocation2 + $0x1d8] sm:$0xff] %v4820_v29  ;;  %v11760_v42 = vld [vmem:[#allocation128_spill] sm:$0xff] }
 0x60b   :  { %v4316_v30 = vmul.f32 %v9936_v28, %v4044_v44  ;;  %v4572_v33 = vadd.f32 %v9933_v18, %v4312_v55  ;;  %v4824_v21 = vmax.f32 %v4568_v17, 0.0  ;;  %v4047_v22 = vsub.f32 %v11759_v24, %v9923_v13  ;;  %5077 = vst [vmem:[#allocation2 + $0x1e0] sm:$0xff] %v4821_v60  ;;  %v11761_v55 = vld [vmem:[#allocation130_spill] sm:$0xff] }
 0x60c   :  { %v4317_v4 = vmul.f32 %v9936_v28, %v4045_v2  ;;  %v4573_v8 = vadd.f32 %v9933_v18, %v4313_v50  ;;  %v4825_v48 = vmax.f32 %v4569_v32, 0.0  ;;  %v4048_v20 = vsub.f32 %v11760_v42, %v9923_v13  ;;  %5078 = vst [vmem:[#allocation2 + $0x1e8] sm:$0xff] %v4822_v47  ;;  %v11762_v50 = vld [vmem:[#allocation132_spill] sm:$0xff] }
 0x60d   :  { %v4318_v15 = vmul.f32 %v9936_v28, %v4046_v41  ;;  %v4574_v44 = vadd.f32 %v9933_v18, %v4314_v37  ;;  %v4826_v36 = vmax.f32 %v4570_v45, 0.0  ;;  %v4049_v17 = vsub.f32 %v11761_v55, %v9923_v13  ;;  %5079 = vst [vmem:[#allocation2 + $0x1f0] sm:$0xff] %v4823_v14  ;;  %v11763_v37 = vld [vmem:[#allocation134_spill] sm:$0xff] }
 0x60e   :  { %v4319_v29 = vmul.f32 %v9936_v28, %v4047_v22  ;;  %v4575_v2 = vadd.f32 %v9933_v18, %v4315_v11  ;;  %v4827_v24 = vmax.f32 %v4571_v5, 0.0  ;;  %v4050_v32 = vsub.f32 %v11762_v50, %v9923_v13  ;;  %5080 = vst [vmem:[#allocation2 + $0x1f8] sm:$0xff] %v4824_v21  ;;  %v11764_v11 = vld [vmem:[#allocation136_spill] sm:$0xff] }
 0x60f   :  { %v4320_v60 = vmul.f32 %v9936_v28, %v4048_v20  ;;  %v4576_v41 = vadd.f32 %v9933_v18, %v4316_v30  ;;  %v4828_v42 = vmax.f32 %v4572_v33, 0.0  ;;  %v4051_v45 = vsub.f32 %v11763_v37, %v9923_v13  ;;  %5081 = vst [vmem:[#allocation2 + $0x200] sm:$0xff] %v4825_v48  ;;  %v11765_v30 = vld [vmem:[#allocation138_spill] sm:$0xff] }
 0x610   :  { %v4321_v47 = vmul.f32 %v9936_v28, %v4049_v17  ;;  %v4577_v22 = vadd.f32 %v9933_v18, %v4317_v4  ;;  %v4829_v55 = vmax.f32 %v4573_v8, 0.0  ;;  %v4052_v5 = vsub.f32 %v11764_v11, %v9923_v13  ;;  %5082 = vst [vmem:[#allocation2 + $0x208] sm:$0xff] %v4826_v36  ;;  %v11766_v4 = vld [vmem:[#allocation140_spill] sm:$0xff] }
 0x611   :  { %v4322_v14 = vmul.f32 %v9936_v28, %v4050_v32  ;;  %v4578_v20 = vadd.f32 %v9933_v18, %v4318_v15  ;;  %v4830_v50 = vmax.f32 %v4574_v44, 0.0  ;;  %v4053_v33 = vsub.f32 %v11765_v30, %v9923_v13  ;;  %5083 = vst [vmem:[#allocation2 + $0x210] sm:$0xff] %v4827_v24  ;;  %v11767_v15 = vld [vmem:[#allocation142_spill] sm:$0xff] }
 0x612   :  { %v4323_v21 = vmul.f32 %v9936_v28, %v4051_v45  ;;  %v4579_v17 = vadd.f32 %v9933_v18, %v4319_v29  ;;  %v4831_v37 = vmax.f32 %v4575_v2, 0.0  ;;  %v4054_v8 = vsub.f32 %v11766_v4, %v9923_v13  ;;  %5084 = vst [vmem:[#allocation2 + $0x218] sm:$0xff] %v4828_v42  ;;  %v11768_v29 = vld [vmem:[#allocation144_spill] sm:$0xff] }
 0x613   :  { %v4324_v48 = vmul.f32 %v9936_v28, %v4052_v5  ;;  %v4580_v32 = vadd.f32 %v9933_v18, %v4320_v60  ;;  %v4832_v11 = vmax.f32 %v4576_v41, 0.0  ;;  %v4055_v44 = vsub.f32 %v11767_v15, %v9923_v13  ;;  %5085 = vst [vmem:[#allocation2 + $0x220] sm:$0xff] %v4829_v55  ;;  %v11769_v60 = vld [vmem:[#allocation146_spill] sm:$0xff] }
 0x614   :  { %v4325_v36 = vmul.f32 %v9936_v28, %v4053_v33  ;;  %v4581_v45 = vadd.f32 %v9933_v18, %v4321_v47  ;;  %v4833_v30 = vmax.f32 %v4577_v22, 0.0  ;;  %v4056_v2 = vsub.f32 %v11768_v29, %v9923_v13  ;;  %5086 = vst [vmem:[#allocation2 + $0x228] sm:$0xff] %v4830_v50  ;;  %v11770_v47 = vld [vmem:[#allocation148_spill] sm:$0xff] }
 0x615   :  { %v4326_v24 = vmul.f32 %v9936_v28, %v4054_v8  ;;  %v4582_v5 = vadd.f32 %v9933_v18, %v4322_v14  ;;  %v4834_v4 = vmax.f32 %v4578_v20, 0.0  ;;  %v4057_v41 = vsub.f32 %v11769_v60, %v9923_v13  ;;  %5087 = vst [vmem:[#allocation2 + $0x230] sm:$0xff] %v4831_v37  ;;  %v11771_v14 = vld [vmem:[#allocation150_spill] sm:$0xff] }
 0x616   :  { %v4327_v42 = vmul.f32 %v9936_v28, %v4055_v44  ;;  %v4583_v33 = vadd.f32 %v9933_v18, %v4323_v21  ;;  %v4835_v15 = vmax.f32 %v4579_v17, 0.0  ;;  %v4058_v22 = vsub.f32 %v11770_v47, %v9923_v13  ;;  %5088 = vst [vmem:[#allocation2 + $0x238] sm:$0xff] %v4832_v11  ;;  %v11772_v21 = vld [vmem:[#allocation152_spill] sm:$0xff] }
 0x617   :  { %v4328_v55 = vmul.f32 %v9936_v28, %v4056_v2  ;;  %v4584_v8 = vadd.f32 %v9933_v18, %v4324_v48  ;;  %v4836_v29 = vmax.f32 %v4580_v32, 0.0  ;;  %v4059_v20 = vsub.f32 %v11771_v14, %v9923_v13  ;;  %5089 = vst [vmem:[#allocation2 + $0x240] sm:$0xff] %v4833_v30  ;;  %v11773_v48 = vld [vmem:[#allocation154_spill] sm:$0xff] }
 0x618   :  { %v4329_v50 = vmul.f32 %v9936_v28, %v4057_v41  ;;  %v4585_v44 = vadd.f32 %v9933_v18, %v4325_v36  ;;  %v4837_v60 = vmax.f32 %v4581_v45, 0.0  ;;  %v4060_v17 = vsub.f32 %v11772_v21, %v9923_v13  ;;  %5090 = vst [vmem:[#allocation2 + $0x248] sm:$0xff] %v4834_v4  ;;  %v11774_v36 = vld [vmem:[#allocation156_spill] sm:$0xff] }
 0x619   :  { %v4330_v37 = vmul.f32 %v9936_v28, %v4058_v22  ;;  %v4586_v2 = vadd.f32 %v9933_v18, %v4326_v24  ;;  %v4838_v47 = vmax.f32 %v4582_v5, 0.0  ;;  %v4061_v32 = vsub.f32 %v11773_v48, %v9923_v13  ;;  %5091 = vst [vmem:[#allocation2 + $0x250] sm:$0xff] %v4835_v15  ;;  %v11775_v24 = vld [vmem:[#allocation158_spill] sm:$0xff] }
 0x61a   :  { %v4331_v11 = vmul.f32 %v9936_v28, %v4059_v20  ;;  %v4587_v41 = vadd.f32 %v9933_v18, %v4327_v42  ;;  %v4839_v14 = vmax.f32 %v4583_v33, 0.0  ;;  %v4062_v45 = vsub.f32 %v11774_v36, %v9923_v13  ;;  %5092 = vst [vmem:[#allocation2 + $0x258] sm:$0xff] %v4836_v29  ;;  %v11776_v42 = vld [vmem:[#allocation160_spill] sm:$0xff] }
 0x61b   :  { %v4332_v30 = vmul.f32 %v9936_v28, %v4060_v17  ;;  %v4588_v22 = vadd.f32 %v9933_v18, %v4328_v55  ;;  %v4840_v21 = vmax.f32 %v4584_v8, 0.0  ;;  %v4063_v5 = vsub.f32 %v11775_v24, %v9923_v13  ;;  %5093 = vst [vmem:[#allocation2 + $0x260] sm:$0xff] %v4837_v60  ;;  %v11777_v55 = vld [vmem:[#allocation162_spill] sm:$0xff] }
 0x61c   :  { %v4333_v4 = vmul.f32 %v9936_v28, %v4061_v32  ;;  %v4589_v20 = vadd.f32 %v9933_v18, %v4329_v50  ;;  %v4841_v48 = vmax.f32 %v4585_v44, 0.0  ;;  %v4064_v33 = vsub.f32 %v11776_v42, %v9923_v13  ;;  %5094 = vst [vmem:[#allocation2 + $0x268] sm:$0xff] %v4838_v47  ;;  %v11778_v50 = vld [vmem:[#allocation164_spill] sm:$0xff] }
 0x61d   :  { %v4334_v15 = vmul.f32 %v9936_v28, %v4062_v45  ;;  %v4590_v17 = vadd.f32 %v9933_v18, %v4330_v37  ;;  %v4842_v36 = vmax.f32 %v4586_v2, 0.0  ;;  %v4065_v8 = vsub.f32 %v11777_v55, %v9923_v13  ;;  %5095 = vst [vmem:[#allocation2 + $0x270] sm:$0xff] %v4839_v14  ;;  %v11779_v37 = vld [vmem:[#allocation166_spill] sm:$0xff] }
 0x61e   :  { %v4335_v29 = vmul.f32 %v9936_v28, %v4063_v5  ;;  %v4591_v32 = vadd.f32 %v9933_v18, %v4331_v11  ;;  %v4843_v24 = vmax.f32 %v4587_v41, 0.0  ;;  %v4066_v44 = vsub.f32 %v11778_v50, %v9923_v13  ;;  %5096 = vst [vmem:[#allocation2 + $0x278] sm:$0xff] %v4840_v21  ;;  %v11780_v11 = vld [vmem:[#allocation168_spill] sm:$0xff] }
 0x61f   :  { %v4336_v60 = vmul.f32 %v9936_v28, %v4064_v33  ;;  %v4592_v45 = vadd.f32 %v9933_v18, %v4332_v30  ;;  %v4844_v42 = vmax.f32 %v4588_v22, 0.0  ;;  %v4067_v2 = vsub.f32 %v11779_v37, %v9923_v13  ;;  %5097 = vst [vmem:[#allocation2 + $0x280] sm:$0xff] %v4841_v48 }
 0x620   :  { %v4337_v47 = vmul.f32 %v9936_v28, %v4065_v8  ;;  %v4593_v5 = vadd.f32 %v9933_v18, %v4333_v4  ;;  %v4845_v55 = vmax.f32 %v4589_v20, 0.0  ;;  %v4068_v41 = vsub.f32 %v11780_v11, %v9923_v13  ;;  %5098 = vst [vmem:[#allocation2 + $0x288] sm:$0xff] %v4842_v36  ;;  %v11781_v4 = vld [vmem:[#allocation170_spill] sm:$0xff] }
 0x621   :  { %v4338_v14 = vmul.f32 %v9936_v28, %v4066_v44  ;;  %v4594_v33 = vadd.f32 %v9933_v18, %v4334_v15  ;;  %v4846_v50 = vmax.f32 %v4590_v17, 0.0  ;;  %v4069_v30 = vsub.f32 %v8489_v31, %v9923_v13  ;;  %5099 = vst [vmem:[#allocation2 + $0x290] sm:$0xff] %v4843_v24  ;;  %v11782_v15 = vld [vmem:[#allocation171_spill] sm:$0xff] }
 0x622   :  { %v4339_v22 = vmul.f32 %v9936_v28, %v4067_v2  ;;  %v4595_v21 = vadd.f32 %v9933_v18, %v4335_v29  ;;  %v4847_v8 = vmax.f32 %v4591_v32, 0.0  ;;  %v4070_v20 = vsub.f32 %v11781_v4, %v9923_v13  ;;  %5100 = vst [vmem:[#allocation2 + $0x298] sm:$0xff] %v4844_v42 }
 0x623   :  { %v4340_v48 = vmul.f32 %v9936_v28, %v4068_v41  ;;  %v4596_v44 = vadd.f32 %v9933_v18, %v4336_v60  ;;  %v4848_v37 = vmax.f32 %v4592_v45, 0.0  ;;  %v4071_v17 = vsub.f32 %v11782_v15, %v9923_v13  ;;  %5101 = vst [vmem:[#allocation2 + $0x2a0] sm:$0xff] %v4845_v55  ;;  %v11783_v60 = vld [vmem:[#allocation173_spill] sm:$0xff] }
 0x624   :  { %v4341_v31 = vmul.f32 %v9936_v28, %v4069_v30  ;;  %v4597_v36 = vadd.f32 %v9933_v18, %v4337_v47  ;;  %v4849_v2 = vmax.f32 %v4593_v5, 0.0  ;;  %v4072_v29 = vsub.f32 %v8590_v53, %v9923_v13  ;;  %5102 = vst [vmem:[#allocation2 + $0x2a8] sm:$0xff] %v4846_v50  ;;  %v11784_v47 = vld [vmem:[#allocation175_spill] sm:$0xff] }
 0x625   :  { %v4342_v32 = vmul.f32 %v9936_v28, %v4070_v20  ;;  %v4598_v24 = vadd.f32 %v9933_v18, %v4338_v14  ;;  %v4850_v11 = vmax.f32 %v4594_v33, 0.0  ;;  %v4073_v45 = vsub.f32 %v11783_v60, %v9923_v13  ;;  %5103 = vst [vmem:[#allocation2 + $0x2b0] sm:$0xff] %v4847_v8  ;;  %v11785_v14 = vld [vmem:[#allocation176_spill] sm:$0xff] }
 0x626   :  { %v4343_v42 = vmul.f32 %v9936_v28, %v4071_v17  ;;  %v4599_v41 = vadd.f32 %v9933_v18, %v4339_v22  ;;  %v4851_v30 = vmax.f32 %v4595_v21, 0.0  ;;  %v4074_v5 = vsub.f32 %v11784_v47, %v9923_v13  ;;  %5104 = vst [vmem:[#allocation2 + $0x2b8] sm:$0xff] %v4848_v37  ;;  %v11786_v22 = vld [vmem:[#allocation177_spill] sm:$0xff] }
 0x627   :  { %v4344_v53 = vmul.f32 %v9936_v28, %v4072_v29  ;;  %v4600_v55 = vadd.f32 %v9933_v18, %v4340_v48  ;;  %v4852_v4 = vmax.f32 %v4596_v44, 0.0  ;;  %v4075_v33 = vsub.f32 %v11785_v14, %v9923_v13  ;;  %5105 = vst [vmem:[#allocation2 + $0x2c0] sm:$0xff] %v4849_v2 }
 0x628   :  { %v4345_v50 = vmul.f32 %v9936_v28, %v4073_v45  ;;  %v4601_v20 = vadd.f32 %v9933_v18, %v4341_v31  ;;  %v4853_v15 = vmax.f32 %v4597_v36, 0.0  ;;  %v4076_v21 = vsub.f32 %v11786_v22, %v9923_v13  ;;  %5106 = vst [vmem:[#allocation2 + $0x2c8] sm:$0xff] %v4850_v11  ;;  %v11787_v31 = vld [vmem:[#allocation180_spill] sm:$0xff] }
 0x629   :  { %v4346_v8 = vmul.f32 %v9936_v28, %v4074_v5  ;;  %v4602_v17 = vadd.f32 %v9933_v18, %v4342_v32  ;;  %v4854_v29 = vmax.f32 %v4598_v24, 0.0  ;;  %v4077_v48 = vsub.f32 %v8744_v51, %v9923_v13  ;;  %5107 = vst [vmem:[#allocation2 + $0x2d0] sm:$0xff] %v4851_v30  ;;  %v11788_v32 = vld [vmem:[#allocation182_spill] sm:$0xff] }
 0x62a   :  { %v4347_v44 = vmul.f32 %v9936_v28, %v4075_v33  ;;  %v4603_v37 = vadd.f32 %v9933_v18, %v4343_v42  ;;  %v4855_v60 = vmax.f32 %v4599_v41, 0.0  ;;  %v4078_v36 = vsub.f32 %v11787_v31, %v9923_v13  ;;  %5108 = vst [vmem:[#allocation2 + $0x2d8] sm:$0xff] %v4852_v4  ;;  %v11789_v42 = vld [vmem:[#allocation184_spill] sm:$0xff] }
 0x62b   :  { %v4348_v2 = vmul.f32 %v9936_v28, %v4076_v21  ;;  %v4604_v45 = vadd.f32 %v9933_v18, %v4344_v53  ;;  %v4856_v47 = vmax.f32 %v4600_v55, 0.0  ;;  %v4079_v24 = vsub.f32 %v11788_v32, %v9923_v13  ;;  %5109 = vst [vmem:[#allocation2 + $0x2e0] sm:$0xff] %v4853_v15  ;;  %v10366_v53 = vld [vmem:[%s10976_s3] ss:$0 sm:$0xff] }
 0x62c   :  { %v4349_v51 = vmul.f32 %v9936_v28, %v4077_v48  ;;  %v4605_v11 = vadd.f32 %v9933_v18, %v4345_v50  ;;  %v4857_v5 = vmax.f32 %v4601_v20, 0.0  ;;  %v4080_v41 = vsub.f32 %v11789_v42, %v9923_v13  ;;  %5110 = vst [vmem:[#allocation2 + $0x2e8] sm:$0xff] %v4854_v29  ;;  %v11790_v20 = vld [vmem:[#allocation187_spill] sm:$0xff] }
 0x62d   :  { %v4350_v30 = vmul.f32 %v9936_v28, %v4078_v36  ;;  %v4606_v55 = vadd.f32 %v10366_v53, %v4346_v8  ;;  %v4858_v4 = vmax.f32 %v4602_v17, 0.0  ;;  %v4081_v14 = vsub.f32 %v8872_v62, %v9923_v13  ;;  %5111 = vst [vmem:[#allocation2 + $0x2f0] sm:$0xff] %v4855_v60  ;;  %v11791_v8 = vld [vmem:[#allocation189_spill] sm:$0xff] }
 0x62e   :  { %v4351_v18 = vmul.f32 %v9936_v28, %v4079_v24  ;;  %v4607_v33 = vadd.f32 %v10366_v53, %v4347_v44  ;;  %v4859_v50 = vmax.f32 %v4603_v37, 0.0  ;;  %v4082_v15 = vsub.f32 %v11790_v20, %v9923_v13  ;;  %5112 = vst [vmem:[#allocation2 + $0x2f8] sm:$0xff] %v4856_v47  ;;  %v11792_v44 = vld [vmem:[#allocation191_spill] sm:$0xff] }
 0x62f   :  { %v4352_v22 = vmul.f32 %v9936_v28, %v4080_v41  ;;  %v4608_v21 = vadd.f32 %v10366_v53, %v4348_v2  ;;  %v4860_v48 = vmax.f32 %v4604_v45, 0.0  ;;  %v4083_v17 = vsub.f32 %v11791_v8, %v9923_v13  ;;  %5113 = vst [vmem:[#allocation2 + $0x300] sm:$0xff] %v4857_v5  ;;  %v11793_v2 = vld [vmem:[#allocation193_spill] sm:$0xff] }
 0x630   :  { %v4353_v62 = vmul.f32 %v9936_v28, %v4081_v14  ;;  %v4609_v29 = vadd.f32 %v10366_v53, %v4349_v51  ;;  %v4861_v31 = vmax.f32 %v4605_v11, 0.0  ;;  %v4084_v37 = vsub.f32 %v11792_v44, %v9923_v13  ;;  %5114 = vst [vmem:[#allocation2 + $0x308] sm:$0xff] %v4858_v4  ;;  %v11794_v51 = vld [vmem:[#allocation195_spill] sm:$0xff] }
 0x631   :  { %v4354_v60 = vmul.f32 %v9936_v28, %v4082_v15  ;;  %v4610_v36 = vadd.f32 %v10366_v53, %v4350_v30  ;;  %v4862_v32 = vmax.f32 %v4606_v55, 0.0  ;;  %v4085_v45 = vsub.f32 %v11793_v2, %v9923_v13  ;;  %5115 = vst [vmem:[#allocation2 + $0x310] sm:$0xff] %v4859_v50  ;;  %v11795_v30 = vld [vmem:[#allocation197_spill] sm:$0xff] }
 0x632   :  { %v4355_v47 = vmul.f32 %v9936_v28, %v4083_v17  ;;  %v4611_v24 = vadd.f32 %v10366_v53, %v4351_v18  ;;  %v4863_v42 = vmax.f32 %v4607_v33, 0.0  ;;  %v4086_v11 = vsub.f32 %v11794_v51, %v9923_v13  ;;  %5116 = vst [vmem:[#allocation2 + $0x318] sm:$0xff] %v4860_v48  ;;  %v11796_v18 = vld [vmem:[#allocation199_spill] sm:$0xff] }
 0x633   :  { %v4356_v5 = vmul.f32 %v9936_v28, %v4084_v37  ;;  %v4612_v41 = vadd.f32 %v10366_v53, %v4352_v22  ;;  %v4864_v14 = vmax.f32 %v4608_v21, 0.0  ;;  %v4087_v55 = vsub.f32 %v11795_v30, %v9923_v13  ;;  %5117 = vst [vmem:[#allocation2 + $0x320] sm:$0xff] %v4861_v31  ;;  %v11797_v22 = vld [vmem:[#allocation201_spill] sm:$0xff] }
 0x634   :  { %v4357_v4 = vmul.f32 %v9936_v28, %v4085_v45  ;;  %v4613_v20 = vadd.f32 %v10366_v53, %v4353_v62  ;;  %v4865_v15 = vmax.f32 %v4609_v29, 0.0  ;;  %v4088_v33 = vsub.f32 %v11796_v18, %v9923_v13  ;;  %5118 = vst [vmem:[#allocation2 + $0x328] sm:$0xff] %v4862_v32  ;;  %v11798_v62 = vld [vmem:[#allocation207_spill] sm:$0xff] }
 0x635   :  { %v4358_v50 = vmul.f32 %v9936_v28, %v4086_v11  ;;  %v4614_v8 = vadd.f32 %v10366_v53, %v4354_v60  ;;  %v4866_v17 = vmax.f32 %v4610_v36, 0.0  ;;  %v4089_v21 = vsub.f32 %v11797_v22, %v9923_v13  ;;  %5119 = vst [vmem:[#allocation2 + $0x330] sm:$0xff] %v4863_v42  ;;  %v11799_v60 = vld [vmem:[#allocation208_spill] sm:$0xff] }
 0x636   :  { %v4359_v48 = vmul.f32 %v9936_v28, %v4087_v55  ;;  %v4615_v44 = vadd.f32 %v10366_v53, %v4355_v47  ;;  %v4867_v37 = vmax.f32 %v4611_v24, 0.0  ;;  %v4090_v29 = vsub.f32 %v11798_v62, %v9923_v13  ;;  %5120 = vst [vmem:[#allocation2 + $0x338] sm:$0xff] %v4864_v14  ;;  %v11800_v47 = vld [vmem:[#allocation209_spill] sm:$0xff] }
 0x637   :  { %v4360_v31 = vmul.f32 %v9936_v28, %v4088_v33  ;;  %v4616_v2 = vadd.f32 %v10366_v53, %v4356_v5  ;;  %v4868_v45 = vmax.f32 %v4612_v41, 0.0  ;;  %v4091_v36 = vsub.f32 %v11799_v60, %v9923_v13  ;;  %5121 = vst [vmem:[#allocation2 + $0x340] sm:$0xff] %v4865_v15  ;;  %v11801_v5 = vld [vmem:[#allocation210_spill] sm:$0xff] }
 0x638   :  { %v4361_v32 = vmul.f32 %v9936_v28, %v4089_v21  ;;  %v4617_v51 = vadd.f32 %v10366_v53, %v4357_v4  ;;  %v4869_v11 = vmax.f32 %v4613_v20, 0.0  ;;  %v4092_v24 = vsub.f32 %v11800_v47, %v9923_v13  ;;  %5122 = vst [vmem:[#allocation2 + $0x348] sm:$0xff] %v4866_v17  ;;  %v11802_v4 = vld [vmem:[#allocation211_spill] sm:$0xff] }
 0x639   :  { %v4362_v42 = vmul.f32 %v9936_v28, %v4090_v29  ;;  %v4618_v30 = vadd.f32 %v10366_v53, %v4358_v50  ;;  %v4870_v55 = vmax.f32 %v4614_v8, 0.0  ;;  %v4093_v41 = vsub.f32 %v11801_v5, %v9923_v13  ;;  %5123 = vst [vmem:[#allocation2 + $0x350] sm:$0xff] %v4867_v37  ;;  %v11803_v50 = vld [vmem:[#allocation212_spill] sm:$0xff] }
 0x63a   :  { %v4363_v14 = vmul.f32 %v9936_v28, %v4091_v36  ;;  %v4619_v18 = vadd.f32 %v10366_v53, %v4359_v48  ;;  %v4871_v33 = vmax.f32 %v4615_v44, 0.0  ;;  %v4094_v20 = vsub.f32 %v11802_v4, %v9923_v13  ;;  %5124 = vst [vmem:[#allocation2 + $0x358] sm:$0xff] %v4868_v45  ;;  %v11804_v48 = vld [vmem:[#allocation213_spill] sm:$0xff] }
 0x63b   :  { %v4364_v15 = vmul.f32 %v9936_v28, %v4092_v24  ;;  %v4620_v22 = vadd.f32 %v10366_v53, %v4360_v31  ;;  %v4872_v21 = vmax.f32 %v4616_v2, 0.0  ;;  %v4095_v8 = vsub.f32 %v11803_v50, %v9923_v13  ;;  %5125 = vst [vmem:[#allocation2 + $0x360] sm:$0xff] %v4869_v11  ;;  %v11805_v31 = vld [vmem:[#allocation214_spill] sm:$0xff] }
 0x63c   :  { %v4365_v17 = vmul.f32 %v9936_v28, %v4093_v41  ;;  %v4621_v62 = vadd.f32 %v10366_v53, %v4361_v32  ;;  %v4873_v29 = vmax.f32 %v4617_v51, 0.0  ;;  %v4096_v44 = vsub.f32 %v11804_v48, %v9923_v13  ;;  %5126 = vst [vmem:[#allocation2 + $0x368] sm:$0xff] %v4870_v55  ;;  %v11806_v32 = vld [vmem:[#allocation215_spill] sm:$0xff] }
 0x63d   :  { %v4366_v37 = vmul.f32 %v9936_v28, %v4094_v20  ;;  %v4622_v60 = vadd.f32 %v10366_v53, %v4362_v42  ;;  %v4874_v36 = vmax.f32 %v4618_v30, 0.0  ;;  %v4097_v2 = vsub.f32 %v11805_v31, %v9923_v13  ;;  %5127 = vst [vmem:[#allocation2 + $0x370] sm:$0xff] %v4871_v33  ;;  %v11807_v42 = vld [vmem:[#allocation216_spill] sm:$0xff] }
 0x63e   :  { %v4367_v45 = vmul.f32 %v9936_v28, %v4095_v8  ;;  %v4623_v47 = vadd.f32 %v10366_v53, %v4363_v14  ;;  %v4875_v24 = vmax.f32 %v4619_v18, 0.0  ;;  %v4098_v51 = vsub.f32 %v11806_v32, %v9923_v13  ;;  %5128 = vst [vmem:[#allocation2 + $0x378] sm:$0xff] %v4872_v21  ;;  %v11808_v14 = vld [vmem:[#allocation217_spill] sm:$0xff] }
 0x63f   :  { %v4368_v11 = vmul.f32 %v9936_v28, %v4096_v44  ;;  %v4624_v5 = vadd.f32 %v10366_v53, %v4364_v15  ;;  %v4876_v41 = vmax.f32 %v4620_v22, 0.0  ;;  %v4099_v30 = vsub.f32 %v11807_v42, %v9923_v13  ;;  %5129 = vst [vmem:[#allocation2 + $0x380] sm:$0xff] %v4873_v29  ;;  %v11809_v15 = vld [vmem:[#allocation32_spill] sm:$0xff] }
 0x640   :  { %v4369_v55 = vmul.f32 %v9936_v28, %v4097_v2  ;;  %v4625_v4 = vadd.f32 %v10366_v53, %v4365_v17  ;;  %v4877_v20 = vmax.f32 %v4621_v62, 0.0  ;;  %v4100_v18 = vsub.f32 %v11808_v14, %v9923_v13  ;;  %5130 = vst [vmem:[#allocation2 + $0x388] sm:$0xff] %v4874_v36  ;;  %v11810_v17 = vld [vmem:[#allocation34_spill] sm:$0xff] }
 0x641   :  { %v4370_v33 = vmul.f32 %v9936_v28, %v4098_v51  ;;  %v4626_v50 = vadd.f32 %v10366_v53, %v4366_v37  ;;  %v4878_v8 = vmax.f32 %v4622_v60, 0.0  ;;  %v4101_v22 = vsub.f32 %v11809_v15, %v9923_v13  ;;  %5131 = vst [vmem:[#allocation2 + $0x390] sm:$0xff] %v4875_v24  ;;  %v11811_v37 = vld [vmem:[#allocation37_spill] sm:$0xff] }
 0x642   :  { %v4371_v21 = vmul.f32 %v9936_v28, %v4099_v30  ;;  %v4627_v48 = vadd.f32 %v10366_v53, %v4367_v45  ;;  %v4879_v44 = vmax.f32 %v4623_v47, 0.0  ;;  %v4102_v62 = vsub.f32 %v11810_v17, %v9923_v13  ;;  %5132 = vst [vmem:[#allocation2 + $0x398] sm:$0xff] %v4876_v41  ;;  %v11812_v45 = vld [vmem:[#allocation39_spill] sm:$0xff] }
 0x643   :  { %v4372_v29 = vmul.f32 %v9936_v28, %v4100_v18  ;;  %v4628_v31 = vadd.f32 %v10366_v53, %v4368_v11  ;;  %v4880_v2 = vmax.f32 %v4624_v5, 0.0  ;;  %v4103_v60 = vsub.f32 %v11811_v37, %v9923_v13  ;;  %5133 = vst [vmem:[#allocation2 + $0x3a0] sm:$0xff] %v4877_v20  ;;  %v11813_v11 = vld [vmem:[#allocation41_spill] sm:$0xff] }
 0x644   :  { %v4373_v36 = vmul.f32 %v9936_v28, %v4101_v22  ;;  %v4629_v32 = vadd.f32 %v10366_v53, %v4369_v55  ;;  %v4881_v51 = vmax.f32 %v4625_v4, 0.0  ;;  %v4104_v47 = vsub.f32 %v11812_v45, %v9923_v13  ;;  %5134 = vst [vmem:[#allocation2 + $0x3a8] sm:$0xff] %v4878_v8  ;;  %v11814_v55 = vld [vmem:[#allocation43_spill] sm:$0xff] }
 0x645   :  { %v4374_v24 = vmul.f32 %v9936_v28, %v4102_v62  ;;  %v4630_v42 = vadd.f32 %v10366_v53, %v4370_v33  ;;  %v4882_v30 = vmax.f32 %v4626_v50, 0.0  ;;  %v4105_v5 = vsub.f32 %v11813_v11, %v9923_v13  ;;  %5135 = vst [vmem:[#allocation2 + $0x3b0] sm:$0xff] %v4879_v44  ;;  %v11815_v33 = vld [vmem:[#allocation45_spill] sm:$0xff] }
 0x646   :  { %v4375_v41 = vmul.f32 %v9936_v28, %v4103_v60  ;;  %v4631_v14 = vadd.f32 %v10366_v53, %v4371_v21  ;;  %v4883_v18 = vmax.f32 %v4627_v48, 0.0  ;;  %v4106_v4 = vsub.f32 %v11814_v55, %v9923_v13  ;;  %5136 = vst [vmem:[#allocation2 + $0x3b8] sm:$0xff] %v4880_v2  ;;  %v11816_v21 = vld [vmem:[#allocation47_spill] sm:$0xff] }
 0x647   :  { %v4376_v20 = vmul.f32 %v9936_v28, %v4104_v47  ;;  %v4632_v15 = vadd.f32 %v10366_v53, %v4372_v29  ;;  %v4884_v22 = vmax.f32 %v4628_v31, 0.0  ;;  %v4107_v50 = vsub.f32 %v11815_v33, %v9923_v13  ;;  %5137 = vst [vmem:[#allocation2 + $0x3c0] sm:$0xff] %v4881_v51  ;;  %v11817_v29 = vld [vmem:[#allocation49_spill] sm:$0xff] }
 0x648   :  { %v4377_v8 = vmul.f32 %v9936_v28, %v4105_v5  ;;  %v4633_v17 = vadd.f32 %v10366_v53, %v4373_v36  ;;  %v4885_v62 = vmax.f32 %v4629_v32, 0.0  ;;  %v4108_v48 = vsub.f32 %v11816_v21, %v9923_v13  ;;  %5138 = vst [vmem:[#allocation2 + $0x3c8] sm:$0xff] %v4882_v30  ;;  %v11818_v36 = vld [vmem:[#allocation51_spill] sm:$0xff] }
 0x649   :  { %v4378_v44 = vmul.f32 %v9936_v28, %v4106_v4  ;;  %v4634_v37 = vadd.f32 %v10366_v53, %v4374_v24  ;;  %v4886_v60 = vmax.f32 %v4630_v42, 0.0  ;;  %v4109_v31 = vsub.f32 %v11817_v29, %v9923_v13  ;;  %5139 = vst [vmem:[#allocation2 + $0x3d0] sm:$0xff] %v4883_v18  ;;  %v11819_v24 = vld [vmem:[#allocation53_spill] sm:$0xff] }
 0x64a   :  { %v4379_v2 = vmul.f32 %v9936_v28, %v4107_v50  ;;  %v4635_v45 = vadd.f32 %v10366_v53, %v4375_v41  ;;  %v4887_v47 = vmax.f32 %v4631_v14, 0.0  ;;  %v4110_v32 = vsub.f32 %v11818_v36, %v9923_v13  ;;  %5140 = vst [vmem:[#allocation2 + $0x3d8] sm:$0xff] %v4884_v22  ;;  %v11820_v41 = vld [vmem:[#allocation55_spill] sm:$0xff] }
 0x64b   :  { %v4380_v51 = vmul.f32 %v9936_v28, %v4108_v48  ;;  %v4636_v11 = vadd.f32 %v10366_v53, %v4376_v20  ;;  %v4888_v5 = vmax.f32 %v4632_v15, 0.0  ;;  %v4111_v42 = vsub.f32 %v11819_v24, %v9923_v13  ;;  %5141 = vst [vmem:[#allocation2 + $0x3e0] sm:$0xff] %v4885_v62  ;;  %v11821_v20 = vld [vmem:[#allocation57_spill] sm:$0xff] }
 0x64c   :  { %v4381_v30 = vmul.f32 %v9936_v28, %v4109_v31  ;;  %v4637_v55 = vadd.f32 %v10366_v53, %v4377_v8  ;;  %v4889_v4 = vmax.f32 %v4633_v17, 0.0  ;;  %v4112_v14 = vsub.f32 %v11820_v41, %v9923_v13  ;;  %5142 = vst [vmem:[#allocation2 + $0x3e8] sm:$0xff] %v4886_v60  ;;  %v11822_v8 = vld [vmem:[#allocation59_spill] sm:$0xff] }
 0x64d   :  { %v4382_v18 = vmul.f32 %v9936_v28, %v4110_v32  ;;  %v4638_v33 = vadd.f32 %v10366_v53, %v4378_v44  ;;  %v4890_v50 = vmax.f32 %v4634_v37, 0.0  ;;  %v4113_v15 = vsub.f32 %v11821_v20, %v9923_v13  ;;  %5143 = vst [vmem:[#allocation2 + $0x3f0] sm:$0xff] %v4887_v47  ;;  %v11823_v44 = vld [vmem:[#allocation61_spill] sm:$0xff] }
 0x64e   :  { %v4383_v22 = vmul.f32 %v9936_v28, %v4111_v42  ;;  %v4639_v21 = vadd.f32 %v10366_v53, %v4379_v2  ;;  %v4891_v48 = vmax.f32 %v4635_v45, 0.0  ;;  %v4114_v17 = vsub.f32 %v11822_v8, %v9923_v13  ;;  %5144 = vst [vmem:[#allocation2 + $0x3f8] sm:$0xff] %v4888_v5  ;;  %v11824_v2 = vld [vmem:[#allocation63_spill] sm:$0xff] }
 0x64f   :  { %v4384_v62 = vmul.f32 %v9936_v28, %v4112_v14  ;;  %v4640_v29 = vadd.f32 %v10366_v53, %v4380_v51  ;;  %v4892_v31 = vmax.f32 %v4636_v11, 0.0  ;;  %v4115_v37 = vsub.f32 %v11823_v44, %v9923_v13  ;;  %5145 = vst [vmem:[#allocation2 + $0x400] sm:$0xff] %v4889_v4  ;;  %v11825_v51 = vld [vmem:[#allocation65_spill] sm:$0xff] }
 0x650   :  { %v4385_v60 = vmul.f32 %v9936_v28, %v4113_v15  ;;  %v4641_v36 = vadd.f32 %v10366_v53, %v4381_v30  ;;  %v4893_v32 = vmax.f32 %v4637_v55, 0.0  ;;  %v4116_v45 = vsub.f32 %v11824_v2, %v9923_v13  ;;  %5146 = vst [vmem:[#allocation2 + $0x408] sm:$0xff] %v4890_v50  ;;  %v11826_v30 = vld [vmem:[#allocation67_spill] sm:$0xff] }
 0x651   :  { %v4386_v47 = vmul.f32 %v9936_v28, %v4114_v17  ;;  %v4642_v24 = vadd.f32 %v10366_v53, %v4382_v18  ;;  %v4894_v42 = vmax.f32 %v4638_v33, 0.0  ;;  %v4117_v11 = vsub.f32 %v11825_v51, %v9923_v13  ;;  %5147 = vst [vmem:[#allocation2 + $0x410] sm:$0xff] %v4891_v48  ;;  %v11827_v18 = vld [vmem:[#allocation69_spill] sm:$0xff] }
 0x652   :  { %v4387_v5 = vmul.f32 %v9936_v28, %v4115_v37  ;;  %v4643_v41 = vadd.f32 %v10366_v53, %v4383_v22  ;;  %v4895_v14 = vmax.f32 %v4639_v21, 0.0  ;;  %v4118_v55 = vsub.f32 %v11826_v30, %v9923_v13  ;;  %5148 = vst [vmem:[#allocation2 + $0x418] sm:$0xff] %v4892_v31  ;;  %v11828_v22 = vld [vmem:[#allocation71_spill] sm:$0xff] }
 0x653   :  { %v4388_v4 = vmul.f32 %v9936_v28, %v4116_v45  ;;  %v4644_v20 = vadd.f32 %v10366_v53, %v4384_v62  ;;  %v4896_v15 = vmax.f32 %v4640_v29, 0.0  ;;  %v4119_v33 = vsub.f32 %v11827_v18, %v9923_v13  ;;  %5149 = vst [vmem:[#allocation2 + $0x420] sm:$0xff] %v4893_v32  ;;  %v11829_v62 = vld [vmem:[#allocation73_spill] sm:$0xff] }
 0x654   :  { %v4389_v50 = vmul.f32 %v9936_v28, %v4117_v11  ;;  %v4645_v8 = vadd.f32 %v10366_v53, %v4385_v60  ;;  %v4897_v17 = vmax.f32 %v4641_v36, 0.0  ;;  %v4120_v21 = vsub.f32 %v11828_v22, %v9923_v13  ;;  %5150 = vst [vmem:[#allocation2 + $0x428] sm:$0xff] %v4894_v42  ;;  %v11830_v60 = vld [vmem:[#allocation75_spill] sm:$0xff] }
 0x655   :  { %v4390_v48 = vmul.f32 %v9936_v28, %v4118_v55  ;;  %v4646_v44 = vadd.f32 %v10366_v53, %v4386_v47  ;;  %v4898_v37 = vmax.f32 %v4642_v24, 0.0  ;;  %v4121_v29 = vsub.f32 %v11829_v62, %v9923_v13  ;;  %5151 = vst [vmem:[#allocation2 + $0x430] sm:$0xff] %v4895_v14  ;;  %v11831_v47 = vld [vmem:[#allocation77_spill] sm:$0xff] }
 0x656   :  { %v4391_v31 = vmul.f32 %v9936_v28, %v4119_v33  ;;  %v4647_v2 = vadd.f32 %v10366_v53, %v4387_v5  ;;  %v4899_v45 = vmax.f32 %v4643_v41, 0.0  ;;  %v4122_v36 = vsub.f32 %v11830_v60, %v9923_v13  ;;  %5152 = vst [vmem:[#allocation2 + $0x438] sm:$0xff] %v4896_v15  ;;  %v11832_v5 = vld [vmem:[#allocation79_spill] sm:$0xff] }
 0x657   :  { %v4392_v32 = vmul.f32 %v9936_v28, %v4120_v21  ;;  %v4648_v51 = vadd.f32 %v10366_v53, %v4388_v4  ;;  %v4900_v11 = vmax.f32 %v4644_v20, 0.0  ;;  %v4123_v24 = vsub.f32 %v11831_v47, %v9923_v13  ;;  %5153 = vst [vmem:[#allocation2 + $0x440] sm:$0xff] %v4897_v17  ;;  %v11833_v4 = vld [vmem:[#allocation81_spill] sm:$0xff] }
 0x658   :  { %v4393_v42 = vmul.f32 %v9936_v28, %v4121_v29  ;;  %v4649_v30 = vadd.f32 %v10366_v53, %v4389_v50  ;;  %v4901_v55 = vmax.f32 %v4645_v8, 0.0  ;;  %v4124_v41 = vsub.f32 %v11832_v5, %v9923_v13  ;;  %5154 = vst [vmem:[#allocation2 + $0x448] sm:$0xff] %v4898_v37  ;;  %v11834_v50 = vld [vmem:[#allocation83_spill] sm:$0xff] }
 0x659   :  { %v4394_v14 = vmul.f32 %v9936_v28, %v4122_v36  ;;  %v4650_v18 = vadd.f32 %v10366_v53, %v4390_v48  ;;  %v4902_v33 = vmax.f32 %v4646_v44, 0.0  ;;  %v4125_v20 = vsub.f32 %v11833_v4, %v9923_v13  ;;  %5155 = vst [vmem:[#allocation2 + $0x450] sm:$0xff] %v4899_v45  ;;  %v11835_v48 = vld [vmem:[#allocation85_spill] sm:$0xff] }
 0x65a   :  { %v4395_v15 = vmul.f32 %v9936_v28, %v4123_v24  ;;  %v4651_v22 = vadd.f32 %v10366_v53, %v4391_v31  ;;  %v4903_v21 = vmax.f32 %v4647_v2, 0.0  ;;  %v4126_v8 = vsub.f32 %v11834_v50, %v9923_v13  ;;  %5156 = vst [vmem:[#allocation2 + $0x458] sm:$0xff] %v4900_v11  ;;  %v11836_v31 = vld [vmem:[#allocation87_spill] sm:$0xff] }
 0x65b   :  { %v4396_v17 = vmul.f32 %v9936_v28, %v4124_v41  ;;  %v4652_v62 = vadd.f32 %v10366_v53, %v4392_v32  ;;  %v4904_v29 = vmax.f32 %v4648_v51, 0.0  ;;  %v4127_v44 = vsub.f32 %v11835_v48, %v9923_v13  ;;  %5157 = vst [vmem:[#allocation2 + $0x460] sm:$0xff] %v4901_v55  ;;  %v11837_v32 = vld [vmem:[#allocation89_spill] sm:$0xff] }
 0x65c   :  { %v4397_v37 = vmul.f32 %v9936_v28, %v4125_v20  ;;  %v4653_v60 = vadd.f32 %v10366_v53, %v4393_v42  ;;  %v4905_v36 = vmax.f32 %v4649_v30, 0.0  ;;  %v4128_v2 = vsub.f32 %v11836_v31, %v9923_v13  ;;  %5158 = vst [vmem:[#allocation2 + $0x468] sm:$0xff] %v4902_v33  ;;  %v11838_v42 = vld [vmem:[#allocation91_spill] sm:$0xff] }
 0x65d   :  { %v4398_v45 = vmul.f32 %v9936_v28, %v4126_v8  ;;  %v4654_v47 = vadd.f32 %v10366_v53, %v4394_v14  ;;  %v4906_v24 = vmax.f32 %v4650_v18, 0.0  ;;  %v4129_v51 = vsub.f32 %v11837_v32, %v9923_v13  ;;  %5159 = vst [vmem:[#allocation2 + $0x470] sm:$0xff] %v4903_v21  ;;  %v11839_v14 = vld [vmem:[#allocation93_spill] sm:$0xff] }
 0x65e   :  { %v4399_v11 = vmul.f32 %v9936_v28, %v4127_v44  ;;  %v4655_v5 = vadd.f32 %v10366_v53, %v4395_v15  ;;  %v4907_v41 = vmax.f32 %v4651_v22, 0.0  ;;  %v4130_v30 = vsub.f32 %v11838_v42, %v9923_v13  ;;  %5160 = vst [vmem:[#allocation2 + $0x478] sm:$0xff] %v4904_v29  ;;  %v11840_v15 = vld [vmem:[#allocation95_spill] sm:$0xff] }
 0x65f   :  { %v4400_v55 = vmul.f32 %v9936_v28, %v4128_v2  ;;  %v4656_v4 = vadd.f32 %v10366_v53, %v4396_v17  ;;  %v4908_v20 = vmax.f32 %v4652_v62, 0.0  ;;  %v4131_v18 = vsub.f32 %v11839_v14, %v9923_v13  ;;  %5161 = vst [vmem:[#allocation2 + $0x480] sm:$0xff] %v4905_v36  ;;  %v11841_v17 = vld [vmem:[#allocation97_spill] sm:$0xff] }
 0x660   :  { %v4401_v33 = vmul.f32 %v9936_v28, %v4129_v51  ;;  %v4657_v50 = vadd.f32 %v10366_v53, %v4397_v37  ;;  %v4909_v8 = vmax.f32 %v4653_v60, 0.0  ;;  %v4132_v22 = vsub.f32 %v11840_v15, %v9923_v13  ;;  %5162 = vst [vmem:[#allocation2 + $0x488] sm:$0xff] %v4906_v24  ;;  %v11842_v37 = vld [vmem:[#allocation99_spill] sm:$0xff] }
 0x661   :  { %v4402_v21 = vmul.f32 %v9936_v28, %v4130_v30  ;;  %v4658_v48 = vadd.f32 %v10366_v53, %v4398_v45  ;;  %v4910_v44 = vmax.f32 %v4654_v47, 0.0  ;;  %v4133_v62 = vsub.f32 %v11841_v17, %v9923_v13  ;;  %5163 = vst [vmem:[#allocation2 + $0x490] sm:$0xff] %v4907_v41  ;;  %v11843_v45 = vld [vmem:[#allocation101_spill] sm:$0xff] }
 0x662   :  { %v4403_v29 = vmul.f32 %v9936_v28, %v4131_v18  ;;  %v4659_v31 = vadd.f32 %v10366_v53, %v4399_v11  ;;  %v4911_v2 = vmax.f32 %v4655_v5, 0.0  ;;  %v4134_v60 = vsub.f32 %v11842_v37, %v9923_v13  ;;  %5164 = vst [vmem:[#allocation2 + $0x498] sm:$0xff] %v4908_v20  ;;  %v11844_v11 = vld [vmem:[#allocation103_spill] sm:$0xff] }
 0x663   :  { %v4404_v36 = vmul.f32 %v9936_v28, %v4132_v22  ;;  %v4660_v32 = vadd.f32 %v10366_v53, %v4400_v55  ;;  %v4912_v51 = vmax.f32 %v4656_v4, 0.0  ;;  %v4135_v47 = vsub.f32 %v11843_v45, %v9923_v13  ;;  %5165 = vst [vmem:[#allocation2 + $0x4a0] sm:$0xff] %v4909_v8  ;;  %v11845_v55 = vld [vmem:[#allocation105_spill] sm:$0xff] }
 0x664   :  { %v4405_v24 = vmul.f32 %v9936_v28, %v4133_v62  ;;  %v4661_v42 = vadd.f32 %v10366_v53, %v4401_v33  ;;  %v4913_v30 = vmax.f32 %v4657_v50, 0.0  ;;  %v4136_v5 = vsub.f32 %v11844_v11, %v9923_v13  ;;  %5166 = vst [vmem:[#allocation2 + $0x4a8] sm:$0xff] %v4910_v44  ;;  %v11846_v33 = vld [vmem:[#allocation107_spill] sm:$0xff] }
 0x665   :  { %v4406_v41 = vmul.f32 %v9936_v28, %v4134_v60  ;;  %v4662_v14 = vadd.f32 %v10366_v53, %v4402_v21  ;;  %v4914_v18 = vmax.f32 %v4658_v48, 0.0  ;;  %v4137_v4 = vsub.f32 %v11845_v55, %v9923_v13  ;;  %5167 = vst [vmem:[#allocation2 + $0x4b0] sm:$0xff] %v4911_v2  ;;  %v11847_v21 = vld [vmem:[#allocation109_spill] sm:$0xff] }
 0x666   :  { %v4407_v20 = vmul.f32 %v9936_v28, %v4135_v47  ;;  %v4663_v15 = vadd.f32 %v10366_v53, %v4403_v29  ;;  %v4915_v22 = vmax.f32 %v4659_v31, 0.0  ;;  %v4138_v50 = vsub.f32 %v11846_v33, %v9923_v13  ;;  %5168 = vst [vmem:[#allocation2 + $0x4b8] sm:$0xff] %v4912_v51  ;;  %v11848_v29 = vld [vmem:[#allocation111_spill] sm:$0xff] }
 0x667   :  { %v4408_v8 = vmul.f32 %v9936_v28, %v4136_v5  ;;  %v4664_v17 = vadd.f32 %v10366_v53, %v4404_v36  ;;  %v4916_v62 = vmax.f32 %v4660_v32, 0.0  ;;  %v4139_v48 = vsub.f32 %v11847_v21, %v9923_v13  ;;  %5169 = vst [vmem:[#allocation2 + $0x4c0] sm:$0xff] %v4913_v30  ;;  %v11849_v36 = vld [vmem:[#allocation113_spill] sm:$0xff] }
 0x668   :  { %v4409_v44 = vmul.f32 %v9936_v28, %v4137_v4  ;;  %v4665_v37 = vadd.f32 %v10366_v53, %v4405_v24  ;;  %v4917_v60 = vmax.f32 %v4661_v42, 0.0  ;;  %v4140_v31 = vsub.f32 %v11848_v29, %v9923_v13  ;;  %5170 = vst [vmem:[#allocation2 + $0x4c8] sm:$0xff] %v4914_v18  ;;  %v11850_v24 = vld [vmem:[#allocation115_spill] sm:$0xff] }
 0x669   :  { %v4410_v2 = vmul.f32 %v9936_v28, %v4138_v50  ;;  %v4666_v45 = vadd.f32 %v10366_v53, %v4406_v41  ;;  %v4918_v47 = vmax.f32 %v4662_v14, 0.0  ;;  %v4141_v32 = vsub.f32 %v11849_v36, %v9923_v13  ;;  %5171 = vst [vmem:[#allocation2 + $0x4d0] sm:$0xff] %v4915_v22  ;;  %v11851_v41 = vld [vmem:[#allocation117_spill] sm:$0xff] }
 0x66a   :  { %v4411_v51 = vmul.f32 %v9936_v28, %v4139_v48  ;;  %v4667_v11 = vadd.f32 %v10366_v53, %v4407_v20  ;;  %v4919_v5 = vmax.f32 %v4663_v15, 0.0  ;;  %v4142_v42 = vsub.f32 %v11850_v24, %v9923_v13  ;;  %5172 = vst [vmem:[#allocation2 + $0x4d8] sm:$0xff] %v4916_v62  ;;  %v11852_v20 = vld [vmem:[#allocation119_spill] sm:$0xff] }
 0x66b   :  { %v4412_v30 = vmul.f32 %v9936_v28, %v4140_v31  ;;  %v4668_v55 = vadd.f32 %v10366_v53, %v4408_v8  ;;  %v4920_v4 = vmax.f32 %v4664_v17, 0.0  ;;  %v4143_v14 = vsub.f32 %v11851_v41, %v9923_v13  ;;  %5173 = vst [vmem:[#allocation2 + $0x4e0] sm:$0xff] %v4917_v60  ;;  %v11853_v8 = vld [vmem:[#allocation121_spill] sm:$0xff] }
 0x66c   :  { %v4413_v18 = vmul.f32 %v9936_v28, %v4141_v32  ;;  %v4669_v33 = vadd.f32 %v10366_v53, %v4409_v44  ;;  %v4921_v50 = vmax.f32 %v4665_v37, 0.0  ;;  %v4144_v15 = vsub.f32 %v11852_v20, %v9923_v13  ;;  %5174 = vst [vmem:[#allocation2 + $0x4e8] sm:$0xff] %v4918_v47  ;;  %v11854_v44 = vld [vmem:[#allocation123_spill] sm:$0xff] }
 0x66d   :  { %v4414_v22 = vmul.f32 %v9936_v28, %v4142_v42  ;;  %v4670_v21 = vadd.f32 %v10366_v53, %v4410_v2  ;;  %v4922_v48 = vmax.f32 %v4666_v45, 0.0  ;;  %v4145_v17 = vsub.f32 %v11853_v8, %v9923_v13  ;;  %5175 = vst [vmem:[#allocation2 + $0x4f0] sm:$0xff] %v4919_v5  ;;  %v11855_v2 = vld [vmem:[#allocation125_spill] sm:$0xff] }
 0x66e   :  { %v4415_v62 = vmul.f32 %v9936_v28, %v4143_v14  ;;  %v4671_v29 = vadd.f32 %v10366_v53, %v4411_v51  ;;  %v4923_v31 = vmax.f32 %v4667_v11, 0.0  ;;  %v4146_v37 = vsub.f32 %v11854_v44, %v9923_v13  ;;  %5176 = vst [vmem:[#allocation2 + $0x4f8] sm:$0xff] %v4920_v4  ;;  %v11856_v51 = vld [vmem:[#allocation127_spill] sm:$0xff] }
 0x66f   :  { %v4416_v60 = vmul.f32 %v9936_v28, %v4144_v15  ;;  %v4672_v36 = vadd.f32 %v10366_v53, %v4412_v30  ;;  %v4924_v32 = vmax.f32 %v4668_v55, 0.0  ;;  %v4147_v45 = vsub.f32 %v11855_v2, %v9923_v13  ;;  %5177 = vst [vmem:[#allocation2 + $0x500] sm:$0xff] %v4921_v50  ;;  %v11857_v30 = vld [vmem:[#allocation129_spill] sm:$0xff] }
 0x670   :  { %v4417_v47 = vmul.f32 %v9936_v28, %v4145_v17  ;;  %v4673_v24 = vadd.f32 %v10366_v53, %v4413_v18  ;;  %v4925_v42 = vmax.f32 %v4669_v33, 0.0  ;;  %v4148_v11 = vsub.f32 %v11856_v51, %v9923_v13  ;;  %5178 = vst [vmem:[#allocation2 + $0x508] sm:$0xff] %v4922_v48  ;;  %v11858_v18 = vld [vmem:[#allocation131_spill] sm:$0xff] }
 0x671   :  { %v4418_v5 = vmul.f32 %v9936_v28, %v4146_v37  ;;  %v4674_v41 = vadd.f32 %v10366_v53, %v4414_v22  ;;  %v4926_v14 = vmax.f32 %v4670_v21, 0.0  ;;  %v4149_v55 = vsub.f32 %v11857_v30, %v9923_v13  ;;  %5179 = vst [vmem:[#allocation2 + $0x510] sm:$0xff] %v4923_v31  ;;  %v11859_v22 = vld [vmem:[#allocation133_spill] sm:$0xff] }
 0x672   :  { %v4419_v4 = vmul.f32 %v9936_v28, %v4147_v45  ;;  %v4675_v20 = vadd.f32 %v10366_v53, %v4415_v62  ;;  %v4927_v15 = vmax.f32 %v4671_v29, 0.0  ;;  %v4150_v33 = vsub.f32 %v11858_v18, %v9923_v13  ;;  %5180 = vst [vmem:[#allocation2 + $0x518] sm:$0xff] %v4924_v32  ;;  %v11860_v62 = vld [vmem:[#allocation135_spill] sm:$0xff] }
 0x673   :  { %v4420_v50 = vmul.f32 %v9936_v28, %v4148_v11  ;;  %v4676_v8 = vadd.f32 %v10366_v53, %v4416_v60  ;;  %v4928_v17 = vmax.f32 %v4672_v36, 0.0  ;;  %v4151_v21 = vsub.f32 %v11859_v22, %v9923_v13  ;;  %5181 = vst [vmem:[#allocation2 + $0x520] sm:$0xff] %v4925_v42  ;;  %v11861_v60 = vld [vmem:[#allocation137_spill] sm:$0xff] }
 0x674   :  { %v4421_v48 = vmul.f32 %v9936_v28, %v4149_v55  ;;  %v4677_v44 = vadd.f32 %v10366_v53, %v4417_v47  ;;  %v4929_v37 = vmax.f32 %v4673_v24, 0.0  ;;  %v4152_v29 = vsub.f32 %v11860_v62, %v9923_v13  ;;  %5182 = vst [vmem:[#allocation2 + $0x528] sm:$0xff] %v4926_v14  ;;  %v11862_v47 = vld [vmem:[#allocation139_spill] sm:$0xff] }
 0x675   :  { %v4422_v31 = vmul.f32 %v9936_v28, %v4150_v33  ;;  %v4678_v2 = vadd.f32 %v10366_v53, %v4418_v5  ;;  %v4930_v45 = vmax.f32 %v4674_v41, 0.0  ;;  %v4153_v36 = vsub.f32 %v11861_v60, %v9923_v13  ;;  %5183 = vst [vmem:[#allocation2 + $0x530] sm:$0xff] %v4927_v15  ;;  %v11863_v5 = vld [vmem:[#allocation141_spill] sm:$0xff] }
 0x676   :  { %v4423_v32 = vmul.f32 %v9936_v28, %v4151_v21  ;;  %v4679_v51 = vadd.f32 %v10366_v53, %v4419_v4  ;;  %v4931_v11 = vmax.f32 %v4675_v20, 0.0  ;;  %v4154_v24 = vsub.f32 %v11862_v47, %v9923_v13  ;;  %5184 = vst [vmem:[#allocation2 + $0x538] sm:$0xff] %v4928_v17  ;;  %v11864_v4 = vld [vmem:[#allocation143_spill] sm:$0xff] }
 0x677   :  { %v4424_v42 = vmul.f32 %v9936_v28, %v4152_v29  ;;  %v4680_v30 = vadd.f32 %v10366_v53, %v4420_v50  ;;  %v4932_v55 = vmax.f32 %v4676_v8, 0.0  ;;  %v4155_v41 = vsub.f32 %v11863_v5, %v9923_v13  ;;  %5185 = vst [vmem:[#allocation2 + $0x540] sm:$0xff] %v4929_v37  ;;  %v11865_v50 = vld [vmem:[#allocation145_spill] sm:$0xff] }
 0x678   :  { %v4425_v14 = vmul.f32 %v9936_v28, %v4153_v36  ;;  %v4681_v18 = vadd.f32 %v10366_v53, %v4421_v48  ;;  %v4933_v33 = vmax.f32 %v4677_v44, 0.0  ;;  %v4156_v20 = vsub.f32 %v11864_v4, %v9923_v13  ;;  %5186 = vst [vmem:[#allocation2 + $0x548] sm:$0xff] %v4930_v45  ;;  %v11866_v48 = vld [vmem:[#allocation147_spill] sm:$0xff] }
 0x679   :  { %v4426_v15 = vmul.f32 %v9936_v28, %v4154_v24  ;;  %v4682_v22 = vadd.f32 %v10366_v53, %v4422_v31  ;;  %v4934_v21 = vmax.f32 %v4678_v2, 0.0  ;;  %v4157_v8 = vsub.f32 %v11865_v50, %v9923_v13  ;;  %5187 = vst [vmem:[#allocation2 + $0x550] sm:$0xff] %v4931_v11 }
 0x67a   :  { %v4427_v17 = vmul.f32 %v9936_v28, %v4155_v41  ;;  %v4683_v62 = vadd.f32 %v10366_v53, %v4423_v32  ;;  %v4935_v29 = vmax.f32 %v4679_v51, 0.0  ;;  %v4158_v44 = vsub.f32 %v11866_v48, %v9923_v13  ;;  %5188 = vst [vmem:[#allocation2 + $0x558] sm:$0xff] %v4932_v55  ;;  %v11867_v32 = vld [vmem:[#allocation151_spill] sm:$0xff] }
 0x67b   :  { %v4428_v37 = vmul.f32 %v9936_v28, %v4156_v20  ;;  %v4684_v60 = vadd.f32 %v10366_v53, %v4424_v42  ;;  %v4936_v36 = vmax.f32 %v4680_v30, 0.0  ;;  %v4159_v31 = vsub.f32 %v11657_v59, %v9923_v13  ;;  %5189 = vst [vmem:[#allocation2 + $0x560] sm:$0xff] %v4933_v33  ;;  %v11868_v42 = vld [vmem:[#allocation153_spill] sm:$0xff] }
 0x67c   :  { %v4429_v2 = vmul.f32 %v9936_v28, %v4157_v8  ;;  %v4685_v45 = vadd.f32 %v10366_v53, %v4425_v14  ;;  %v4937_v47 = vmax.f32 %v4681_v18, 0.0  ;;  %v4160_v51 = vsub.f32 %v11867_v32, %v9923_v13  ;;  %5190 = vst [vmem:[#allocation2 + $0x568] sm:$0xff] %v4934_v21  ;;  %v11869_v14 = vld [vmem:[#allocation155_spill] sm:$0xff] }
 0x67d   :  { %v4430_v11 = vmul.f32 %v9936_v28, %v4158_v44  ;;  %v4686_v24 = vadd.f32 %v10366_v53, %v4426_v15  ;;  %v4938_v5 = vmax.f32 %v4682_v22, 0.0  ;;  %v4161_v30 = vsub.f32 %v11868_v42, %v9923_v13  ;;  %5191 = vst [vmem:[#allocation2 + $0x570] sm:$0xff] %v4935_v29  ;;  %v11870_v15 = vld [vmem:[#allocation157_spill] sm:$0xff] }
 0x67e   :  { %v4431_v59 = vmul.f32 %v9936_v28, %v4159_v31  ;;  %v4687_v55 = vadd.f32 %v10366_v53, %v4427_v17  ;;  %v4939_v41 = vmax.f32 %v4683_v62, 0.0  ;;  %v4162_v18 = vsub.f32 %v11869_v14, %v9923_v13  ;;  %5192 = vst [vmem:[#allocation2 + $0x578] sm:$0xff] %v4936_v36  ;;  %v11871_v17 = vld [vmem:[#allocation159_spill] sm:$0xff] }
 0x67f   :  { %v4432_v33 = vmul.f32 %v9936_v28, %v4160_v51  ;;  %v4688_v4 = vadd.f32 %v10366_v53, %v4428_v37  ;;  %v4940_v20 = vmax.f32 %v4684_v60, 0.0  ;;  %v4163_v22 = vsub.f32 %v11870_v15, %v9923_v13  ;;  %5193 = vst [vmem:[#allocation2 + $0x580] sm:$0xff] %v4937_v47  ;;  %v11872_v37 = vld [vmem:[#allocation161_spill] sm:$0xff] }
 0x680   :  { %v4433_v21 = vmul.f32 %v9936_v28, %v4161_v30  ;;  %v4689_v50 = vadd.f32 %v10366_v53, %v4429_v2  ;;  %v4941_v8 = vmax.f32 %v4685_v45, 0.0  ;;  %v4164_v62 = vsub.f32 %v11871_v17, %v9923_v13  ;;  %5194 = vst [vmem:[#allocation2 + $0x588] sm:$0xff] %v4938_v5  ;;  %v11873_v2 = vld [vmem:[#allocation163_spill] sm:$0xff] }
 0x681   :  { %v4434_v29 = vmul.f32 %v9936_v28, %v4162_v18  ;;  %v4690_v48 = vadd.f32 %v10366_v53, %v4430_v11  ;;  %v4942_v44 = vmax.f32 %v4686_v24, 0.0  ;;  %v4165_v60 = vsub.f32 %v11872_v37, %v9923_v13  ;;  %5195 = vst [vmem:[#allocation2 + $0x590] sm:$0xff] %v4939_v41 }
 0x682   :  { %v4435_v36 = vmul.f32 %v9936_v28, %v4163_v22  ;;  %v4691_v31 = vadd.f32 %v10366_v53, %v4431_v59  ;;  %v4943_v32 = vmax.f32 %v4687_v55, 0.0  ;;  %v4166_v45 = vsub.f32 %v11873_v2, %v9923_v13  ;;  %5196 = vst [vmem:[#allocation2 + $0x598] sm:$0xff] %v4940_v20 }
 0x683   :  { %v4436_v47 = vmul.f32 %v9936_v28, %v4164_v62  ;;  %v4692_v51 = vadd.f32 %v10366_v53, %v4432_v33  ;;  %v4944_v42 = vmax.f32 %v4688_v4, 0.0  ;;  %v4167_v11 = vsub.f32 %v11665_v10, %v9923_v13  ;;  %5197 = vst [vmem:[#allocation2 + $0x5a0] sm:$0xff] %v4941_v8 }
 0x684   :  { %v4437_v24 = vmul.f32 %v9936_v28, %v4165_v60  ;;  %v4693_v5 = vadd.f32 %v10366_v53, %v4433_v21  ;;  %v4945_v30 = vmax.f32 %v4689_v50, 0.0  ;;  %v4168_v59 = vsub.f32 %v11666_v12, %v9923_v13  ;;  %5198 = vst [vmem:[#allocation2 + $0x5a8] sm:$0xff] %v4942_v44 }
 0x685   :  { %v4438_v55 = vmul.f32 %v9936_v28, %v4166_v45  ;;  %v4694_v41 = vadd.f32 %v10366_v53, %v4434_v29  ;;  %v4946_v14 = vmax.f32 %v4690_v48, 0.0  ;;  %v4169_v18 = vsub.f32 %v11667_v56, %v9923_v13  ;;  %5199 = vst [vmem:[#allocation2 + $0x5b0] sm:$0xff] %v4943_v32  ;;  %v11874_v48 = vld [vmem:[#allocation172_spill] sm:$0xff] }
 0x686   :  { %v4439_v10 = vmul.f32 %v9936_v28, %v4167_v11  ;;  %v4695_v33 = vadd.f32 %v10366_v53, %v4435_v36  ;;  %v4947_v4 = vmax.f32 %v4691_v31, 0.0  ;;  %v4170_v20 = vsub.f32 %v8493_v1, %v9923_v13  ;;  %5200 = vst [vmem:[#allocation2 + $0x5b8] sm:$0xff] %v4944_v42  ;;  %v11875_v36 = vld [vmem:[#allocation174_spill] sm:$0xff] }
 0x687   :  { %v4440_v12 = vmul.f32 %v9936_v28, %v4168_v59  ;;  %v4696_v15 = vadd.f32 %v10366_v53, %v4436_v47  ;;  %v4948_v22 = vmax.f32 %v4692_v51, 0.0  ;;  %v4171_v21 = vsub.f32 %v8542_v38, %v9923_v13  ;;  %5201 = vst [vmem:[#allocation2 + $0x5c0] sm:$0xff] %v4945_v30  ;;  %v11876_v59 = vld [vmem:[#allocation178_spill] sm:$0xff] }
 0x688   :  { %v4441_v56 = vmul.f32 %v9936_v28, %v4169_v18  ;;  %v4697_v50 = vadd.f32 %v10366_v53, %v4437_v24  ;;  %v4949_v8 = vmax.f32 %v4693_v5, 0.0  ;;  %v4172_v17 = vsub.f32 %v8556_v9, %v9923_v13  ;;  %5202 = vst [vmem:[#allocation2 + $0x5c8] sm:$0xff] %v4946_v14  ;;  %v11877_v18 = vld [vmem:[#allocation179_spill] sm:$0xff] }
 0x689   :  { %v4442_v1 = vmul.f32 %v9936_v28, %v4170_v20  ;;  %v4698_v62 = vadd.f32 %v10366_v53, %v4438_v55  ;;  %v4950_v29 = vmax.f32 %v4694_v41, 0.0  ;;  %v4173_v44 = vsub.f32 %v11874_v48, %v9923_v13  ;;  %5203 = vst [vmem:[#allocation2 + $0x5d0] sm:$0xff] %v4947_v4  ;;  %v11878_v20 = vld [vmem:[#allocation181_spill] sm:$0xff] }
 0x68a   :  { %v4443_v38 = vmul.f32 %v9936_v28, %v4171_v21  ;;  %v4699_v37 = vadd.f32 %v10366_v53, %v4439_v10  ;;  %v4951_v60 = vmax.f32 %v4695_v33, 0.0  ;;  %v4174_v31 = vsub.f32 %v11875_v36, %v9923_v13  ;;  %5204 = vst [vmem:[#allocation2 + $0x5d8] sm:$0xff] %v4948_v22 }
 0x68b   :  { %v4444_v9 = vmul.f32 %v9936_v28, %v4172_v17  ;;  %v4700_v32 = vadd.f32 %v10366_v53, %v4440_v12  ;;  %v4952_v2 = vmax.f32 %v4696_v15, 0.0  ;;  %v4175_v45 = vsub.f32 %v8670_v19, %v9923_v13  ;;  %5205 = vst [vmem:[#allocation2 + $0x5e0] sm:$0xff] %v4949_v8 }
 0x68c   :  { %v4445_v47 = vmul.f32 %v9936_v28, %v4173_v44  ;;  %v4701_v51 = vadd.f32 %v10366_v53, %v4441_v56  ;;  %v4953_v42 = vmax.f32 %v4697_v50, 0.0  ;;  %v4176_v11 = vsub.f32 %v8684_v39, %v9923_v13  ;;  %5206 = vst [vmem:[#allocation2 + $0x5e8] sm:$0xff] %v4950_v29  ;;  %v11879_v56 = vld [vmem:[#allocation183_spill] sm:$0xff] }
 0x68d   :  { %v4446_v24 = vmul.f32 %v9936_v28, %v4174_v31  ;;  %v4702_v5 = vadd.f32 %v10366_v53, %v4442_v1  ;;  %v4954_v30 = vmax.f32 %v4698_v62, 0.0  ;;  %v4177_v55 = vsub.f32 %v11876_v59, %v9923_v13  ;;  %5207 = vst [vmem:[#allocation2 + $0x5f0] sm:$0xff] %v4951_v60  ;;  %v11880_v62 = vld [vmem:[#allocation185_spill] sm:$0xff]  ;;  %v11884_v59 = vld [vmem:[#allocation192_spill] sm:$0xff] }
 0x68e   :  { %v4447_v19 = vmul.f32 %v9936_v28, %v4175_v45  ;;  %v4703_v41 = vadd.f32 %v10366_v53, %v4443_v38  ;;  %v4955_v14 = vmax.f32 %v4699_v37, 0.0  ;;  %v4178_v10 = vsub.f32 %v11877_v18, %v9923_v13  ;;  %5208 = vst [vmem:[#allocation2 + $0x5f8] sm:$0xff] %v4952_v2  ;;  %v11881_v37 = vld [vmem:[#allocation186_spill] sm:$0xff] }
 0x68f   :  { %v4448_v39 = vmul.f32 %v9936_v28, %v4176_v11  ;;  %v4704_v33 = vadd.f32 %v10366_v53, %v4444_v9  ;;  %v4956_v4 = vmax.f32 %v4700_v32, 0.0  ;;  %v4179_v12 = vsub.f32 %v11878_v20, %v9923_v13  ;;  %5209 = vst [vmem:[#allocation2 + $0x600] sm:$0xff] %v4953_v42  ;;  %v11882_v32 = vld [vmem:[#allocation188_spill] sm:$0xff]  ;;  %v11883_v11 = vld [vmem:[#allocation190_spill] sm:$0xff] }
 0x690   :  { %v4449_v15 = vmul.f32 %v9936_v28, %v4177_v55  ;;  %v4705_v22 = vadd.f32 %v10366_v53, %v4445_v47  ;;  %v4957_v21 = vmax.f32 %v4701_v51, 0.0  ;;  %v4180_v50 = vsub.f32 %v11879_v56, %v9923_v13  ;;  %5210 = vst [vmem:[#allocation2 + $0x608] sm:$0xff] %v4954_v30  ;;  %v10783_v47 = vld [vmem:[%s10976_s3] ss:$0 sm:$0xff]  ;;  %v11885_v18 = vld [vmem:[#allocation194_spill] sm:$0xff]  ;;  %v11886_v20 = vld [vmem:[#allocation196_spill] sm:$0xff] }
 0x691   :  { %v4450_v8 = vmul.f32 %v9936_v28, %v4178_v10  ;;  %v4706_v17 = vadd.f32 %v10366_v53, %v4446_v24  ;;  %v4958_v1 = vmax.f32 %v4702_v5, 0.0  ;;  %v4181_v29 = vsub.f32 %v11880_v62, %v9923_v13  ;;  %5211 = vst [vmem:[#allocation2 + $0x610] sm:$0xff] %v4955_v14  ;;  %v11887_v56 = vld [vmem:[#allocation198_spill] sm:$0xff]  ;;  %v11888_v62 = vld [vmem:[#allocation200_spill] sm:$0xff]  ;;  %s6788_s3 = smov [#allocation2]  }
 0x692   :  { %v4451_v48 = vmul.f32 %v9936_v28, %v4179_v12  ;;  %v4707_v44 = vadd.f32 %v10366_v53, %v4447_v19  ;;  %v4959_v38 = vmax.f32 %v4703_v41, 0.0  ;;  %v4182_v60 = vsub.f32 %v11881_v37, %v9923_v13  ;;  %5212 = vst [vmem:[#allocation2 + $0x618] sm:$0xff] %v4956_v4  ;;  %s5277_s13 = sshll.u32 %s6788_s3, 4  ;;  %s5278_s13 = int_to_ptr.vmem [resolvable:$true] %s5277_s13 }
 0x693   :  { %v4452_v36 = vmul.f32 %v9936_v28, %v4180_v50  ;;  %v4708_v31 = vadd.f32 %v10366_v53, %v4448_v39  ;;  %v4960_v9 = vmax.f32 %v4704_v33, 0.0  ;;  %v4183_v2 = vsub.f32 %v11882_v32, %v9923_v13  ;;  %5213 = vst [vmem:[#allocation2 + $0x620] sm:$0xff] %v4957_v21 }
 0x694   :  { %v4453_v45 = vmul.f32 %v9936_v28, %v4181_v29  ;;  %v4709_v51 = vadd.f32 %v10783_v47, %v4449_v15  ;;  %v4961_v42 = vmax.f32 %v4705_v22, 0.0  ;;  %v4184_v24 = vsub.f32 %v11883_v11, %v9923_v13  ;;  %5214 = vst [vmem:[#allocation2 + $0x628] sm:$0xff] %v4958_v1 }
 0x695   :  { %v4454_v53 = vmul.f32 %v9936_v28, %v4182_v60  ;;  %v4710_v5 = vadd.f32 %v10783_v47, %v4450_v8  ;;  %v4962_v30 = vmax.f32 %v4706_v17, 0.0  ;;  %v4185_v55 = vsub.f32 %v11884_v59, %v9923_v13  ;;  %5215 = vst [vmem:[#allocation2 + $0x630] sm:$0xff] %v4959_v38  ;;  %v11890_v59 = vld [vmem:[#allocation206_spill] sm:$0xff] }
 0x696   :  { %v4455_v19 = vmul.f32 %v9936_v28, %v4183_v2  ;;  %v4711_v41 = vadd.f32 %v10783_v47, %v4451_v48  ;;  %v4963_v14 = vmax.f32 %v4707_v44, 0.0  ;;  %v4186_v10 = vsub.f32 %v11885_v18, %v9923_v13  ;;  %5216 = vst [vmem:[#allocation2 + $0x638] sm:$0xff] %v4960_v9 }
 0x697   :  { %v4456_v39 = vmul.f32 %v9936_v28, %v4184_v24  ;;  %v4712_v33 = vadd.f32 %v10783_v47, %v4452_v36  ;;  %v4964_v4 = vmax.f32 %v4708_v31, 0.0  ;;  %v4187_v12 = vsub.f32 %v11886_v20, %v9923_v13  ;;  %5217 = vst [vmem:[#allocation2 + $0x640] sm:$0xff] %v4961_v42  ;;  %v11889_v24 = vld [vmem:[#allocation205_spill] sm:$0xff] }
 0x698   :  { %v4457_v15 = vmul.f32 %v9936_v28, %v4185_v55  ;;  %v4713_v22 = vadd.f32 %v10783_v47, %v4453_v45  ;;  %v4965_v21 = vmax.f32 %v4709_v51, 0.0  ;;  %v4188_v50 = vsub.f32 %v11887_v56, %v9923_v13  ;;  %5218 = vst [vmem:[#allocation2 + $0x648] sm:$0xff] %v4962_v30 }
 0x699   :  { %v4458_v8 = vmul.f32 %v9936_v28, %v4186_v10  ;;  %v4714_v17 = vadd.f32 %v10783_v47, %v4454_v53  ;;  %v4966_v1 = vmax.f32 %v4710_v5, 0.0  ;;  %v4189_v29 = vsub.f32 %v11888_v62, %v9923_v13  ;;  %5219 = vst [vmem:[#allocation2 + $0x650] sm:$0xff] %v4963_v14 }
 0x69a   :  { %v4459_v48 = vmul.f32 %v9936_v28, %v4187_v12  ;;  %v4715_v44 = vadd.f32 %v10783_v47, %v4455_v19  ;;  %v4967_v38 = vmax.f32 %v4711_v41, 0.0  ;;  %v4190_v37 = vsub.f32 %v11672_v27, %v9923_v13  ;;  %5220 = vst [vmem:[#allocation2 + $0x658] sm:$0xff] %v4964_v4 }
 0x69b   :  { %v4460_v60 = vmul.f32 %v9936_v28, %v4188_v50  ;;  %v4716_v36 = vadd.f32 %v10783_v47, %v4456_v39  ;;  %v4968_v31 = vmax.f32 %v4712_v33, 0.0  ;;  %v4191_v9 = vsub.f32 %v11673_v26, %v9923_v13  ;;  %5221 = vst [vmem:[#allocation2 + $0x660] sm:$0xff] %v4965_v21 }
 0x69c   :  { %v4461_v32 = vmul.f32 %v9936_v28, %v4189_v29  ;;  %v4717_v2 = vadd.f32 %v10783_v47, %v4457_v15  ;;  %v4969_v45 = vmax.f32 %v4713_v22, 0.0  ;;  %v4192_v51 = vsub.f32 %v11674_v23, %v9923_v13  ;;  %5222 = vst [vmem:[#allocation2 + $0x668] sm:$0xff] %v4966_v1 }
 0x69d   :  { %v4462_v27 = vmul.f32 %v9936_v28, %v4190_v37  ;;  %v4718_v42 = vadd.f32 %v10783_v47, %v4458_v8  ;;  %v4970_v11 = vmax.f32 %v4714_v17, 0.0  ;;  %v4193_v53 = vsub.f32 %v11889_v24, %v9923_v13  ;;  %5223 = vst [vmem:[#allocation2 + $0x670] sm:$0xff] %v4967_v38 }
 0x69e   :  { %v4463_v26 = vmul.f32 %v9936_v28, %v4191_v9  ;;  %v4719_v5 = vadd.f32 %v10783_v47, %v4459_v48  ;;  %v4971_v30 = vmax.f32 %v4715_v44, 0.0  ;;  %v4194_v55 = vsub.f32 %v11890_v59, %v9923_v13  ;;  %5224 = vst [vmem:[#allocation2 + $0x678] sm:$0xff] %v4968_v31  ;;  %v11893_v59 = vld [vmem:[#allocation220_spill] sm:$0xff] }
 0x69f   :  { %v4464_v23 = vmul.f32 %v9936_v28, %v4192_v51  ;;  %v4720_v19 = vadd.f32 %v10783_v47, %v4460_v60  ;;  %v4972_v41 = vmax.f32 %v4716_v36, 0.0  ;;  %v4195_v14 = vsub.f32 %v9213_v35, %v9923_v13  ;;  %5225 = vst [vmem:[#allocation2 + $0x680] sm:$0xff] %v4969_v45 }
 0x6a0   :  { %v4465_v18 = vmul.f32 %v9936_v28, %v4193_v53  ;;  %v4721_v10 = vadd.f32 %v10783_v47, %v4461_v32  ;;  %v4973_v39 = vmax.f32 %v4717_v2, 0.0  ;;  %v4196_v33 = vsub.f32 %v9225_v46, %v9923_v13  ;;  %5226 = vst [vmem:[#allocation2 + $0x688] sm:$0xff] %v4970_v11  ;;  %v11891_v32 = vld [vmem:[#allocation218_spill] sm:$0xff] }
 0x6a1   :  { %v4466_v4 = vmul.f32 %v9936_v28, %v4194_v55  ;;  %v4722_v20 = vadd.f32 %v10783_v47, %v4462_v27  ;;  %v4974_v12 = vmax.f32 %v4718_v42, 0.0  ;;  %v4197_v15 = vsub.f32 %v9270_v61, %v9923_v13  ;;  %5227 = vst [vmem:[#allocation2 + $0x690] sm:$0xff] %v4971_v30  ;;  %v11892_v27 = vld [vmem:[#allocation219_spill] sm:$0xff] }
 0x6a2   :  { %v4467_v35 = vmul.f32 %v9936_v28, %v4195_v14  ;;  %v4723_v22 = vadd.f32 %v10783_v47, %v4463_v26  ;;  %v4975_v21 = vmax.f32 %v4719_v5, 0.0  ;;  %v4198_v56 = vsub.f32 %v9278_v34, %v9923_v13  ;;  %5228 = vst [vmem:[#allocation2 + $0x698] sm:$0xff] %v4972_v41 }
 0x6a3   :  { %v4468_v46 = vmul.f32 %v9936_v28, %v4196_v33  ;;  %v4724_v50 = vadd.f32 %v10783_v47, %v4464_v23  ;;  %v4976_v8 = vmax.f32 %v4720_v19, 0.0  ;;  %v4199_v17 = vsub.f32 %v9340_v6, %v9923_v13  ;;  %5229 = vst [vmem:[#allocation2 + $0x6a0] sm:$0xff] %v4973_v39 }
 0x6a4   :  { %v4469_v61 = vmul.f32 %v9936_v28, %v4197_v15  ;;  %v4725_v1 = vadd.f32 %v10783_v47, %v4465_v18  ;;  %v4977_v62 = vmax.f32 %v4721_v10, 0.0  ;;  %v4200_v29 = vsub.f32 %v9342_v57, %v9923_v13  ;;  %5230 = vst [vmem:[#allocation2 + $0x6a8] sm:$0xff] %v4974_v12  ;;  %v11894_v12 = vld [vmem:[#allocation221_spill] sm:$0xff] }
 0x6a5   :  { %v4470_v34 = vmul.f32 %v9936_v28, %v4198_v56  ;;  %v4726_v48 = vadd.f32 %v10783_v47, %v4466_v4  ;;  %v4978_v44 = vmax.f32 %v4722_v20, 0.0  ;;  %v4201_v38 = vsub.f32 %v9390_v54, %v9923_v13  ;;  %5231 = vst [vmem:[#allocation2 + $0x6b0] sm:$0xff] %v4975_v21 }
 0x6a6   :  { %v4471_v6 = vmul.f32 %v9936_v28, %v4199_v17  ;;  %v4727_v37 = vadd.f32 %v10783_v47, %v4467_v35  ;;  %v4979_v60 = vmax.f32 %v4723_v22, 0.0  ;;  %v4202_v36 = vsub.f32 %v9392_v52, %v9923_v13  ;;  %5232 = vst [vmem:[#allocation2 + $0x6b8] sm:$0xff] %v4976_v8 }
 0x6a7   :  { %v4472_v57 = vmul.f32 %v9936_v28, %v4200_v29  ;;  %v4728_v31 = vadd.f32 %v10783_v47, %v4468_v46  ;;  %v4980_v9 = vmax.f32 %v4724_v50, 0.0  ;;  %v4203_v2 = vsub.f32 %v11891_v32, %v9923_v13  ;;  %5233 = vst [vmem:[#allocation2 + $0x6c0] sm:$0xff] %v4977_v62  ;;  %v11895_v50 = vld [vmem:[#allocation222_spill] sm:$0xff] }
 0x6a8   :  { %v4473_v54 = vmul.f32 %v9936_v28, %v4201_v38  ;;  %v4729_v45 = vadd.f32 %v10783_v47, %v4469_v61  ;;  %v4981_v51 = vmax.f32 %v4725_v1, 0.0  ;;  %v4204_v42 = vsub.f32 %v11892_v27, %v9923_v13  ;;  %5234 = vst [vmem:[#allocation2 + $0x6c8] sm:$0xff] %v4978_v44 }
 0x6a9   :  { %v4474_v52 = vmul.f32 %v9936_v28, %v4202_v36  ;;  %v4730_v11 = vadd.f32 %v10783_v47, %v4470_v34  ;;  %v4982_v24 = vmax.f32 %v4726_v48, 0.0  ;;  %v4205_v53 = vsub.f32 %v9472_v3, %v9923_v13  ;;  %5235 = vst [vmem:[#allocation2 + $0x6d0] sm:$0xff] %v4979_v60 }
 0x6aa   :  { %v4475_v26 = vmul.f32 %v9936_v28, %v4203_v2  ;;  %v4731_v5 = vadd.f32 %v10783_v47, %v4471_v6  ;;  %v4983_v30 = vmax.f32 %v4727_v37, 0.0  ;;  %v4206_v55 = vsub.f32 %v11893_v59, %v9923_v13  ;;  %5236 = vst [vmem:[#allocation2 + $0x6d8] sm:$0xff] %v4980_v9  ;;  %v11898_v59 = vld [vmem:[#allocation167_spill] sm:$0xff] }
 0x6ab   :  { %v4476_v23 = vmul.f32 %v9936_v28, %v4204_v42  ;;  %v4732_v19 = vadd.f32 %v10783_v47, %v4472_v57  ;;  %v4984_v41 = vmax.f32 %v4728_v31, 0.0  ;;  %v4207_v14 = vsub.f32 %v9513_v63, %v9923_v13  ;;  %5237 = vst [vmem:[#allocation2 + $0x6e0] sm:$0xff] %v4981_v51  ;;  %v11896_v42 = vld [vmem:[#allocation149_spill] sm:$0xff] }
 0x6ac   :  { %v4477_v3 = vmul.f32 %v9936_v28, %v4205_v53  ;;  %v4733_v18 = vadd.f32 %v10783_v47, %v4473_v54  ;;  %v4985_v10 = vmax.f32 %v4729_v45, 0.0  ;;  %v4208_v39 = vsub.f32 %v9515_v40, %v9923_v13  ;;  %5238 = vst [vmem:[#allocation2 + $0x6e8] sm:$0xff] %v4982_v24  ;;  %v11897_v53 = vld [vmem:[#allocation165_spill] sm:$0xff] }
 0x6ad   :  { %v4478_v33 = vmul.f32 %v9936_v28, %v4206_v55  ;;  %v4734_v4 = vadd.f32 %v10783_v47, %v4474_v52  ;;  %v4986_v20 = vmax.f32 %v4730_v11, 0.0  ;;  %v4209_v15 = vsub.f32 %v11894_v12, %v9923_v13  ;;  %5239 = vst [vmem:[#allocation2 + $0x6f0] sm:$0xff] %v4983_v30 }
 0x6ae   :  { %v4479_v63 = vmul.f32 %v9936_v28, %v4207_v14  ;;  %v4735_v35 = vadd.f32 %v10783_v47, %v4475_v26  ;;  %v4987_v22 = vmax.f32 %v4731_v5, 0.0  ;;  %v4210_v21 = vsub.f32 %v9556_v16, %v9923_v13  ;;  %5240 = vst [vmem:[#allocation2 + $0x6f8] sm:$0xff] %v4984_v41  ;;  %v11899_v14 = vld [vmem:[#allocation169_spill] sm:$0xff] }
 0x6af   :  { %v4480_v40 = vmul.f32 %v9936_v28, %v4208_v39  ;;  %v4736_v56 = vadd.f32 %v10783_v47, %v4476_v23  ;;  %v4988_v46 = vmax.f32 %v4732_v19, 0.0  ;;  %v4211_v8 = vsub.f32 %v11895_v50, %v9923_v13  ;;  %5241 = vst [vmem:[#allocation2 + $0x700] sm:$0xff] %v4985_v10 }
 0x6b0   :  { %v4481_v17 = vmul.f32 %v9936_v28, %v4209_v15  ;;  %v4737_v61 = vadd.f32 %v10783_v47, %v4477_v3  ;;  %v4989_v1 = vmax.f32 %v4733_v18, 0.0  ;;  %v4212_v62 = vsub.f32 %v9597_v49, %v9923_v13  ;;  %5242 = vst [vmem:[#allocation2 + $0x708] sm:$0xff] %v4986_v20 }
 0x6b1   :  { %v4482_v16 = vmul.f32 %v9936_v28, %v4210_v21  ;;  %v4738_v29 = vadd.f32 %v10783_v47, %v4478_v33  ;;  %v4990_v34 = vmax.f32 %v4734_v4, 0.0  ;;  %v4213_v48 = vsub.f32 %v9623_v25, %v9923_v13  ;;  %5243 = vst [vmem:[#allocation2 + $0x710] sm:$0xff] %v4987_v22  ;;  %v11900_v33 = vld [vmem:[#allocation202_spill] sm:$0xff] }
 0x6b2   :  { %v4483_v44 = vmul.f32 %v9936_v28, %v4211_v8  ;;  %v4739_v38 = vadd.f32 %v10783_v47, %v4479_v63  ;;  %v4991_v6 = vmax.f32 %v4735_v35, 0.0  ;;  %v4214_v37 = vsub.f32 %v9625_v58, %v9923_v13  ;;  %5244 = vst [vmem:[#allocation2 + $0x718] sm:$0xff] %v4988_v46  ;;  %v11901_v63 = vld [vmem:[#allocation203_spill] sm:$0xff] }
 0x6b3   :  { %v4484_v49 = vmul.f32 %v9936_v28, %v4212_v62  ;;  %v4740_v60 = vadd.f32 %v10783_v47, %v4480_v40  ;;  %v4992_v36 = vmax.f32 %v4736_v56, 0.0  ;;  %v4215_v57 = vsub.f32 %v9651_v7, %v9923_v13  ;;  %5245 = vst [vmem:[#allocation2 + $0x720] sm:$0xff] %v4989_v1  ;;  %v11902_v56 = vld [vmem:[#allocation204_spill] sm:$0xff] }
 0x6b4   :  { %v4485_v25 = vmul.f32 %v9936_v28, %v4213_v48  ;;  %v4741_v31 = vadd.f32 %v10783_v47, %v4481_v17  ;;  %v4993_v9 = vmax.f32 %v4737_v61, 0.0  ;;  %v4216_v32 = vsub.f32 %v9653_v43, %v9923_v13  ;;  %5246 = vst [vmem:[#allocation2 + $0x728] sm:$0xff] %v4990_v34  ;;  %v11903_v61 = vld [vmem:[#allocation223_spill] sm:$0xff]  ;;  %v11904_v34 = vld [vmem:[#allocation224_spill] sm:$0xff] }
 0x6b5   :  { %v4486_v58 = vmul.f32 %v9936_v28, %v4214_v37  ;;  %v4742_v2 = vadd.f32 %v10783_v47, %v4482_v16  ;;  %v4994_v54 = vmax.f32 %v4738_v29, 0.0  ;;  %v4217_v45 = vsub.f32 %v9679_v0, %v9923_v13  ;;  %5247 = vst [vmem:[#allocation2 + $0x730] sm:$0xff] %v4991_v6  ;;  %v11905_v37 = vld [vmem:[#allocation225_spill] sm:$0xff] }
 0x6b6   :  { %v4487_v7 = vmul.f32 %v9936_v28, %v4215_v57  ;;  %v4743_v51 = vadd.f32 %v10783_v47, %v4483_v44  ;;  %v4995_v27 = vmax.f32 %v4739_v38, 0.0  ;;  %v4218_v52 = vsub.f32 %v11896_v42, %v9923_v13  ;;  %5248 = vst [vmem:[#allocation2 + $0x738] sm:$0xff] %v4992_v36 }
 0x6b7   :  { %v4488_v43 = vmul.f32 %v9936_v28, %v4216_v32  ;;  %v4744_v11 = vadd.f32 %v10783_v47, %v4484_v49  ;;  %v4996_v24 = vmax.f32 %v4740_v60, 0.0  ;;  %v4219_v26 = vsub.f32 %v11897_v53, %v9923_v13  ;;  %5249 = vst [vmem:[#allocation2 + $0x740] sm:$0xff] %v4993_v9 }
 0x6b8   :  { %v4489_v0 = vmul.f32 %v9936_v28, %v4217_v45  ;;  %v4745_v5 = vadd.f32 %v10783_v47, %v4485_v25  ;;  %v4997_v30 = vmax.f32 %v4741_v31, 0.0  ;;  %v4220_v55 = vsub.f32 %v11898_v59, %v9923_v13  ;;  %5250 = vst [vmem:[#allocation2 + $0x748] sm:$0xff] %v4994_v54 }
 0x6b9   :  { %v4490_v23 = vmul.f32 %v9936_v28, %v4218_v52  ;;  %v4746_v19 = vadd.f32 %v10783_v47, %v4486_v58  ;;  %v4998_v41 = vmax.f32 %v4742_v2, 0.0  ;;  %v4221_v3 = vsub.f32 %v11899_v14, %v9923_v13  ;;  %5251 = vst [vmem:[#allocation2 + $0x750] sm:$0xff] %v4995_v27 }
 0x6ba   :  { %v4491_v18 = vmul.f32 %v9936_v28, %v4219_v26  ;;  %v4747_v10 = vadd.f32 %v10783_v47, %v4487_v7  ;;  %v4999_v39 = vmax.f32 %v4743_v51, 0.0  ;;  %v4222_v4 = vsub.f32 %v11900_v33, %v9923_v13  ;;  %5252 = vst [vmem:[#allocation2 + $0x758] sm:$0xff] %v4996_v24 }
 0x6bb   :  { %v4492_v20 = vmul.f32 %v9936_v28, %v4220_v55  ;;  %v4748_v12 = vadd.f32 %v10783_v47, %v4488_v43  ;;  %v5000_v15 = vmax.f32 %v4744_v11, 0.0  ;;  %v4223_v35 = vsub.f32 %v11901_v63, %v9923_v13  ;;  %5253 = vst [vmem:[#allocation2 + $0x760] sm:$0xff] %v4997_v30 }
 0x6bc   :  { %v4493_v22 = vmul.f32 %v9936_v28, %v4221_v3  ;;  %v4749_v21 = vadd.f32 %v10783_v47, %v4489_v0  ;;  %v5001_v40 = vmax.f32 %v4745_v5, 0.0  ;;  %v4224_v46 = vsub.f32 %v11902_v56, %v9923_v13  ;;  %5254 = vst [vmem:[#allocation2 + $0x768] sm:$0xff] %v4998_v41 }
 0x6bd   :  { %v4494_v50 = vmul.f32 %v9936_v28, %v4222_v4  ;;  %v4750_v8 = vadd.f32 %v10783_v47, %v4490_v23  ;;  %v5002_v17 = vmax.f32 %v4746_v19, 0.0  ;;  %v4225_v1 = vsub.f32 %v11903_v61, %v9923_v13  ;;  %5255 = vst [vmem:[#allocation2 + $0x770] sm:$0xff] %v4999_v39 }
 0x6be   :  { %v4495_v62 = vmul.f32 %v9936_v28, %v4223_v35  ;;  %v4751_v16 = vadd.f32 %v10783_v47, %v4491_v18  ;;  %v5003_v29 = vmax.f32 %v4747_v10, 0.0  ;;  %v4226_v48 = vsub.f32 %v11904_v34, %v9923_v13  ;;  %5256 = vst [vmem:[#allocation2 + $0x778] sm:$0xff] %v5000_v15 }
 0x6bf   :  { %v4496_v44 = vmul.f32 %v9936_v28, %v4224_v46  ;;  %v4752_v38 = vadd.f32 %v10783_v47, %v4492_v20  ;;  %v5004_v6 = vmax.f32 %v4748_v12, 0.0  ;;  %v4227_v49 = vsub.f32 %v11905_v37, %v9923_v13  ;;  %5257 = vst [vmem:[#allocation2 + $0x780] sm:$0xff] %v5001_v40 }
 0x6c0   :  { %v4497_v60 = vmul.f32 %v9936_v28, %v4225_v1  ;;  %v4753_v36 = vadd.f32 %v10783_v47, %v4493_v22  ;;  %v5005_v57 = vmax.f32 %v4749_v21, 0.0  ;;  %v4498_v25 = vmul.f32 %v9936_v28, %v4226_v48  ;;  %5258 = vst [vmem:[#allocation2 + $0x788] sm:$0xff] %v5002_v17 }
 0x6c1   :  { %v4754_v31 = vadd.f32 %v10783_v47, %v4494_v50  ;;  %v5006_v9 = vmax.f32 %v4750_v8, 0.0  ;;  %v4499_v32 = vmul.f32 %v9936_v28, %v4227_v49  ;;  %v4755_v58 = vadd.f32 %v10783_v47, %v4495_v62  ;;  %5259 = vst [vmem:[#allocation2 + $0x790] sm:$0xff] %v5003_v29 }
 0x6c2   :  { %v5007_v2 = vmax.f32 %v4751_v16, 0.0  ;;  %v4756_v13 = vadd.f32 %v10783_v47, %v4496_v44  ;;  %v5008_v54 = vmax.f32 %v4752_v38, 0.0  ;;  %5260 = vst [vmem:[#allocation2 + $0x798] sm:$0xff] %v5004_v6  ;;  %v4757_v45 = vadd.f32 %v10783_v47, %v4497_v60 }
 0x6c3   :  { %v5009_v7 = vmax.f32 %v4753_v36, 0.0  ;;  %5261 = vst [vmem:[#allocation2 + $0x7a0] sm:$0xff] %v5005_v57  ;;  %v4758_v51 = vadd.f32 %v10783_v47, %v4498_v25  ;;  %v5010_v27 = vmax.f32 %v4754_v31, 0.0  ;;  %v4759_v42 = vadd.f32 %v10783_v47, %v4499_v32 }
 0x6c4   :  { %5262 = vst [vmem:[#allocation2 + $0x7a8] sm:$0xff] %v5006_v9  ;;  %v5011_v52 = vmax.f32 %v4755_v58, 0.0  ;;  %v5012_v28 = vmax.f32 %v4756_v13, 0.0  ;;  %v5013_v43 = vmax.f32 %v4757_v45, 0.0 }
 0x6c5   :  { %5263 = vst [vmem:[#allocation2 + $0x7b0] sm:$0xff] %v5007_v2  ;;  %v5014_v11 = vmax.f32 %v4758_v51, 0.0  ;;  %v5015_v24 = vmax.f32 %v4759_v42, 0.0 }
 0x6c6   :  { %5264 = vst [vmem:[#allocation2 + $0x7b8] sm:$0xff] %v5008_v54 }
 0x6c7   :  { %5265 = vst [vmem:[#allocation2 + $0x7c0] sm:$0xff] %v5009_v7 }
 0x6c8   :  { %5266 = vst [vmem:[#allocation2 + $0x7c8] sm:$0xff] %v5010_v27 }
 0x6c9   :  { %5267 = vst [vmem:[#allocation2 + $0x7d0] sm:$0xff] %v5011_v52 }
 0x6ca   :  { %5268 = vst [vmem:[#allocation2 + $0x7d8] sm:$0xff] %v5012_v28 }
 0x6cb   :  { %5269 = vst [vmem:[#allocation2 + $0x7e0] sm:$0xff] %v5013_v43 }
 0x6cc   :  { %5270 = vst [vmem:[#allocation2 + $0x7e8] sm:$0xff] %v5014_v11 }
 0x6cd   :  { %5271 = vst [vmem:[#allocation2 + $0x7f0] sm:$0xff] %v5015_v24 }
 0x6ce   :  { %5285 = dma.vmem_to_hbm [thread:$0]  %s5278_s13, 32768, %s5280_s16, [#allocation3], %s6789_s17, %s6789_s17, %s6790_s18  }
 0x6cf   :  { %6786 = dma.done.wait [#allocation3], 32768  }
 0x6d0   :  { %6787 = vsyncadd [#allocation3], 4294934528 }
 0x6d1   :  { %5290 = vsyncpa [#allocation3], 1 }

</bundles_post_ra>
